<compile_context>
chip_gen: v7x
topology: tpu7x:2x2x1
jax: 0.10.0
libtpu: 0.0.40
codegen_flags: <defaults>
</compile_context>

<pallas_src>
import jax
import jax.numpy as jnp
from jax.experimental import pallas as pl
from jax.experimental.pallas import tpu as pltpu

VMEM_SPEC = pl.BlockSpec(memory_space=pltpu.MemorySpace.VMEM)


# --------------------------------------------------------------------------- kernel
def _encoder_kernel(p_ref, w1_ref, b1_ref, w2_ref, b2_ref, w3_ref, b3_ref,
                    w4_ref, b4_ref, w5_ref, b5_ref, wf1_ref, bf1_ref,
                    wf2_ref, bf2_ref, r_ref, o_ref):
    f32 = jnp.float32
    n_img = r_ref.shape[1]          # N = B * L images
    qrows = 18 * n_img              # rows of every trunk activation: (q, n), q-major

    def mm(a, w):                   # bf16 MXU matmul, f32 accumulation
        return jnp.dot(a.astype(jnp.bfloat16), w.astype(jnp.bfloat16),
                       preferred_element_type=f32)

    def shift_prev(xv):             # row (q, n) <- value at (q-1, n); zeros at q == 0
        pad = jnp.zeros((n_img, xv.shape[1]), f32)
        return jnp.concatenate([pad, xv[:-n_img, :]], axis=0)

    def shift_next(xv):             # row (q, n) <- value at (q+1, n); zeros at q == 17
        pad = jnp.zeros((n_img, xv.shape[1]), f32)
        return jnp.concatenate([xv[n_img:, :], pad], axis=0)

    # ---- conv1 (1->32, k3, s2, p1) + ReLU + maxpool 2x2/2 : one im2col matmul ----
    # p_ref rows: 4 pool-corner blocks (a,b) x 4 (j,p) blocks x (q, n); cols = 9 taps.
    m_all = mm(p_ref[...], w1_ref[...])                       # (16*qrows, 32)
    blk = 4 * qrows
    pre = jnp.maximum(jnp.maximum(m_all[0:blk], m_all[blk:2 * blk]),
                      jnp.maximum(m_all[2 * blk:3 * blk], m_all[3 * blk:4 * blk]))
    pool1 = jnp.maximum(pre + b1_ref[...], 0.0)               # (4*qrows, 32)
    # pool1 blocks: column j in {0,1}, row-parity p in {0,1}  -> Q[j][p]  (qrows, 32)
    q_arr = [[pool1[(2 * j + p) * qrows:(2 * j + p + 1) * qrows, :]
              for p in range(2)] for j in range(2)]

    # ---- conv2 (32->64, k3, s1, p1) + ReLU + maxpool 2x2/2 ----
    c2 = []
    for j in range(2):              # output column
        for p in range(2):          # output row parity
            acc = None
            for dh in range(3):
                t = p + dh - 1      # input row = 2q + t
                pp = t % 2          # parity of input row
                off = (t - pp) // 2  # -1 / 0 / +1 shift in q
                for dw in range(3):
                    jsrc = j + dw - 1
                    if jsrc < 0 or jsrc > 1:     # zero padding in width
                        continue
                    src = q_arr[jsrc][pp]
                    if off == -1:
                        src = shift_prev(src)
                    elif off == 1:
                        src = shift_next(src)
                    term = mm(src, w2_ref[dh * 3 + dw])        # (qrows, 64)
                    acc = term if acc is None else acc + term
            c2.append(jnp.maximum(acc + b2_ref[...], 0.0))
    # pool2: max over the 2x2 window = max over (parity p, column j)
    a3 = jnp.maximum(jnp.maximum(c2[0], c2[1]), jnp.maximum(c2[2], c2[3]))  # (qrows, 64)

    # ---- conv3/4/5: spatial map is 18x1, so only the middle kw column matters ----
    def conv1d3(xv, w_ref, b_ref):
        z = (mm(shift_prev(xv), w_ref[0]) + mm(xv, w_ref[1])
             + mm(shift_next(xv), w_ref[2]) + b_ref[...])
        return jnp.maximum(z, 0.0)

    a4 = conv1d3(a3, w3_ref, b3_ref)      # (qrows, 64)
    a5 = conv1d3(a4, w4_ref, b4_ref)      # (qrows, 128)
    a6 = conv1d3(a5, w5_ref, b5_ref)      # (qrows, 128)
    # pool3 = maxpool k3 s1 p1 (post-ReLU values >= 0, so zero-fill == -inf pad)
    pooled = jnp.maximum(jnp.maximum(shift_prev(a6), a6), shift_next(a6))

    # ---- fc1 + ReLU : rows are (q, n), so tap h is the contiguous block h*N..h*N+N ----
    acc = None
    for h in range(18):
        g = pooled[h * n_img:(h + 1) * n_img, :]               # (N, 128)
        term = mm(g, wf1_ref[h])                               # (N, 256)
        acc = term if acc is None else acc + term
    f1 = jnp.maximum(acc + bf1_ref[...], 0.0)                  # (N, 256)

    # ---- fc2 ----
    f2 = mm(f1, wf2_ref[...]) + bf2_ref[...]                   # (N, 128)

    # ---- masked sum over L and divide by lens, folded into one small matmul ----
    o_ref[...] = jnp.dot(r_ref[...], f2,
                         preferred_element_type=f32).astype(o_ref.dtype)


# --------------------------------------------------------------------------- wrapper
def _build_conv1_patches(x_pad, n_img):
    """x_pad: (N, 146, 10) zero-padded images.  Returns (16*18*N, 9) bf16 im2col matrix.

    Row layout: 4 blocks for the pool1 2x2 corner (a,b); inside, 4 blocks for
    (output column j, output-row parity p); inside, rows ordered (q, n) q-major.
    Column t = kh*3 + kw.  conv1 output position: i = 4q+2p+a, jj = 2j+b;
    padded input element: x_pad[n, 8q + 4p + 2a + kh, 4j + 2b + kw].
    """
    ab_blocks = []
    for a in range(2):
        for b in range(2):
            jp_blocks = []
            for j in range(2):
                for p in range(2):
                    taps = []
                    for kh in range(3):
                        for kw in range(3):
                            r0 = 4 * p + 2 * a + kh
                            c0 = 4 * j + 2 * b + kw
                            col = x_pad[:, r0:r0 + 8 * 18:8, c0]      # (N, 18)
                            taps.append(jnp.transpose(col))           # (18, N)
                    blk = jnp.stack(taps, axis=-1).reshape(18 * n_img, 9)
                    jp_blocks.append(blk)
            ab_blocks.append(jnp.concatenate(jp_blocks, axis=0))
    return jnp.concatenate(ab_blocks, axis=0).astype(jnp.bfloat16)


def alexnet_encoder_forward(kparams, x, lens, padding_mask):
    """x: (B, L, 8, 144), lens: (B,), padding_mask: (B, L, 1) bool -> (B, 128)."""
    B, L, c, d = x.shape
    assert (c, d) == (8, 144), "spec requires final spatial 18x1 -> per-step input 8x144"
    N = B * L
    # PyTorch: transpose(-1,-2) -> (B, L, 144, 8); reshape to N images of (H=144, W=8).
    xi = jnp.swapaxes(x, -1, -2).reshape(N, d, c).astype(jnp.float32)
    xp = jnp.pad(xi, ((0, 0), (1, 1), (1, 1)))                         # conv1 padding=1
    patches = _build_conv1_patches(xp, N)                              # (16*18N, 9) bf16
    # masked_fill + sum over L + /lens  ==  R @ fc2_out, with R built here.
    valid = (1.0 - padding_mask[..., 0].astype(jnp.float32)) / lens[:, None]
    R = (valid[:, None, :] * jnp.eye(B, dtype=jnp.float32)[:, :, None]).reshape(B, N)

    return pl.pallas_call(
        _encoder_kernel,
        out_shape=jax.ShapeDtypeStruct((B, 128), jnp.float32),
        in_specs=[VMEM_SPEC] * 16,
        out_specs=VMEM_SPEC,
    )(patches, kparams["w1"], kparams["b1"], kparams["w2"], kparams["b2"],
      kparams["w3"], kparams["b3"], kparams["w4"], kparams["b4"],
      kparams["w5"], kparams["b5"], kparams["wf1"], kparams["bf1"],
      kparams["wf2"], kparams["bf2"], R)


# --------------------------------------------------------------------------- params
def init_params(key):
    """Synthetic parameters in PyTorch layouts (uniform +-1/sqrt(fan_in))."""
    def u(k, shape, fan_in):
        b = 1.0 / (fan_in ** 0.5)
        return jax.random.uniform(k, shape, jnp.float32, -b, b)
    ks = jax.random.split(key, 14)
    p = {}
    p["conv1_w"] = u(ks[0], (32, 1, 3, 3), 9);        p["conv1_b"] = u(ks[1], (32,), 9)
    p["conv2_w"] = u(ks[2], (64, 32, 3, 3), 32 * 9);  p["conv2_b"] = u(ks[3], (64,), 32 * 9)
    p["conv3_w"] = u(ks[4], (64, 64, 3, 3), 64 * 9);  p["conv3_b"] = u(ks[5], (64,), 64 * 9)
    p["conv4_w"] = u(ks[6], (128, 64, 3, 3), 64 * 9); p["conv4_b"] = u(ks[7], (128,), 64 * 9)
    p["conv5_w"] = u(ks[8], (128, 128, 3, 3), 128 * 9); p["conv5_b"] = u(ks[9], (128,), 128 * 9)
    p["fc1_w"] = u(ks[10], (256, 2304), 2304);        p["fc1_b"] = u(ks[11], (256,), 2304)
    p["fc2_w"] = u(ks[12], (128, 256), 256);          p["fc2_b"] = u(ks[13], (128,), 256)
    return p


def prepare_params(p):
    """One-time conversion of PyTorch-layout weights to kernel layouts (bf16 matmul operands)."""
    bf16 = jnp.bfloat16
    k = {}
    k["w1"] = p["conv1_w"].reshape(32, 9).T.astype(bf16)                           # (9, 32)
    k["b1"] = p["conv1_b"].reshape(1, 32)
    k["w2"] = jnp.transpose(p["conv2_w"], (2, 3, 1, 0)).reshape(9, 32, 64).astype(bf16)
    k["b2"] = p["conv2_b"].reshape(1, 64)
    # 18x1 spatial: only the middle kw column of the 3x3 kernels touches real data.
    k["w3"] = jnp.transpose(p["conv3_w"][:, :, :, 1], (2, 1, 0)).astype(bf16)      # (3, 64, 64)
    k["b3"] = p["conv3_b"].reshape(1, 64)
    k["w4"] = jnp.transpose(p["conv4_w"][:, :, :, 1], (2, 1, 0)).astype(bf16)      # (3, 64, 128)
    k["b4"] = p["conv4_b"].reshape(1, 128)
    k["w5"] = jnp.transpose(p["conv5_w"][:, :, :, 1], (2, 1, 0)).astype(bf16)      # (3, 128, 128)
    k["b5"] = p["conv5_b"].reshape(1, 128)
    # PyTorch flattens (C=128, H=18, W=1) channel-major; permute fc1 rows to (h, c).
    k["wf1"] = jnp.transpose(p["fc1_w"].T.reshape(128, 18, 256), (1, 0, 2)).astype(bf16)
    k["bf1"] = p["fc1_b"].reshape(1, 256)
    k["wf2"] = p["fc2_w"].T.astype(bf16)                                           # (256, 128)
    k["bf2"] = p["fc2_b"].reshape(1, 128)
    return k


# --------------------------------------------------------------------------- demo
if __name__ == "__main__":
    B, L, C_IN, D_IN = 2, 3, 8, 144

    key = jax.random.PRNGKey(0)
    k_params, k_x = jax.random.split(key)
    params = init_params(k_params)
    kparams = prepare_params(params)

    x = jax.random.normal(k_x, (B, L, C_IN, D_IN), jnp.float32)
    lens = jnp.array([3.0, 2.0], jnp.float32)
    padding_mask = jnp.array([[False, False, False],
                              [False, False, True]])[:, :, None]       # (B, L, 1)

    fwd = jax.jit(alexnet_encoder_forward)
    out = fwd(kparams, x, lens, padding_mask)
    out = jax.block_until_ready(out)

    assert out.shape == (B, 128), out.shape
    assert bool(jnp.all(jnp.isfinite(out)))
    print("KERNEL_OK")
</pallas_src>

<mosaic_0001>
module attributes {stable_mosaic.version = 11 : i64} {
  func.func @_encoder_kernel(%arg0: memref<1728x9xbf16, #tpu.memory_space<vmem>>, %arg1: memref<9x32xbf16, #tpu.memory_space<vmem>>, %arg2: memref<1x32xf32, #tpu.memory_space<vmem>>, %arg3: memref<9x32x64xbf16, #tpu.memory_space<vmem>>, %arg4: memref<1x64xf32, #tpu.memory_space<vmem>>, %arg5: memref<3x64x64xbf16, #tpu.memory_space<vmem>>, %arg6: memref<1x64xf32, #tpu.memory_space<vmem>>, %arg7: memref<3x64x128xbf16, #tpu.memory_space<vmem>>, %arg8: memref<1x128xf32, #tpu.memory_space<vmem>>, %arg9: memref<3x128x128xbf16, #tpu.memory_space<vmem>>, %arg10: memref<1x128xf32, #tpu.memory_space<vmem>>, %arg11: memref<18x128x256xbf16, #tpu.memory_space<vmem>>, %arg12: memref<1x256xf32, #tpu.memory_space<vmem>>, %arg13: memref<256x128xbf16, #tpu.memory_space<vmem>>, %arg14: memref<1x128xf32, #tpu.memory_space<vmem>>, %arg15: memref<2x6xf32, #tpu.memory_space<vmem>>, %arg16: memref<2x128xf32, #tpu.memory_space<vmem>>) attributes {dimension_semantics = [], scalar_prefetch = 0 : i64, scratch_operands = 0 : i64, tpu.core_type = #tpu.core_type<tc>} {
    %c0 = arith.constant 0 : index
    %c0_0 = arith.constant 0 : index
    %0 = vector.load %arg0[%c0, %c0_0] : memref<1728x9xbf16, #tpu.memory_space<vmem>>, vector<1728x9xbf16>
    %c0_1 = arith.constant 0 : index
    %c0_2 = arith.constant 0 : index
    %1 = vector.load %arg1[%c0_1, %c0_2] : memref<9x32xbf16, #tpu.memory_space<vmem>>, vector<9x32xbf16>
    %cst = arith.constant dense<0.000000e+00> : vector<1728x32xf32>
    %2 = tpu.matmul %0, %1, %cst {dimension_numbers = #tpu.dot_dimension_numbers<[1], [0], [0], [1], [0, 0, 1, 1], [], []>} : vector<1728x9xbf16>, vector<9x32xbf16>, vector<1728x32xf32> -> vector<1728x32xf32>
    %3 = vector.extract_strided_slice %2 {offsets = [0, 0], sizes = [432, 32], strides = [1, 1]} : vector<1728x32xf32> to vector<432x32xf32>
    %4 = vector.extract_strided_slice %2 {offsets = [432, 0], sizes = [432, 32], strides = [1, 1]} : vector<1728x32xf32> to vector<432x32xf32>
    %5 = arith.maximumf %3, %4 : vector<432x32xf32>
    %6 = vector.extract_strided_slice %2 {offsets = [864, 0], sizes = [432, 32], strides = [1, 1]} : vector<1728x32xf32> to vector<432x32xf32>
    %7 = vector.extract_strided_slice %2 {offsets = [1296, 0], sizes = [432, 32], strides = [1, 1]} : vector<1728x32xf32> to vector<432x32xf32>
    %8 = arith.maximumf %6, %7 : vector<432x32xf32>
    %9 = arith.maximumf %5, %8 : vector<432x32xf32>
    %c0_3 = arith.constant 0 : index
    %c0_4 = arith.constant 0 : index
    %10 = vector.load %arg2[%c0_3, %c0_4] : memref<1x32xf32, #tpu.memory_space<vmem>>, vector<1x32xf32>
    %11 = vector.broadcast %10 : vector<1x32xf32> to vector<432x32xf32>
    %12 = arith.addf %9, %11 : vector<432x32xf32>
    %cst_5 = arith.constant 0.000000e+00 : f32
    %13 = vector.broadcast %cst_5 : f32 to vector<432x32xf32>
    %14 = arith.maximumf %12, %13 : vector<432x32xf32>
    %15 = vector.extract_strided_slice %14 {offsets = [0, 0], sizes = [108, 32], strides = [1, 1]} : vector<432x32xf32> to vector<108x32xf32>
    %16 = vector.extract_strided_slice %14 {offsets = [108, 0], sizes = [108, 32], strides = [1, 1]} : vector<432x32xf32> to vector<108x32xf32>
    %17 = vector.extract_strided_slice %14 {offsets = [216, 0], sizes = [108, 32], strides = [1, 1]} : vector<432x32xf32> to vector<108x32xf32>
    %18 = vector.extract_strided_slice %14 {offsets = [324, 0], sizes = [108, 32], strides = [1, 1]} : vector<432x32xf32> to vector<108x32xf32>
    %cst_6 = arith.constant 0.000000e+00 : f32
    %19 = vector.broadcast %cst_6 : f32 to vector<6x32xf32>
    %20 = vector.extract_strided_slice %16 {offsets = [0, 0], sizes = [102, 32], strides = [1, 1]} : vector<108x32xf32> to vector<102x32xf32>
    %21 = tpu.concatenate %19, %20 in 0 : vector<6x32xf32>, vector<102x32xf32> -> vector<108x32xf32>
    %c1 = arith.constant 1 : index
    %c0_7 = arith.constant 0 : index
    %c0_8 = arith.constant 0 : index
    %22 = vector.load %arg3[%c1, %c0_7, %c0_8] : memref<9x32x64xbf16, #tpu.memory_space<vmem>>, vector<1x32x64xbf16>
    %23 = vector.shape_cast %22 : vector<1x32x64xbf16> to vector<32x64xbf16>
    %24 = arith.truncf %21 : vector<108x32xf32> to vector<108x32xbf16>
    %cst_9 = arith.constant dense<0.000000e+00> : vector<108x64xf32>
    %25 = tpu.matmul %24, %23, %cst_9 {dimension_numbers = #tpu.dot_dimension_numbers<[1], [0], [0], [1], [0, 0, 1, 1], [], []>} : vector<108x32xbf16>, vector<32x64xbf16>, vector<108x64xf32> -> vector<108x64xf32>
    %cst_10 = arith.constant 0.000000e+00 : f32
    %26 = vector.broadcast %cst_10 : f32 to vector<6x32xf32>
    %27 = vector.extract_strided_slice %18 {offsets = [0, 0], sizes = [102, 32], strides = [1, 1]} : vector<108x32xf32> to vector<102x32xf32>
    %28 = tpu.concatenate %26, %27 in 0 : vector<6x32xf32>, vector<102x32xf32> -> vector<108x32xf32>
    %c2 = arith.constant 2 : index
    %c0_11 = arith.constant 0 : index
    %c0_12 = arith.constant 0 : index
    %29 = vector.load %arg3[%c2, %c0_11, %c0_12] : memref<9x32x64xbf16, #tpu.memory_space<vmem>>, vector<1x32x64xbf16>
    %30 = vector.shape_cast %29 : vector<1x32x64xbf16> to vector<32x64xbf16>
    %31 = arith.truncf %28 : vector<108x32xf32> to vector<108x32xbf16>
    %cst_13 = arith.constant dense<0.000000e+00> : vector<108x64xf32>
    %32 = tpu.matmul %31, %30, %cst_13 {dimension_numbers = #tpu.dot_dimension_numbers<[1], [0], [0], [1], [0, 0, 1, 1], [], []>} : vector<108x32xbf16>, vector<32x64xbf16>, vector<108x64xf32> -> vector<108x64xf32>
    %33 = arith.addf %25, %32 : vector<108x64xf32>
    %c4 = arith.constant 4 : index
    %c0_14 = arith.constant 0 : index
    %c0_15 = arith.constant 0 : index
    %34 = vector.load %arg3[%c4, %c0_14, %c0_15] : memref<9x32x64xbf16, #tpu.memory_space<vmem>>, vector<1x32x64xbf16>
    %35 = vector.shape_cast %34 : vector<1x32x64xbf16> to vector<32x64xbf16>
    %36 = arith.truncf %15 : vector<108x32xf32> to vector<108x32xbf16>
    %cst_16 = arith.constant dense<0.000000e+00> : vector<108x64xf32>
    %37 = tpu.matmul %36, %35, %cst_16 {dimension_numbers = #tpu.dot_dimension_numbers<[1], [0], [0], [1], [0, 0, 1, 1], [], []>} : vector<108x32xbf16>, vector<32x64xbf16>, vector<108x64xf32> -> vector<108x64xf32>
    %38 = arith.addf %33, %37 : vector<108x64xf32>
    %c5 = arith.constant 5 : index
    %c0_17 = arith.constant 0 : index
    %c0_18 = arith.constant 0 : index
    %39 = vector.load %arg3[%c5, %c0_17, %c0_18] : memref<9x32x64xbf16, #tpu.memory_space<vmem>>, vector<1x32x64xbf16>
    %40 = vector.shape_cast %39 : vector<1x32x64xbf16> to vector<32x64xbf16>
    %41 = arith.truncf %17 : vector<108x32xf32> to vector<108x32xbf16>
    %cst_19 = arith.constant dense<0.000000e+00> : vector<108x64xf32>
    %42 = tpu.matmul %41, %40, %cst_19 {dimension_numbers = #tpu.dot_dimension_numbers<[1], [0], [0], [1], [0, 0, 1, 1], [], []>} : vector<108x32xbf16>, vector<32x64xbf16>, vector<108x64xf32> -> vector<108x64xf32>
    %43 = arith.addf %38, %42 : vector<108x64xf32>
    %c7 = arith.constant 7 : index
    %c0_20 = arith.constant 0 : index
    %c0_21 = arith.constant 0 : index
    %44 = vector.load %arg3[%c7, %c0_20, %c0_21] : memref<9x32x64xbf16, #tpu.memory_space<vmem>>, vector<1x32x64xbf16>
    %45 = vector.shape_cast %44 : vector<1x32x64xbf16> to vector<32x64xbf16>
    %46 = arith.truncf %16 : vector<108x32xf32> to vector<108x32xbf16>
    %cst_22 = arith.constant dense<0.000000e+00> : vector<108x64xf32>
    %47 = tpu.matmul %46, %45, %cst_22 {dimension_numbers = #tpu.dot_dimension_numbers<[1], [0], [0], [1], [0, 0, 1, 1], [], []>} : vector<108x32xbf16>, vector<32x64xbf16>, vector<108x64xf32> -> vector<108x64xf32>
    %48 = arith.addf %43, %47 : vector<108x64xf32>
    %c8 = arith.constant 8 : index
    %c0_23 = arith.constant 0 : index
    %c0_24 = arith.constant 0 : index
    %49 = vector.load %arg3[%c8, %c0_23, %c0_24] : memref<9x32x64xbf16, #tpu.memory_space<vmem>>, vector<1x32x64xbf16>
    %50 = vector.shape_cast %49 : vector<1x32x64xbf16> to vector<32x64xbf16>
    %51 = arith.truncf %18 : vector<108x32xf32> to vector<108x32xbf16>
    %cst_25 = arith.constant dense<0.000000e+00> : vector<108x64xf32>
    %52 = tpu.matmul %51, %50, %cst_25 {dimension_numbers = #tpu.dot_dimension_numbers<[1], [0], [0], [1], [0, 0, 1, 1], [], []>} : vector<108x32xbf16>, vector<32x64xbf16>, vector<108x64xf32> -> vector<108x64xf32>
    %53 = arith.addf %48, %52 : vector<108x64xf32>
    %c0_26 = arith.constant 0 : index
    %c0_27 = arith.constant 0 : index
    %54 = vector.load %arg4[%c0_26, %c0_27] : memref<1x64xf32, #tpu.memory_space<vmem>>, vector<1x64xf32>
    %55 = vector.broadcast %54 : vector<1x64xf32> to vector<108x64xf32>
    %56 = arith.addf %53, %55 : vector<108x64xf32>
    %cst_28 = arith.constant 0.000000e+00 : f32
    %57 = vector.broadcast %cst_28 : f32 to vector<108x64xf32>
    %58 = arith.maximumf %56, %57 : vector<108x64xf32>
    %c1_29 = arith.constant 1 : index
    %c0_30 = arith.constant 0 : index
    %c0_31 = arith.constant 0 : index
    %59 = vector.load %arg3[%c1_29, %c0_30, %c0_31] : memref<9x32x64xbf16, #tpu.memory_space<vmem>>, vector<1x32x64xbf16>
    %60 = vector.shape_cast %59 : vector<1x32x64xbf16> to vector<32x64xbf16>
    %61 = arith.truncf %15 : vector<108x32xf32> to vector<108x32xbf16>
    %cst_32 = arith.constant dense<0.000000e+00> : vector<108x64xf32>
    %62 = tpu.matmul %61, %60, %cst_32 {dimension_numbers = #tpu.dot_dimension_numbers<[1], [0], [0], [1], [0, 0, 1, 1], [], []>} : vector<108x32xbf16>, vector<32x64xbf16>, vector<108x64xf32> -> vector<108x64xf32>
    %c2_33 = arith.constant 2 : index
    %c0_34 = arith.constant 0 : index
    %c0_35 = arith.constant 0 : index
    %63 = vector.load %arg3[%c2_33, %c0_34, %c0_35] : memref<9x32x64xbf16, #tpu.memory_space<vmem>>, vector<1x32x64xbf16>
    %64 = vector.shape_cast %63 : vector<1x32x64xbf16> to vector<32x64xbf16>
    %65 = arith.truncf %17 : vector<108x32xf32> to vector<108x32xbf16>
    %cst_36 = arith.constant dense<0.000000e+00> : vector<108x64xf32>
    %66 = tpu.matmul %65, %64, %cst_36 {dimension_numbers = #tpu.dot_dimension_numbers<[1], [0], [0], [1], [0, 0, 1, 1], [], []>} : vector<108x32xbf16>, vector<32x64xbf16>, vector<108x64xf32> -> vector<108x64xf32>
    %67 = arith.addf %62, %66 : vector<108x64xf32>
    %c4_37 = arith.constant 4 : index
    %c0_38 = arith.constant 0 : index
    %c0_39 = arith.constant 0 : index
    %68 = vector.load %arg3[%c4_37, %c0_38, %c0_39] : memref<9x32x64xbf16, #tpu.memory_space<vmem>>, vector<1x32x64xbf16>
    %69 = vector.shape_cast %68 : vector<1x32x64xbf16> to vector<32x64xbf16>
    %70 = arith.truncf %16 : vector<108x32xf32> to vector<108x32xbf16>
    %cst_40 = arith.constant dense<0.000000e+00> : vector<108x64xf32>
    %71 = tpu.matmul %70, %69, %cst_40 {dimension_numbers = #tpu.dot_dimension_numbers<[1], [0], [0], [1], [0, 0, 1, 1], [], []>} : vector<108x32xbf16>, vector<32x64xbf16>, vector<108x64xf32> -> vector<108x64xf32>
    %72 = arith.addf %67, %71 : vector<108x64xf32>
    %c5_41 = arith.constant 5 : index
    %c0_42 = arith.constant 0 : index
    %c0_43 = arith.constant 0 : index
    %73 = vector.load %arg3[%c5_41, %c0_42, %c0_43] : memref<9x32x64xbf16, #tpu.memory_space<vmem>>, vector<1x32x64xbf16>
    %74 = vector.shape_cast %73 : vector<1x32x64xbf16> to vector<32x64xbf16>
    %75 = arith.truncf %18 : vector<108x32xf32> to vector<108x32xbf16>
    %cst_44 = arith.constant dense<0.000000e+00> : vector<108x64xf32>
    %76 = tpu.matmul %75, %74, %cst_44 {dimension_numbers = #tpu.dot_dimension_numbers<[1], [0], [0], [1], [0, 0, 1, 1], [], []>} : vector<108x32xbf16>, vector<32x64xbf16>, vector<108x64xf32> -> vector<108x64xf32>
    %77 = arith.addf %72, %76 : vector<108x64xf32>
    %cst_45 = arith.constant 0.000000e+00 : f32
    %78 = vector.broadcast %cst_45 : f32 to vector<6x32xf32>
    %79 = vector.extract_strided_slice %15 {offsets = [6, 0], sizes = [102, 32], strides = [1, 1]} : vector<108x32xf32> to vector<102x32xf32>
    %80 = tpu.concatenate %79, %78 in 0 : vector<102x32xf32>, vector<6x32xf32> -> vector<108x32xf32>
    %c7_46 = arith.constant 7 : index
    %c0_47 = arith.constant 0 : index
    %c0_48 = arith.constant 0 : index
    %81 = vector.load %arg3[%c7_46, %c0_47, %c0_48] : memref<9x32x64xbf16, #tpu.memory_space<vmem>>, vector<1x32x64xbf16>
    %82 = vector.shape_cast %81 : vector<1x32x64xbf16> to vector<32x64xbf16>
    %83 = arith.truncf %80 : vector<108x32xf32> to vector<108x32xbf16>
    %cst_49 = arith.constant dense<0.000000e+00> : vector<108x64xf32>
    %84 = tpu.matmul %83, %82, %cst_49 {dimension_numbers = #tpu.dot_dimension_numbers<[1], [0], [0], [1], [0, 0, 1, 1], [], []>} : vector<108x32xbf16>, vector<32x64xbf16>, vector<108x64xf32> -> vector<108x64xf32>
    %85 = arith.addf %77, %84 : vector<108x64xf32>
    %cst_50 = arith.constant 0.000000e+00 : f32
    %86 = vector.broadcast %cst_50 : f32 to vector<6x32xf32>
    %87 = vector.extract_strided_slice %17 {offsets = [6, 0], sizes = [102, 32], strides = [1, 1]} : vector<108x32xf32> to vector<102x32xf32>
    %88 = tpu.concatenate %87, %86 in 0 : vector<102x32xf32>, vector<6x32xf32> -> vector<108x32xf32>
    %c8_51 = arith.constant 8 : index
    %c0_52 = arith.constant 0 : index
    %c0_53 = arith.constant 0 : index
    %89 = vector.load %arg3[%c8_51, %c0_52, %c0_53] : memref<9x32x64xbf16, #tpu.memory_space<vmem>>, vector<1x32x64xbf16>
    %90 = vector.shape_cast %89 : vector<1x32x64xbf16> to vector<32x64xbf16>
    %91 = arith.truncf %88 : vector<108x32xf32> to vector<108x32xbf16>
    %cst_54 = arith.constant dense<0.000000e+00> : vector<108x64xf32>
    %92 = tpu.matmul %91, %90, %cst_54 {dimension_numbers = #tpu.dot_dimension_numbers<[1], [0], [0], [1], [0, 0, 1, 1], [], []>} : vector<108x32xbf16>, vector<32x64xbf16>, vector<108x64xf32> -> vector<108x64xf32>
    %93 = arith.addf %85, %92 : vector<108x64xf32>
    %c0_55 = arith.constant 0 : index
    %c0_56 = arith.constant 0 : index
    %94 = vector.load %arg4[%c0_55, %c0_56] : memref<1x64xf32, #tpu.memory_space<vmem>>, vector<1x64xf32>
    %95 = vector.broadcast %94 : vector<1x64xf32> to vector<108x64xf32>
    %96 = arith.addf %93, %95 : vector<108x64xf32>
    %cst_57 = arith.constant 0.000000e+00 : f32
    %97 = vector.broadcast %cst_57 : f32 to vector<108x64xf32>
    %98 = arith.maximumf %96, %97 : vector<108x64xf32>
    %cst_58 = arith.constant 0.000000e+00 : f32
    %99 = vector.broadcast %cst_58 : f32 to vector<6x32xf32>
    %100 = vector.extract_strided_slice %16 {offsets = [0, 0], sizes = [102, 32], strides = [1, 1]} : vector<108x32xf32> to vector<102x32xf32>
    %101 = tpu.concatenate %99, %100 in 0 : vector<6x32xf32>, vector<102x32xf32> -> vector<108x32xf32>
    %c0_59 = arith.constant 0 : index
    %c0_60 = arith.constant 0 : index
    %c0_61 = arith.constant 0 : index
    %102 = vector.load %arg3[%c0_59, %c0_60, %c0_61] : memref<9x32x64xbf16, #tpu.memory_space<vmem>>, vector<1x32x64xbf16>
    %103 = vector.shape_cast %102 : vector<1x32x64xbf16> to vector<32x64xbf16>
    %104 = arith.truncf %101 : vector<108x32xf32> to vector<108x32xbf16>
    %cst_62 = arith.constant dense<0.000000e+00> : vector<108x64xf32>
    %105 = tpu.matmul %104, %103, %cst_62 {dimension_numbers = #tpu.dot_dimension_numbers<[1], [0], [0], [1], [0, 0, 1, 1], [], []>} : vector<108x32xbf16>, vector<32x64xbf16>, vector<108x64xf32> -> vector<108x64xf32>
    %cst_63 = arith.constant 0.000000e+00 : f32
    %106 = vector.broadcast %cst_63 : f32 to vector<6x32xf32>
    %107 = vector.extract_strided_slice %18 {offsets = [0, 0], sizes = [102, 32], strides = [1, 1]} : vector<108x32xf32> to vector<102x32xf32>
    %108 = tpu.concatenate %106, %107 in 0 : vector<6x32xf32>, vector<102x32xf32> -> vector<108x32xf32>
    %c1_64 = arith.constant 1 : index
    %c0_65 = arith.constant 0 : index
    %c0_66 = arith.constant 0 : index
    %109 = vector.load %arg3[%c1_64, %c0_65, %c0_66] : memref<9x32x64xbf16, #tpu.memory_space<vmem>>, vector<1x32x64xbf16>
    %110 = vector.shape_cast %109 : vector<1x32x64xbf16> to vector<32x64xbf16>
    %111 = arith.truncf %108 : vector<108x32xf32> to vector<108x32xbf16>
    %cst_67 = arith.constant dense<0.000000e+00> : vector<108x64xf32>
    %112 = tpu.matmul %111, %110, %cst_67 {dimension_numbers = #tpu.dot_dimension_numbers<[1], [0], [0], [1], [0, 0, 1, 1], [], []>} : vector<108x32xbf16>, vector<32x64xbf16>, vector<108x64xf32> -> vector<108x64xf32>
    %113 = arith.addf %105, %112 : vector<108x64xf32>
    %c3 = arith.constant 3 : index
    %c0_68 = arith.constant 0 : index
    %c0_69 = arith.constant 0 : index
    %114 = vector.load %arg3[%c3, %c0_68, %c0_69] : memref<9x32x64xbf16, #tpu.memory_space<vmem>>, vector<1x32x64xbf16>
    %115 = vector.shape_cast %114 : vector<1x32x64xbf16> to vector<32x64xbf16>
    %116 = arith.truncf %15 : vector<108x32xf32> to vector<108x32xbf16>
    %cst_70 = arith.constant dense<0.000000e+00> : vector<108x64xf32>
    %117 = tpu.matmul %116, %115, %cst_70 {dimension_numbers = #tpu.dot_dimension_numbers<[1], [0], [0], [1], [0, 0, 1, 1], [], []>} : vector<108x32xbf16>, vector<32x64xbf16>, vector<108x64xf32> -> vector<108x64xf32>
    %118 = arith.addf %113, %117 : vector<108x64xf32>
    %c4_71 = arith.constant 4 : index
    %c0_72 = arith.constant 0 : index
    %c0_73 = arith.constant 0 : index
    %119 = vector.load %arg3[%c4_71, %c0_72, %c0_73] : memref<9x32x64xbf16, #tpu.memory_space<vmem>>, vector<1x32x64xbf16>
    %120 = vector.shape_cast %119 : vector<1x32x64xbf16> to vector<32x64xbf16>
    %121 = arith.truncf %17 : vector<108x32xf32> to vector<108x32xbf16>
    %cst_74 = arith.constant dense<0.000000e+00> : vector<108x64xf32>
    %122 = tpu.matmul %121, %120, %cst_74 {dimension_numbers = #tpu.dot_dimension_numbers<[1], [0], [0], [1], [0, 0, 1, 1], [], []>} : vector<108x32xbf16>, vector<32x64xbf16>, vector<108x64xf32> -> vector<108x64xf32>
    %123 = arith.addf %118, %122 : vector<108x64xf32>
    %c6 = arith.constant 6 : index
    %c0_75 = arith.constant 0 : index
    %c0_76 = arith.constant 0 : index
    %124 = vector.load %arg3[%c6, %c0_75, %c0_76] : memref<9x32x64xbf16, #tpu.memory_space<vmem>>, vector<1x32x64xbf16>
    %125 = vector.shape_cast %124 : vector<1x32x64xbf16> to vector<32x64xbf16>
    %126 = arith.truncf %16 : vector<108x32xf32> to vector<108x32xbf16>
    %cst_77 = arith.constant dense<0.000000e+00> : vector<108x64xf32>
    %127 = tpu.matmul %126, %125, %cst_77 {dimension_numbers = #tpu.dot_dimension_numbers<[1], [0], [0], [1], [0, 0, 1, 1], [], []>} : vector<108x32xbf16>, vector<32x64xbf16>, vector<108x64xf32> -> vector<108x64xf32>
    %128 = arith.addf %123, %127 : vector<108x64xf32>
    %c7_78 = arith.constant 7 : index
    %c0_79 = arith.constant 0 : index
    %c0_80 = arith.constant 0 : index
    %129 = vector.load %arg3[%c7_78, %c0_79, %c0_80] : memref<9x32x64xbf16, #tpu.memory_space<vmem>>, vector<1x32x64xbf16>
    %130 = vector.shape_cast %129 : vector<1x32x64xbf16> to vector<32x64xbf16>
    %131 = arith.truncf %18 : vector<108x32xf32> to vector<108x32xbf16>
    %cst_81 = arith.constant dense<0.000000e+00> : vector<108x64xf32>
    %132 = tpu.matmul %131, %130, %cst_81 {dimension_numbers = #tpu.dot_dimension_numbers<[1], [0], [0], [1], [0, 0, 1, 1], [], []>} : vector<108x32xbf16>, vector<32x64xbf16>, vector<108x64xf32> -> vector<108x64xf32>
    %133 = arith.addf %128, %132 : vector<108x64xf32>
    %c0_82 = arith.constant 0 : index
    %c0_83 = arith.constant 0 : index
    %134 = vector.load %arg4[%c0_82, %c0_83] : memref<1x64xf32, #tpu.memory_space<vmem>>, vector<1x64xf32>
    %135 = vector.broadcast %134 : vector<1x64xf32> to vector<108x64xf32>
    %136 = arith.addf %133, %135 : vector<108x64xf32>
    %cst_84 = arith.constant 0.000000e+00 : f32
    %137 = vector.broadcast %cst_84 : f32 to vector<108x64xf32>
    %138 = arith.maximumf %136, %137 : vector<108x64xf32>
    %c0_85 = arith.constant 0 : index
    %c0_86 = arith.constant 0 : index
    %c0_87 = arith.constant 0 : index
    %139 = vector.load %arg3[%c0_85, %c0_86, %c0_87] : memref<9x32x64xbf16, #tpu.memory_space<vmem>>, vector<1x32x64xbf16>
    %140 = vector.shape_cast %139 : vector<1x32x64xbf16> to vector<32x64xbf16>
    %141 = arith.truncf %15 : vector<108x32xf32> to vector<108x32xbf16>
    %cst_88 = arith.constant dense<0.000000e+00> : vector<108x64xf32>
    %142 = tpu.matmul %141, %140, %cst_88 {dimension_numbers = #tpu.dot_dimension_numbers<[1], [0], [0], [1], [0, 0, 1, 1], [], []>} : vector<108x32xbf16>, vector<32x64xbf16>, vector<108x64xf32> -> vector<108x64xf32>
    %c1_89 = arith.constant 1 : index
    %c0_90 = arith.constant 0 : index
    %c0_91 = arith.constant 0 : index
    %143 = vector.load %arg3[%c1_89, %c0_90, %c0_91] : memref<9x32x64xbf16, #tpu.memory_space<vmem>>, vector<1x32x64xbf16>
    %144 = vector.shape_cast %143 : vector<1x32x64xbf16> to vector<32x64xbf16>
    %145 = arith.truncf %17 : vector<108x32xf32> to vector<108x32xbf16>
    %cst_92 = arith.constant dense<0.000000e+00> : vector<108x64xf32>
    %146 = tpu.matmul %145, %144, %cst_92 {dimension_numbers = #tpu.dot_dimension_numbers<[1], [0], [0], [1], [0, 0, 1, 1], [], []>} : vector<108x32xbf16>, vector<32x64xbf16>, vector<108x64xf32> -> vector<108x64xf32>
    %147 = arith.addf %142, %146 : vector<108x64xf32>
    %c3_93 = arith.constant 3 : index
    %c0_94 = arith.constant 0 : index
    %c0_95 = arith.constant 0 : index
    %148 = vector.load %arg3[%c3_93, %c0_94, %c0_95] : memref<9x32x64xbf16, #tpu.memory_space<vmem>>, vector<1x32x64xbf16>
    %149 = vector.shape_cast %148 : vector<1x32x64xbf16> to vector<32x64xbf16>
    %150 = arith.truncf %16 : vector<108x32xf32> to vector<108x32xbf16>
    %cst_96 = arith.constant dense<0.000000e+00> : vector<108x64xf32>
    %151 = tpu.matmul %150, %149, %cst_96 {dimension_numbers = #tpu.dot_dimension_numbers<[1], [0], [0], [1], [0, 0, 1, 1], [], []>} : vector<108x32xbf16>, vector<32x64xbf16>, vector<108x64xf32> -> vector<108x64xf32>
    %152 = arith.addf %147, %151 : vector<108x64xf32>
    %c4_97 = arith.constant 4 : index
    %c0_98 = arith.constant 0 : index
    %c0_99 = arith.constant 0 : index
    %153 = vector.load %arg3[%c4_97, %c0_98, %c0_99] : memref<9x32x64xbf16, #tpu.memory_space<vmem>>, vector<1x32x64xbf16>
    %154 = vector.shape_cast %153 : vector<1x32x64xbf16> to vector<32x64xbf16>
    %155 = arith.truncf %18 : vector<108x32xf32> to vector<108x32xbf16>
    %cst_100 = arith.constant dense<0.000000e+00> : vector<108x64xf32>
    %156 = tpu.matmul %155, %154, %cst_100 {dimension_numbers = #tpu.dot_dimension_numbers<[1], [0], [0], [1], [0, 0, 1, 1], [], []>} : vector<108x32xbf16>, vector<32x64xbf16>, vector<108x64xf32> -> vector<108x64xf32>
    %157 = arith.addf %152, %156 : vector<108x64xf32>
    %cst_101 = arith.constant 0.000000e+00 : f32
    %158 = vector.broadcast %cst_101 : f32 to vector<6x32xf32>
    %159 = vector.extract_strided_slice %15 {offsets = [6, 0], sizes = [102, 32], strides = [1, 1]} : vector<108x32xf32> to vector<102x32xf32>
    %160 = tpu.concatenate %159, %158 in 0 : vector<102x32xf32>, vector<6x32xf32> -> vector<108x32xf32>
    %c6_102 = arith.constant 6 : index
    %c0_103 = arith.constant 0 : index
    %c0_104 = arith.constant 0 : index
    %161 = vector.load %arg3[%c6_102, %c0_103, %c0_104] : memref<9x32x64xbf16, #tpu.memory_space<vmem>>, vector<1x32x64xbf16>
    %162 = vector.shape_cast %161 : vector<1x32x64xbf16> to vector<32x64xbf16>
    %163 = arith.truncf %160 : vector<108x32xf32> to vector<108x32xbf16>
    %cst_105 = arith.constant dense<0.000000e+00> : vector<108x64xf32>
    %164 = tpu.matmul %163, %162, %cst_105 {dimension_numbers = #tpu.dot_dimension_numbers<[1], [0], [0], [1], [0, 0, 1, 1], [], []>} : vector<108x32xbf16>, vector<32x64xbf16>, vector<108x64xf32> -> vector<108x64xf32>
    %165 = arith.addf %157, %164 : vector<108x64xf32>
    %cst_106 = arith.constant 0.000000e+00 : f32
    %166 = vector.broadcast %cst_106 : f32 to vector<6x32xf32>
    %167 = vector.extract_strided_slice %17 {offsets = [6, 0], sizes = [102, 32], strides = [1, 1]} : vector<108x32xf32> to vector<102x32xf32>
    %168 = tpu.concatenate %167, %166 in 0 : vector<102x32xf32>, vector<6x32xf32> -> vector<108x32xf32>
    %c7_107 = arith.constant 7 : index
    %c0_108 = arith.constant 0 : index
    %c0_109 = arith.constant 0 : index
    %169 = vector.load %arg3[%c7_107, %c0_108, %c0_109] : memref<9x32x64xbf16, #tpu.memory_space<vmem>>, vector<1x32x64xbf16>
    %170 = vector.shape_cast %169 : vector<1x32x64xbf16> to vector<32x64xbf16>
    %171 = arith.truncf %168 : vector<108x32xf32> to vector<108x32xbf16>
    %cst_110 = arith.constant dense<0.000000e+00> : vector<108x64xf32>
    %172 = tpu.matmul %171, %170, %cst_110 {dimension_numbers = #tpu.dot_dimension_numbers<[1], [0], [0], [1], [0, 0, 1, 1], [], []>} : vector<108x32xbf16>, vector<32x64xbf16>, vector<108x64xf32> -> vector<108x64xf32>
    %173 = arith.addf %165, %172 : vector<108x64xf32>
    %c0_111 = arith.constant 0 : index
    %c0_112 = arith.constant 0 : index
    %174 = vector.load %arg4[%c0_111, %c0_112] : memref<1x64xf32, #tpu.memory_space<vmem>>, vector<1x64xf32>
    %175 = vector.broadcast %174 : vector<1x64xf32> to vector<108x64xf32>
    %176 = arith.addf %173, %175 : vector<108x64xf32>
    %cst_113 = arith.constant 0.000000e+00 : f32
    %177 = vector.broadcast %cst_113 : f32 to vector<108x64xf32>
    %178 = arith.maximumf %176, %177 : vector<108x64xf32>
    %179 = arith.maximumf %58, %98 : vector<108x64xf32>
    %180 = arith.maximumf %138, %178 : vector<108x64xf32>
    %181 = arith.maximumf %179, %180 : vector<108x64xf32>
    %cst_114 = arith.constant 0.000000e+00 : f32
    %182 = vector.broadcast %cst_114 : f32 to vector<6x64xf32>
    %183 = vector.extract_strided_slice %181 {offsets = [0, 0], sizes = [102, 64], strides = [1, 1]} : vector<108x64xf32> to vector<102x64xf32>
    %184 = tpu.concatenate %182, %183 in 0 : vector<6x64xf32>, vector<102x64xf32> -> vector<108x64xf32>
    %c0_115 = arith.constant 0 : index
    %c0_116 = arith.constant 0 : index
    %c0_117 = arith.constant 0 : index
    %185 = vector.load %arg5[%c0_115, %c0_116, %c0_117] : memref<3x64x64xbf16, #tpu.memory_space<vmem>>, vector<1x64x64xbf16>
    %186 = vector.shape_cast %185 : vector<1x64x64xbf16> to vector<64x64xbf16>
    %187 = arith.truncf %184 : vector<108x64xf32> to vector<108x64xbf16>
    %cst_118 = arith.constant dense<0.000000e+00> : vector<108x64xf32>
    %188 = tpu.matmul %187, %186, %cst_118 {dimension_numbers = #tpu.dot_dimension_numbers<[1], [0], [0], [1], [0, 0, 1, 1], [], []>} : vector<108x64xbf16>, vector<64x64xbf16>, vector<108x64xf32> -> vector<108x64xf32>
    %c1_119 = arith.constant 1 : index
    %c0_120 = arith.constant 0 : index
    %c0_121 = arith.constant 0 : index
    %189 = vector.load %arg5[%c1_119, %c0_120, %c0_121] : memref<3x64x64xbf16, #tpu.memory_space<vmem>>, vector<1x64x64xbf16>
    %190 = vector.shape_cast %189 : vector<1x64x64xbf16> to vector<64x64xbf16>
    %191 = arith.truncf %181 : vector<108x64xf32> to vector<108x64xbf16>
    %cst_122 = arith.constant dense<0.000000e+00> : vector<108x64xf32>
    %192 = tpu.matmul %191, %190, %cst_122 {dimension_numbers = #tpu.dot_dimension_numbers<[1], [0], [0], [1], [0, 0, 1, 1], [], []>} : vector<108x64xbf16>, vector<64x64xbf16>, vector<108x64xf32> -> vector<108x64xf32>
    %193 = arith.addf %188, %192 : vector<108x64xf32>
    %cst_123 = arith.constant 0.000000e+00 : f32
    %194 = vector.broadcast %cst_123 : f32 to vector<6x64xf32>
    %195 = vector.extract_strided_slice %181 {offsets = [6, 0], sizes = [102, 64], strides = [1, 1]} : vector<108x64xf32> to vector<102x64xf32>
    %196 = tpu.concatenate %195, %194 in 0 : vector<102x64xf32>, vector<6x64xf32> -> vector<108x64xf32>
    %c2_124 = arith.constant 2 : index
    %c0_125 = arith.constant 0 : index
    %c0_126 = arith.constant 0 : index
    %197 = vector.load %arg5[%c2_124, %c0_125, %c0_126] : memref<3x64x64xbf16, #tpu.memory_space<vmem>>, vector<1x64x64xbf16>
    %198 = vector.shape_cast %197 : vector<1x64x64xbf16> to vector<64x64xbf16>
    %199 = arith.truncf %196 : vector<108x64xf32> to vector<108x64xbf16>
    %cst_127 = arith.constant dense<0.000000e+00> : vector<108x64xf32>
    %200 = tpu.matmul %199, %198, %cst_127 {dimension_numbers = #tpu.dot_dimension_numbers<[1], [0], [0], [1], [0, 0, 1, 1], [], []>} : vector<108x64xbf16>, vector<64x64xbf16>, vector<108x64xf32> -> vector<108x64xf32>
    %201 = arith.addf %193, %200 : vector<108x64xf32>
    %c0_128 = arith.constant 0 : index
    %c0_129 = arith.constant 0 : index
    %202 = vector.load %arg6[%c0_128, %c0_129] : memref<1x64xf32, #tpu.memory_space<vmem>>, vector<1x64xf32>
    %203 = vector.broadcast %202 : vector<1x64xf32> to vector<108x64xf32>
    %204 = arith.addf %201, %203 : vector<108x64xf32>
    %cst_130 = arith.constant 0.000000e+00 : f32
    %205 = vector.broadcast %cst_130 : f32 to vector<108x64xf32>
    %206 = arith.maximumf %204, %205 : vector<108x64xf32>
    %cst_131 = arith.constant 0.000000e+00 : f32
    %207 = vector.broadcast %cst_131 : f32 to vector<6x64xf32>
    %208 = vector.extract_strided_slice %206 {offsets = [0, 0], sizes = [102, 64], strides = [1, 1]} : vector<108x64xf32> to vector<102x64xf32>
    %209 = tpu.concatenate %207, %208 in 0 : vector<6x64xf32>, vector<102x64xf32> -> vector<108x64xf32>
    %c0_132 = arith.constant 0 : index
    %c0_133 = arith.constant 0 : index
    %c0_134 = arith.constant 0 : index
    %210 = vector.load %arg7[%c0_132, %c0_133, %c0_134] : memref<3x64x128xbf16, #tpu.memory_space<vmem>>, vector<1x64x128xbf16>
    %211 = vector.shape_cast %210 : vector<1x64x128xbf16> to vector<64x128xbf16>
    %212 = arith.truncf %209 : vector<108x64xf32> to vector<108x64xbf16>
    %cst_135 = arith.constant dense<0.000000e+00> : vector<108x128xf32>
    %213 = tpu.matmul %212, %211, %cst_135 {dimension_numbers = #tpu.dot_dimension_numbers<[1], [0], [0], [1], [0, 0, 1, 1], [], []>} : vector<108x64xbf16>, vector<64x128xbf16>, vector<108x128xf32> -> vector<108x128xf32>
    %c1_136 = arith.constant 1 : index
    %c0_137 = arith.constant 0 : index
    %c0_138 = arith.constant 0 : index
    %214 = vector.load %arg7[%c1_136, %c0_137, %c0_138] : memref<3x64x128xbf16, #tpu.memory_space<vmem>>, vector<1x64x128xbf16>
    %215 = vector.shape_cast %214 : vector<1x64x128xbf16> to vector<64x128xbf16>
    %216 = arith.truncf %206 : vector<108x64xf32> to vector<108x64xbf16>
    %cst_139 = arith.constant dense<0.000000e+00> : vector<108x128xf32>
    %217 = tpu.matmul %216, %215, %cst_139 {dimension_numbers = #tpu.dot_dimension_numbers<[1], [0], [0], [1], [0, 0, 1, 1], [], []>} : vector<108x64xbf16>, vector<64x128xbf16>, vector<108x128xf32> -> vector<108x128xf32>
    %218 = arith.addf %213, %217 : vector<108x128xf32>
    %cst_140 = arith.constant 0.000000e+00 : f32
    %219 = vector.broadcast %cst_140 : f32 to vector<6x64xf32>
    %220 = vector.extract_strided_slice %206 {offsets = [6, 0], sizes = [102, 64], strides = [1, 1]} : vector<108x64xf32> to vector<102x64xf32>
    %221 = tpu.concatenate %220, %219 in 0 : vector<102x64xf32>, vector<6x64xf32> -> vector<108x64xf32>
    %c2_141 = arith.constant 2 : index
    %c0_142 = arith.constant 0 : index
    %c0_143 = arith.constant 0 : index
    %222 = vector.load %arg7[%c2_141, %c0_142, %c0_143] : memref<3x64x128xbf16, #tpu.memory_space<vmem>>, vector<1x64x128xbf16>
    %223 = vector.shape_cast %222 : vector<1x64x128xbf16> to vector<64x128xbf16>
    %224 = arith.truncf %221 : vector<108x64xf32> to vector<108x64xbf16>
    %cst_144 = arith.constant dense<0.000000e+00> : vector<108x128xf32>
    %225 = tpu.matmul %224, %223, %cst_144 {dimension_numbers = #tpu.dot_dimension_numbers<[1], [0], [0], [1], [0, 0, 1, 1], [], []>} : vector<108x64xbf16>, vector<64x128xbf16>, vector<108x128xf32> -> vector<108x128xf32>
    %226 = arith.addf %218, %225 : vector<108x128xf32>
    %c0_145 = arith.constant 0 : index
    %c0_146 = arith.constant 0 : index
    %227 = vector.load %arg8[%c0_145, %c0_146] : memref<1x128xf32, #tpu.memory_space<vmem>>, vector<1x128xf32>
    %228 = vector.broadcast %227 : vector<1x128xf32> to vector<108x128xf32>
    %229 = arith.addf %226, %228 : vector<108x128xf32>
    %cst_147 = arith.constant 0.000000e+00 : f32
    %230 = vector.broadcast %cst_147 : f32 to vector<108x128xf32>
    %231 = arith.maximumf %229, %230 : vector<108x128xf32>
    %cst_148 = arith.constant 0.000000e+00 : f32
    %232 = vector.broadcast %cst_148 : f32 to vector<6x128xf32>
    %233 = vector.extract_strided_slice %231 {offsets = [0, 0], sizes = [102, 128], strides = [1, 1]} : vector<108x128xf32> to vector<102x128xf32>
    %234 = tpu.concatenate %232, %233 in 0 : vector<6x128xf32>, vector<102x128xf32> -> vector<108x128xf32>
    %c0_149 = arith.constant 0 : index
    %c0_150 = arith.constant 0 : index
    %c0_151 = arith.constant 0 : index
    %235 = vector.load %arg9[%c0_149, %c0_150, %c0_151] : memref<3x128x128xbf16, #tpu.memory_space<vmem>>, vector<1x128x128xbf16>
    %236 = vector.shape_cast %235 : vector<1x128x128xbf16> to vector<128x128xbf16>
    %237 = arith.truncf %234 : vector<108x128xf32> to vector<108x128xbf16>
    %cst_152 = arith.constant dense<0.000000e+00> : vector<108x128xf32>
    %238 = tpu.matmul %237, %236, %cst_152 {dimension_numbers = #tpu.dot_dimension_numbers<[1], [0], [0], [1], [0, 0, 1, 1], [], []>} : vector<108x128xbf16>, vector<128x128xbf16>, vector<108x128xf32> -> vector<108x128xf32>
    %c1_153 = arith.constant 1 : index
    %c0_154 = arith.constant 0 : index
    %c0_155 = arith.constant 0 : index
    %239 = vector.load %arg9[%c1_153, %c0_154, %c0_155] : memref<3x128x128xbf16, #tpu.memory_space<vmem>>, vector<1x128x128xbf16>
    %240 = vector.shape_cast %239 : vector<1x128x128xbf16> to vector<128x128xbf16>
    %241 = arith.truncf %231 : vector<108x128xf32> to vector<108x128xbf16>
    %cst_156 = arith.constant dense<0.000000e+00> : vector<108x128xf32>
    %242 = tpu.matmul %241, %240, %cst_156 {dimension_numbers = #tpu.dot_dimension_numbers<[1], [0], [0], [1], [0, 0, 1, 1], [], []>} : vector<108x128xbf16>, vector<128x128xbf16>, vector<108x128xf32> -> vector<108x128xf32>
    %243 = arith.addf %238, %242 : vector<108x128xf32>
    %cst_157 = arith.constant 0.000000e+00 : f32
    %244 = vector.broadcast %cst_157 : f32 to vector<6x128xf32>
    %245 = vector.extract_strided_slice %231 {offsets = [6, 0], sizes = [102, 128], strides = [1, 1]} : vector<108x128xf32> to vector<102x128xf32>
    %246 = tpu.concatenate %245, %244 in 0 : vector<102x128xf32>, vector<6x128xf32> -> vector<108x128xf32>
    %c2_158 = arith.constant 2 : index
    %c0_159 = arith.constant 0 : index
    %c0_160 = arith.constant 0 : index
    %247 = vector.load %arg9[%c2_158, %c0_159, %c0_160] : memref<3x128x128xbf16, #tpu.memory_space<vmem>>, vector<1x128x128xbf16>
    %248 = vector.shape_cast %247 : vector<1x128x128xbf16> to vector<128x128xbf16>
    %249 = arith.truncf %246 : vector<108x128xf32> to vector<108x128xbf16>
    %cst_161 = arith.constant dense<0.000000e+00> : vector<108x128xf32>
    %250 = tpu.matmul %249, %248, %cst_161 {dimension_numbers = #tpu.dot_dimension_numbers<[1], [0], [0], [1], [0, 0, 1, 1], [], []>} : vector<108x128xbf16>, vector<128x128xbf16>, vector<108x128xf32> -> vector<108x128xf32>
    %251 = arith.addf %243, %250 : vector<108x128xf32>
    %c0_162 = arith.constant 0 : index
    %c0_163 = arith.constant 0 : index
    %252 = vector.load %arg10[%c0_162, %c0_163] : memref<1x128xf32, #tpu.memory_space<vmem>>, vector<1x128xf32>
    %253 = vector.broadcast %252 : vector<1x128xf32> to vector<108x128xf32>
    %254 = arith.addf %251, %253 : vector<108x128xf32>
    %cst_164 = arith.constant 0.000000e+00 : f32
    %255 = vector.broadcast %cst_164 : f32 to vector<108x128xf32>
    %256 = arith.maximumf %254, %255 : vector<108x128xf32>
    %cst_165 = arith.constant 0.000000e+00 : f32
    %257 = vector.broadcast %cst_165 : f32 to vector<6x128xf32>
    %258 = vector.extract_strided_slice %256 {offsets = [0, 0], sizes = [102, 128], strides = [1, 1]} : vector<108x128xf32> to vector<102x128xf32>
    %259 = tpu.concatenate %257, %258 in 0 : vector<6x128xf32>, vector<102x128xf32> -> vector<108x128xf32>
    %260 = arith.maximumf %259, %256 : vector<108x128xf32>
    %cst_166 = arith.constant 0.000000e+00 : f32
    %261 = vector.broadcast %cst_166 : f32 to vector<6x128xf32>
    %262 = vector.extract_strided_slice %256 {offsets = [6, 0], sizes = [102, 128], strides = [1, 1]} : vector<108x128xf32> to vector<102x128xf32>
    %263 = tpu.concatenate %262, %261 in 0 : vector<102x128xf32>, vector<6x128xf32> -> vector<108x128xf32>
    %264 = arith.maximumf %260, %263 : vector<108x128xf32>
    %265 = vector.extract_strided_slice %264 {offsets = [0, 0], sizes = [6, 128], strides = [1, 1]} : vector<108x128xf32> to vector<6x128xf32>
    %c0_167 = arith.constant 0 : index
    %c0_168 = arith.constant 0 : index
    %c0_169 = arith.constant 0 : index
    %266 = vector.load %arg11[%c0_167, %c0_168, %c0_169] : memref<18x128x256xbf16, #tpu.memory_space<vmem>>, vector<1x128x256xbf16>
    %267 = vector.shape_cast %266 : vector<1x128x256xbf16> to vector<128x256xbf16>
    %268 = arith.truncf %265 : vector<6x128xf32> to vector<6x128xbf16>
    %cst_170 = arith.constant dense<0.000000e+00> : vector<6x256xf32>
    %269 = tpu.matmul %268, %267, %cst_170 {dimension_numbers = #tpu.dot_dimension_numbers<[1], [0], [0], [1], [0, 0, 1, 1], [], []>} : vector<6x128xbf16>, vector<128x256xbf16>, vector<6x256xf32> -> vector<6x256xf32>
    %270 = vector.extract_strided_slice %264 {offsets = [6, 0], sizes = [6, 128], strides = [1, 1]} : vector<108x128xf32> to vector<6x128xf32>
    %c1_171 = arith.constant 1 : index
    %c0_172 = arith.constant 0 : index
    %c0_173 = arith.constant 0 : index
    %271 = vector.load %arg11[%c1_171, %c0_172, %c0_173] : memref<18x128x256xbf16, #tpu.memory_space<vmem>>, vector<1x128x256xbf16>
    %272 = vector.shape_cast %271 : vector<1x128x256xbf16> to vector<128x256xbf16>
    %273 = arith.truncf %270 : vector<6x128xf32> to vector<6x128xbf16>
    %cst_174 = arith.constant dense<0.000000e+00> : vector<6x256xf32>
    %274 = tpu.matmul %273, %272, %cst_174 {dimension_numbers = #tpu.dot_dimension_numbers<[1], [0], [0], [1], [0, 0, 1, 1], [], []>} : vector<6x128xbf16>, vector<128x256xbf16>, vector<6x256xf32> -> vector<6x256xf32>
    %275 = arith.addf %269, %274 : vector<6x256xf32>
    %276 = vector.extract_strided_slice %264 {offsets = [12, 0], sizes = [6, 128], strides = [1, 1]} : vector<108x128xf32> to vector<6x128xf32>
    %c2_175 = arith.constant 2 : index
    %c0_176 = arith.constant 0 : index
    %c0_177 = arith.constant 0 : index
    %277 = vector.load %arg11[%c2_175, %c0_176, %c0_177] : memref<18x128x256xbf16, #tpu.memory_space<vmem>>, vector<1x128x256xbf16>
    %278 = vector.shape_cast %277 : vector<1x128x256xbf16> to vector<128x256xbf16>
    %279 = arith.truncf %276 : vector<6x128xf32> to vector<6x128xbf16>
    %cst_178 = arith.constant dense<0.000000e+00> : vector<6x256xf32>
    %280 = tpu.matmul %279, %278, %cst_178 {dimension_numbers = #tpu.dot_dimension_numbers<[1], [0], [0], [1], [0, 0, 1, 1], [], []>} : vector<6x128xbf16>, vector<128x256xbf16>, vector<6x256xf32> -> vector<6x256xf32>
    %281 = arith.addf %275, %280 : vector<6x256xf32>
    %282 = vector.extract_strided_slice %264 {offsets = [18, 0], sizes = [6, 128], strides = [1, 1]} : vector<108x128xf32> to vector<6x128xf32>
    %c3_179 = arith.constant 3 : index
    %c0_180 = arith.constant 0 : index
    %c0_181 = arith.constant 0 : index
    %283 = vector.load %arg11[%c3_179, %c0_180, %c0_181] : memref<18x128x256xbf16, #tpu.memory_space<vmem>>, vector<1x128x256xbf16>
    %284 = vector.shape_cast %283 : vector<1x128x256xbf16> to vector<128x256xbf16>
    %285 = arith.truncf %282 : vector<6x128xf32> to vector<6x128xbf16>
    %cst_182 = arith.constant dense<0.000000e+00> : vector<6x256xf32>
    %286 = tpu.matmul %285, %284, %cst_182 {dimension_numbers = #tpu.dot_dimension_numbers<[1], [0], [0], [1], [0, 0, 1, 1], [], []>} : vector<6x128xbf16>, vector<128x256xbf16>, vector<6x256xf32> -> vector<6x256xf32>
    %287 = arith.addf %281, %286 : vector<6x256xf32>
    %288 = vector.extract_strided_slice %264 {offsets = [24, 0], sizes = [6, 128], strides = [1, 1]} : vector<108x128xf32> to vector<6x128xf32>
    %c4_183 = arith.constant 4 : index
    %c0_184 = arith.constant 0 : index
    %c0_185 = arith.constant 0 : index
    %289 = vector.load %arg11[%c4_183, %c0_184, %c0_185] : memref<18x128x256xbf16, #tpu.memory_space<vmem>>, vector<1x128x256xbf16>
    %290 = vector.shape_cast %289 : vector<1x128x256xbf16> to vector<128x256xbf16>
    %291 = arith.truncf %288 : vector<6x128xf32> to vector<6x128xbf16>
    %cst_186 = arith.constant dense<0.000000e+00> : vector<6x256xf32>
    %292 = tpu.matmul %291, %290, %cst_186 {dimension_numbers = #tpu.dot_dimension_numbers<[1], [0], [0], [1], [0, 0, 1, 1], [], []>} : vector<6x128xbf16>, vector<128x256xbf16>, vector<6x256xf32> -> vector<6x256xf32>
    %293 = arith.addf %287, %292 : vector<6x256xf32>
    %294 = vector.extract_strided_slice %264 {offsets = [30, 0], sizes = [6, 128], strides = [1, 1]} : vector<108x128xf32> to vector<6x128xf32>
    %c5_187 = arith.constant 5 : index
    %c0_188 = arith.constant 0 : index
    %c0_189 = arith.constant 0 : index
    %295 = vector.load %arg11[%c5_187, %c0_188, %c0_189] : memref<18x128x256xbf16, #tpu.memory_space<vmem>>, vector<1x128x256xbf16>
    %296 = vector.shape_cast %295 : vector<1x128x256xbf16> to vector<128x256xbf16>
    %297 = arith.truncf %294 : vector<6x128xf32> to vector<6x128xbf16>
    %cst_190 = arith.constant dense<0.000000e+00> : vector<6x256xf32>
    %298 = tpu.matmul %297, %296, %cst_190 {dimension_numbers = #tpu.dot_dimension_numbers<[1], [0], [0], [1], [0, 0, 1, 1], [], []>} : vector<6x128xbf16>, vector<128x256xbf16>, vector<6x256xf32> -> vector<6x256xf32>
    %299 = arith.addf %293, %298 : vector<6x256xf32>
    %300 = vector.extract_strided_slice %264 {offsets = [36, 0], sizes = [6, 128], strides = [1, 1]} : vector<108x128xf32> to vector<6x128xf32>
    %c6_191 = arith.constant 6 : index
    %c0_192 = arith.constant 0 : index
    %c0_193 = arith.constant 0 : index
    %301 = vector.load %arg11[%c6_191, %c0_192, %c0_193] : memref<18x128x256xbf16, #tpu.memory_space<vmem>>, vector<1x128x256xbf16>
    %302 = vector.shape_cast %301 : vector<1x128x256xbf16> to vector<128x256xbf16>
    %303 = arith.truncf %300 : vector<6x128xf32> to vector<6x128xbf16>
    %cst_194 = arith.constant dense<0.000000e+00> : vector<6x256xf32>
    %304 = tpu.matmul %303, %302, %cst_194 {dimension_numbers = #tpu.dot_dimension_numbers<[1], [0], [0], [1], [0, 0, 1, 1], [], []>} : vector<6x128xbf16>, vector<128x256xbf16>, vector<6x256xf32> -> vector<6x256xf32>
    %305 = arith.addf %299, %304 : vector<6x256xf32>
    %306 = vector.extract_strided_slice %264 {offsets = [42, 0], sizes = [6, 128], strides = [1, 1]} : vector<108x128xf32> to vector<6x128xf32>
    %c7_195 = arith.constant 7 : index
    %c0_196 = arith.constant 0 : index
    %c0_197 = arith.constant 0 : index
    %307 = vector.load %arg11[%c7_195, %c0_196, %c0_197] : memref<18x128x256xbf16, #tpu.memory_space<vmem>>, vector<1x128x256xbf16>
    %308 = vector.shape_cast %307 : vector<1x128x256xbf16> to vector<128x256xbf16>
    %309 = arith.truncf %306 : vector<6x128xf32> to vector<6x128xbf16>
    %cst_198 = arith.constant dense<0.000000e+00> : vector<6x256xf32>
    %310 = tpu.matmul %309, %308, %cst_198 {dimension_numbers = #tpu.dot_dimension_numbers<[1], [0], [0], [1], [0, 0, 1, 1], [], []>} : vector<6x128xbf16>, vector<128x256xbf16>, vector<6x256xf32> -> vector<6x256xf32>
    %311 = arith.addf %305, %310 : vector<6x256xf32>
    %312 = vector.extract_strided_slice %264 {offsets = [48, 0], sizes = [6, 128], strides = [1, 1]} : vector<108x128xf32> to vector<6x128xf32>
    %c8_199 = arith.constant 8 : index
    %c0_200 = arith.constant 0 : index
    %c0_201 = arith.constant 0 : index
    %313 = vector.load %arg11[%c8_199, %c0_200, %c0_201] : memref<18x128x256xbf16, #tpu.memory_space<vmem>>, vector<1x128x256xbf16>
    %314 = vector.shape_cast %313 : vector<1x128x256xbf16> to vector<128x256xbf16>
    %315 = arith.truncf %312 : vector<6x128xf32> to vector<6x128xbf16>
    %cst_202 = arith.constant dense<0.000000e+00> : vector<6x256xf32>
    %316 = tpu.matmul %315, %314, %cst_202 {dimension_numbers = #tpu.dot_dimension_numbers<[1], [0], [0], [1], [0, 0, 1, 1], [], []>} : vector<6x128xbf16>, vector<128x256xbf16>, vector<6x256xf32> -> vector<6x256xf32>
    %317 = arith.addf %311, %316 : vector<6x256xf32>
    %318 = vector.extract_strided_slice %264 {offsets = [54, 0], sizes = [6, 128], strides = [1, 1]} : vector<108x128xf32> to vector<6x128xf32>
    %c9 = arith.constant 9 : index
    %c0_203 = arith.constant 0 : index
    %c0_204 = arith.constant 0 : index
    %319 = vector.load %arg11[%c9, %c0_203, %c0_204] : memref<18x128x256xbf16, #tpu.memory_space<vmem>>, vector<1x128x256xbf16>
    %320 = vector.shape_cast %319 : vector<1x128x256xbf16> to vector<128x256xbf16>
    %321 = arith.truncf %318 : vector<6x128xf32> to vector<6x128xbf16>
    %cst_205 = arith.constant dense<0.000000e+00> : vector<6x256xf32>
    %322 = tpu.matmul %321, %320, %cst_205 {dimension_numbers = #tpu.dot_dimension_numbers<[1], [0], [0], [1], [0, 0, 1, 1], [], []>} : vector<6x128xbf16>, vector<128x256xbf16>, vector<6x256xf32> -> vector<6x256xf32>
    %323 = arith.addf %317, %322 : vector<6x256xf32>
    %324 = vector.extract_strided_slice %264 {offsets = [60, 0], sizes = [6, 128], strides = [1, 1]} : vector<108x128xf32> to vector<6x128xf32>
    %c10 = arith.constant 10 : index
    %c0_206 = arith.constant 0 : index
    %c0_207 = arith.constant 0 : index
    %325 = vector.load %arg11[%c10, %c0_206, %c0_207] : memref<18x128x256xbf16, #tpu.memory_space<vmem>>, vector<1x128x256xbf16>
    %326 = vector.shape_cast %325 : vector<1x128x256xbf16> to vector<128x256xbf16>
    %327 = arith.truncf %324 : vector<6x128xf32> to vector<6x128xbf16>
    %cst_208 = arith.constant dense<0.000000e+00> : vector<6x256xf32>
    %328 = tpu.matmul %327, %326, %cst_208 {dimension_numbers = #tpu.dot_dimension_numbers<[1], [0], [0], [1], [0, 0, 1, 1], [], []>} : vector<6x128xbf16>, vector<128x256xbf16>, vector<6x256xf32> -> vector<6x256xf32>
    %329 = arith.addf %323, %328 : vector<6x256xf32>
    %330 = vector.extract_strided_slice %264 {offsets = [66, 0], sizes = [6, 128], strides = [1, 1]} : vector<108x128xf32> to vector<6x128xf32>
    %c11 = arith.constant 11 : index
    %c0_209 = arith.constant 0 : index
    %c0_210 = arith.constant 0 : index
    %331 = vector.load %arg11[%c11, %c0_209, %c0_210] : memref<18x128x256xbf16, #tpu.memory_space<vmem>>, vector<1x128x256xbf16>
    %332 = vector.shape_cast %331 : vector<1x128x256xbf16> to vector<128x256xbf16>
    %333 = arith.truncf %330 : vector<6x128xf32> to vector<6x128xbf16>
    %cst_211 = arith.constant dense<0.000000e+00> : vector<6x256xf32>
    %334 = tpu.matmul %333, %332, %cst_211 {dimension_numbers = #tpu.dot_dimension_numbers<[1], [0], [0], [1], [0, 0, 1, 1], [], []>} : vector<6x128xbf16>, vector<128x256xbf16>, vector<6x256xf32> -> vector<6x256xf32>
    %335 = arith.addf %329, %334 : vector<6x256xf32>
    %336 = vector.extract_strided_slice %264 {offsets = [72, 0], sizes = [6, 128], strides = [1, 1]} : vector<108x128xf32> to vector<6x128xf32>
    %c12 = arith.constant 12 : index
    %c0_212 = arith.constant 0 : index
    %c0_213 = arith.constant 0 : index
    %337 = vector.load %arg11[%c12, %c0_212, %c0_213] : memref<18x128x256xbf16, #tpu.memory_space<vmem>>, vector<1x128x256xbf16>
    %338 = vector.shape_cast %337 : vector<1x128x256xbf16> to vector<128x256xbf16>
    %339 = arith.truncf %336 : vector<6x128xf32> to vector<6x128xbf16>
    %cst_214 = arith.constant dense<0.000000e+00> : vector<6x256xf32>
    %340 = tpu.matmul %339, %338, %cst_214 {dimension_numbers = #tpu.dot_dimension_numbers<[1], [0], [0], [1], [0, 0, 1, 1], [], []>} : vector<6x128xbf16>, vector<128x256xbf16>, vector<6x256xf32> -> vector<6x256xf32>
    %341 = arith.addf %335, %340 : vector<6x256xf32>
    %342 = vector.extract_strided_slice %264 {offsets = [78, 0], sizes = [6, 128], strides = [1, 1]} : vector<108x128xf32> to vector<6x128xf32>
    %c13 = arith.constant 13 : index
    %c0_215 = arith.constant 0 : index
    %c0_216 = arith.constant 0 : index
    %343 = vector.load %arg11[%c13, %c0_215, %c0_216] : memref<18x128x256xbf16, #tpu.memory_space<vmem>>, vector<1x128x256xbf16>
    %344 = vector.shape_cast %343 : vector<1x128x256xbf16> to vector<128x256xbf16>
    %345 = arith.truncf %342 : vector<6x128xf32> to vector<6x128xbf16>
    %cst_217 = arith.constant dense<0.000000e+00> : vector<6x256xf32>
    %346 = tpu.matmul %345, %344, %cst_217 {dimension_numbers = #tpu.dot_dimension_numbers<[1], [0], [0], [1], [0, 0, 1, 1], [], []>} : vector<6x128xbf16>, vector<128x256xbf16>, vector<6x256xf32> -> vector<6x256xf32>
    %347 = arith.addf %341, %346 : vector<6x256xf32>
    %348 = vector.extract_strided_slice %264 {offsets = [84, 0], sizes = [6, 128], strides = [1, 1]} : vector<108x128xf32> to vector<6x128xf32>
    %c14 = arith.constant 14 : index
    %c0_218 = arith.constant 0 : index
    %c0_219 = arith.constant 0 : index
    %349 = vector.load %arg11[%c14, %c0_218, %c0_219] : memref<18x128x256xbf16, #tpu.memory_space<vmem>>, vector<1x128x256xbf16>
    %350 = vector.shape_cast %349 : vector<1x128x256xbf16> to vector<128x256xbf16>
    %351 = arith.truncf %348 : vector<6x128xf32> to vector<6x128xbf16>
    %cst_220 = arith.constant dense<0.000000e+00> : vector<6x256xf32>
    %352 = tpu.matmul %351, %350, %cst_220 {dimension_numbers = #tpu.dot_dimension_numbers<[1], [0], [0], [1], [0, 0, 1, 1], [], []>} : vector<6x128xbf16>, vector<128x256xbf16>, vector<6x256xf32> -> vector<6x256xf32>
    %353 = arith.addf %347, %352 : vector<6x256xf32>
    %354 = vector.extract_strided_slice %264 {offsets = [90, 0], sizes = [6, 128], strides = [1, 1]} : vector<108x128xf32> to vector<6x128xf32>
    %c15 = arith.constant 15 : index
    %c0_221 = arith.constant 0 : index
    %c0_222 = arith.constant 0 : index
    %355 = vector.load %arg11[%c15, %c0_221, %c0_222] : memref<18x128x256xbf16, #tpu.memory_space<vmem>>, vector<1x128x256xbf16>
    %356 = vector.shape_cast %355 : vector<1x128x256xbf16> to vector<128x256xbf16>
    %357 = arith.truncf %354 : vector<6x128xf32> to vector<6x128xbf16>
    %cst_223 = arith.constant dense<0.000000e+00> : vector<6x256xf32>
    %358 = tpu.matmul %357, %356, %cst_223 {dimension_numbers = #tpu.dot_dimension_numbers<[1], [0], [0], [1], [0, 0, 1, 1], [], []>} : vector<6x128xbf16>, vector<128x256xbf16>, vector<6x256xf32> -> vector<6x256xf32>
    %359 = arith.addf %353, %358 : vector<6x256xf32>
    %360 = vector.extract_strided_slice %264 {offsets = [96, 0], sizes = [6, 128], strides = [1, 1]} : vector<108x128xf32> to vector<6x128xf32>
    %c16 = arith.constant 16 : index
    %c0_224 = arith.constant 0 : index
    %c0_225 = arith.constant 0 : index
    %361 = vector.load %arg11[%c16, %c0_224, %c0_225] : memref<18x128x256xbf16, #tpu.memory_space<vmem>>, vector<1x128x256xbf16>
    %362 = vector.shape_cast %361 : vector<1x128x256xbf16> to vector<128x256xbf16>
    %363 = arith.truncf %360 : vector<6x128xf32> to vector<6x128xbf16>
    %cst_226 = arith.constant dense<0.000000e+00> : vector<6x256xf32>
    %364 = tpu.matmul %363, %362, %cst_226 {dimension_numbers = #tpu.dot_dimension_numbers<[1], [0], [0], [1], [0, 0, 1, 1], [], []>} : vector<6x128xbf16>, vector<128x256xbf16>, vector<6x256xf32> -> vector<6x256xf32>
    %365 = arith.addf %359, %364 : vector<6x256xf32>
    %366 = vector.extract_strided_slice %264 {offsets = [102, 0], sizes = [6, 128], strides = [1, 1]} : vector<108x128xf32> to vector<6x128xf32>
    %c17 = arith.constant 17 : index
    %c0_227 = arith.constant 0 : index
    %c0_228 = arith.constant 0 : index
    %367 = vector.load %arg11[%c17, %c0_227, %c0_228] : memref<18x128x256xbf16, #tpu.memory_space<vmem>>, vector<1x128x256xbf16>
    %368 = vector.shape_cast %367 : vector<1x128x256xbf16> to vector<128x256xbf16>
    %369 = arith.truncf %366 : vector<6x128xf32> to vector<6x128xbf16>
    %cst_229 = arith.constant dense<0.000000e+00> : vector<6x256xf32>
    %370 = tpu.matmul %369, %368, %cst_229 {dimension_numbers = #tpu.dot_dimension_numbers<[1], [0], [0], [1], [0, 0, 1, 1], [], []>} : vector<6x128xbf16>, vector<128x256xbf16>, vector<6x256xf32> -> vector<6x256xf32>
    %371 = arith.addf %365, %370 : vector<6x256xf32>
    %c0_230 = arith.constant 0 : index
    %c0_231 = arith.constant 0 : index
    %372 = vector.load %arg12[%c0_230, %c0_231] : memref<1x256xf32, #tpu.memory_space<vmem>>, vector<1x256xf32>
    %373 = vector.broadcast %372 : vector<1x256xf32> to vector<6x256xf32>
    %374 = arith.addf %371, %373 : vector<6x256xf32>
    %cst_232 = arith.constant 0.000000e+00 : f32
    %375 = vector.broadcast %cst_232 : f32 to vector<6x256xf32>
    %376 = arith.maximumf %374, %375 : vector<6x256xf32>
    %c0_233 = arith.constant 0 : index
    %c0_234 = arith.constant 0 : index
    %377 = vector.load %arg13[%c0_233, %c0_234] : memref<256x128xbf16, #tpu.memory_space<vmem>>, vector<256x128xbf16>
    %378 = arith.truncf %376 : vector<6x256xf32> to vector<6x256xbf16>
    %cst_235 = arith.constant dense<0.000000e+00> : vector<6x128xf32>
    %379 = tpu.matmul %378, %377, %cst_235 {dimension_numbers = #tpu.dot_dimension_numbers<[1], [0], [0], [1], [0, 0, 1, 1], [], []>} : vector<6x256xbf16>, vector<256x128xbf16>, vector<6x128xf32> -> vector<6x128xf32>
    %c0_236 = arith.constant 0 : index
    %c0_237 = arith.constant 0 : index
    %380 = vector.load %arg14[%c0_236, %c0_237] : memref<1x128xf32, #tpu.memory_space<vmem>>, vector<1x128xf32>
    %381 = vector.broadcast %380 : vector<1x128xf32> to vector<6x128xf32>
    %382 = arith.addf %379, %381 : vector<6x128xf32>
    %c0_238 = arith.constant 0 : index
    %c0_239 = arith.constant 0 : index
    %383 = vector.load %arg15[%c0_238, %c0_239] : memref<2x6xf32, #tpu.memory_space<vmem>>, vector<2x6xf32>
    %cst_240 = arith.constant dense<0.000000e+00> : vector<2x128xf32>
    %384 = tpu.matmul %383, %382, %cst_240 {dimension_numbers = #tpu.dot_dimension_numbers<[1], [0], [0], [1], [0, 0, 1, 1], [], []>} : vector<2x6xf32>, vector<6x128xf32>, vector<2x128xf32> -> vector<2x128xf32>
    %c0_241 = arith.constant 0 : index
    %c0_242 = arith.constant 0 : index
    %385 = vector.load %arg16[%c0_241, %c0_242] : memref<2x128xf32, #tpu.memory_space<vmem>>, vector<2x128xf32>
    tpu.vector_store %arg16[%c0_241, %c0_242], %384 {strides = array<i32>} : memref<2x128xf32, #tpu.memory_space<vmem>>, vector<2x128xf32>,
    return
  }
}

</mosaic_0001>

<bundles_post_ra>
// kernel: alexnet_encoder_forward.1
= control target key start
LH: loop header
LB: loop body
LE: loop exit
PB: predicated region body
PF: predicated region fallthrough
CT: control target
= control target key end

     0   :  { %s19000_s0 = inlined_call_operand.vmem [shape: bf16[1728,9], index: 0, kind: input, shape index: {}]   ;;  %s19001_s1 = inlined_call_operand.vmem [shape: bf16[9,32], index: 1, kind: input, shape index: {}]   ;;  %s19002_s2 = inlined_call_operand.vmem [shape: f32[1,32], index: 2, kind: input, shape index: {}]   ;;  %s19003_s3 = inlined_call_operand.vmem [shape: bf16[9,32,64], index: 3, kind: input, shape index: {}]   ;;  %s19004_s4 = inlined_call_operand.vmem [shape: f32[1,64], index: 4, kind: input, shape index: {}]   ;;  %s19005_s5 = inlined_call_operand.vmem [shape: bf16[3,64,64], index: 5, kind: input, shape index: {}]   ;;  %s19006_s6 = inlined_call_operand.vmem [shape: f32[1,64], index: 6, kind: input, shape index: {}]   ;;  %s19007_s7 = inlined_call_operand.vmem [shape: bf16[3,64,128], index: 7, kind: input, shape index: {}]   ;;  %s19008_s8 = inlined_call_operand.vmem [shape: f32[1,128], index: 8, kind: input, shape index: {}]   ;;  %s19009_s9 = inlined_call_operand.vmem [shape: bf16[3,128,128], index: 9, kind: input, shape index: {}]   ;;  %s19010_s10 = inlined_call_operand.vmem [shape: f32[1,128], index: 10, kind: input, shape index: {}]   ;;  %s19011_s11 = inlined_call_operand.vmem [shape: bf16[18,128,256], index: 11, kind: input, shape index: {}]   ;;  %s19012_s12 = inlined_call_operand.vmem [shape: f32[1,256], index: 12, kind: input, shape index: {}]   ;;  %s19013_s13 = inlined_call_operand.vmem [shape: bf16[256,128], index: 13, kind: input, shape index: {}]   ;;  %s19014_s14 = inlined_call_operand.vmem [shape: f32[1,128], index: 14, kind: input, shape index: {}]   ;;  %s19015_s15 = inlined_call_operand.vmem [shape: f32[2,6], index: 15, kind: input, shape index: {}]   ;;  %s19016_s16 = inlined_call_operand.hbm [shape: f32[2,128], index: 16, kind: output, shape index: {}]  }
   0x1   :  { %19140 = sst [smem:[#allocation129_spill]] %s19000_s0 }
   0x2   :  { %v13262_v0 = vld [vmem:[%s19001_s1] sm:$0x1f]   ;;  %vm1143_vm0 = vcmask 1043456   ;;  %vm1144_vm1 = vcmask 1044480   ;;  %s19141_s25 = sld [smem:[#allocation129_spill]]  ;;  %v13918_v2 = vmov 65535  }
   0x3   :  { %v1145_v3 = vsel %vm1143_vm0, 4294967295, %v13918_v2  ;;  %vm818_vm2 = vcmask 72704  }
   0x4   :  { %v1146_v4 = vsel %vm1144_vm1, %v1145_v3, 0 }
   0x5   :  { %v1148_v5 = vand.u32 %v13262_v0, %v1146_v4 }
   0x7   :  { %11917 = vmatprep.subr.bf16.mxu0 %v1148_v5 }
   0x8   :  { %v13263_v1 = vld [vmem:[%s19141_s25] sm:$0xff]   ;;  %v13264_v6 = vld [vmem:[%s19141_s25 + $0x8] sm:$0xff]   ;;  %11918 = vmatpush3.bf16.msra.mxu0 %v1148_v5  ;;  %v13265_v7 = vld [vmem:[%s19141_s25 + $0x10] sm:$0xff]  }
   0x9   :  { %11919 = vmatprep.mubr.msk.bf16.mxu0 %vm818_vm2, %v13263_v1  ;;  %v13266_v8 = vld [vmem:[%s19141_s25 + $0x18] sm:$0xff]   ;;  %v13267_v9 = vld [vmem:[%s19141_s25 + $0x20] sm:$0xff]   ;;  %v13268_v10 = vld [vmem:[%s19141_s25 + $0x28] sm:$0xff]  }
   0xa   :  { %v13269_v11 = vld [vmem:[%s19141_s25 + $0x30] sm:$0xff]   ;;  %v13270_v12 = vld [vmem:[%s19141_s25 + $0x38] sm:$0xff]   ;;  %v13271_v13 = vld [vmem:[%s19141_s25 + $0x40] sm:$0xff]  }
   0xb   :  { %11920 = vmatmul.mubr.msk.bf16.vlgmr.msra.gmra.mrb[0].mxu0 %vm818_vm2, %v13264_v6  ;;  %v13272_v14 = vld [vmem:[%s19141_s25 + $0x48] sm:$0xff]   ;;  %v13273_v15 = vld [vmem:[%s19141_s25 + $0x50] sm:$0xff]   ;;  %v13274_v16 = vld [vmem:[%s19141_s25 + $0x58] sm:$0xff]  }
   0xc   :  { %11923 = vmatprep.mubr.msk.bf16.mxu0 %vm818_vm2, %v13265_v7  ;;  %v13275_v17 = vld [vmem:[%s19141_s25 + $0x60] sm:$0xff]   ;;  %v13276_v18 = vld [vmem:[%s19141_s25 + $0x68] sm:$0xff]   ;;  %v13277_v19 = vld [vmem:[%s19141_s25 + $0x70] sm:$0xff]  }
   0xd   :  { %v13278_v20 = vld [vmem:[%s19141_s25 + $0x78] sm:$0xff]   ;;  %v13279_v21 = vld [vmem:[%s19141_s25 + $0x80] sm:$0xff]   ;;  %v13280_v22 = vld [vmem:[%s19141_s25 + $0x88] sm:$0xff]  }
   0xe   :  { %v13281_v23 = vld [vmem:[%s19141_s25 + $0x90] sm:$0xff]   ;;  %v13282_v24 = vld [vmem:[%s19141_s25 + $0x98] sm:$0xff]   ;;  %v13283_v25 = vld [vmem:[%s19141_s25 + $0xa0] sm:$0xff]  }
   0xf   :  { %v13284_v26 = vld [vmem:[%s19141_s25 + $0xa8] sm:$0xff]   ;;  %v13285_v27 = vld [vmem:[%s19141_s25 + $0xb0] sm:$0xff]   ;;  %v13286_v28 = vld [vmem:[%s19141_s25 + $0xb8] sm:$0xff]  }
  0x10   :  { %v13287_v29 = vld [vmem:[%s19141_s25 + $0xc0] sm:$0xff]   ;;  %v13288_v30 = vld [vmem:[%s19141_s25 + $0xc8] sm:$0xff]   ;;  %v13289_v31 = vld [vmem:[%s19141_s25 + $0xd0] sm:$0xff]  }
  0x11   :  { %v13290_v32 = vld [vmem:[%s19141_s25 + $0xd8] sm:$0xff]   ;;  %v13291_v33 = vld [vmem:[%s19141_s25 + $0xe0] sm:$0xff]   ;;  %v13292_v34 = vld [vmem:[%s19141_s25 + $0xe8] sm:$0xff]  }
  0x12   :  { %v13293_v35 = vld [vmem:[%s19141_s25 + $0xf0] sm:$0xff]   ;;  %v13294_v36 = vld [vmem:[%s19141_s25 + $0xf8] sm:$0xff]   ;;  %v13295_v37 = vld [vmem:[%s19141_s25 + $0x100] sm:$0xff]  }
  0x13   :  { %11924 = vmatmul.mubr.msk.bf16.gmra.mrb[4].mxu0 %vm818_vm2, %v13266_v8  ;;  %v13296_v38 = vld [vmem:[%s19141_s25 + $0x108] sm:$0xff]   ;;  %v13297_v39 = vld [vmem:[%s19141_s25 + $0x110] sm:$0xff]   ;;  %v13298_v40 = vld [vmem:[%s19141_s25 + $0x118] sm:$0xff]  }
  0x14   :  { %11927 = vmatprep.mubr.msk.bf16.mxu0 %vm818_vm2, %v13267_v9  ;;  %v13299_v41 = vld [vmem:[%s19141_s25 + $0x120] sm:$0xff]   ;;  %v13300_v42 = vld [vmem:[%s19141_s25 + $0x128] sm:$0xff]   ;;  %v13301_v43 = vld [vmem:[%s19141_s25 + $0x130] sm:$0xff]  }
  0x15   :  { %v13302_v44 = vld [vmem:[%s19141_s25 + $0x138] sm:$0xff]   ;;  %v13303_v45 = vld [vmem:[%s19141_s25 + $0x140] sm:$0xff]   ;;  %v13304_v46 = vld [vmem:[%s19141_s25 + $0x148] sm:$0xff]  }
  0x16   :  { %v13305_v47 = vld [vmem:[%s19141_s25 + $0x150] sm:$0xff]   ;;  %v13306_v48 = vld [vmem:[%s19141_s25 + $0x158] sm:$0xff]   ;;  %v13307_v49 = vld [vmem:[%s19141_s25 + $0x160] sm:$0xff]  }
  0x17   :  { %v13308_v50 = vld [vmem:[%s19141_s25 + $0x168] sm:$0xff]   ;;  %v13309_v51 = vld [vmem:[%s19141_s25 + $0x170] sm:$0xff]   ;;  %v13310_v52 = vld [vmem:[%s19141_s25 + $0x178] sm:$0xff]  }
  0x18   :  { %v13311_v53 = vld [vmem:[%s19141_s25 + $0x180] sm:$0xff]   ;;  %v13312_v54 = vld [vmem:[%s19141_s25 + $0x188] sm:$0xff]   ;;  %v13313_v55 = vld [vmem:[%s19141_s25 + $0x190] sm:$0xff]  }
  0x19   :  { %v13314_v56 = vld [vmem:[%s19141_s25 + $0x198] sm:$0xff]   ;;  %v13315_v57 = vld [vmem:[%s19141_s25 + $0x1a0] sm:$0xff]   ;;  %v13316_v58 = vld [vmem:[%s19141_s25 + $0x1a8] sm:$0xff]  }
  0x1a   :  { %v13317_v59 = vld [vmem:[%s19141_s25 + $0x1b0] sm:$0xff]   ;;  %v13318_v60 = vld [vmem:[%s19141_s25 + $0x1b8] sm:$0xff]   ;;  %v13319_v0 = vld [vmem:[%s19141_s25 + $0x1c0] sm:$0xff]  }
  0x1b   :  { %11928 = vmatmul.mubr.msk.bf16.gmra.mrb[8].mxu0 %vm818_vm2, %v13268_v10  ;;  %v13320_v2 = vld [vmem:[%s19141_s25 + $0x1c8] sm:$0xff]   ;;  %v13321_v6 = vld [vmem:[%s19141_s25 + $0x1d0] sm:$0xff]   ;;  %v13322_v8 = vld [vmem:[%s19141_s25 + $0x1d8] sm:$0xff]  }
  0x1c   :  { %11931 = vmatprep.mubr.msk.bf16.mxu0 %vm818_vm2, %v13269_v11 }
  0x23   :  { %11932 = vmatmul.mubr.msk.bf16.gmra.mrb[12].mxu0 %vm818_vm2, %v13270_v12  ;;  %v13323_v12 = vld [vmem:[%s19141_s25 + $0x1e0] sm:$0xff]  }
  0x24   :  { %11935 = vmatprep.mubr.msk.bf16.mxu0 %vm818_vm2, %v13271_v13 }
  0x2b   :  { %11936 = vmatmul.mubr.msk.bf16.gmra.mrb[16].mxu0 %vm818_vm2, %v13272_v14 }
  0x2c   :  { %11939 = vmatprep.mubr.msk.bf16.mxu0 %vm818_vm2, %v13273_v15 }
  0x33   :  { %11940 = vmatmul.mubr.msk.bf16.gmra.mrb[20].mxu0 %vm818_vm2, %v13274_v16  ;;  %v13324_v16 = vld [vmem:[%s19141_s25 + $0x1e8] sm:$0xff]  }
  0x34   :  { %11943 = vmatprep.mubr.msk.bf16.mxu0 %vm818_vm2, %v13275_v17 }
  0x3b   :  { %11944 = vmatmul.mubr.msk.bf16.gmra.mrb[24].mxu0 %vm818_vm2, %v13276_v18  ;;  %v13325_v18 = vld [vmem:[%s19141_s25 + $0x1f0] sm:$0xff]  }
  0x3c   :  { %11947 = vmatprep.mubr.msk.bf16.mxu0 %vm818_vm2, %v13277_v19 }
  0x43   :  { %11948 = vmatmul.mubr.msk.bf16.gmra.mrb[28].mxu0 %vm818_vm2, %v13278_v20 }
  0x44   :  { %11951 = vmatprep.mubr.msk.bf16.mxu0 %vm818_vm2, %v13279_v21 }
  0x4b   :  { %11952 = vmatmul.mubr.msk.bf16.gmra.mrb[32].mxu0 %vm818_vm2, %v13280_v22  ;;  %v13326_v22 = vld [vmem:[%s19141_s25 + $0x1f8] sm:$0xff]  }
  0x4c   :  { %11955 = vmatprep.mubr.msk.bf16.mxu0 %vm818_vm2, %v13281_v23 }
  0x53   :  { %11956 = vmatmul.mubr.msk.bf16.gmra.mrb[36].mxu0 %vm818_vm2, %v13282_v24  ;;  %v13327_v24 = vld [vmem:[%s19141_s25 + $0x200] sm:$0xff]  }
  0x54   :  { %11959 = vmatprep.mubr.msk.bf16.mxu0 %vm818_vm2, %v13283_v25 }
  0x5b   :  { %11960 = vmatmul.mubr.msk.bf16.gmra.mrb[40].mxu0 %vm818_vm2, %v13284_v26 }
  0x5c   :  { %11963 = vmatprep.mubr.msk.bf16.mxu0 %vm818_vm2, %v13285_v27 }
  0x63   :  { %11964 = vmatmul.mubr.msk.bf16.gmra.mrb[44].mxu0 %vm818_vm2, %v13286_v28 }
  0x64   :  { %11967 = vmatprep.mubr.msk.bf16.mxu0 %vm818_vm2, %v13287_v29 }
  0x6b   :  { %11968 = vmatmul.mubr.msk.bf16.gmra.mrb[48].mxu0 %vm818_vm2, %v13288_v30 }
  0x6c   :  { %11971 = vmatprep.mubr.msk.bf16.mxu0 %vm818_vm2, %v13289_v31 }
  0x73   :  { %11972 = vmatmul.mubr.msk.bf16.gmra.mrb[52].mxu0 %vm818_vm2, %v13290_v32 }
  0x74   :  { %11975 = vmatprep.mubr.msk.bf16.mxu0 %vm818_vm2, %v13291_v33 }
  0x7b   :  { %11976 = vmatmul.mubr.msk.bf16.gmra.mrb[56].mxu0 %vm818_vm2, %v13292_v34 }
  0x7c   :  { %11979 = vmatprep.mubr.msk.bf16.mxu0 %vm818_vm2, %v13293_v35 }
  0x83   :  { %11980 = vmatmul.mubr.msk.bf16.gmra.mrb[60].mxu0 %vm818_vm2, %v13294_v36 }
  0x84   :  { %11983 = vmatprep.mubr.msk.bf16.mxu0 %vm818_vm2, %v13295_v37 }
  0x8b   :  { %11984 = vmatmul.mubr.msk.bf16.gmra.mrb[64].mxu0 %vm818_vm2, %v13296_v38 }
  0x8c   :  { %11987 = vmatprep.mubr.msk.bf16.mxu0 %vm818_vm2, %v13297_v39 }
  0x93   :  { %11988 = vmatmul.mubr.msk.bf16.gmra.mrb[68].mxu0 %vm818_vm2, %v13298_v40 }
  0x94   :  { %11991 = vmatprep.mubr.msk.bf16.mxu0 %vm818_vm2, %v13299_v41 }
  0x9b   :  { %11992 = vmatmul.mubr.msk.bf16.gmra.mrb[72].mxu0 %vm818_vm2, %v13300_v42 }
  0x9c   :  { %11995 = vmatprep.mubr.msk.bf16.mxu0 %vm818_vm2, %v13301_v43 }
  0xa3   :  { %11996 = vmatmul.mubr.msk.bf16.gmra.mrb[76].mxu0 %vm818_vm2, %v13302_v44 }
  0xa4   :  { %11999 = vmatprep.mubr.msk.bf16.mxu0 %vm818_vm2, %v13303_v45 }
  0xab   :  { %12000 = vmatmul.mubr.msk.bf16.gmra.mrb[80].mxu0 %vm818_vm2, %v13304_v46 }
  0xac   :  { %12003 = vmatprep.mubr.msk.bf16.mxu0 %vm818_vm2, %v13305_v47 }
  0xb3   :  { %12004 = vmatmul.mubr.msk.bf16.gmra.mrb[84].mxu0 %vm818_vm2, %v13306_v48 }
  0xb4   :  { %12007 = vmatprep.mubr.msk.bf16.mxu0 %vm818_vm2, %v13307_v49 }
  0xbb   :  { %12008 = vmatmul.mubr.msk.bf16.gmra.mrb[88].mxu0 %vm818_vm2, %v13308_v50 }
  0xbc   :  { %12011 = vmatprep.mubr.msk.bf16.mxu0 %vm818_vm2, %v13309_v51 }
  0xc3   :  { %12012 = vmatmul.mubr.msk.bf16.gmra.mrb[92].mxu0 %vm818_vm2, %v13310_v52 }
  0xc4   :  { %12015 = vmatprep.mubr.msk.bf16.mxu0 %vm818_vm2, %v13311_v53 }
  0xcb   :  { %12016 = vmatmul.mubr.msk.bf16.gmra.mrb[96].mxu0 %vm818_vm2, %v13312_v54 }
  0xcc   :  { %12019 = vmatprep.mubr.msk.bf16.mxu0 %vm818_vm2, %v13313_v55 }
  0xd3   :  { %12020 = vmatmul.mubr.msk.bf16.gmra.mrb[100].mxu0 %vm818_vm2, %v13314_v56 }
  0xd4   :  { %12023 = vmatprep.mubr.msk.bf16.mxu0 %vm818_vm2, %v13315_v57 }
  0xdb   :  { %12024 = vmatmul.mubr.msk.bf16.gmra.mrb[104].mxu0 %vm818_vm2, %v13316_v58 }
  0xdc   :  { %12027 = vmatprep.mubr.msk.bf16.mxu0 %vm818_vm2, %v13317_v59 }
  0xde   :  { %v14235_v61 = vpop.f32.mrb[0].mxu0 }
  0xdf   :  { %v14237_v62 = vpop.f32.mrb[1].mxu0 }
  0xe0   :  { %v14239_v63 = vpop.f32.mrb[2].mxu0 }
  0xe1   :  { %v14244_v1 = vpop.f32.mrb[3].mxu0 }
  0xe3   :  { %12028 = vmatmul.mubr.msk.bf16.gmra.mrb[108].mxu0 %vm818_vm2, %v13318_v60 }
  0xe4   :  { %12031 = vmatprep.mubr.msk.bf16.mxu0 %vm818_vm2, %v13319_v0 }
  0xe6   :  { %v14251_v3 = vpop.f32.mrb[4].mxu0 }
  0xe7   :  { %v14253_v4 = vpop.f32.mrb[5].mxu0 }
  0xe8   :  { %v14255_v5 = vpop.f32.mrb[6].mxu0 }
  0xe9   :  { %v14260_v7 = vpop.f32.mrb[7].mxu0 }
  0xea   :  { %19142 = vst [vmem:[#allocation5_spill] sm:$0xff] %v14260_v7 }
  0xeb   :  { %12032 = vmatmul.mubr.msk.bf16.gmra.mrb[112].mxu0 %vm818_vm2, %v13320_v2 }
  0xec   :  { %12035 = vmatprep.mubr.msk.bf16.mxu0 %vm818_vm2, %v13321_v6 }
  0xee   :  { %v14267_v9 = vpop.f32.mrb[8].mxu0 }
  0xef   :  { %v14269_v10 = vpop.f32.mrb[9].mxu0 }
  0xf0   :  { %v14271_v11 = vpop.f32.mrb[10].mxu0 }
  0xf1   :  { %v14276_v13 = vpop.f32.mrb[11].mxu0 }
  0xf2   :  { %19143 = vst [vmem:[#allocation6_spill] sm:$0xff] %v14276_v13 }
  0xf3   :  { %12036 = vmatmul.mubr.msk.bf16.gmra.mrb[116].mxu0 %vm818_vm2, %v13322_v8 }
  0xf4   :  { %12039 = vmatprep.mubr.msk.bf16.mxu0 %vm818_vm2, %v13323_v12 }
  0xf6   :  { %v14280_v14 = vpop.f32.mrb[12].mxu0 }
  0xf7   :  { %v14282_v15 = vpop.f32.mrb[13].mxu0 }
  0xf8   :  { %v14287_v17 = vpop.f32.mrb[14].mxu0 }
  0xf9   :  { %v14292_v19 = vpop.f32.mrb[15].mxu0 }
  0xfa   :  { %19144 = vst [vmem:[#allocation7_spill] sm:$0xff] %v14292_v19 }
  0xfb   :  { %12040 = vmatmul.mubr.msk.bf16.gmra.mrb[120].mxu0 %vm818_vm2, %v13324_v16 }
  0xfc   :  { %12043 = vmatprep.mubr.msk.bf16.mxu0 %vm818_vm2, %v13325_v18 }
  0xfe   :  { %v14296_v20 = vpop.f32.mrb[16].mxu0 }
  0xff   :  { %v14298_v21 = vpop.f32.mrb[17].mxu0 }
 0x100   :  { %v14303_v23 = vpop.f32.mrb[18].mxu0 }
 0x101   :  { %v14308_v25 = vpop.f32.mrb[19].mxu0 }
 0x102   :  { %19145 = vst [vmem:[#allocation8_spill] sm:$0xff] %v14308_v25 }
 0x103   :  { %21 = vsyncpa [#allocation3], 0  ;;  %12044 = vmatmul.mubr.msk.bf16.gmra.mrb[124].mxu0 %vm818_vm2, %v13326_v22  ;;  %v13328_v28 = vld [vmem:[%s19141_s25 + $0x208] sm:$0xff]   ;;  %v13329_v30 = vld [vmem:[%s19141_s25 + $0x210] sm:$0xff]   ;;  %vm13920_vm3 = vmmov 0   ;;  %vm2338_vm4 = vcmask 1041408  }
 0x104   :  { %12047 = vmatprep.mubr.msk.bf16.mxu0 %vm818_vm2, %v13327_v24  ;;  %v13330_v34 = vld [vmem:[%s19141_s25 + $0x218] sm:$0xff]   ;;  %v13331_v36 = vld [vmem:[%s19141_s25 + $0x220] sm:$0xff]   ;;  %v13332_v40 = vld [vmem:[%s19141_s25 + $0x228] sm:$0xff]   ;;  %vm2380_vm5 = vcmask 1045504   ;;  %vm2474_vm6 = vcmask 261120   ;;  %vm5591_vm7 = vcmask 523264  }
 0x105   :  { %v13333_v42 = vld [vmem:[%s19141_s25 + $0x230] sm:$0xff]   ;;  %v13334_v46 = vld [vmem:[%s19141_s25 + $0x238] sm:$0xff]   ;;  %v13335_v48 = vld [vmem:[%s19141_s25 + $0x240] sm:$0xff]   ;;  %vm13921_vm9 = vmmov 1   ;;  %vm10185_vm12 = vcmask 48128  }
 0x106   :  { %v14312_v26 = vpop.f32.mrb[20].mxu0  ;;  %v13336_v52 = vld [vmem:[%s19141_s25 + $0x248] sm:$0xff]   ;;  %v13337_v54 = vld [vmem:[%s19141_s25 + $0x250] sm:$0xff]   ;;  %v13338_v58 = vld [vmem:[%s19141_s25 + $0x258] sm:$0xff]  }
 0x107   :  { %19146 = vst [vmem:[#allocation9_spill] sm:$0xff] %v14312_v26  ;;  %v14314_v27 = vpop.f32.mrb[21].mxu0  ;;  %v13339_v60 = vld [vmem:[%s19141_s25 + $0x260] sm:$0xff]   ;;  %v13340_v8 = vld [vmem:[%s19141_s25 + $0x268] sm:$0xff]   ;;  %v13341_v16 = vld [vmem:[%s19141_s25 + $0x270] sm:$0xff]  }
 0x108   :  { %v14319_v29 = vpop.f32.mrb[22].mxu0  ;;  %vm17713_vm8 = vmneg %vm2380_vm5 }
 0x109   :  { %19147 = vst [vmem:[#allocation10_spill] sm:$0xff] %v14319_v29  ;;  %v14324_v31 = vpop.f32.mrb[23].mxu0  ;;  %vm10847_vm10 = vmpackc.low %vm13921_vm9, %vm17713_vm8 }
 0x10a   :  { %19148 = vst [vmem:[#allocation11_spill] sm:$0xff] %v14324_v31  ;;  %vm10874_vm11 = vmpackc.low %vm13921_vm9, %vm2380_vm5 }
 0x10b   :  { %12048 = vmatmul.mubr.msk.bf16.gmra.mrb[128].mxu0 %vm818_vm2, %v13328_v28  ;;  %v13342_v28 = vld [vmem:[%s19141_s25 + $0x278] sm:$0xff]  }
 0x10c   :  { %12051 = vmatprep.mubr.msk.bf16.mxu0 %vm818_vm2, %v13329_v30 }
 0x10e   :  { %v14328_v32 = vpop.f32.mrb[24].mxu0 }
 0x10f   :  { %19149 = vst [vmem:[#allocation12_spill] sm:$0xff] %v14328_v32  ;;  %v14330_v33 = vpop.f32.mrb[25].mxu0 }
 0x110   :  { %v14335_v35 = vpop.f32.mrb[26].mxu0 }
 0x111   :  { %19150 = vst [vmem:[#allocation13_spill] sm:$0xff] %v14335_v35  ;;  %v14340_v37 = vpop.f32.mrb[27].mxu0  ;;  %v13373_v35 = vld [vmem:[%s19003_s3 + $0x20] sm:$0xff]  }
 0x112   :  { %19151 = vst [vmem:[#allocation14_spill] sm:$0xff] %v14340_v37 }
 0x113   :  { %12052 = vmatmul.mubr.msk.bf16.gmra.mrb[132].mxu0 %vm818_vm2, %v13330_v34  ;;  %v13343_v34 = vld [vmem:[%s19141_s25 + $0x280] sm:$0xff]  }
 0x114   :  { %12055 = vmatprep.mubr.msk.bf16.mxu0 %vm818_vm2, %v13331_v36 }
 0x116   :  { %v14344_v38 = vpop.f32.mrb[28].mxu0 }
 0x117   :  { %19152 = vst [vmem:[#allocation15_spill] sm:$0xff] %v14344_v38  ;;  %v14346_v39 = vpop.f32.mrb[29].mxu0 }
 0x118   :  { %19153 = vst [vmem:[#allocation16_spill] sm:$0xff] %v14346_v39  ;;  %v14351_v41 = vpop.f32.mrb[30].mxu0 }
 0x119   :  { %19154 = vst [vmem:[#allocation17_spill] sm:$0xff] %v14351_v41  ;;  %v14356_v43 = vpop.f32.mrb[31].mxu0 }
 0x11a   :  { %19155 = vst [vmem:[#allocation18_spill] sm:$0xff] %v14356_v43 }
 0x11b   :  { %12056 = vmatmul.mubr.msk.bf16.gmra.mrb[136].mxu0 %vm818_vm2, %v13332_v40 }
 0x11c   :  { %12059 = vmatprep.mubr.msk.bf16.mxu0 %vm818_vm2, %v13333_v42 }
 0x11e   :  { %v14360_v44 = vpop.f32.mrb[32].mxu0 }
 0x11f   :  { %19156 = vst [vmem:[#allocation19_spill] sm:$0xff] %v14360_v44  ;;  %v14362_v45 = vpop.f32.mrb[33].mxu0 }
 0x120   :  { %19157 = vst [vmem:[#allocation20_spill] sm:$0xff] %v14362_v45  ;;  %v14367_v47 = vpop.f32.mrb[34].mxu0 }
 0x121   :  { %19158 = vst [vmem:[#allocation21_spill] sm:$0xff] %v14367_v47  ;;  %v14372_v49 = vpop.f32.mrb[35].mxu0 }
 0x122   :  { %19159 = vst [vmem:[#allocation22_spill] sm:$0xff] %v14372_v49 }
 0x123   :  { %12060 = vmatmul.mubr.msk.bf16.gmra.mrb[140].mxu0 %vm818_vm2, %v13334_v46 }
 0x124   :  { %12063 = vmatprep.mubr.msk.bf16.mxu0 %vm818_vm2, %v13335_v48  ;;  %v13344_v48 = vld [vmem:[%s19141_s25 + $0x288] sm:$0xff]  }
 0x126   :  { %v14376_v50 = vpop.f32.mrb[36].mxu0 }
 0x127   :  { %19160 = vst [vmem:[#allocation23_spill] sm:$0xff] %v14376_v50  ;;  %v14378_v51 = vpop.f32.mrb[37].mxu0 }
 0x128   :  { %19161 = vst [vmem:[#allocation24_spill] sm:$0xff] %v14378_v51  ;;  %v14383_v53 = vpop.f32.mrb[38].mxu0 }
 0x129   :  { %19162 = vst [vmem:[#allocation25_spill] sm:$0xff] %v14383_v53  ;;  %v14388_v55 = vpop.f32.mrb[39].mxu0 }
 0x12a   :  { %19163 = vst [vmem:[#allocation26_spill] sm:$0xff] %v14388_v55 }
 0x12b   :  { %12064 = vmatmul.mubr.msk.bf16.gmra.mrb[144].mxu0 %vm818_vm2, %v13336_v52 }
 0x12c   :  { %12067 = vmatprep.mubr.msk.bf16.mxu0 %vm818_vm2, %v13337_v54  ;;  %v13345_v54 = vld [vmem:[%s19141_s25 + $0x290] sm:$0xff]  }
 0x12e   :  { %v14392_v56 = vpop.f32.mrb[40].mxu0 }
 0x12f   :  { %19164 = vst [vmem:[#allocation27_spill] sm:$0xff] %v14392_v56  ;;  %v14394_v57 = vpop.f32.mrb[41].mxu0 }
 0x130   :  { %19165 = vst [vmem:[#allocation28_spill] sm:$0xff] %v14394_v57  ;;  %v14399_v59 = vpop.f32.mrb[42].mxu0 }
 0x131   :  { %19166 = vst [vmem:[#allocation29_spill] sm:$0xff] %v14399_v59  ;;  %v14404_v0 = vpop.f32.mrb[43].mxu0 }
 0x132   :  { %19167 = vst [vmem:[#allocation30_spill] sm:$0xff] %v14404_v0 }
 0x133   :  { %12068 = vmatmul.mubr.msk.bf16.gmra.mrb[148].mxu0 %vm818_vm2, %v13338_v58 }
 0x134   :  { %12071 = vmatprep.mubr.msk.bf16.mxu0 %vm818_vm2, %v13339_v60 }
 0x136   :  { %v14408_v2 = vpop.f32.mrb[44].mxu0 }
 0x137   :  { %19168 = vst [vmem:[#allocation31_spill] sm:$0xff] %v14408_v2  ;;  %v14410_v6 = vpop.f32.mrb[45].mxu0 }
 0x138   :  { %19169 = vst [vmem:[#allocation32_spill] sm:$0xff] %v14410_v6  ;;  %v14415_v12 = vpop.f32.mrb[46].mxu0 }
 0x139   :  { %19170 = vst [vmem:[#allocation33_spill] sm:$0xff] %v14415_v12  ;;  %v14420_v18 = vpop.f32.mrb[47].mxu0  ;;  %v13372_v12 = vld [vmem:[%s19003_s3 + $0x48] sm:$0xff]  }
 0x13a   :  { %19171 = vst [vmem:[#allocation34_spill] sm:$0xff] %v14420_v18 }
 0x13b   :  { %12072 = vmatmul.mubr.msk.bf16.gmra.mrb[152].mxu0 %vm818_vm2, %v13340_v8 }
 0x13c   :  { %12075 = vmatprep.mubr.msk.bf16.mxu0 %vm818_vm2, %v13341_v16 }
 0x13e   :  { %v14424_v22 = vpop.f32.mrb[48].mxu0 }
 0x13f   :  { %19172 = vst [vmem:[#allocation35_spill] sm:$0xff] %v14424_v22  ;;  %v14426_v24 = vpop.f32.mrb[49].mxu0 }
 0x140   :  { %19173 = vst [vmem:[#allocation36_spill] sm:$0xff] %v14426_v24  ;;  %v14431_v30 = vpop.f32.mrb[50].mxu0 }
 0x141   :  { %19174 = vst [vmem:[#allocation37_spill] sm:$0xff] %v14431_v30  ;;  %v14436_v36 = vpop.f32.mrb[51].mxu0  ;;  %v13371_v30 = vld [vmem:[%s19003_s3 + $0x40] sm:$0xff]  }
 0x142   :  { %19175 = vst [vmem:[#allocation38_spill] sm:$0xff] %v14436_v36 }
 0x143   :  { %12076 = vmatmul.mubr.msk.bf16.gmra.mrb[156].mxu0 %vm818_vm2, %v13342_v28 }
 0x144   :  { %12079 = vmatprep.mubr.msk.bf16.mxu0 %vm818_vm2, %v13343_v34  ;;  %v13346_v34 = vld [vmem:[%s19141_s25 + $0x298] sm:$0xff]  }
 0x146   :  { %v14440_v40 = vpop.f32.mrb[52].mxu0 }
 0x147   :  { %v14444_v46 = vpop.f32.mrb[53].mxu0 }
 0x148   :  { %19176 = vst [vmem:[#allocation39_spill] sm:$0xff] %v14444_v46  ;;  %v14449_v52 = vpop.f32.mrb[54].mxu0 }
 0x149   :  { %19177 = vst [vmem:[#allocation40_spill] sm:$0xff] %v14449_v52  ;;  %v14456_v60 = vpop.f32.mrb[55].mxu0 }
 0x14a   :  { %19178 = vst [vmem:[#allocation41_spill] sm:$0xff] %v14456_v60  ;;  %v19088_v60 = vmov 0.0  }
 0x14b   :  { %12080 = vmatmul.mubr.msk.bf16.gmra.mrb[160].mxu0 %vm818_vm2, %v13344_v48  ;;  %v13347_v48 = vld [vmem:[%s19141_s25 + $0x2a0] sm:$0xff]   ;;  %12391 = vmatprep.subr.bf16.mxu0 %v19088_v60 }
 0x14c   :  { %12083 = vmatprep.mubr.msk.bf16.mxu0 %vm818_vm2, %v13345_v54  ;;  %v13348_v54 = vld [vmem:[%s19141_s25 + $0x2a8] sm:$0xff]   ;;  %12135 = vmatprep.subr.bf16.mxu1 %v19088_v60 }
 0x14d   :  { %12392 = vmatpush3.bf16.msra.mxu0 %v13371_v30  ;;  %12139 = vmatprep.mubr.msk.bf16.mxu1 %vm13920_vm3, %v19088_v60 }
 0x14e   :  { %v14460_v8 = vpop.f32.mrb[56].mxu0  ;;  %12393 = vmatprep.subr.bf16.mxu0 %v19088_v60  ;;  %12136 = vmatpush3.bf16.msra.mxu1 %v13373_v35 }
 0x14f   :  { %19179 = vst [vmem:[#allocation42_spill] sm:$0xff] %v14460_v8  ;;  %v14464_v28 = vpop.f32.mrb[57].mxu0 }
 0x150   :  { %19180 = vst [vmem:[#allocation43_spill] sm:$0xff] %v14464_v28  ;;  %v14471_v42 = vpop.f32.mrb[58].mxu0 }
 0x151   :  { %19181 = vst [vmem:[#allocation44_spill] sm:$0xff] %v14471_v42  ;;  %v14478_v52 = vpop.f32.mrb[59].mxu0  ;;  %12394 = vmatpush3.bf16.msra.mxu0 %v13372_v12 }
 0x152   :  { %12455 = vmatprep.subr.bf16.mxu0 %v19088_v60 }
 0x153   :  { %12084 = vmatmul.mubr.msk.bf16.gmra.mrb[164].mxu0 %vm818_vm2, %v13346_v34  ;;  %v13349_v34 = vld [vmem:[%s19141_s25 + $0x2b0] sm:$0xff]  }
 0x154   :  { %12087 = vmatprep.mubr.msk.bf16.mxu0 %vm818_vm2, %v13347_v48  ;;  %v13350_v48 = vld [vmem:[%s19141_s25 + $0x2b8] sm:$0xff]  }
 0x156   :  { %v14484_v8 = vpop.f32.mrb[60].mxu0 }
 0x157   :  { %19182 = vst [vmem:[#allocation45_spill] sm:$0xff] %v14484_v8  ;;  %v14488_v28 = vpop.f32.mrb[61].mxu0 }
 0x158   :  { %19183 = vst [vmem:[#allocation46_spill] sm:$0xff] %v14488_v28  ;;  %v14495_v7 = vpop.f32.mrb[62].mxu0 }
 0x159   :  { %19184 = vst [vmem:[#allocation47_spill] sm:$0xff] %v14495_v7  ;;  %v14502_v16 = vpop.f32.mrb[63].mxu0 }
 0x15b   :  { %12088 = vmatmul.mubr.msk.bf16.gmra.mrb[168].mxu0 %vm818_vm2, %v13348_v54  ;;  %v13351_v54 = vld [vmem:[%s19141_s25 + $0x2c0] sm:$0xff]  }
 0x15c   :  { %12091 = vmatprep.mubr.msk.bf16.mxu0 %vm818_vm2, %v13349_v34  ;;  %v13352_v34 = vld [vmem:[%s19141_s25 + $0x2c8] sm:$0xff]  }
 0x15e   :  { %v14508_v8 = vpop.f32.mrb[64].mxu0 }
 0x15f   :  { %19185 = vst [vmem:[#allocation48_spill] sm:$0xff] %v14508_v8  ;;  %v14512_v28 = vpop.f32.mrb[65].mxu0 }
 0x160   :  { %19186 = vst [vmem:[#allocation49_spill] sm:$0xff] %v14512_v28  ;;  %v14519_v13 = vpop.f32.mrb[66].mxu0 }
 0x161   :  { %19187 = vst [vmem:[#allocation50_spill] sm:$0xff] %v14519_v13  ;;  %v14526_v58 = vpop.f32.mrb[67].mxu0 }
 0x163   :  { %12092 = vmatmul.mubr.msk.bf16.gmra.mrb[172].mxu0 %vm818_vm2, %v13350_v48  ;;  %v13353_v48 = vld [vmem:[%s19141_s25 + $0x2d0] sm:$0xff]  }
 0x164   :  { %12095 = vmatprep.mubr.msk.bf16.mxu0 %vm818_vm2, %v13351_v54  ;;  %v13354_v54 = vld [vmem:[%s19141_s25 + $0x2d8] sm:$0xff]  }
 0x166   :  { %v14532_v8 = vpop.f32.mrb[68].mxu0 }
 0x167   :  { %19188 = vst [vmem:[#allocation51_spill] sm:$0xff] %v14532_v8  ;;  %v14536_v28 = vpop.f32.mrb[69].mxu0 }
 0x168   :  { %19189 = vst [vmem:[#allocation52_spill] sm:$0xff] %v14536_v28  ;;  %v14543_v19 = vpop.f32.mrb[70].mxu0 }
 0x169   :  { %19190 = vst [vmem:[#allocation53_spill] sm:$0xff] %v14543_v19  ;;  %v14550_v42 = vpop.f32.mrb[71].mxu0 }
 0x16b   :  { %12096 = vmatmul.mubr.msk.bf16.gmra.mrb[176].mxu0 %vm818_vm2, %v13352_v34  ;;  %v13355_v34 = vld [vmem:[%s19141_s25 + $0x2e0] sm:$0xff]  }
 0x16c   :  { %12099 = vmatprep.mubr.msk.bf16.mxu0 %vm818_vm2, %v13353_v48  ;;  %v13356_v48 = vld [vmem:[%s19141_s25 + $0x2e8] sm:$0xff]  }
 0x16e   :  { %v14556_v8 = vpop.f32.mrb[72].mxu0 }
 0x16f   :  { %19191 = vst [vmem:[#allocation54_spill] sm:$0xff] %v14556_v8  ;;  %v14560_v28 = vpop.f32.mrb[73].mxu0 }
 0x170   :  { %19192 = vst [vmem:[#allocation55_spill] sm:$0xff] %v14560_v28  ;;  %v14567_v25 = vpop.f32.mrb[74].mxu0 }
 0x171   :  { %19193 = vst [vmem:[#allocation56_spill] sm:$0xff] %v14567_v25  ;;  %v14574_v7 = vpop.f32.mrb[75].mxu0 }
 0x173   :  { %12100 = vmatmul.mubr.msk.bf16.gmra.mrb[180].mxu0 %vm818_vm2, %v13354_v54  ;;  %v13357_v54 = vld [vmem:[%s19141_s25 + $0x2f0] sm:$0xff]  }
 0x174   :  { %12103 = vmatprep.mubr.msk.bf16.mxu0 %vm818_vm2, %v13355_v34  ;;  %v13358_v34 = vld [vmem:[%s19141_s25 + $0x2f8] sm:$0xff]  }
 0x176   :  { %v14580_v8 = vpop.f32.mrb[76].mxu0 }
 0x177   :  { %19194 = vst [vmem:[#allocation57_spill] sm:$0xff] %v14580_v8  ;;  %v14584_v28 = vpop.f32.mrb[77].mxu0 }
 0x178   :  { %19195 = vst [vmem:[#allocation58_spill] sm:$0xff] %v14584_v28  ;;  %v14591_v31 = vpop.f32.mrb[78].mxu0 }
 0x179   :  { %19196 = vst [vmem:[#allocation59_spill] sm:$0xff] %v14591_v31  ;;  %v14598_v13 = vpop.f32.mrb[79].mxu0 }
 0x17a   :  { %19197 = vst [vmem:[#allocation60_spill] sm:$0xff] %v14598_v13 }
 0x17b   :  { %12104 = vmatmul.mubr.msk.bf16.gmra.mrb[184].mxu0 %vm818_vm2, %v13356_v48  ;;  %v13359_v48 = vld [vmem:[%s19141_s25 + $0x300] sm:$0xff]  }
 0x17c   :  { %12107 = vmatprep.mubr.msk.bf16.mxu0 %vm818_vm2, %v13357_v54  ;;  %v13360_v54 = vld [vmem:[%s19141_s25 + $0x308] sm:$0xff]  }
 0x17e   :  { %v14604_v8 = vpop.f32.mrb[80].mxu0 }
 0x17f   :  { %19198 = vst [vmem:[#allocation61_spill] sm:$0xff] %v14604_v8  ;;  %v14608_v28 = vpop.f32.mrb[81].mxu0 }
 0x180   :  { %19199 = vst [vmem:[#allocation62_spill] sm:$0xff] %v14608_v28  ;;  %v14615_v37 = vpop.f32.mrb[82].mxu0 }
 0x181   :  { %19200 = vst [vmem:[#allocation63_spill] sm:$0xff] %v14615_v37  ;;  %v14622_v19 = vpop.f32.mrb[83].mxu0 }
 0x182   :  { %19201 = vst [vmem:[#allocation64_spill] sm:$0xff] %v14622_v19 }
 0x183   :  { %12108 = vmatmul.mubr.msk.bf16.gmra.mrb[188].mxu0 %vm818_vm2, %v13358_v34  ;;  %v13361_v34 = vld [vmem:[%s19141_s25 + $0x310] sm:$0xff]  }
 0x184   :  { %12111 = vmatprep.mubr.msk.bf16.mxu0 %vm818_vm2, %v13359_v48  ;;  %v13362_v48 = vld [vmem:[%s19141_s25 + $0x318] sm:$0xff]  }
 0x186   :  { %v14628_v8 = vpop.f32.mrb[84].mxu0 }
 0x187   :  { %19202 = vst [vmem:[#allocation65_spill] sm:$0xff] %v14628_v8  ;;  %v14632_v28 = vpop.f32.mrb[85].mxu0 }
 0x188   :  { %19203 = vst [vmem:[#allocation66_spill] sm:$0xff] %v14632_v28  ;;  %v14639_v43 = vpop.f32.mrb[86].mxu0 }
 0x189   :  { %19204 = vst [vmem:[#allocation67_spill] sm:$0xff] %v14639_v43  ;;  %v14646_v25 = vpop.f32.mrb[87].mxu0 }
 0x18a   :  { %19205 = vst [vmem:[#allocation68_spill] sm:$0xff] %v14646_v25 }
 0x18b   :  { %12112 = vmatmul.mubr.msk.bf16.gmra.mrb[192].mxu0 %vm818_vm2, %v13360_v54  ;;  %v13363_v54 = vld [vmem:[%s19141_s25 + $0x320] sm:$0xff]  }
 0x18c   :  { %12115 = vmatprep.mubr.msk.bf16.mxu0 %vm818_vm2, %v13361_v34  ;;  %v13364_v34 = vld [vmem:[%s19141_s25 + $0x328] sm:$0xff]  }
 0x18e   :  { %v14652_v8 = vpop.f32.mrb[88].mxu0 }
 0x18f   :  { %19206 = vst [vmem:[#allocation69_spill] sm:$0xff] %v14652_v8  ;;  %v14656_v28 = vpop.f32.mrb[89].mxu0 }
 0x190   :  { %19207 = vst [vmem:[#allocation70_spill] sm:$0xff] %v14656_v28  ;;  %v14663_v49 = vpop.f32.mrb[90].mxu0 }
 0x191   :  { %19208 = vst [vmem:[#allocation71_spill] sm:$0xff] %v14663_v49  ;;  %v14670_v31 = vpop.f32.mrb[91].mxu0 }
 0x192   :  { %19209 = vst [vmem:[#allocation72_spill] sm:$0xff] %v14670_v31 }
 0x193   :  { %12116 = vmatmul.mubr.msk.bf16.gmra.mrb[196].mxu0 %vm818_vm2, %v13362_v48  ;;  %v13365_v48 = vld [vmem:[%s19141_s25 + $0x330] sm:$0xff]  }
 0x194   :  { %12119 = vmatprep.mubr.msk.bf16.mxu0 %vm818_vm2, %v13363_v54  ;;  %v13366_v54 = vld [vmem:[%s19141_s25 + $0x338] sm:$0xff]  }
 0x196   :  { %v14676_v8 = vpop.f32.mrb[92].mxu0 }
 0x197   :  { %19210 = vst [vmem:[#allocation73_spill] sm:$0xff] %v14676_v8  ;;  %v14680_v28 = vpop.f32.mrb[93].mxu0 }
 0x198   :  { %19211 = vst [vmem:[#allocation74_spill] sm:$0xff] %v14680_v28  ;;  %v14687_v55 = vpop.f32.mrb[94].mxu0 }
 0x199   :  { %19212 = vst [vmem:[#allocation75_spill] sm:$0xff] %v14687_v55  ;;  %v14694_v37 = vpop.f32.mrb[95].mxu0 }
 0x19a   :  { %19213 = vst [vmem:[#allocation76_spill] sm:$0xff] %v14694_v37 }
 0x19b   :  { %12120 = vmatmul.mubr.msk.bf16.gmra.mrb[200].mxu0 %vm818_vm2, %v13364_v34  ;;  %v13367_v34 = vld [vmem:[%s19141_s25 + $0x340] sm:$0xff]  }
 0x19c   :  { %12123 = vmatprep.mubr.msk.bf16.mxu0 %vm818_vm2, %v13365_v48  ;;  %v13368_v48 = vld [vmem:[%s19141_s25 + $0x348] sm:$0xff]  }
 0x19e   :  { %v14700_v8 = vpop.f32.mrb[96].mxu0 }
 0x19f   :  { %19214 = vst [vmem:[#allocation77_spill] sm:$0xff] %v14700_v8  ;;  %v14704_v28 = vpop.f32.mrb[97].mxu0 }
 0x1a0   :  { %19215 = vst [vmem:[#allocation78_spill] sm:$0xff] %v14704_v28  ;;  %v14711_v0 = vpop.f32.mrb[98].mxu0 }
 0x1a1   :  { %19216 = vst [vmem:[#allocation79_spill] sm:$0xff] %v14711_v0  ;;  %v14718_v43 = vpop.f32.mrb[99].mxu0 }
 0x1a2   :  { %19217 = vst [vmem:[#allocation80_spill] sm:$0xff] %v14718_v43 }
 0x1a3   :  { %12124 = vmatmul.mubr.msk.bf16.gmra.mrb[204].mxu0 %vm818_vm2, %v13366_v54  ;;  %v13369_v54 = vld [vmem:[%s19141_s25 + $0x350] sm:$0xff]  }
 0x1a4   :  { %12127 = vmatprep.mubr.msk.bf16.mxu0 %vm818_vm2, %v13367_v34  ;;  %v13370_v34 = vld [vmem:[%s19141_s25 + $0x358] sm:$0xff]  }
 0x1a6   :  { %v14724_v8 = vpop.f32.mrb[100].mxu0 }
 0x1a7   :  { %19218 = vst [vmem:[#allocation81_spill] sm:$0xff] %v14724_v8  ;;  %v14728_v28 = vpop.f32.mrb[101].mxu0 }
 0x1a8   :  { %19219 = vst [vmem:[#allocation82_spill] sm:$0xff] %v14728_v28  ;;  %v14735_v18 = vpop.f32.mrb[102].mxu0 }
 0x1a9   :  { %19220 = vst [vmem:[#allocation83_spill] sm:$0xff] %v14735_v18  ;;  %v14742_v49 = vpop.f32.mrb[103].mxu0 }
 0x1aa   :  { %19221 = vst [vmem:[#allocation84_spill] sm:$0xff] %v14742_v49 }
 0x1ab   :  { %12128 = vmatmul.mubr.msk.bf16.gmra.mrb[208].mxu0 %vm818_vm2, %v13368_v48 }
 0x1ac   :  { %12131 = vmatprep.mubr.msk.bf16.mxu0 %vm818_vm2, %v13369_v54 }
 0x1ae   :  { %v14748_v8 = vpop.f32.mrb[104].mxu0 }
 0x1af   :  { %19222 = vst [vmem:[#allocation85_spill] sm:$0xff] %v14748_v8  ;;  %v14752_v28 = vpop.f32.mrb[105].mxu0 }
 0x1b0   :  { %19223 = vst [vmem:[#allocation86_spill] sm:$0xff] %v14752_v28  ;;  %v14759_v36 = vpop.f32.mrb[106].mxu0 }
 0x1b1   :  { %19224 = vst [vmem:[#allocation87_spill] sm:$0xff] %v14759_v36  ;;  %v14763_v54 = vpop.f32.mrb[107].mxu0 }
 0x1b2   :  { %19225 = vst [vmem:[#allocation88_spill] sm:$0xff] %v14763_v54 }
 0x1b3   :  { %12132 = vmatmul.mubr.msk.bf16.gmra.mrb[212].mxu0 %vm818_vm2, %v13370_v34 }
 0x1b4   :  { %12395 = vmatprep.mubr.msk.bf16.mxu0 %vm13920_vm3, %v19088_v60 }
 0x1b6   :  { %v14768_v0 = vpop.f32.mrb[108].mxu0 }
 0x1b7   :  { %v14770_v8 = vpop.f32.mrb[109].mxu0 }
 0x1b8   :  { %v14772_v46 = vpop.f32.mrb[110].mxu0 }
 0x1b9   :  { %v14774_v49 = vpop.f32.mrb[111].mxu0 }
 0x1be   :  { %v14776_v18 = vpop.f32.mrb[112].mxu0 }
 0x1bf   :  { %v14778_v28 = vpop.f32.mrb[113].mxu0 }
 0x1c0   :  { %v14780_v48 = vpop.f32.mrb[114].mxu0 }
 0x1c1   :  { %v14782_v36 = vpop.f32.mrb[115].mxu0 }
 0x1c6   :  { %v14786_v34 = vpop.f32.mrb[116].mxu0 }
 0x1c7   :  { %v14788_v55 = vpop.f32.mrb[117].mxu0 }
 0x1c8   :  { %v14790_v54 = vpop.f32.mrb[118].mxu0 }
 0x1c9   :  { %v14795_v22 = vpop.f32.mrb[119].mxu0 }
 0x1ce   :  { %v14801_v2 = vpop.f32.mrb[120].mxu0 }
 0x1cf   :  { %v14803_v24 = vpop.f32.mrb[121].mxu0 }
 0x1d0   :  { %v14806_v43 = vpop.f32.mrb[122].mxu0 }
 0x1d1   :  { %v14812_v30 = vpop.f32.mrb[123].mxu0 }
 0x1d6   :  { %v14814_v59 = vpop.f32.mrb[124].mxu0 }
 0x1d7   :  { %v14816_v56 = vpop.f32.mrb[125].mxu0 }
 0x1d8   :  { %v14818_v12 = vpop.f32.mrb[126].mxu0 }
 0x1d9   :  { %v14820_v6 = vpop.f32.mrb[127].mxu0 }
 0x1de   :  { %v14822_v37 = vpop.f32.mrb[128].mxu0 }
 0x1df   :  { %v14824_v53 = vpop.f32.mrb[129].mxu0 }
 0x1e0   :  { %v14826_v50 = vpop.f32.mrb[130].mxu0 }
 0x1e1   :  { %19226 = vst [vmem:[#allocation89_spill] sm:$0xff] %v14826_v50  ;;  %v14828_v57 = vpop.f32.mrb[131].mxu0 }
 0x1e6   :  { %v14830_v31 = vpop.f32.mrb[132].mxu0 }
 0x1e7   :  { %19227 = vst [vmem:[#allocation90_spill] sm:$0xff] %v14830_v31  ;;  %v14832_v60 = vpop.f32.mrb[133].mxu0 }
 0x1e8   :  { %v14834_v47 = vpop.f32.mrb[134].mxu0 }
 0x1e9   :  { %19228 = vst [vmem:[#allocation91_spill] sm:$0xff] %v14834_v47  ;;  %v14836_v44 = vpop.f32.mrb[135].mxu0 }
 0x1ea   :  { %19229 = vst [vmem:[#allocation92_spill] sm:$0xff] %v14836_v44 }
 0x1ee   :  { %v14838_v51 = vpop.f32.mrb[136].mxu0 }
 0x1ef   :  { %19230 = vst [vmem:[#allocation93_spill] sm:$0xff] %v14838_v51  ;;  %v14840_v25 = vpop.f32.mrb[137].mxu0  ;;  %v19238_v51 = vmov 0.0  }
 0x1f0   :  { %19231 = vst [vmem:[#allocation94_spill] sm:$0xff] %v14840_v25  ;;  %v14842_v41 = vpop.f32.mrb[138].mxu0  ;;  %12137 = vmatprep.subr.bf16.mxu1 %v19238_v51 }
 0x1f1   :  { %19232 = vst [vmem:[#allocation95_spill] sm:$0xff] %v14842_v41  ;;  %v14844_v38 = vpop.f32.mrb[139].mxu0  ;;  %v13374_v41 = vld [vmem:[%s19003_s3 + $0x28] sm:$0xff]  }
 0x1f2   :  { %19233 = vst [vmem:[#allocation96_spill] sm:$0xff] %v14844_v38  ;;  %12138 = vmatpush3.bf16.msra.mxu1 %v13374_v41 }
 0x1f3   :  { %12167 = vmatprep.subr.bf16.mxu1 %v19238_v51 }
 0x1f6   :  { %v14846_v45 = vpop.f32.mrb[140].mxu0 }
 0x1f7   :  { %19234 = vst [vmem:[#allocation97_spill] sm:$0xff] %v14846_v45  ;;  %v14848_v19 = vpop.f32.mrb[141].mxu0 }
 0x1f8   :  { %19235 = vst [vmem:[#allocation98_spill] sm:$0xff] %v14848_v19  ;;  %v14853_v32 = vpop.f32.mrb[142].mxu0 }
 0x1f9   :  { %19236 = vst [vmem:[#allocation99_spill] sm:$0xff] %v14853_v32  ;;  %v14855_v47 = vpop.f32.mrb[143].mxu0 }
 0x1fa   :  { %19237 = vst [vmem:[#allocation100_spill] sm:$0xff] %v14855_v47 }
 0x1fe   :  { %v14861_v38 = vpop.f32.mrb[144].mxu0 }
 0x1ff   :  { %19239 = vst [vmem:[#allocation101_spill] sm:$0xff] %v14861_v38  ;;  %v14864_v45 = vpop.f32.mrb[145].mxu0 }
 0x200   :  { %19240 = vst [vmem:[#allocation102_spill] sm:$0xff] %v14864_v45  ;;  %v14866_v19 = vpop.f32.mrb[146].mxu0 }
 0x201   :  { %19241 = vst [vmem:[#allocation103_spill] sm:$0xff] %v14866_v19  ;;  %v14868_v39 = vpop.f32.mrb[147].mxu0 }
 0x202   :  { %19242 = vst [vmem:[#allocation104_spill] sm:$0xff] %v14868_v39 }
 0x206   :  { %v14870_v32 = vpop.f32.mrb[148].mxu0 }
 0x207   :  { %19243 = vst [vmem:[#allocation105_spill] sm:$0xff] %v14870_v32  ;;  %v14872_v35 = vpop.f32.mrb[149].mxu0 }
 0x208   :  { %19244 = vst [vmem:[#allocation106_spill] sm:$0xff] %v14872_v35  ;;  %v14874_v47 = vpop.f32.mrb[150].mxu0 }
 0x209   :  { %19245 = vst [vmem:[#allocation107_spill] sm:$0xff] %v14874_v47  ;;  %v14876_v31 = vpop.f32.mrb[151].mxu0 }
 0x20a   :  { %19246 = vst [vmem:[#allocation108_spill] sm:$0xff] %v14876_v31 }
 0x20e   :  { %v14878_v25 = vpop.f32.mrb[152].mxu0 }
 0x20f   :  { %19247 = vst [vmem:[#allocation109_spill] sm:$0xff] %v14878_v25  ;;  %v14880_v41 = vpop.f32.mrb[153].mxu0  ;;  %v14900_v25 = vld [vmem:[%s19002_s2] ss:$0 sm:$0xff] }
 0x210   :  { %19248 = vst [vmem:[#allocation110_spill] sm:$0xff] %v14880_v41  ;;  %v14882_v38 = vpop.f32.mrb[154].mxu0 }
 0x211   :  { %19249 = vst [vmem:[#allocation111_spill] sm:$0xff] %v14882_v38  ;;  %v14884_v13 = vpop.f32.mrb[155].mxu0 }
 0x212   :  { %19250 = vst [vmem:[#allocation112_spill] sm:$0xff] %v14884_v13 }
 0x216   :  { %v14886_v45 = vpop.f32.mrb[156].mxu0 }
 0x217   :  { %19251 = vst [vmem:[#allocation113_spill] sm:$0xff] %v14886_v45  ;;  %v14888_v19 = vpop.f32.mrb[157].mxu0  ;;  %v19256_v45 = vmax.f32 %v14237_v62, %v14440_v40 }
 0x218   :  { %19252 = vst [vmem:[#allocation114_spill] sm:$0xff] %v14888_v19  ;;  %v14890_v39 = vpop.f32.mrb[158].mxu0 }
 0x219   :  { %19253 = vst [vmem:[#allocation115_spill] sm:$0xff] %v14890_v39  ;;  %v14892_v32 = vpop.f32.mrb[159].mxu0 }
 0x21a   :  { %19254 = vst [vmem:[#allocation116_spill] sm:$0xff] %v14892_v32 }
 0x21e   :  { %v12081_v35 = vpop.f32.mrb[160].mxu0 }
 0x21f   :  { %v2101_v47 = vmax.f32 %v14770_v8, %v12081_v35  ;;  %v14895_v31 = vpop.f32.mrb[161].mxu0  ;;  %v19257_v8 = vld [vmem:[#allocation40_spill] sm:$0xff] }
 0x220   :  { %19255 = vst [vmem:[#allocation117_spill] sm:$0xff] %v14895_v31  ;;  %v12082_v38 = vpop.f32.mrb[162].mxu0  ;;  %v19258_v35 = vmax.f32 %v14244_v1, %v19257_v8 }
 0x221   :  { %v2155_v13 = vmax.f32 %v19256_v45, %v2101_v47  ;;  %v2102_v19 = vmax.f32 %v14774_v49, %v12082_v38  ;;  %v14906_v39 = vpop.f32.mrb[163].mxu0  ;;  %v19259_v49 = vld [vmem:[#allocation42_spill] sm:$0xff] }
 0x222   :  { %v19260_v1 = vmax.f32 %v14253_v4, %v19259_v49 }
 0x223   :  { %v2216_v32 = vadd.f32 %v14900_v25, %v2155_v13  ;;  %v2156_v31 = vmax.f32 %v19258_v35, %v2102_v19 }
 0x225   :  { %v2270_v41 = vmax.f32 %v2216_v32, 0.0  ;;  %v2217_v29 = vadd.f32 %v14900_v25, %v2156_v31 }
 0x226   :  { %v12085_v51 = vpop.f32.mrb[164].mxu0 }
 0x227   :  { %v2271_v50 = vmax.f32 %v2217_v29, 0.0  ;;  %v2105_v26 = vmax.f32 %v14778_v28, %v12085_v51  ;;  %v1840_v44 = vpop.f32.mrb[165].mxu0  ;;  %v3772_v62 = vrot.slane %v2270_v41, 6  ;;  %v19261_v29 = vld [vmem:[#allocation43_spill] sm:$0xff] }
 0x228   :  { %v2103_v38 = vmax.f32 %v14768_v0, %v1840_v44  ;;  %v12086_v45 = vpop.f32.mrb[166].mxu0  ;;  %v19262_v40 = vmax.f32 %v14235_v61, %v19261_v29  ;;  %v19263_v0 = vld [vmem:[#allocation5_spill] sm:$0xff] }
 0x229   :  { %v14915_v47 = vpack.c.bf16 %v2271_v50, %v2270_v41  ;;  %v3773_v13 = vrot.slane %v2271_v50, 6  ;;  %v2159_v19 = vmax.f32 %v19260_v1, %v2105_v26  ;;  %v2106_v32 = vmax.f32 %v14782_v36, %v12086_v45  ;;  %v1843_v31 = vpop.f32.mrb[167].mxu0  ;;  %v19264_v41 = vld [vmem:[#allocation44_spill] sm:$0xff] }
 0x22a   :  { %v2157_v51 = vmax.f32 %v19262_v40, %v2103_v38  ;;  %v2104_v28 = vmax.f32 %v14772_v46, %v1843_v31  ;;  %v19265_v50 = vmax.f32 %v19263_v0, %v19264_v41  ;;  %v19266_v26 = vmax.f32 %v14239_v63, %v14478_v52  ;;  %v19267_v63 = vld [vmem:[#allocation45_spill] sm:$0xff] }
 0x22b   :  { %v3774_v8 = vsel %vm2338_vm4, %v3772_v62, %v3773_v13  ;;  %v2220_v44 = vadd.f32 %v14900_v25, %v2159_v19  ;;  %v19268_v52 = vmax.f32 %v14269_v10, %v19267_v63  ;;  %v19272_v10 = vld [vmem:[#allocation6_spill] sm:$0xff] }
 0x22c   :  { %v2160_v35 = vmax.f32 %v19265_v50, %v2106_v32  ;;  %v2218_v4 = vadd.f32 %v14900_v25, %v2157_v51  ;;  %v2158_v36 = vmax.f32 %v19266_v26, %v2104_v28 }
 0x22d   :  { %v2274_v45 = vmax.f32 %v2220_v44, 0.0 }
 0x22e   :  { %v2221_v61 = vadd.f32 %v14900_v25, %v2160_v35  ;;  %v2272_v38 = vmax.f32 %v2218_v4, 0.0  ;;  %v2219_v46 = vadd.f32 %v14900_v25, %v2158_v36  ;;  %v12089_v49 = vpop.f32.mrb[168].mxu0  ;;  %v19269_v4 = vld [vmem:[#allocation46_spill] sm:$0xff] }
 0x22f   :  { %v2109_v1 = vmax.f32 %v14788_v55, %v12089_v49  ;;  %v1856_v19 = vpop.f32.mrb[169].mxu0  ;;  %v3779_v31 = vrot.slane %v2274_v45, 6  ;;  %v19270_v26 = vmax.f32 %v14251_v3, %v19269_v4  ;;  %v19273_v49 = vld [vmem:[#allocation47_spill] sm:$0xff] }
 0x230   :  { %v2275_v62 = vmax.f32 %v2221_v61, 0.0  ;;  %v3775_v29 = vrot.slane %v2272_v38, 6  ;;  %v2273_v32 = vmax.f32 %v2219_v46, 0.0  ;;  %v2107_v40 = vmax.f32 %v14776_v18, %v1856_v19  ;;  %v12090_v51 = vpop.f32.mrb[170].mxu0 }
 0x231   :  { %v2163_v28 = vmax.f32 %v19268_v52, %v2109_v1  ;;  %v2110_v44 = vmax.f32 %v14795_v22, %v12090_v51  ;;  %v1859_v41 = vpop.f32.mrb[171].mxu0  ;;  %v19274_v1 = vmax.f32 %v19272_v10, %v19273_v49 }
 0x232   :  { %v3781_v0 = vrot.slane %v2275_v62, 6  ;;  %v14942_v50 = vpack.c.bf16 %v2275_v62, %v2274_v45  ;;  %v3776_v35 = vsel %vm2338_vm4, %v3773_v13, %v3775_v29  ;;  %v3777_v55 = vrot.slane %v2273_v32, 6 }
 0x233   :  { %v2161_v36 = vmax.f32 %v19270_v26, %v2107_v40  ;;  %v2108_v18 = vmax.f32 %v14780_v48, %v1859_v41  ;;  %v14949_v61 = vpack.c.bf16 %v3776_v35, %v3774_v8  ;;  %v2224_v46 = vadd.f32 %v14900_v25, %v2163_v28 }
 0x234   :  { %v2164_v22 = vmax.f32 %v19274_v1, %v2110_v44  ;;  %v3782_v45 = vsel %vm2338_vm4, %v3779_v31, %v3781_v0  ;;  %v19275_v13 = vmax.f32 %v14255_v5, %v14502_v16  ;;  %v3778_v3 = vsel %vm2338_vm4, %v3775_v29, %v3777_v55 }
 0x235   :  { %19271 = vst [vmem:[#allocation40_spill] sm:$0xff] %v14949_v61  ;;  %v2222_v62 = vadd.f32 %v14900_v25, %v2161_v36  ;;  %v3780_v48 = vsel %vm2338_vm4, %v3777_v55, %v3779_v31  ;;  %v2278_v8 = vmax.f32 %v2224_v46, 0.0  ;;  %v14965_v63 = vpack.c.bf16 %v2273_v32, %v2272_v38  ;;  %v19276_v36 = vld [vmem:[#allocation48_spill] sm:$0xff] }
 0x236   :  { %v2162_v19 = vmax.f32 %v19275_v13, %v2108_v18  ;;  %v2225_v40 = vadd.f32 %v14900_v25, %v2164_v22  ;;  %v14963_v51 = vpack.c.bf16 %v3780_v48, %v3778_v3  ;;  %v12093_v44 = vpop.f32.mrb[172].mxu0  ;;  %v19277_v18 = vmax.f32 %v14282_v15, %v19276_v36  ;;  %v19281_v15 = vld [vmem:[#allocation7_spill] sm:$0xff]  ;;  %v19282_v3 = vld [vmem:[#allocation50_spill] sm:$0xff] }
 0x237   :  { %v2276_v52 = vmax.f32 %v2222_v62, 0.0  ;;  %v2113_v35 = vmax.f32 %v14803_v24, %v12093_v44  ;;  %v1872_v5 = vpop.f32.mrb[173].mxu0  ;;  %v3787_v16 = vrot.slane %v2278_v8, 6  ;;  %v19279_v24 = vld [vmem:[#allocation49_spill] sm:$0xff]  ;;  %v19283_v48 = vmax.f32 %v19281_v15, %v19282_v3 }
 0x238   :  { %v2223_v28 = vadd.f32 %v14900_v25, %v2162_v19  ;;  %v2279_v41 = vmax.f32 %v2225_v40, 0.0  ;;  %v2111_v31 = vmax.f32 %v14786_v34, %v1872_v5  ;;  %v12094_v55 = vpop.f32.mrb[174].mxu0  ;;  %v19280_v1 = vmax.f32 %v14267_v9, %v19279_v24 }
 0x239   :  { %v3783_v4 = vrot.slane %v2276_v52, 6  ;;  %v2167_v38 = vmax.f32 %v19277_v18, %v2113_v35  ;;  %v2114_v32 = vmax.f32 %v14812_v30, %v12094_v55  ;;  %v1875_v46 = vpop.f32.mrb[175].mxu0 }
 0x23a   :  { %v2277_v29 = vmax.f32 %v2223_v28, 0.0  ;;  %v3789_v26 = vrot.slane %v2279_v41, 6  ;;  %v14974_v10 = vpack.c.bf16 %v2279_v41, %v2278_v8  ;;  %v2165_v22 = vmax.f32 %v19280_v1, %v2111_v31 }
 0x23b   :  { %v2112_v62 = vmax.f32 %v14790_v54, %v1875_v46  ;;  %v3784_v34 = vsel %vm2338_vm4, %v3781_v0, %v3783_v4  ;;  %v2228_v19 = vadd.f32 %v14900_v25, %v2167_v38  ;;  %v2168_v30 = vmax.f32 %v19283_v48, %v2114_v32 }
 0x23c   :  { %19278 = vst [vmem:[#allocation42_spill] sm:$0xff] %v14974_v10  ;;  %v3785_v49 = vrot.slane %v2277_v29, 6  ;;  %v3790_v13 = vsel %vm2338_vm4, %v3787_v16, %v3789_v26  ;;  %v14986_v40 = vpack.c.bf16 %v3784_v34, %v3782_v45  ;;  %v2226_v9 = vadd.f32 %v14900_v25, %v2165_v22  ;;  %v19288_v34 = vld [vmem:[#allocation52_spill] sm:$0xff] }
 0x23d   :  { %v19284_v54 = vmax.f32 %v14271_v11, %v14526_v58  ;;  %v2282_v41 = vmax.f32 %v2228_v19, 0.0  ;;  %v2229_v35 = vadd.f32 %v14900_v25, %v2168_v30  ;;  %v14997_v5 = vpack.c.bf16 %v2277_v29, %v2276_v52 }
 0x23e   :  { %v3786_v8 = vsel %vm2338_vm4, %v3783_v4, %v3785_v49  ;;  %v3788_v28 = vsel %vm2338_vm4, %v3785_v49, %v3787_v16  ;;  %v2280_v31 = vmax.f32 %v2226_v9, 0.0  ;;  %v12097_v55 = vpop.f32.mrb[176].mxu0  ;;  %v19285_v49 = vld [vmem:[#allocation51_spill] sm:$0xff]  ;;  %v19289_v19 = vmax.f32 %v14280_v14, %v19288_v34  ;;  %v19290_v14 = vld [vmem:[#allocation8_spill] sm:$0xff] }
 0x23f   :  { %v2166_v0 = vmax.f32 %v19284_v54, %v2112_v62  ;;  %v14994_v44 = vpack.c.bf16 %v3788_v28, %v3786_v8  ;;  %v2283_v4 = vmax.f32 %v2229_v35, 0.0  ;;  %v2117_v16 = vmax.f32 %v14816_v56, %v12097_v55  ;;  %v1888_v36 = vpop.f32.mrb[177].mxu0  ;;  %v19291_v28 = vld [vmem:[#allocation53_spill] sm:$0xff] }
 0x240   :  { %v3795_v18 = vrot.slane %v2282_v41, 6  ;;  %v3791_v38 = vrot.slane %v2280_v31, 6  ;;  %v2115_v11 = vmax.f32 %v14801_v2, %v1888_v36  ;;  %v12098_v58 = vpop.f32.mrb[178].mxu0  ;;  %v19286_v24 = vmax.f32 %v14298_v21, %v19285_v49 }
 0x241   :  { %v2227_v45 = vadd.f32 %v14900_v25, %v2166_v0  ;;  %v2339_v46 = vrot.slane %v2283_v4, 6  ;;  %v2118_v29 = vmax.f32 %v14820_v6, %v12098_v58  ;;  %v1891_v1 = vpop.f32.mrb[179].mxu0  ;;  %v15006_v22 = vpack.c.bf16 %v2283_v4, %v2282_v41 }
 0x242   :  { %v2171_v52 = vmax.f32 %v19286_v24, %v2117_v16  ;;  %v3792_v62 = vsel %vm2338_vm4, %v3789_v26, %v3791_v38  ;;  %v2169_v15 = vmax.f32 %v19289_v19, %v2115_v11  ;;  %v2116_v2 = vmax.f32 %v14806_v43, %v1891_v1 }
 0x243   :  { %v2281_v32 = vmax.f32 %v2227_v45, 0.0  ;;  %19287 = vst [vmem:[#allocation43_spill] sm:$0xff] %v15006_v22  ;;  %v15013_v3 = vpack.c.bf16 %v3792_v62, %v3790_v13  ;;  %v15016_v48 = vsel %vm2338_vm4, %v3795_v18, %v2339_v46  ;;  %v19292_v9 = vmax.f32 %v19290_v14, %v19291_v28 }
 0x244   :  { %v2232_v21 = vadd.f32 %v14900_v25, %v2171_v52  ;;  %v2230_v26 = vadd.f32 %v14900_v25, %v2169_v15  ;;  %v19293_v0 = vmax.f32 %v14287_v17, %v14550_v42  ;;  %v2381_v24 = vsel %vm2380_vm5, 0.0, %v2339_v46  ;;  %v19295_v42 = vld [vmem:[#allocation54_spill] sm:$0xff] }
 0x245   :  { %v3793_v56 = vrot.slane %v2281_v32, 6  ;;  %v2172_v43 = vmax.f32 %v19292_v9, %v2118_v29  ;;  %v15030_v45 = vpack.c.bf16 %v2281_v32, %v2280_v31  ;;  %v19296_v31 = vmax.f32 %v14314_v27, %v19295_v42 }
 0x246   :  { %v2286_v13 = vmax.f32 %v2232_v21, 0.0  ;;  %v2284_v54 = vmax.f32 %v2230_v26, 0.0  ;;  %v2170_v41 = vmax.f32 %v19293_v0, %v2116_v2  ;;  %v12101_v35 = vpop.f32.mrb[180].mxu0  ;;  %v19300_v2 = vld [vmem:[#allocation11_spill] sm:$0xff]  ;;  %v19301_v21 = vld [vmem:[#allocation56_spill] sm:$0xff]  ;;  %v19303_v0 = vmax.f32 %v14303_v23, %v14574_v7 }
 0x247   :  { %v3794_v6 = vsel %vm2338_vm4, %v3791_v38, %v3793_v56  ;;  %v3796_v30 = vsel %vm2338_vm4, %v3793_v56, %v3795_v18  ;;  %19294 = vst [vmem:[#allocation5_spill] sm:$0xff] %v15030_v45  ;;  %v2233_v55 = vadd.f32 %v14900_v25, %v2172_v43  ;;  %v2121_v16 = vmax.f32 %v14824_v53, %v12101_v35  ;;  %v1904_v36 = vpop.f32.mrb[181].mxu0 }
 0x248   :  { %v15022_v8 = vpack.c.bf16 %v3796_v30, %v3794_v6  ;;  %v2340_v18 = vrot.slane %v2284_v54, 6  ;;  %v3008_v38 = vpack.c.bf16 %v2284_v54, %v2283_v4  ;;  %v2231_v11 = vadd.f32 %v14900_v25, %v2170_v41  ;;  %v12102_v49 = vpop.f32.mrb[182].mxu0  ;;  %v19297_v4 = vld [vmem:[#allocation55_spill] sm:$0xff] }
 0x249   :  { %v2119_v58 = vmax.f32 %v14814_v59, %v1904_v36  ;;  %v2287_v17 = vmax.f32 %v2233_v55, 0.0  ;;  %v2175_v32 = vmax.f32 %v19296_v31, %v2121_v16  ;;  %v2122_v52 = vmax.f32 %v14828_v57, %v12102_v49  ;;  %v1907_v29 = vpop.f32.mrb[183].mxu0 }
 0x24a   :  { %v2344_v53 = vrot.slane %v2286_v13, 6  ;;  %v2341_v1 = vsel %vm2338_vm4, %v2339_v46, %v2340_v18  ;;  %v2285_v62 = vmax.f32 %v2231_v11, 0.0  ;;  %v19298_v56 = vmax.f32 %v14296_v20, %v19297_v4 }
 0x24b   :  { %v15045_v59 = vpack.c.bf16 %v2341_v1, %v2381_v24  ;;  %v2346_v19 = vrot.slane %v2287_v17, 6  ;;  %v2236_v15 = vadd.f32 %v14900_v25, %v2175_v32  ;;  %v19302_v27 = vmax.f32 %v19300_v2, %v19301_v21  ;;  %v19307_v1 = vld [vmem:[#allocation9_spill] sm:$0xff]  ;;  %v19313_v21 = vld [vmem:[#allocation14_spill] sm:$0xff] }
 0x24c   :  { %v2173_v34 = vmax.f32 %v19298_v56, %v2119_v58  ;;  %v2342_v30 = vrot.slane %v2285_v62, 6  ;;  %v3009_v57 = vpack.c.bf16 %v2286_v13, %v2285_v62  ;;  %v2120_v46 = vmax.f32 %v14818_v12, %v1907_v29  ;;  %v15063_v13 = vld [vmem:[%s19003_s3 + $0x70] sm:$0xff]   ;;  %v19310_v56 = vld [vmem:[#allocation89_spill] sm:$0xff] }
 0x24d   :  { %19299 = vst [vmem:[#allocation44_spill] sm:$0xff] %v15045_v59  ;;  %v2176_v6 = vmax.f32 %v19302_v27, %v2122_v52  ;;  %v3023_v14 = vrot.slane %v3008_v38, 2  ;;  %v2290_v28 = vmax.f32 %v2236_v15, 0.0  ;;  %v2347_v9 = vsel %vm2338_vm4, %v2344_v53, %v2346_v19  ;;  %v19314_v27 = vld [vmem:[#allocation59_spill] sm:$0xff] }
 0x24e   :  { %v2234_v26 = vadd.f32 %v14900_v25, %v2173_v34  ;;  %v3024_v43 = vrot.slane %v3009_v57, 2  ;;  %v2174_v41 = vmax.f32 %v19303_v0, %v2120_v46  ;;  %v12105_v35 = vpop.f32.mrb[184].mxu0  ;;  %v2343_v12 = vsel %vm2338_vm4, %v2340_v18, %v2342_v30  ;;  %v19304_v18 = vld [vmem:[#allocation57_spill] sm:$0xff] }
 0x24f   :  { %v15054_v20 = vadd.f32 %v14900_v25, %v2176_v6  ;;  %v15066_v55 = vrot.slane %v2290_v28, 6  ;;  %v2125_v16 = vmax.f32 %v14832_v60, %v12105_v35  ;;  %v1920_v36 = vpop.f32.mrb[185].mxu0  ;;  %v2345_v38 = vsel %vm2338_vm4, %v2342_v30, %v2344_v53  ;;  %v19306_v60 = vld [vmem:[#allocation92_spill] sm:$0xff] }
 0x250   :  { %v2288_v54 = vmax.f32 %v2234_v26, 0.0  ;;  %v2235_v58 = vadd.f32 %v14900_v25, %v2174_v41  ;;  %v2123_v7 = vmax.f32 %v14822_v37, %v1920_v36  ;;  %v15073_v23 = vsel %vm2380_vm5, %v3023_v14, %v3024_v43  ;;  %v12106_v49 = vpop.f32.mrb[186].mxu0  ;;  %v19308_v37 = vld [vmem:[#allocation58_spill] sm:$0xff] }
 0x251   :  { %v2291_v24 = vmax.f32 %v15054_v20, 0.0  ;;  %v19305_v42 = vmax.f32 %v14330_v33, %v19304_v18  ;;  %12396 = vmatmul.mubr.msk.bf16.vlgmr.msra.gmra.mrb[216].mxu0 %vm2474_vm6, %v15073_v23  ;;  %v2126_v32 = vmax.f32 %v19306_v60, %v12106_v49  ;;  %v1923_v52 = vpop.f32.mrb[187].mxu0  ;;  %v19309_v62 = vmax.f32 %v19307_v1, %v19308_v37  ;;  %v15092_v33 = vld [vmem:[%s19003_s3 + $0x78] sm:$0xff]   ;;  %v19316_v20 = vld [vmem:[#allocation10_spill] sm:$0xff] }
 0x252   :  { %v2348_v11 = vrot.slane %v2288_v54, 6  ;;  %v3010_v29 = vpack.c.bf16 %v2288_v54, %v2287_v17  ;;  %v2289_v53 = vmax.f32 %v2235_v58, 0.0  ;;  %v2124_v34 = vmax.f32 %v19310_v56, %v1923_v52  ;;  %12456 = vmatpush3.bf16.msra.mxu0 %v15063_v13  ;;  %v19317_v54 = vld [vmem:[#allocation60_spill] sm:$0xff] }
 0x253   :  { %v2179_v31 = vmax.f32 %v19305_v42, %v2125_v16  ;;  %v2177_v4 = vmax.f32 %v19309_v62, %v2123_v7  ;;  %v19311_v15 = vmov 0.0   ;;  %v15094_v2 = vpack.c.bf16 %v2345_v38, %v2343_v12  ;;  %v19322_v62 = vld [vmem:[#allocation16_spill] sm:$0xff] }
 0x254   :  { %12399 = vmatprep.mubr.msk.bf16.mxu0 %vm13920_vm3, %v19311_v15  ;;  %v19315_v6 = vmax.f32 %v19313_v21, %v19314_v27  ;;  %v3026_v57 = vrot.slane %v3010_v29, 2  ;;  %12457 = vmatprep.subr.bf16.mxu0 %v19311_v15  ;;  %v2349_v26 = vsel %vm2338_vm4, %v2346_v19, %v2348_v11  ;;  %v2350_v46 = vrot.slane %v2289_v53, 6  ;;  %v19321_v29 = vld [vmem:[#allocation90_spill] sm:$0xff] }
 0x255   :  { %19312 = vst [vmem:[#allocation45_spill] sm:$0xff] %v15094_v2  ;;  %v2240_v17 = vadd.f32 %v14900_v25, %v2179_v31  ;;  %v2238_v14 = vadd.f32 %v14900_v25, %v2177_v4  ;;  %v19318_v0 = vmax.f32 %v19316_v20, %v19317_v54  ;;  %v3011_v35 = vpack.c.bf16 %v2290_v28, %v2289_v53  ;;  %v19320_v28 = vld [vmem:[#allocation94_spill] sm:$0xff]  ;;  %v19323_v4 = vld [vmem:[#allocation61_spill] sm:$0xff]  ;;  %v19329_v54 = vld [vmem:[#allocation91_spill] sm:$0xff] }
 0x256   :  { %v2180_v30 = vmax.f32 %v19315_v6, %v2126_v32  ;;  %v15108_v36 = vsel %vm2380_vm5, %v3024_v43, %v3026_v57  ;;  %v15110_v38 = vpack.c.bf16 %v2349_v26, %v2347_v9  ;;  %v12109_v19 = vpop.f32.mrb[188].mxu0  ;;  %12458 = vmatpush3.bf16.msra.mxu0 %v15092_v33  ;;  %v2351_v18 = vsel %vm2338_vm4, %v2348_v11, %v2350_v46  ;;  %v19326_v26 = vld [vmem:[#allocation12_spill] sm:$0xff] }
 0x257   :  { %v2178_v41 = vmax.f32 %v19318_v0, %v2124_v34  ;;  %v2294_v12 = vmax.f32 %v2240_v17, 0.0  ;;  %v2292_v58 = vmax.f32 %v2238_v14, 0.0  ;;  %v3028_v49 = vrot.slane %v3011_v35, 2  ;;  %v1936_v32 = vpop.f32.mrb[189].mxu0  ;;  %12519 = vmatprep.subr.bf16.mxu0 %v19311_v15  ;;  %v19325_v17 = vld [vmem:[#allocation96_spill] sm:$0xff]  ;;  %v19330_v35 = vld [vmem:[#allocation18_spill] sm:$0xff] }
 0x258   :  { %v2241_v16 = vadd.f32 %v14900_v25, %v2180_v30  ;;  %19319 = vst [vmem:[#allocation46_spill] sm:$0xff] %v15110_v38  ;;  %v2354_v42 = vrot.slane %v2291_v24, 6  ;;  %v2129_v60 = vmax.f32 %v19320_v28, %v12109_v19  ;;  %v2353_v9 = vsel %vm2338_vm4, %v2350_v46, %v15066_v55  ;;  %v12110_v1 = vpop.f32.mrb[190].mxu0  ;;  %v19327_v46 = vld [vmem:[#allocation62_spill] sm:$0xff] }
 0x259   :  { %v2239_v7 = vadd.f32 %v14900_v25, %v2178_v41  ;;  %v15115_v31 = vrot.slane %v2294_v12, 6  ;;  %v2127_v53 = vmax.f32 %v19321_v29, %v1936_v32  ;;  %v15123_v37 = vsel %vm2380_vm5, %v3026_v57, %v3028_v49  ;;  %12400 = vmatmul.mubr.msk.bf16.gmra.mrb[220].mxu0 %vm2474_vm6, %v15108_v36  ;;  %v1939_v27 = vpop.f32.mrb[191].mxu0  ;;  %v19335_v32 = vld [vmem:[#allocation64_spill] sm:$0xff] }
 0x25a   :  { %v2295_v43 = vmax.f32 %v2241_v16, 0.0  ;;  %v2356_v11 = vrot.slane %v2292_v58, 6  ;;  %v19324_v56 = vmax.f32 %v19322_v62, %v19323_v4  ;;  %v2130_v21 = vmax.f32 %v19325_v17, %v12110_v1  ;;  %12403 = vmatprep.mubr.msk.bf16.mxu0 %vm13920_vm3, %v19311_v15  ;;  %v19331_v16 = vld [vmem:[#allocation63_spill] sm:$0xff] }
 0x25b   :  { %v2293_v52 = vmax.f32 %v2239_v7, 0.0  ;;  %v3012_v6 = vpack.c.bf16 %v2292_v58, %v2291_v24  ;;  %v19328_v14 = vmax.f32 %v19326_v26, %v19327_v46  ;;  %v2128_v57 = vmax.f32 %v19329_v54, %v1939_v27  ;;  %v19341_v54 = vld [vmem:[#allocation93_spill] sm:$0xff] }
 0x25c   :  { %v2183_v34 = vmax.f32 %v19324_v56, %v2129_v60  ;;  %v19332_v7 = vmax.f32 %v19330_v35, %v19331_v16  ;;  %v15143_v24 = vpack.c.bf16 %v2353_v9, %v2351_v18  ;;  %v19334_v60 = vld [vmem:[#allocation13_spill] sm:$0xff]  ;;  %v2357_v18 = vsel %vm2338_vm4, %v2354_v42, %v2356_v11  ;;  %v19342_v16 = vld [vmem:[#allocation20_spill] sm:$0xff] }
 0x25d   :  { %v2358_v30 = vrot.slane %v2293_v52, 6  ;;  %v2181_v20 = vmax.f32 %v19328_v14, %v2127_v53  ;;  %v15137_v0 = vpack.c.bf16 %v2294_v12, %v2293_v52  ;;  %v3030_v28 = vrot.slane %v3012_v6, 2  ;;  %v19340_v6 = vld [vmem:[#allocation98_spill] sm:$0xff] }
 0x25e   :  { %v2244_v41 = vadd.f32 %v14900_v25, %v2183_v34  ;;  %v2184_v19 = vmax.f32 %v19332_v7, %v2130_v21  ;;  %19333 = vst [vmem:[#allocation6_spill] sm:$0xff] %v15143_v24  ;;  %v19336_v29 = vmax.f32 %v19334_v60, %v19335_v32  ;;  %v2355_v12 = vsel %vm2338_vm4, %v15066_v55, %v2354_v42  ;;  %v12113_v34 = vpop.f32.mrb[192].mxu0  ;;  %v19343_v7 = vld [vmem:[#allocation65_spill] sm:$0xff] }
 0x25f   :  { %v2242_v58 = vadd.f32 %v14900_v25, %v2181_v20  ;;  %v19105_v1 = vrot.slane %v15137_v0, 2  ;;  %v15154_v4 = vsel %vm2380_vm5, %v3028_v49, %v3030_v28  ;;  %v15163_v21 = vpack.c.bf16 %v2357_v18, %v2355_v12  ;;  %v1952_v46 = vpop.f32.mrb[193].mxu0  ;;  %v19346_v12 = vld [vmem:[#allocation15_spill] sm:$0xff] }
 0x260   :  { %v2182_v53 = vmax.f32 %v19336_v29, %v2128_v57  ;;  %v2298_v52 = vmax.f32 %v2244_v41, 0.0  ;;  %v2245_v62 = vadd.f32 %v14900_v25, %v2184_v19  ;;  %19337 = vst [vmem:[#allocation47_spill] sm:$0xff] %v15154_v4  ;;  %v2362_v55 = vrot.slane %v2295_v43, 6  ;;  %v12114_v41 = vpop.f32.mrb[194].mxu0 }
 0x261   :  { %v2296_v9 = vmax.f32 %v2242_v58, 0.0  ;;  %v15161_v17 = vsel %vm2380_vm5, %v3030_v28, %v19105_v1  ;;  %19339 = vst [vmem:[#allocation49_spill] sm:$0xff] %v15163_v21  ;;  %v2133_v26 = vmax.f32 %v19340_v6, %v12113_v34  ;;  %v2359_v49 = vsel %vm2338_vm4, %v2356_v11, %v2358_v30  ;;  %12404 = vmatmul.mubr.msk.bf16.gmra.mrb[224].mxu0 %vm2474_vm6, %v15123_v37  ;;  %v19345_v58 = vld [vmem:[#allocation100_spill] sm:$0xff]  ;;  %v1955_v32 = vpop.f32.mrb[195].mxu0 }
 0x262   :  { %v2243_v56 = vadd.f32 %v14900_v25, %v2182_v53  ;;  %19338 = vst [vmem:[#allocation48_spill] sm:$0xff] %v15161_v17  ;;  %v2299_v27 = vmax.f32 %v2245_v62, 0.0  ;;  %v3957_v14 = vrot.slane %v2298_v52, 6  ;;  %v2131_v57 = vmax.f32 %v19341_v54, %v1952_v46  ;;  %v19347_v62 = vld [vmem:[#allocation66_spill] sm:$0xff]  ;;  %12407 = vmatprep.mubr.msk.bf16.mxu0 %vm13920_vm3, %v19311_v15  ;;  %v19350_v46 = vld [vmem:[#allocation67_spill] sm:$0xff] }
 0x263   :  { %v15167_v42 = vpack.c.bf16 %v2296_v9, %v2295_v43  ;;  %v19344_v19 = vmax.f32 %v19342_v16, %v19343_v7  ;;  %v2134_v60 = vmax.f32 %v19345_v58, %v12114_v41  ;;  %v2361_v11 = vsel %vm2338_vm4, %v2358_v30, %v15115_v31  ;;  %v19352_v30 = vld [vmem:[#allocation95_spill] sm:$0xff]  ;;  %v19355_v58 = vld [vmem:[#allocation17_spill] sm:$0xff] }
 0x264   :  { %v2297_v20 = vmax.f32 %v2243_v56, 0.0  ;;  %v3959_v35 = vrot.slane %v2299_v27, 6  ;;  %v2364_v43 = vrot.slane %v2296_v9, 6  ;;  %v19348_v18 = vmax.f32 %v19346_v12, %v19347_v62  ;;  %v19356_v12 = vld [vmem:[#allocation68_spill] sm:$0xff] }
 0x265   :  { %v2187_v28 = vmax.f32 %v19344_v19, %v2133_v26  ;;  %v19349_v26 = vld [vmem:[#allocation22_spill] sm:$0xff]  ;;  %v2132_v9 = vmax.f32 %v19352_v30, %v1955_v32  ;;  %v15193_v16 = vpack.c.bf16 %v2361_v11, %v2359_v49 }
 0x266   :  { %v15178_v29 = vpack.c.bf16 %v2298_v52, %v2297_v20  ;;  %v3956_v53 = vrot.slane %v2297_v20, 6  ;;  %v2185_v56 = vmax.f32 %v19348_v18, %v2131_v57  ;;  %v3960_v34 = vsel %vm2338_vm4, %v3957_v14, %v3959_v35  ;;  %v19358_v11 = vld [vmem:[#allocation102_spill] sm:$0xff] }
 0x267   :  { %v2248_v6 = vadd.f32 %v14900_v25, %v2187_v28  ;;  %v19351_v54 = vmax.f32 %v19349_v26, %v19350_v46  ;;  %19353 = vst [vmem:[#allocation7_spill] sm:$0xff] %v15193_v16  ;;  %v19357_v28 = vmax.f32 %v19355_v58, %v19356_v12  ;;  %v12117_v26 = vpop.f32.mrb[196].mxu0  ;;  %v19359_v46 = vld [vmem:[#allocation97_spill] sm:$0xff] }
 0x268   :  { %v3958_v52 = vsel %vm2338_vm4, %v3956_v53, %v3957_v14  ;;  %v2246_v20 = vadd.f32 %v14900_v25, %v2185_v56  ;;  %v2365_v14 = vsel %vm2338_vm4, %v2362_v55, %v2364_v43  ;;  %v2137_v56 = vmax.f32 %v19358_v11, %v12117_v26  ;;  %v19362_v58 = vld [vmem:[#allocation69_spill] sm:$0xff]  ;;  %v19365_v26 = vld [vmem:[#allocation19_spill] sm:$0xff]  ;;  %v19366_v11 = vld [vmem:[#allocation70_spill] sm:$0xff] }
 0x269   :  { %v2188_v41 = vmax.f32 %v19351_v54, %v2134_v60  ;;  %v15195_v57 = vpack.c.bf16 %v3960_v34, %v3958_v52  ;;  %v2302_v7 = vmax.f32 %v2248_v6, 0.0  ;;  %v2186_v62 = vmax.f32 %v19357_v28, %v2132_v9  ;;  %v1968_v34 = vpop.f32.mrb[197].mxu0  ;;  %12408 = vmatmul.mubr.msk.bf16.gmra.mrb[228].mxu0 %vm2474_vm6, %v15154_v4 }
 0x26a   :  { %v2300_v18 = vmax.f32 %v2246_v20, 0.0  ;;  %v2363_v60 = vsel %vm2338_vm4, %v15115_v31, %v2362_v55  ;;  %v2135_v54 = vmax.f32 %v19359_v46, %v1968_v34  ;;  %v19361_v31 = vld [vmem:[#allocation24_spill] sm:$0xff]  ;;  %12411 = vmatprep.mubr.msk.bf16.mxu0 %vm13920_vm3, %v19311_v15  ;;  %v19369_v46 = vld [vmem:[#allocation26_spill] sm:$0xff] }
 0x26b   :  { %19354 = vst [vmem:[#allocation50_spill] sm:$0xff] %v15195_v57  ;;  %v2249_v19 = vadd.f32 %v14900_v25, %v2188_v41  ;;  %v3965_v32 = vrot.slane %v2302_v7, 6  ;;  %v2247_v49 = vadd.f32 %v14900_v25, %v2186_v62  ;;  %v12118_v41 = vpop.f32.mrb[198].mxu0  ;;  %v15207_v30 = vpack.c.bf16 %v2365_v14, %v2363_v60 }
 0x26c   :  { %v3961_v6 = vrot.slane %v2300_v18, 6  ;;  %v15209_v9 = vpack.c.bf16 %v2300_v18, %v2299_v27  ;;  %v19363_v55 = vmax.f32 %v19361_v31, %v19362_v58  ;;  %v1971_v28 = vpop.f32.mrb[199].mxu0  ;;  %v19367_v60 = vmax.f32 %v19365_v26, %v19366_v11  ;;  %v19368_v27 = vld [vmem:[#allocation99_spill] sm:$0xff] }
 0x26d   :  { %v2303_v53 = vmax.f32 %v2249_v19, 0.0  ;;  %19360 = vst [vmem:[#allocation51_spill] sm:$0xff] %v15207_v30  ;;  %v2301_v20 = vmax.f32 %v2247_v49, 0.0  ;;  %v19364_v19 = vld [vmem:[#allocation104_spill] sm:$0xff]  ;;  %v2136_v18 = vmax.f32 %v19368_v27, %v1971_v28  ;;  %v19370_v31 = vld [vmem:[#allocation71_spill] sm:$0xff] }
 0x26e   :  { %v2191_v43 = vmax.f32 %v19363_v55, %v2137_v56  ;;  %v2138_v12 = vmax.f32 %v19364_v19, %v12118_v41  ;;  %v3962_v62 = vsel %vm2338_vm4, %v3959_v35, %v3961_v6  ;;  %v2189_v14 = vmax.f32 %v19367_v60, %v2135_v54  ;;  %v19372_v55 = vld [vmem:[#allocation21_spill] sm:$0xff]  ;;  %v19373_v19 = vld [vmem:[#allocation72_spill] sm:$0xff] }
 0x26f   :  { %v3967_v52 = vrot.slane %v2303_v53, 6  ;;  %v3963_v56 = vrot.slane %v2301_v20, 6  ;;  %v19371_v41 = vmax.f32 %v19369_v46, %v19370_v31  ;;  %v19374_v26 = vmax.f32 %v19372_v55, %v19373_v19  ;;  %v12121_v46 = vpop.f32.mrb[200].mxu0  ;;  %v19381_v19 = vld [vmem:[#allocation73_spill] sm:$0xff] }
 0x270   :  { %v2252_v34 = vadd.f32 %v14900_v25, %v2191_v43  ;;  %v2250_v35 = vadd.f32 %v14900_v25, %v2189_v14  ;;  %v15233_v11 = vpack.c.bf16 %v2302_v7, %v2301_v20  ;;  %v15244_v31 = vrot.slane %v15167_v42, 2  ;;  %v19378_v20 = vld [vmem:[#allocation106_spill] sm:$0xff] }
 0x271   :  { %v3968_v49 = vsel %vm2338_vm4, %v3965_v32, %v3967_v52  ;;  %v2192_v58 = vmax.f32 %v19371_v41, %v2138_v12  ;;  %v2190_v54 = vmax.f32 %v19374_v26, %v2136_v18  ;;  %v3964_v28 = vsel %vm2338_vm4, %v3961_v6, %v3963_v56  ;;  %v1984_v6 = vpop.f32.mrb[201].mxu0  ;;  %12412 = vmatmul.mubr.msk.bf16.gmra.mrb[232].mxu0 %vm2474_vm6, %v15161_v17 }
 0x272   :  { %v3966_v60 = vsel %vm2338_vm4, %v3963_v56, %v3965_v32  ;;  %v2306_v27 = vmax.f32 %v2252_v34, 0.0  ;;  %v15238_v43 = vpack.c.bf16 %v3964_v28, %v3962_v62  ;;  %v2304_v12 = vmax.f32 %v2250_v35, 0.0  ;;  %19377 = vst [vmem:[#allocation53_spill] sm:$0xff] %v15244_v31  ;;  %v19379_v56 = vld [vmem:[#allocation101_spill] sm:$0xff]  ;;  %v19380_v35 = vld [vmem:[#allocation28_spill] sm:$0xff]  ;;  %12415 = vmatprep.mubr.msk.bf16.mxu0 %vm13920_vm3, %v19311_v15 }
 0x273   :  { %v2253_v1 = vadd.f32 %v14900_v25, %v2192_v58  ;;  %v15240_v57 = vpack.c.bf16 %v3968_v49, %v3966_v60  ;;  %v2251_v14 = vadd.f32 %v14900_v25, %v2190_v54  ;;  %v2141_v18 = vmax.f32 %v19378_v20, %v12121_v46  ;;  %v12122_v58 = vpop.f32.mrb[202].mxu0  ;;  %v19384_v46 = vld [vmem:[#allocation23_spill] sm:$0xff]  ;;  %v19385_v20 = vld [vmem:[#allocation74_spill] sm:$0xff] }
 0x274   :  { %19375 = vst [vmem:[#allocation52_spill] sm:$0xff] %v15238_v43  ;;  %v3969_v41 = vrot.slane %v2304_v12, 6  ;;  %v2139_v34 = vmax.f32 %v19379_v56, %v1984_v6  ;;  %v15248_v62 = vpack.c.bf16 %v2304_v12, %v2303_v53  ;;  %v3973_v49 = vrot.slane %v2306_v27, 6  ;;  %v1987_v28 = vpop.f32.mrb[203].mxu0  ;;  %v19387_v12 = vld [vmem:[#allocation103_spill] sm:$0xff] }
 0x275   :  { %19376 = vst [vmem:[#allocation8_spill] sm:$0xff] %v15240_v57  ;;  %v2307_v7 = vmax.f32 %v2253_v1, 0.0  ;;  %v2305_v32 = vmax.f32 %v2251_v14, 0.0  ;;  %v19382_v26 = vmax.f32 %v19380_v35, %v19381_v19  ;;  %v19383_v1 = vld [vmem:[#allocation108_spill] sm:$0xff]  ;;  %v19386_v6 = vmax.f32 %v19384_v46, %v19385_v20  ;;  %v19388_v19 = vld [vmem:[#allocation30_spill] sm:$0xff] }
 0x276   :  { %v2142_v42 = vmax.f32 %v19383_v1, %v12122_v58  ;;  %v3970_v60 = vsel %vm2338_vm4, %v3967_v52, %v3969_v41  ;;  %v2140_v56 = vmax.f32 %v19387_v12, %v1987_v28  ;;  %v19392_v28 = vld [vmem:[#allocation25_spill] sm:$0xff]  ;;  %v19393_v20 = vld [vmem:[#allocation76_spill] sm:$0xff] }
 0x277   :  { %v3975_v55 = vrot.slane %v2307_v7, 6  ;;  %v2195_v54 = vmax.f32 %v19382_v26, %v2141_v18  ;;  %v3971_v14 = vrot.slane %v2305_v32, 6  ;;  %v2193_v53 = vmax.f32 %v19386_v6, %v2139_v34  ;;  %v19389_v26 = vld [vmem:[#allocation75_spill] sm:$0xff] }
 0x278   :  { %v19390_v58 = vmax.f32 %v19388_v19, %v19389_v26  ;;  %v15268_v57 = vpack.c.bf16 %v2306_v27, %v2305_v32  ;;  %v19394_v6 = vmax.f32 %v19392_v28, %v19393_v20  ;;  %v12125_v32 = vpop.f32.mrb[204].mxu0  ;;  %v19402_v20 = vld [vmem:[#allocation32_spill] sm:$0xff] }
 0x279   :  { %v3976_v18 = vsel %vm2338_vm4, %v3973_v49, %v3975_v55  ;;  %v2256_v35 = vadd.f32 %v14900_v25, %v2195_v54  ;;  %v3972_v52 = vsel %vm2338_vm4, %v3969_v41, %v3971_v14  ;;  %v3974_v46 = vsel %vm2338_vm4, %v3971_v14, %v3973_v49  ;;  %v19397_v49 = vld [vmem:[#allocation110_spill] sm:$0xff] }
 0x27a   :  { %v2196_v1 = vmax.f32 %v19390_v58, %v2142_v42  ;;  %19391 = vst [vmem:[#allocation54_spill] sm:$0xff] %v15268_v57  ;;  %v2254_v34 = vadd.f32 %v14900_v25, %v2193_v53  ;;  %v2194_v12 = vmax.f32 %v19394_v6, %v2140_v56  ;;  %v15276_v43 = vpack.c.bf16 %v3972_v52, %v3970_v60  ;;  %v2000_v53 = vpop.f32.mrb[205].mxu0  ;;  %v19403_v6 = vld [vmem:[#allocation77_spill] sm:$0xff]  ;;  %v19445_v57 = vld [vmem:[#allocation115_spill] sm:$0xff] }
 0x27b   :  { %v15278_v17 = vpack.c.bf16 %v3976_v18, %v3974_v46  ;;  %v2310_v54 = vmax.f32 %v2256_v35, 0.0  ;;  %v2145_v14 = vmax.f32 %v19397_v49, %v12125_v32  ;;  %v19398_v58 = vrot.slane %v15137_v0, 2  ;;  %v19400_v35 = vld [vmem:[#allocation105_spill] sm:$0xff]  ;;  %v19405_v0 = vld [vmem:[#allocation112_spill] sm:$0xff] }
 0x27c   :  { %19395 = vst [vmem:[#allocation55_spill] sm:$0xff] %v15276_v43  ;;  %v2257_v19 = vadd.f32 %v14900_v25, %v2196_v1  ;;  %v2308_v42 = vmax.f32 %v2254_v34, 0.0  ;;  %v2255_v27 = vadd.f32 %v14900_v25, %v2194_v12  ;;  %v2143_v52 = vmax.f32 %v19400_v35, %v2000_v53  ;;  %v12126_v1 = vpop.f32.mrb[206].mxu0  ;;  %v19406_v53 = vld [vmem:[#allocation27_spill] sm:$0xff]  ;;  %v19407_v35 = vld [vmem:[#allocation78_spill] sm:$0xff] }
 0x27d   :  { %19396 = vst [vmem:[#allocation11_spill] sm:$0xff] %v15278_v17  ;;  %v2408_v41 = vrot.slane %v2310_v54, 6  ;;  %v15287_v60 = vsel %vm2380_vm5, %v19398_v58, %v15244_v31  ;;  %v19404_v12 = vmax.f32 %v19402_v20, %v19403_v6  ;;  %v2146_v32 = vmax.f32 %v19405_v0, %v12126_v1  ;;  %v2003_v49 = vpop.f32.mrb[207].mxu0  ;;  %v19409_v17 = vld [vmem:[#allocation107_spill] sm:$0xff]  ;;  %v19410_v20 = vld [vmem:[#allocation34_spill] sm:$0xff] }
 0x27e   :  { %v2311_v26 = vmax.f32 %v2257_v19, 0.0  ;;  %19399 = vst [vmem:[#allocation56_spill] sm:$0xff] %v15287_v60  ;;  %v3977_v56 = vrot.slane %v2308_v42, 6  ;;  %v2309_v18 = vmax.f32 %v2255_v27, 0.0  ;;  %v15290_v46 = vpack.c.bf16 %v2308_v42, %v2307_v7  ;;  %12416 = vmatmul.mubr.msk.bf16.gmra.mrb[236].mxu0 %vm2474_vm6, %v15287_v60  ;;  %v19411_v6 = vld [vmem:[#allocation79_spill] sm:$0xff] }
 0x27f   :  { %v2199_v19 = vmax.f32 %v19404_v12, %v2145_v14  ;;  %v19408_v7 = vmax.f32 %v19406_v53, %v19407_v35  ;;  %12419 = vmatprep.mubr.msk.bf16.mxu0 %vm13920_vm3, %v19311_v15  ;;  %v19412_v12 = vmax.f32 %v19410_v20, %v19411_v6  ;;  %v19414_v53 = vld [vmem:[#allocation29_spill] sm:$0xff] }
 0x280   :  { %19401 = vst [vmem:[#allocation57_spill] sm:$0xff] %v15290_v46  ;;  %v2409_v34 = vrot.slane %v2311_v26, 6  ;;  %v15292_v28 = vpack.c.bf16 %v2311_v26, %v2310_v54  ;;  %v3978_v27 = vsel %vm2338_vm4, %v3975_v55, %v3977_v56  ;;  %v3979_v58 = vrot.slane %v2309_v18, 6 }
 0x281   :  { %v2197_v42 = vmax.f32 %v19408_v7, %v2143_v52  ;;  %v2144_v26 = vmax.f32 %v19409_v17, %v2003_v49  ;;  %v2260_v14 = vadd.f32 %v14900_v25, %v2199_v19  ;;  %v2200_v43 = vmax.f32 %v19412_v12, %v2146_v32  ;;  %v19415_v17 = vld [vmem:[#allocation80_spill] sm:$0xff] }
 0x282   :  { %v2410_v1 = vsel %vm2338_vm4, %v2408_v41, %v2409_v34  ;;  %v3980_v55 = vsel %vm2338_vm4, %v3977_v56, %v3979_v58  ;;  %v15314_v0 = vsel %vm2338_vm4, %v3979_v58, %v2408_v41  ;;  %v19416_v49 = vmax.f32 %v19414_v53, %v19415_v17  ;;  %v12129_v56 = vpop.f32.mrb[208].mxu0 }
 0x283   :  { %19413 = vst [vmem:[#allocation92_spill] sm:$0xff] %v15314_v0  ;;  %v2258_v52 = vadd.f32 %v14900_v25, %v2197_v42  ;;  %v15320_v7 = vpack.c.bf16 %v3980_v55, %v3978_v27  ;;  %v2314_v19 = vmax.f32 %v2260_v14, 0.0  ;;  %v2261_v60 = vadd.f32 %v14900_v25, %v2200_v43  ;;  %v15329_v42 = vld [vmem:[%s19003_s3 + $0x10] sm:$0xff]   ;;  %v2016_v43 = vpop.f32.mrb[209].mxu0  ;;  %v19421_v0 = vld [vmem:[#allocation36_spill] sm:$0xff] }
 0x284   :  { %v2198_v35 = vmax.f32 %v19416_v49, %v2144_v26  ;;  %v3191_v32 = vrot.slane %v15292_v28, 2  ;;  %v2449_v58 = vsel %vm2380_vm5, 0.0, %v2408_v41  ;;  %v19418_v27 = vld [vmem:[#allocation114_spill] sm:$0xff]  ;;  %v12130_v49 = vpop.f32.mrb[210].mxu0 }
 0x285   :  { %19417 = vst [vmem:[#allocation9_spill] sm:$0xff] %v15320_v7  ;;  %v2312_v20 = vmax.f32 %v2258_v52, 0.0  ;;  %v2415_v12 = vrot.slane %v2314_v19, 6  ;;  %v2315_v26 = vmax.f32 %v2261_v60, 0.0  ;;  %v2149_v55 = vmax.f32 %v19418_v27, %v12129_v56  ;;  %v19419_v52 = vld [vmem:[#allocation109_spill] sm:$0xff]  ;;  %v19424_v60 = vld [vmem:[#allocation116_spill] sm:$0xff] }
 0x286   :  { %v2259_v6 = vadd.f32 %v14900_v25, %v2198_v35  ;;  %v15332_v14 = vpack.c.bf16 %v2410_v1, %v2449_v58  ;;  %v2147_v17 = vmax.f32 %v19419_v52, %v2016_v43  ;;  %v15335_v35 = vpack.c.bf16 %v2310_v54, %v2309_v18  ;;  %v19422_v7 = vld [vmem:[#allocation81_spill] sm:$0xff]  ;;  %12420 = vmatmul.mubr.msk.bf16.gmra.mrb[240].mxu0 %vm2474_vm6, %v15244_v31  ;;  %v2019_v56 = vpop.f32.mrb[211].mxu0  ;;  %v19425_v54 = vld [vmem:[#allocation31_spill] sm:$0xff]  ;;  %v19426_v18 = vld [vmem:[#allocation82_spill] sm:$0xff] }
 0x287   :  { %v2411_v53 = vrot.slane %v2312_v20, 6  ;;  %v2417_v41 = vrot.slane %v2315_v26, 6  ;;  %v19423_v46 = vmax.f32 %v19421_v0, %v19422_v7  ;;  %v2150_v1 = vmax.f32 %v19424_v60, %v12130_v49  ;;  %12459 = vmatprep.mubr.msk.bf16.mxu0 %vm13920_vm3, %v19311_v15  ;;  %v19432_v60 = vld [vmem:[#allocation33_spill] sm:$0xff] }
 0x288   :  { %v2313_v28 = vmax.f32 %v2259_v6, 0.0  ;;  %19420 = vst [vmem:[#allocation58_spill] sm:$0xff] %v15335_v35  ;;  %12140 = vmatmul.mubr.msk.bf16.vlgmr.msra.gmra.mrb[0].mxu1 %vm2474_vm6, %v15332_v14  ;;  %v15345_v6 = vpack.c.bf16 %v2315_v26, %v2314_v19  ;;  %v19427_v43 = vmax.f32 %v19425_v54, %v19426_v18  ;;  %v19428_v35 = vld [vmem:[#allocation111_spill] sm:$0xff]  ;;  %v19429_v19 = vld [vmem:[#allocation38_spill] sm:$0xff] }
 0x289   :  { %v2203_v4 = vmax.f32 %v19423_v46, %v2149_v55  ;;  %v2148_v0 = vmax.f32 %v19428_v35, %v2019_v56  ;;  %12143 = vmatprep.mubr.msk.bf16.mxu1 %vm13920_vm3, %v19311_v15  ;;  %12168 = vmatpush3.bf16.msra.mxu1 %v15329_v42  ;;  %v15357_v46 = vld [vmem:[%s19003_s3 + $0x18] sm:$0xff]  }
 0x28a   :  { %v2413_v58 = vrot.slane %v2313_v28, 6  ;;  %v3178_v27 = vpack.c.bf16 %v2313_v28, %v2312_v20  ;;  %v2201_v52 = vmax.f32 %v19427_v43, %v2147_v17  ;;  %v19430_v20 = vld [vmem:[#allocation83_spill] sm:$0xff]  ;;  %v2412_v28 = vsel %vm2338_vm4, %v2409_v34, %v2411_v53  ;;  %v19433_v56 = vld [vmem:[#allocation84_spill] sm:$0xff]  ;;  %12169 = vmatprep.subr.bf16.mxu1 %v19311_v15 }
 0x28b   :  { %v2264_v7 = vadd.f32 %v14900_v25, %v2203_v4  ;;  %v19431_v26 = vmax.f32 %v19429_v19, %v19430_v20  ;;  %v2418_v17 = vsel %vm2338_vm4, %v2415_v12, %v2417_v41  ;;  %v19434_v54 = vmax.f32 %v19432_v60, %v19433_v56  ;;  %v19436_v60 = vld [vmem:[#allocation117_spill] sm:$0xff] }
 0x28c   :  { %v3192_v49 = vrot.slane %v3178_v27, 2  ;;  %v2262_v35 = vadd.f32 %v14900_v25, %v2201_v52  ;;  %v2414_v4 = vsel %vm2338_vm4, %v2411_v53, %v2413_v58  ;;  %v2416_v34 = vsel %vm2338_vm4, %v2413_v58, %v2415_v12 }
 0x28d   :  { %v2204_v55 = vmax.f32 %v19431_v26, %v2150_v1  ;;  %v2202_v18 = vmax.f32 %v19434_v54, %v2148_v0  ;;  %v2318_v43 = vmax.f32 %v2264_v7, 0.0  ;;  %v15374_v19 = vpack.c.bf16 %v2414_v4, %v2412_v28  ;;  %v12133_v26 = vpop.f32.mrb[212].mxu0  ;;  %12170 = vmatpush3.bf16.msra.mxu1 %v15357_v46  ;;  %v19438_v4 = vld [vmem:[#allocation39_spill] sm:$0xff] }
 0x28e   :  { %v2316_v20 = vmax.f32 %v2262_v35, 0.0  ;;  %v15378_v52 = vpack.c.bf16 %v2418_v17, %v2416_v34  ;;  %v15382_v0 = vsel %vm2380_vm5, %v3191_v32, %v3192_v49  ;;  %v2153_v7 = vmax.f32 %v19436_v60, %v12133_v26  ;;  %v2032_v56 = vpop.f32.mrb[213].mxu0  ;;  %12199 = vmatprep.subr.bf16.mxu1 %v19311_v15  ;;  %v19437_v35 = vld [vmem:[#allocation113_spill] sm:$0xff]  ;;  %12460 = vmatmul.mubr.msk.bf16.vlgmr.msra.gmra.mrb[244].mxu0 %vm2474_vm6, %v14949_v61  ;;  %v19442_v60 = vld [vmem:[#allocation35_spill] sm:$0xff] }
 0x28f   :  { %v2265_v1 = vadd.f32 %v14900_v25, %v2204_v55  ;;  %v2263_v27 = vadd.f32 %v14900_v25, %v2202_v18  ;;  %19435 = vst [vmem:[#allocation89_spill] sm:$0xff] %v15382_v0  ;;  %v3194_v55 = vrot.slane %v15345_v6, 2  ;;  %v2423_v12 = vrot.slane %v2318_v43, 6  ;;  %v12134_v17 = vpop.f32.mrb[214].mxu0  ;;  %v19439_v34 = vld [vmem:[#allocation85_spill] sm:$0xff]  ;;  %12463 = vmatprep.mubr.msk.bf16.mxu0 %vm13920_vm3, %v19311_v15  ;;  %12520 = vmatpush3.bf16.msra.mxu0 %v15329_v42 }
 0x290   :  { %v2419_v58 = vrot.slane %v2316_v20, 6  ;;  %v2151_v54 = vmax.f32 %v19437_v35, %v2032_v56  ;;  %v19440_v31 = vmax.f32 %v19438_v4, %v19439_v34  ;;  %12144 = vmatmul.mubr.msk.bf16.gmra.mrb[4].mxu1 %vm2474_vm6, %v15374_v19  ;;  %v2035_v6 = vpop.f32.mrb[215].mxu0  ;;  %v19443_v56 = vld [vmem:[#allocation86_spill] sm:$0xff]  ;;  %12521 = vmatprep.subr.bf16.mxu0 %v19311_v15 }
 0x291   :  { %v2319_v53 = vmax.f32 %v2265_v1, 0.0  ;;  %v2317_v28 = vmax.f32 %v2263_v27, 0.0  ;;  %v2154_v1 = vmax.f32 %v14906_v39, %v12134_v17  ;;  %v15397_v26 = vsel %vm2380_vm5, %v3192_v49, %v3194_v55  ;;  %12147 = vmatprep.mubr.msk.bf16.mxu1 %vm13920_vm3, %v19311_v15  ;;  %v19447_v49 = vld [vmem:[#allocation87_spill] sm:$0xff] }
 0x292   :  { %v2207_v32 = vmax.f32 %v19440_v31, %v2153_v7  ;;  %19441 = vst [vmem:[#allocation14_spill] sm:$0xff] %v15397_v26  ;;  %v19444_v35 = vmax.f32 %v19442_v60, %v19443_v56  ;;  %v2152_v4 = vmax.f32 %v19445_v57, %v2035_v6  ;;  %v2420_v31 = vsel %vm2338_vm4, %v2417_v41, %v2419_v58  ;;  %v19446_v7 = vld [vmem:[#allocation41_spill] sm:$0xff]  ;;  %v19450_v60 = vld [vmem:[#allocation88_spill] sm:$0xff] }
 0x293   :  { %v2425_v18 = vrot.slane %v2319_v53, 6  ;;  %v2421_v27 = vrot.slane %v2317_v28, 6  ;;  %v19448_v17 = vmax.f32 %v19446_v7, %v19447_v49  ;;  %v19449_v6 = vld [vmem:[#allocation37_spill] sm:$0xff]  ;;  %12522 = vmatpush3.bf16.msra.mxu0 %v15357_v46 }
 0x294   :  { %v2205_v0 = vmax.f32 %v19444_v35, %v2151_v54  ;;  %v2268_v39 = vadd.f32 %v14900_v25, %v2207_v32  ;;  %v3180_v54 = vpack.c.bf16 %v2317_v28, %v2316_v20  ;;  %v19451_v56 = vmax.f32 %v19449_v6, %v19450_v60  ;;  %12583 = vmatprep.subr.bf16.mxu0 %v19311_v15 }
 0x295   :  { %v2208_v34 = vmax.f32 %v19448_v17, %v2154_v1  ;;  %v2426_v61 = vsel %vm2338_vm4, %v2423_v12, %v2425_v18  ;;  %v2422_v26 = vsel %vm2338_vm4, %v2419_v58, %v2421_v27  ;;  %v2424_v41 = vsel %vm2338_vm4, %v2421_v27, %v2423_v12 }
 0x296   :  { %v2266_v57 = vadd.f32 %v14900_v25, %v2205_v0  ;;  %v2206_v35 = vmax.f32 %v19451_v56, %v2152_v4  ;;  %v2322_v32 = vmax.f32 %v2268_v39, 0.0  ;;  %v15422_v7 = vpack.c.bf16 %v2422_v26, %v2420_v31  ;;  %12464 = vmatmul.mubr.msk.bf16.gmra.mrb[248].mxu0 %vm2474_vm6, %v14963_v51 }
 0x297   :  { %v2269_v1 = vadd.f32 %v14900_v25, %v2208_v34  ;;  %v15424_v49 = vpack.c.bf16 %v2426_v61, %v2424_v41  ;;  %v3196_v28 = vrot.slane %v3180_v54, 2  ;;  %v3181_v17 = vpack.c.bf16 %v2319_v53, %v2318_v43  ;;  %12467 = vmatprep.mubr.msk.bf16.mxu0 %vm13920_vm3, %v19311_v15 }
 0x298   :  { %v2320_v20 = vmax.f32 %v2266_v57, 0.0  ;;  %v2267_v0 = vadd.f32 %v14900_v25, %v2206_v35  ;;  %v2431_v26 = vrot.slane %v2322_v32, 6  ;;  %12148 = vmatmul.mubr.msk.bf16.gmra.mrb[8].mxu1 %vm2474_vm6, %v15378_v52 }
 0x299   :  { %v2323_v6 = vmax.f32 %v2269_v1, 0.0  ;;  %v15430_v12 = vsel %vm2380_vm5, %v3194_v55, %v3196_v28  ;;  %v3198_v27 = vrot.slane %v3181_v17, 2  ;;  %12151 = vmatprep.mubr.msk.bf16.mxu1 %vm13920_vm3, %v19311_v15  ;;  %v15510_v1 = vld [vmem:[%s19003_s3 + $0x30] sm:$0xff]  }
 0x29a   :  { %v2427_v58 = vrot.slane %v2320_v20, 6  ;;  %v2321_v4 = vmax.f32 %v2267_v0, 0.0 }
 0x29b   :  { %v2433_v31 = vrot.slane %v2323_v6, 6  ;;  %v15432_v61 = vpack.c.bf16 %v2323_v6, %v2322_v32  ;;  %v15444_v53 = vsel %vm2380_vm5, %v3196_v28, %v3198_v27  ;;  %v13885_v32 = vld [vmem:[%s19003_s3 + $0x40] sm:$0xff]  }
 0x29c   :  { %v2429_v25 = vrot.slane %v2321_v4, 6  ;;  %v2428_v43 = vsel %vm2338_vm4, %v2425_v18, %v2427_v58  ;;  %v15446_v55 = vpack.c.bf16 %v2321_v4, %v2320_v20  ;;  %v3811_v18 = vsel %vm2380_vm5, %v15016_v48, 0.0  ;;  %v13886_v48 = vld [vmem:[%s19003_s3 + $0x48] sm:$0xff]   ;;  %v15525_v20 = vld [vmem:[%s19003_s3 + $0x38] sm:$0xff]  }
 0x29d   :  { %v2434_v39 = vsel %vm2338_vm4, %v2431_v26, %v2433_v31  ;;  %v15490_v41 = vpack.c.bf16 %v19311_v15, %v3811_v18 }
 0x29e   :  { %v2430_v34 = vsel %vm2338_vm4, %v2427_v58, %v2429_v25  ;;  %v2432_v54 = vsel %vm2338_vm4, %v2429_v25, %v2431_v26  ;;  %v19126_v57 = vrot.slane %v15446_v55, 2  ;;  %12468 = vmatmul.mubr.msk.bf16.gmra.mrb[252].mxu0 %vm2474_vm6, %v14986_v40 }
 0x29f   :  { %v2460_v60 = vpack.c.bf16 %v2430_v34, %v2428_v43  ;;  %v2461_v56 = vpack.c.bf16 %v2434_v39, %v2432_v54  ;;  %12471 = vmatprep.mubr.msk.bf16.mxu0 %vm13920_vm3, %v19311_v15 }
 0x2a0   :  { %v15455_v35 = vsel %vm2380_vm5, %v3198_v27, %v19126_v57  ;;  %12152 = vmatmul.mubr.msk.bf16.gmra.mrb[12].mxu1 %vm2474_vm6, %v15422_v7 }
 0x2a1   :  { %12155 = vmatprep.mubr.msk.bf16.mxu1 %vm13920_vm3, %v19311_v15 }
 0x2a6   :  { %12472 = vmatmul.mubr.msk.bf16.gmra.mrb[0].mxu0 %vm2474_vm6, %v14994_v44 }
 0x2a7   :  { %12475 = vmatprep.mubr.msk.bf16.mxu0 %vm13920_vm3, %v19311_v15 }
 0x2a8   :  { %12156 = vmatmul.mubr.msk.bf16.gmra.mrb[16].mxu1 %vm2474_vm6, %v15424_v49 }
 0x2a9   :  { %12159 = vmatprep.mubr.msk.bf16.mxu1 %vm13920_vm3, %v19311_v15 }
 0x2ae   :  { %12476 = vmatmul.mubr.msk.bf16.gmra.mrb[4].mxu0 %vm2474_vm6, %v15013_v3 }
 0x2af   :  { %12479 = vmatprep.mubr.msk.bf16.mxu0 %vm13920_vm3, %v19311_v15 }
 0x2b0   :  { %12160 = vmatmul.mubr.msk.bf16.gmra.mrb[20].mxu1 %vm2474_vm6, %v2460_v60 }
 0x2b1   :  { %12163 = vmatprep.mubr.msk.bf16.mxu1 %vm13920_vm3, %v19311_v15 }
 0x2b6   :  { %12480 = vmatmul.mubr.msk.bf16.gmra.mrb[8].mxu0 %vm2474_vm6, %v15022_v8 }
 0x2b7   :  { %12483 = vmatprep.mubr.msk.bf16.mxu0 %vm13920_vm3, %v19311_v15 }
 0x2b8   :  { %12164 = vmatmul.mubr.msk.bf16.gmra.mrb[24].mxu1 %vm2474_vm6, %v2461_v56 }
 0x2b9   :  { %12171 = vmatprep.mubr.msk.bf16.mxu1 %vm13920_vm3, %v19311_v15 }
 0x2be   :  { %12484 = vmatmul.mubr.msk.bf16.gmra.mrb[12].mxu0 %vm2474_vm6, %v15490_v41 }
 0x2bf   :  { %12523 = vmatprep.mubr.msk.bf16.mxu0 %vm13920_vm3, %v19311_v15 }
 0x2c0   :  { %12172 = vmatmul.mubr.msk.bf16.vlgmr.msra.gmra.mrb[28].mxu1 %vm2474_vm6, %v15045_v59 }
 0x2c1   :  { %12175 = vmatprep.mubr.msk.bf16.mxu1 %vm13920_vm3, %v19311_v15  ;;  %12200 = vmatpush3.bf16.msra.mxu1 %v13885_v32  ;;  %v19462_v32 = vld [vmem:[#allocation54_spill] sm:$0xff] }
 0x2c2   :  { %12201 = vmatprep.subr.bf16.mxu1 %v19311_v15 }
 0x2c5   :  { %12202 = vmatpush3.bf16.msra.mxu1 %v13886_v48  ;;  %v19463_v48 = vld [vmem:[#allocation47_spill] sm:$0xff] }
 0x2c6   :  { %12231 = vmatprep.subr.bf16.mxu1 %v19311_v15  ;;  %12524 = vmatmul.mubr.msk.bf16.vlgmr.msra.gmra.mrb[16].mxu0 %vm2474_vm6, %v15332_v14  ;;  %v15572_v14 = vld [vmem:[%s19003_s3 + $0x50] sm:$0xff]  }
 0x2c7   :  { %12527 = vmatprep.mubr.msk.bf16.mxu0 %vm13920_vm3, %v19311_v15  ;;  %12584 = vmatpush3.bf16.msra.mxu0 %v15510_v1 }
 0x2c8   :  { %12176 = vmatmul.mubr.msk.bf16.gmra.mrb[32].mxu1 %vm2474_vm6, %v15094_v2  ;;  %12585 = vmatprep.subr.bf16.mxu0 %v19311_v15 }
 0x2c9   :  { %12179 = vmatprep.mubr.msk.bf16.mxu1 %vm13920_vm3, %v19311_v15 }
 0x2cb   :  { %12586 = vmatpush3.bf16.msra.mxu0 %v15525_v20 }
 0x2cc   :  { %12647 = vmatprep.subr.bf16.mxu0 %v19311_v15 }
 0x2ce   :  { %12528 = vmatmul.mubr.msk.bf16.gmra.mrb[20].mxu0 %vm2474_vm6, %v15374_v19  ;;  %v15583_v19 = vld [vmem:[%s19003_s3 + $0x58] sm:$0xff]  }
 0x2cf   :  { %12531 = vmatprep.mubr.msk.bf16.mxu0 %vm13920_vm3, %v19311_v15 }
 0x2d0   :  { %12180 = vmatmul.mubr.msk.bf16.gmra.mrb[36].mxu1 %vm2474_vm6, %v15110_v38 }
 0x2d1   :  { %12183 = vmatprep.mubr.msk.bf16.mxu1 %vm13920_vm3, %v19311_v15 }
 0x2d6   :  { %12532 = vmatmul.mubr.msk.bf16.gmra.mrb[24].mxu0 %vm2474_vm6, %v15378_v52  ;;  %v15592_v52 = vld [vmem:[%s19003_s3 + $0x60] sm:$0xff]  }
 0x2d7   :  { %12535 = vmatprep.mubr.msk.bf16.mxu0 %vm13920_vm3, %v19311_v15 }
 0x2d8   :  { %12184 = vmatmul.mubr.msk.bf16.gmra.mrb[40].mxu1 %vm2474_vm6, %v15143_v24 }
 0x2d9   :  { %12187 = vmatprep.mubr.msk.bf16.mxu1 %vm13920_vm3, %v19311_v15 }
 0x2de   :  { %12536 = vmatmul.mubr.msk.bf16.gmra.mrb[28].mxu0 %vm2474_vm6, %v15422_v7  ;;  %v15607_v7 = vld [vmem:[%s19003_s3 + $0x68] sm:$0xff]  }
 0x2df   :  { %12539 = vmatprep.mubr.msk.bf16.mxu0 %vm13920_vm3, %v19311_v15 }
 0x2e0   :  { %12188 = vmatmul.mubr.msk.bf16.gmra.mrb[44].mxu1 %vm2474_vm6, %v15163_v21 }
 0x2e1   :  { %12191 = vmatprep.mubr.msk.bf16.mxu1 %vm13920_vm3, %v19311_v15 }
 0x2e6   :  { %12540 = vmatmul.mubr.msk.bf16.gmra.mrb[32].mxu0 %vm2474_vm6, %v15424_v49 }
 0x2e7   :  { %12543 = vmatprep.mubr.msk.bf16.mxu0 %vm13920_vm3, %v19311_v15 }
 0x2e8   :  { %12192 = vmatmul.mubr.msk.bf16.gmra.mrb[48].mxu1 %vm2474_vm6, %v15193_v16 }
 0x2e9   :  { %12195 = vmatprep.mubr.msk.bf16.mxu1 %vm13920_vm3, %v19311_v15 }
 0x2ee   :  { %12544 = vmatmul.mubr.msk.bf16.gmra.mrb[36].mxu0 %vm2474_vm6, %v2460_v60 }
 0x2ef   :  { %12547 = vmatprep.mubr.msk.bf16.mxu0 %vm13920_vm3, %v19311_v15 }
 0x2f0   :  { %12196 = vmatmul.mubr.msk.bf16.gmra.mrb[52].mxu1 %vm2474_vm6, %v15207_v30 }
 0x2f1   :  { %12203 = vmatprep.mubr.msk.bf16.mxu1 %vm13920_vm3, %v19311_v15 }
 0x2f6   :  { %12548 = vmatmul.mubr.msk.bf16.gmra.mrb[40].mxu0 %vm2474_vm6, %v2461_v56 }
 0x2f7   :  { %12587 = vmatprep.mubr.msk.bf16.mxu0 %vm13920_vm3, %v19311_v15 }
 0x2f8   :  { %12204 = vmatmul.mubr.msk.bf16.vlgmr.msra.gmra.mrb[56].mxu1 %vm2474_vm6, %v14915_v47 }
 0x2f9   :  { %12207 = vmatprep.mubr.msk.bf16.mxu1 %vm13920_vm3, %v19311_v15  ;;  %12232 = vmatpush3.bf16.msra.mxu1 %v15572_v14 }
 0x2fa   :  { %12233 = vmatprep.subr.bf16.mxu1 %v19311_v15 }
 0x2fd   :  { %12234 = vmatpush3.bf16.msra.mxu1 %v15583_v19 }
 0x2fe   :  { %12263 = vmatprep.subr.bf16.mxu1 %v19311_v15  ;;  %12588 = vmatmul.mubr.msk.bf16.vlgmr.msra.gmra.mrb[44].mxu0 %vm2474_vm6, %v14915_v47 }
 0x2ff   :  { %12591 = vmatprep.mubr.msk.bf16.mxu0 %vm13920_vm3, %v19311_v15  ;;  %12648 = vmatpush3.bf16.msra.mxu0 %v15592_v52 }
 0x300   :  { %12208 = vmatmul.mubr.msk.bf16.gmra.mrb[60].mxu1 %vm2474_vm6, %v14965_v63  ;;  %12649 = vmatprep.subr.bf16.mxu0 %v19311_v15 }
 0x301   :  { %12211 = vmatprep.mubr.msk.bf16.mxu1 %vm13920_vm3, %v19311_v15 }
 0x303   :  { %12650 = vmatpush3.bf16.msra.mxu0 %v15607_v7 }
 0x304   :  { %12711 = vmatprep.subr.bf16.mxu0 %v19311_v15 }
 0x306   :  { %12592 = vmatmul.mubr.msk.bf16.gmra.mrb[48].mxu0 %vm2474_vm6, %v14965_v63 }
 0x307   :  { %12595 = vmatprep.mubr.msk.bf16.mxu0 %vm13920_vm3, %v19311_v15 }
 0x308   :  { %12212 = vmatmul.mubr.msk.bf16.gmra.mrb[64].mxu1 %vm2474_vm6, %v14942_v50 }
 0x309   :  { %12215 = vmatprep.mubr.msk.bf16.mxu1 %vm13920_vm3, %v19311_v15 }
 0x30e   :  { %12596 = vmatmul.mubr.msk.bf16.gmra.mrb[52].mxu0 %vm2474_vm6, %v14942_v50 }
 0x30f   :  { %12599 = vmatprep.mubr.msk.bf16.mxu0 %vm13920_vm3, %v19311_v15 }
 0x310   :  { %12216 = vmatmul.mubr.msk.bf16.gmra.mrb[68].mxu1 %vm2474_vm6, %v14997_v5 }
 0x311   :  { %12219 = vmatprep.mubr.msk.bf16.mxu1 %vm13920_vm3, %v19311_v15 }
 0x316   :  { %12600 = vmatmul.mubr.msk.bf16.gmra.mrb[56].mxu0 %vm2474_vm6, %v14997_v5 }
 0x317   :  { %12603 = vmatprep.mubr.msk.bf16.mxu0 %vm13920_vm3, %v19311_v15 }
 0x318   :  { %12220 = vmatmul.mubr.msk.bf16.gmra.mrb[72].mxu1 %vm2474_vm6, %v14974_v10 }
 0x319   :  { %12223 = vmatprep.mubr.msk.bf16.mxu1 %vm13920_vm3, %v19311_v15 }
 0x31e   :  { %12604 = vmatmul.mubr.msk.bf16.gmra.mrb[60].mxu0 %vm2474_vm6, %v14974_v10 }
 0x31f   :  { %12607 = vmatprep.mubr.msk.bf16.mxu0 %vm13920_vm3, %v19311_v15 }
 0x320   :  { %12224 = vmatmul.mubr.msk.bf16.gmra.mrb[76].mxu1 %vm2474_vm6, %v15030_v45 }
 0x321   :  { %12227 = vmatprep.mubr.msk.bf16.mxu1 %vm13920_vm3, %v19311_v15 }
 0x324   :  { %v15652_v49 = vpop.f32.mrb[216].mxu0 }
 0x325   :  { %19452 = vst [vmem:[#allocation59_spill] sm:$0xff] %v15652_v49  ;;  %v12397_v0 = vpop.f32.mrb[217].mxu0 }
 0x326   :  { %12608 = vmatmul.mubr.msk.bf16.gmra.mrb[64].mxu0 %vm2474_vm6, %v15030_v45  ;;  %v15654_v28 = vpop.f32.mrb[218].mxu0 }
 0x327   :  { %12611 = vmatprep.mubr.msk.bf16.mxu0 %vm13920_vm3, %v19311_v15  ;;  %19453 = vst [vmem:[#allocation10_spill] sm:$0xff] %v15654_v28  ;;  %v12398_v17 = vpop.f32.mrb[219].mxu0 }
 0x328   :  { %12228 = vmatmul.mubr.msk.bf16.gmra.mrb[80].mxu1 %vm2474_vm6, %v15006_v22 }
 0x329   :  { %12235 = vmatprep.mubr.msk.bf16.mxu1 %vm13920_vm3, %v19311_v15 }
 0x32c   :  { %v15666_v6 = vpop.f32.mrb[220].mxu0 }
 0x32d   :  { %19454 = vst [vmem:[#allocation60_spill] sm:$0xff] %v15666_v6  ;;  %v12401_v58 = vpop.f32.mrb[221].mxu0 }
 0x32e   :  { %12612 = vmatmul.mubr.msk.bf16.gmra.mrb[68].mxu0 %vm2474_vm6, %v15006_v22  ;;  %v15668_v4 = vpop.f32.mrb[222].mxu0 }
 0x32f   :  { %12651 = vmatprep.mubr.msk.bf16.mxu0 %vm13920_vm3, %v19311_v15  ;;  %19455 = vst [vmem:[#allocation94_spill] sm:$0xff] %v15668_v4  ;;  %v12402_v27 = vpop.f32.mrb[223].mxu0 }
 0x330   :  { %12236 = vmatmul.mubr.msk.bf16.vlgmr.msra.gmra.mrb[84].mxu1 %vm2474_vm6, %v15178_v29 }
 0x331   :  { %12239 = vmatprep.mubr.msk.bf16.mxu1 %vm13920_vm3, %v19311_v15  ;;  %12264 = vmatpush3.bf16.msra.mxu1 %v15063_v13 }
 0x332   :  { %12265 = vmatprep.subr.bf16.mxu1 %v19311_v15 }
 0x334   :  { %v15681_v13 = vpop.f32.mrb[224].mxu0 }
 0x335   :  { %12266 = vmatpush3.bf16.msra.mxu1 %v15092_v33  ;;  %19456 = vst [vmem:[#allocation90_spill] sm:$0xff] %v15681_v13  ;;  %v12405_v33 = vpop.f32.mrb[225].mxu0 }
 0x336   :  { %12295 = vmatprep.subr.bf16.mxu1 %v19311_v15  ;;  %12652 = vmatmul.mubr.msk.bf16.vlgmr.msra.gmra.mrb[72].mxu0 %vm2474_vm6, %v15073_v23  ;;  %v15684_v26 = vpop.f32.mrb[226].mxu0  ;;  %v19466_v33 = vld [vmem:[#allocation57_spill] sm:$0xff] }
 0x337   :  { %12655 = vmatprep.mubr.msk.bf16.mxu0 %vm13920_vm3, %v19311_v15  ;;  %12712 = vmatpush3.bf16.msra.mxu0 %v15329_v42  ;;  %19457 = vst [vmem:[#allocation16_spill] sm:$0xff] %v15684_v26  ;;  %v12406_v31 = vpop.f32.mrb[227].mxu0  ;;  %v19475_v26 = vld [vmem:[#allocation53_spill] sm:$0xff] }
 0x338   :  { %12240 = vmatmul.mubr.msk.bf16.gmra.mrb[88].mxu1 %vm2474_vm6, %v15209_v9  ;;  %12713 = vmatprep.subr.bf16.mxu0 %v19311_v15  ;;  %v19467_v31 = vld [vmem:[#allocation48_spill] sm:$0xff] }
 0x339   :  { %12243 = vmatprep.mubr.msk.bf16.mxu1 %vm13920_vm3, %v19311_v15 }
 0x33b   :  { %12714 = vmatpush3.bf16.msra.mxu0 %v15357_v46 }
 0x33c   :  { %12775 = vmatprep.subr.bf16.mxu0 %v19311_v15  ;;  %v15696_v25 = vpop.f32.mrb[228].mxu0 }
 0x33d   :  { %19458 = vst [vmem:[#allocation61_spill] sm:$0xff] %v15696_v25  ;;  %v12409_v43 = vpop.f32.mrb[229].mxu0 }
 0x33e   :  { %12656 = vmatmul.mubr.msk.bf16.gmra.mrb[76].mxu0 %vm2474_vm6, %v15108_v36  ;;  %v15698_v39 = vpop.f32.mrb[230].mxu0 }
 0x33f   :  { %12659 = vmatprep.mubr.msk.bf16.mxu0 %vm13920_vm3, %v19311_v15  ;;  %19459 = vst [vmem:[#allocation96_spill] sm:$0xff] %v15698_v39  ;;  %v12410_v34 = vpop.f32.mrb[231].mxu0 }
 0x340   :  { %12244 = vmatmul.mubr.msk.bf16.gmra.mrb[92].mxu1 %vm2474_vm6, %v15233_v11 }
 0x341   :  { %12247 = vmatprep.mubr.msk.bf16.mxu1 %vm13920_vm3, %v19311_v15 }
 0x344   :  { %v15708_v54 = vpop.f32.mrb[232].mxu0 }
 0x345   :  { %19460 = vst [vmem:[#allocation12_spill] sm:$0xff] %v15708_v54  ;;  %v12413_v60 = vpop.f32.mrb[233].mxu0  ;;  %v15759_v54 = vld [vmem:[%s19003_s3 + $0x80] sm:$0xff]  }
 0x346   :  { %12660 = vmatmul.mubr.msk.bf16.gmra.mrb[80].mxu0 %vm2474_vm6, %v15123_v37  ;;  %v15710_v56 = vpop.f32.mrb[234].mxu0  ;;  %19474 = vst [vmem:[#allocation93_spill] sm:$0xff] %v15759_v54 }
 0x347   :  { %12663 = vmatprep.mubr.msk.bf16.mxu0 %vm13920_vm3, %v19311_v15  ;;  %19461 = vst [vmem:[#allocation62_spill] sm:$0xff] %v15710_v56  ;;  %v12414_v18 = vpop.f32.mrb[235].mxu0  ;;  %v19471_v56 = vld [vmem:[#allocation56_spill] sm:$0xff] }
 0x348   :  { %12248 = vmatmul.mubr.msk.bf16.gmra.mrb[96].mxu1 %vm2474_vm6, %v15248_v62 }
 0x349   :  { %12251 = vmatprep.mubr.msk.bf16.mxu1 %vm13920_vm3, %v19311_v15 }
 0x34e   :  { %12664 = vmatmul.mubr.msk.bf16.gmra.mrb[84].mxu0 %vm2474_vm6, %v19463_v48 }
 0x34f   :  { %12667 = vmatprep.mubr.msk.bf16.mxu0 %vm13920_vm3, %v19311_v15 }
 0x350   :  { %12252 = vmatmul.mubr.msk.bf16.gmra.mrb[100].mxu1 %vm2474_vm6, %v19462_v32 }
 0x351   :  { %12255 = vmatprep.mubr.msk.bf16.mxu1 %vm13920_vm3, %v19311_v15  ;;  %v15720_v0 = vpop.f32.mrb[236].mxu0 }
 0x352   :  { %19464 = vst [vmem:[#allocation91_spill] sm:$0xff] %v15720_v0  ;;  %v12417_v17 = vpop.f32.mrb[237].mxu0  ;;  %v19470_v0 = vld [vmem:[#allocation58_spill] sm:$0xff] }
 0x353   :  { %v15722_v58 = vpop.f32.mrb[238].mxu0 }
 0x354   :  { %19465 = vst [vmem:[#allocation18_spill] sm:$0xff] %v15722_v58  ;;  %v12418_v27 = vpop.f32.mrb[239].mxu0 }
 0x356   :  { %12668 = vmatmul.mubr.msk.bf16.gmra.mrb[88].mxu0 %vm2474_vm6, %v19467_v31 }
 0x357   :  { %12671 = vmatprep.mubr.msk.bf16.mxu0 %vm13920_vm3, %v19311_v15 }
 0x358   :  { %12256 = vmatmul.mubr.msk.bf16.gmra.mrb[104].mxu1 %vm2474_vm6, %v19466_v33 }
 0x359   :  { %12259 = vmatprep.mubr.msk.bf16.mxu1 %vm13920_vm3, %v19311_v15  ;;  %v15734_v34 = vpop.f32.mrb[240].mxu0 }
 0x35a   :  { %19468 = vst [vmem:[#allocation63_spill] sm:$0xff] %v15734_v34  ;;  %v12421_v18 = vpop.f32.mrb[241].mxu0 }
 0x35b   :  { %v15732_v43 = vpop.f32.mrb[0].mxu1  ;;  %v15738_v27 = vpop.f32.mrb[242].mxu0 }
 0x35c   :  { %v12141_v60 = vpop.f32.mrb[1].mxu1  ;;  %19469 = vst [vmem:[#allocation13_spill] sm:$0xff] %v15738_v27  ;;  %v12422_v58 = vpop.f32.mrb[243].mxu0 }
 0x35d   :  { %v15736_v17 = vpop.f32.mrb[2].mxu1 }
 0x35e   :  { %v12142_v57 = vpop.f32.mrb[3].mxu1  ;;  %12672 = vmatmul.mubr.msk.bf16.gmra.mrb[92].mxu0 %vm2474_vm6, %v19471_v56 }
 0x35f   :  { %12675 = vmatprep.mubr.msk.bf16.mxu0 %vm13920_vm3, %v19311_v15 }
 0x360   :  { %12260 = vmatmul.mubr.msk.bf16.gmra.mrb[108].mxu1 %vm2474_vm6, %v19470_v0 }
 0x361   :  { %12267 = vmatprep.mubr.msk.bf16.mxu1 %vm13920_vm3, %v19311_v15  ;;  %v15750_v18 = vpop.f32.mrb[244].mxu0 }
 0x362   :  { %19472 = vst [vmem:[#allocation64_spill] sm:$0xff] %v15750_v18  ;;  %v12461_v27 = vpop.f32.mrb[245].mxu0 }
 0x363   :  { %v15748_v60 = vpop.f32.mrb[4].mxu1  ;;  %v15754_v58 = vpop.f32.mrb[246].mxu0 }
 0x364   :  { %v12145_v34 = vpop.f32.mrb[5].mxu1  ;;  %19473 = vst [vmem:[#allocation98_spill] sm:$0xff] %v15754_v58  ;;  %v12462_v25 = vpop.f32.mrb[247].mxu0 }
 0x365   :  { %v15752_v57 = vpop.f32.mrb[6].mxu1  ;;  %v15771_v34 = vld [vmem:[%s19003_s3 + $0x88] sm:$0xff]  }
 0x366   :  { %v12146_v39 = vpop.f32.mrb[7].mxu1  ;;  %12676 = vmatmul.mubr.msk.bf16.gmra.mrb[96].mxu0 %vm2474_vm6, %v19475_v26  ;;  %19476 = vst [vmem:[#allocation20_spill] sm:$0xff] %v15771_v34 }
 0x367   :  { %12715 = vmatprep.mubr.msk.bf16.mxu0 %vm13920_vm3, %v19311_v15 }
 0x368   :  { %12268 = vmatmul.mubr.msk.bf16.vlgmr.msra.gmra.mrb[112].mxu1 %vm2474_vm6, %v15073_v23 }
 0x369   :  { %12271 = vmatprep.mubr.msk.bf16.mxu1 %vm13920_vm3, %v19311_v15  ;;  %12296 = vmatpush3.bf16.msra.mxu1 %v15759_v54  ;;  %v15778_v39 = vpop.f32.mrb[248].mxu0  ;;  %v19491_v54 = vld [vmem:[#allocation89_spill] sm:$0xff] }
 0x36a   :  { %12297 = vmatprep.subr.bf16.mxu1 %v19311_v15  ;;  %19477 = vst [vmem:[#allocation65_spill] sm:$0xff] %v15778_v39  ;;  %v12465_v58 = vpop.f32.mrb[249].mxu0 }
 0x36b   :  { %v15776_v25 = vpop.f32.mrb[8].mxu1  ;;  %v15782_v13 = vpop.f32.mrb[250].mxu0 }
 0x36c   :  { %v12149_v27 = vpop.f32.mrb[9].mxu1  ;;  %19478 = vst [vmem:[#allocation100_spill] sm:$0xff] %v15782_v13  ;;  %v12466_v6 = vpop.f32.mrb[251].mxu0 }
 0x36d   :  { %v15780_v18 = vpop.f32.mrb[10].mxu1  ;;  %12298 = vmatpush3.bf16.msra.mxu1 %v15771_v34 }
 0x36e   :  { %v12150_v4 = vpop.f32.mrb[11].mxu1  ;;  %12327 = vmatprep.subr.bf16.mxu1 %v19311_v15  ;;  %12716 = vmatmul.mubr.msk.bf16.vlgmr.msra.gmra.mrb[100].mxu0 %vm2474_vm6, %v15178_v29 }
 0x36f   :  { %12719 = vmatprep.mubr.msk.bf16.mxu0 %vm13920_vm3, %v19311_v15  ;;  %12776 = vmatpush3.bf16.msra.mxu0 %v15510_v1 }
 0x370   :  { %12272 = vmatmul.mubr.msk.bf16.gmra.mrb[116].mxu1 %vm2474_vm6, %v15108_v36  ;;  %12777 = vmatprep.subr.bf16.mxu0 %v19311_v15 }
 0x371   :  { %12275 = vmatprep.mubr.msk.bf16.mxu1 %vm13920_vm3, %v19311_v15  ;;  %v15797_v4 = vpop.f32.mrb[252].mxu0 }
 0x372   :  { %19479 = vst [vmem:[#allocation15_spill] sm:$0xff] %v15797_v4  ;;  %v12469_v27 = vpop.f32.mrb[253].mxu0 }
 0x373   :  { %v15795_v58 = vpop.f32.mrb[12].mxu1  ;;  %v15802_v39 = vpop.f32.mrb[254].mxu0  ;;  %12778 = vmatpush3.bf16.msra.mxu0 %v15525_v20 }
 0x374   :  { %v12153_v6 = vpop.f32.mrb[13].mxu1  ;;  %19480 = vst [vmem:[#allocation66_spill] sm:$0xff] %v15802_v39  ;;  %v12470_v30 = vpop.f32.mrb[255].mxu0  ;;  %12839 = vmatprep.subr.bf16.mxu0 %v19311_v15 }
 0x375   :  { %v15800_v13 = vpop.f32.mrb[14].mxu1 }
 0x376   :  { %v12154_v28 = vpop.f32.mrb[15].mxu1  ;;  %12720 = vmatmul.mubr.msk.bf16.gmra.mrb[104].mxu0 %vm2474_vm6, %v15209_v9 }
 0x377   :  { %12723 = vmatprep.mubr.msk.bf16.mxu0 %vm13920_vm3, %v19311_v15 }
 0x378   :  { %12276 = vmatmul.mubr.msk.bf16.gmra.mrb[120].mxu1 %vm2474_vm6, %v15123_v37 }
 0x379   :  { %12279 = vmatprep.mubr.msk.bf16.mxu1 %vm13920_vm3, %v19311_v15  ;;  %v15816_v28 = vpop.f32.mrb[0].mxu0 }
 0x37a   :  { %19481 = vst [vmem:[#allocation22_spill] sm:$0xff] %v15816_v28  ;;  %v12473_v20 = vpop.f32.mrb[1].mxu0 }
 0x37b   :  { %v15814_v1 = vpop.f32.mrb[16].mxu1  ;;  %v15820_v27 = vpop.f32.mrb[2].mxu0 }
 0x37c   :  { %v12157_v30 = vpop.f32.mrb[17].mxu1  ;;  %19482 = vst [vmem:[#allocation67_spill] sm:$0xff] %v15820_v27  ;;  %v12474_v4 = vpop.f32.mrb[3].mxu0 }
 0x37d   :  { %v15818_v6 = vpop.f32.mrb[18].mxu1 }
 0x37e   :  { %v12158_v39 = vpop.f32.mrb[19].mxu1  ;;  %12724 = vmatmul.mubr.msk.bf16.gmra.mrb[108].mxu0 %vm2474_vm6, %v15233_v11 }
 0x37f   :  { %12727 = vmatprep.mubr.msk.bf16.mxu0 %vm13920_vm3, %v19311_v15 }
 0x380   :  { %12280 = vmatmul.mubr.msk.bf16.gmra.mrb[124].mxu1 %vm2474_vm6, %v19463_v48 }
 0x381   :  { %12283 = vmatprep.mubr.msk.bf16.mxu1 %vm13920_vm3, %v19311_v15  ;;  %v15832_v20 = vpop.f32.mrb[4].mxu0 }
 0x382   :  { %19483 = vst [vmem:[#allocation95_spill] sm:$0xff] %v15832_v20  ;;  %v12477_v27 = vpop.f32.mrb[5].mxu0 }
 0x383   :  { %v15830_v30 = vpop.f32.mrb[20].mxu1  ;;  %v15836_v4 = vpop.f32.mrb[6].mxu0 }
 0x384   :  { %v12161_v28 = vpop.f32.mrb[21].mxu1  ;;  %19484 = vst [vmem:[#allocation17_spill] sm:$0xff] %v15836_v4  ;;  %v12478_v16 = vpop.f32.mrb[7].mxu0 }
 0x385   :  { %v15834_v39 = vpop.f32.mrb[22].mxu1 }
 0x386   :  { %v12162_v49 = vpop.f32.mrb[23].mxu1  ;;  %12728 = vmatmul.mubr.msk.bf16.gmra.mrb[112].mxu0 %vm2474_vm6, %v15248_v62 }
 0x387   :  { %12731 = vmatprep.mubr.msk.bf16.mxu0 %vm13920_vm3, %v19311_v15 }
 0x388   :  { %12284 = vmatmul.mubr.msk.bf16.gmra.mrb[128].mxu1 %vm2474_vm6, %v19467_v31 }
 0x389   :  { %12287 = vmatprep.mubr.msk.bf16.mxu1 %vm13920_vm3, %v19311_v15  ;;  %v15848_v27 = vpop.f32.mrb[8].mxu0 }
 0x38a   :  { %19485 = vst [vmem:[#allocation68_spill] sm:$0xff] %v15848_v27  ;;  %v12481_v4 = vpop.f32.mrb[9].mxu0 }
 0x38b   :  { %v15846_v28 = vpop.f32.mrb[24].mxu1  ;;  %v15852_v16 = vpop.f32.mrb[10].mxu0 }
 0x38c   :  { %v12165_v20 = vpop.f32.mrb[25].mxu1  ;;  %19486 = vst [vmem:[#allocation102_spill] sm:$0xff] %v15852_v16  ;;  %v12482_v24 = vpop.f32.mrb[11].mxu0 }
 0x38d   :  { %v15850_v49 = vpop.f32.mrb[26].mxu1 }
 0x38e   :  { %v12166_v21 = vpop.f32.mrb[27].mxu1  ;;  %12732 = vmatmul.mubr.msk.bf16.gmra.mrb[116].mxu0 %vm2474_vm6, %v19462_v32 }
 0x38f   :  { %12735 = vmatprep.mubr.msk.bf16.mxu0 %vm13920_vm3, %v19311_v15 }
 0x390   :  { %12288 = vmatmul.mubr.msk.bf16.gmra.mrb[132].mxu1 %vm2474_vm6, %v19471_v56 }
 0x391   :  { %12291 = vmatprep.mubr.msk.bf16.mxu1 %vm13920_vm3, %v19311_v15  ;;  %v15862_v4 = vpop.f32.mrb[12].mxu0 }
 0x392   :  { %19487 = vst [vmem:[#allocation97_spill] sm:$0xff] %v15862_v4  ;;  %v12485_v24 = vpop.f32.mrb[13].mxu0 }
 0x393   :  { %v2652_v20 = vpop.f32.mrb[28].mxu1  ;;  %v15867_v38 = vpop.f32.mrb[14].mxu0 }
 0x394   :  { %v15865_v27 = vadd.f32 %v2652_v20, %v15732_v43  ;;  %v12173_v21 = vpop.f32.mrb[29].mxu1  ;;  %19488 = vst [vmem:[#allocation24_spill] sm:$0xff] %v15867_v38  ;;  %v12486_v34 = vpop.f32.mrb[15].mxu0 }
 0x395   :  { %v2655_v16 = vpop.f32.mrb[30].mxu1 }
 0x396   :  { %v15870_v2 = vadd.f32 %v2655_v16, %v15736_v17  ;;  %v12174_v59 = vpop.f32.mrb[31].mxu1  ;;  %12736 = vmatmul.mubr.msk.bf16.gmra.mrb[120].mxu0 %vm2474_vm6, %v19466_v33 }
 0x397   :  { %12739 = vmatprep.mubr.msk.bf16.mxu0 %vm13920_vm3, %v19311_v15 }
 0x398   :  { %12292 = vmatmul.mubr.msk.bf16.gmra.mrb[136].mxu1 %vm2474_vm6, %v19475_v26 }
 0x399   :  { %12299 = vmatprep.mubr.msk.bf16.mxu1 %vm13920_vm3, %v19311_v15  ;;  %v15880_v20 = vpop.f32.mrb[16].mxu0 }
 0x39a   :  { %19489 = vst [vmem:[#allocation69_spill] sm:$0xff] %v15880_v20  ;;  %v12525_v34 = vpop.f32.mrb[17].mxu0 }
 0x39b   :  { %v2660_v43 = vpop.f32.mrb[32].mxu1  ;;  %v15885_v21 = vpop.f32.mrb[18].mxu0 }
 0x39c   :  { %v15883_v17 = vadd.f32 %v2660_v43, %v15748_v60  ;;  %v12177_v59 = vpop.f32.mrb[33].mxu1  ;;  %19490 = vst [vmem:[#allocation104_spill] sm:$0xff] %v15885_v21  ;;  %v12526_v4 = vpop.f32.mrb[19].mxu0  ;;  %v13887_v60 = vld [vmem:[%s19003_s3 + $0x20] sm:$0xff]  }
 0x39d   :  { %v2663_v16 = vpop.f32.mrb[34].mxu1 }
 0x39e   :  { %v15888_v24 = vadd.f32 %v2663_v16, %v15752_v57  ;;  %v12178_v38 = vpop.f32.mrb[35].mxu1  ;;  %12740 = vmatmul.mubr.msk.bf16.gmra.mrb[124].mxu0 %vm2474_vm6, %v19470_v0 }
 0x39f   :  { %12779 = vmatprep.mubr.msk.bf16.mxu0 %vm13920_vm3, %v19311_v15 }
 0x3a0   :  { %12300 = vmatmul.mubr.msk.bf16.vlgmr.msra.gmra.mrb[140].mxu1 %vm2474_vm6, %v19491_v54 }
 0x3a1   :  { %12303 = vmatprep.mubr.msk.bf16.mxu1 %vm13920_vm3, %v19311_v15  ;;  %12328 = vmatpush3.bf16.msra.mxu1 %v13887_v60  ;;  %v15902_v57 = vpop.f32.mrb[20].mxu0  ;;  %v13888_v60 = vld [vmem:[%s19003_s3 + $0x28] sm:$0xff]  }
 0x3a2   :  { %12329 = vmatprep.subr.bf16.mxu1 %v19311_v15  ;;  %19492 = vst [vmem:[#allocation19_spill] sm:$0xff] %v15902_v57  ;;  %v12529_v59 = vpop.f32.mrb[21].mxu0  ;;  %v19494_v57 = vld [vmem:[#allocation14_spill] sm:$0xff] }
 0x3a3   :  { %v2668_v38 = vpop.f32.mrb[36].mxu1  ;;  %v15907_v16 = vpop.f32.mrb[22].mxu0 }
 0x3a4   :  { %v15905_v4 = vadd.f32 %v2668_v38, %v15776_v25  ;;  %v12181_v43 = vpop.f32.mrb[37].mxu1  ;;  %19493 = vst [vmem:[#allocation70_spill] sm:$0xff] %v15907_v16  ;;  %v12530_v54 = vpop.f32.mrb[23].mxu0 }
 0x3a5   :  { %v2671_v34 = vpop.f32.mrb[38].mxu1  ;;  %12330 = vmatpush3.bf16.msra.mxu1 %v13888_v60 }
 0x3a6   :  { %v15913_v21 = vadd.f32 %v2671_v34, %v15780_v18  ;;  %v12182_v20 = vpop.f32.mrb[39].mxu1  ;;  %12359 = vmatprep.subr.bf16.mxu1 %v19311_v15  ;;  %12780 = vmatmul.mubr.msk.bf16.vlgmr.msra.gmra.mrb[128].mxu0 %vm2474_vm6, %v15073_v23 }
 0x3a7   :  { %12783 = vmatprep.mubr.msk.bf16.mxu0 %vm13920_vm3, %v19311_v15  ;;  %12840 = vmatpush3.bf16.msra.mxu0 %v15592_v52 }
 0x3a8   :  { %12304 = vmatmul.mubr.msk.bf16.gmra.mrb[144].mxu1 %vm2474_vm6, %v19494_v57  ;;  %12841 = vmatprep.subr.bf16.mxu0 %v19311_v15 }
 0x3a9   :  { %12307 = vmatprep.mubr.msk.bf16.mxu1 %vm13920_vm3, %v19311_v15  ;;  %v15925_v25 = vpop.f32.mrb[24].mxu0 }
 0x3aa   :  { %19495 = vst [vmem:[#allocation99_spill] sm:$0xff] %v15925_v25  ;;  %v12533_v38 = vpop.f32.mrb[25].mxu0 }
 0x3ab   :  { %v2676_v18 = vpop.f32.mrb[40].mxu1  ;;  %v15931_v23 = vpop.f32.mrb[26].mxu0  ;;  %12842 = vmatpush3.bf16.msra.mxu0 %v15607_v7 }
 0x3ac   :  { %v15929_v54 = vadd.f32 %v2676_v18, %v15795_v58  ;;  %v12185_v20 = vpop.f32.mrb[41].mxu1  ;;  %19496 = vst [vmem:[#allocation26_spill] sm:$0xff] %v15931_v23  ;;  %v12534_v60 = vpop.f32.mrb[27].mxu0  ;;  %12903 = vmatprep.subr.bf16.mxu0 %v19311_v15 }
 0x3ad   :  { %v2679_v43 = vpop.f32.mrb[42].mxu1 }
 0x3ae   :  { %v15934_v59 = vadd.f32 %v2679_v43, %v15800_v13  ;;  %v12186_v34 = vpop.f32.mrb[43].mxu1  ;;  %12784 = vmatmul.mubr.msk.bf16.gmra.mrb[132].mxu0 %vm2474_vm6, %v15108_v36 }
 0x3af   :  { %12787 = vmatprep.mubr.msk.bf16.mxu0 %vm13920_vm3, %v19311_v15 }
 0x3b0   :  { %12308 = vmatmul.mubr.msk.bf16.gmra.mrb[148].mxu1 %vm2474_vm6, %v15430_v12 }
 0x3b1   :  { %12311 = vmatprep.mubr.msk.bf16.mxu1 %vm13920_vm3, %v19311_v15  ;;  %v15946_v13 = vpop.f32.mrb[28].mxu0 }
 0x3b2   :  { %19497 = vst [vmem:[#allocation71_spill] sm:$0xff] %v15946_v13  ;;  %v12537_v18 = vpop.f32.mrb[29].mxu0 }
 0x3b3   :  { %v2684_v52 = vpop.f32.mrb[44].mxu1  ;;  %v15951_v38 = vpop.f32.mrb[30].mxu0 }
 0x3b4   :  { %v15949_v58 = vadd.f32 %v2684_v52, %v15814_v1  ;;  %v12189_v7 = vpop.f32.mrb[45].mxu1  ;;  %19498 = vst [vmem:[#allocation21_spill] sm:$0xff] %v15951_v38  ;;  %v12538_v34 = vpop.f32.mrb[31].mxu0 }
 0x3b5   :  { %v2687_v20 = vpop.f32.mrb[46].mxu1 }
 0x3b6   :  { %v15954_v43 = vadd.f32 %v2687_v20, %v15818_v6  ;;  %v12190_v36 = vpop.f32.mrb[47].mxu1  ;;  %12788 = vmatmul.mubr.msk.bf16.gmra.mrb[136].mxu0 %vm2474_vm6, %v15123_v37 }
 0x3b7   :  { %12791 = vmatprep.mubr.msk.bf16.mxu0 %vm13920_vm3, %v19311_v15 }
 0x3b8   :  { %12312 = vmatmul.mubr.msk.bf16.gmra.mrb[152].mxu1 %vm2474_vm6, %v15444_v53 }
 0x3b9   :  { %12315 = vmatprep.mubr.msk.bf16.mxu1 %vm13920_vm3, %v19311_v15  ;;  %v15964_v60 = vpop.f32.mrb[32].mxu0 }
 0x3ba   :  { %19499 = vst [vmem:[#allocation72_spill] sm:$0xff] %v15964_v60  ;;  %v12541_v7 = vpop.f32.mrb[33].mxu0 }
 0x3bb   :  { %v2692_v1 = vpop.f32.mrb[48].mxu1  ;;  %v15969_v20 = vpop.f32.mrb[34].mxu0 }
 0x3bc   :  { %v15967_v6 = vadd.f32 %v2692_v1, %v15830_v30  ;;  %v12193_v52 = vpop.f32.mrb[49].mxu1  ;;  %19500 = vst [vmem:[#allocation106_spill] sm:$0xff] %v15969_v20  ;;  %v12542_v34 = vpop.f32.mrb[35].mxu0  ;;  %v15983_v30 = vrot.slane %v15432_v61, 2  ;;  %v19503_v61 = vrot.slane %v15446_v55, 2 }
 0x3bd   :  { %v2695_v18 = vpop.f32.mrb[50].mxu1 }
 0x3be   :  { %v15972_v36 = vadd.f32 %v2695_v18, %v15834_v39  ;;  %v12194_v37 = vpop.f32.mrb[51].mxu1  ;;  %12792 = vmatmul.mubr.msk.bf16.gmra.mrb[140].mxu0 %vm2474_vm6, %v19463_v48  ;;  %v15999_v38 = vsel %vm2380_vm5, %v19503_v61, %v15983_v30 }
 0x3bf   :  { %12795 = vmatprep.mubr.msk.bf16.mxu0 %vm13920_vm3, %v19311_v15 }
 0x3c0   :  { %12316 = vmatmul.mubr.msk.bf16.gmra.mrb[156].mxu1 %vm2474_vm6, %v15455_v35 }
 0x3c1   :  { %12319 = vmatprep.mubr.msk.bf16.mxu1 %vm13920_vm3, %v19311_v15  ;;  %v15985_v39 = vpop.f32.mrb[36].mxu0 }
 0x3c2   :  { %19501 = vst [vmem:[#allocation101_spill] sm:$0xff] %v15985_v39  ;;  %v12545_v18 = vpop.f32.mrb[37].mxu0 }
 0x3c3   :  { %v2700_v1 = vpop.f32.mrb[52].mxu1  ;;  %v15990_v34 = vpop.f32.mrb[38].mxu0 }
 0x3c4   :  { %v15988_v52 = vadd.f32 %v2700_v1, %v15846_v28  ;;  %v12197_v7 = vpop.f32.mrb[53].mxu1  ;;  %19502 = vst [vmem:[#allocation28_spill] sm:$0xff] %v15990_v34  ;;  %v12546_v60 = vpop.f32.mrb[39].mxu0 }
 0x3c5   :  { %v2703_v37 = vpop.f32.mrb[54].mxu1 }
 0x3c6   :  { %v15993_v48 = vadd.f32 %v2703_v37, %v15850_v49  ;;  %v12198_v20 = vpop.f32.mrb[55].mxu1  ;;  %12796 = vmatmul.mubr.msk.bf16.gmra.mrb[144].mxu0 %vm2474_vm6, %v19467_v31 }
 0x3c7   :  { %12799 = vmatprep.mubr.msk.bf16.mxu0 %vm13920_vm3, %v19311_v15 }
 0x3c8   :  { %12320 = vmatmul.mubr.msk.bf16.gmra.mrb[160].mxu1 %vm2474_vm6, %v15999_v38 }
 0x3c9   :  { %12323 = vmatprep.mubr.msk.bf16.mxu1 %vm13920_vm3, %v19311_v15  ;;  %v16009_v49 = vpop.f32.mrb[40].mxu0 }
 0x3ca   :  { %19504 = vst [vmem:[#allocation73_spill] sm:$0xff] %v16009_v49  ;;  %v12549_v20 = vpop.f32.mrb[41].mxu0 }
 0x3cb   :  { %v2786_v28 = vpop.f32.mrb[56].mxu1  ;;  %v16014_v7 = vpop.f32.mrb[42].mxu0 }
 0x3cc   :  { %v16012_v55 = vadd.f32 %v2786_v28, %v15865_v27  ;;  %v12205_v60 = vpop.f32.mrb[57].mxu1  ;;  %19505 = vst [vmem:[#allocation108_spill] sm:$0xff] %v16014_v7  ;;  %v12550_v37 = vpop.f32.mrb[43].mxu0  ;;  %v19510_v7 = vld [vmem:[#allocation40_spill] sm:$0xff] }
 0x3cd   :  { %v2789_v1 = vpop.f32.mrb[58].mxu1 }
 0x3ce   :  { %v16017_v18 = vadd.f32 %v2789_v1, %v15870_v2  ;;  %v12206_v31 = vpop.f32.mrb[59].mxu1  ;;  %12800 = vmatmul.mubr.msk.bf16.gmra.mrb[148].mxu0 %vm2474_vm6, %v19471_v56 }
 0x3cf   :  { %12803 = vmatprep.mubr.msk.bf16.mxu0 %vm13920_vm3, %v19311_v15 }
 0x3d0   :  { %12324 = vmatmul.mubr.msk.bf16.gmra.mrb[164].mxu1 %vm2474_vm6, %v15983_v30 }
 0x3d1   :  { %12331 = vmatprep.mubr.msk.bf16.mxu1 %vm13920_vm3, %v19311_v15  ;;  %v16027_v61 = vpop.f32.mrb[44].mxu0 }
 0x3d2   :  { %19506 = vst [vmem:[#allocation23_spill] sm:$0xff] %v16027_v61  ;;  %v12589_v60 = vpop.f32.mrb[45].mxu0 }
 0x3d3   :  { %v2794_v27 = vpop.f32.mrb[60].mxu1  ;;  %v16032_v1 = vpop.f32.mrb[46].mxu0 }
 0x3d4   :  { %v16030_v2 = vadd.f32 %v2794_v27, %v15883_v17  ;;  %v12209_v28 = vpop.f32.mrb[61].mxu1  ;;  %19507 = vst [vmem:[#allocation74_spill] sm:$0xff] %v16032_v1  ;;  %v12590_v37 = vpop.f32.mrb[47].mxu0 }
 0x3d5   :  { %v2797_v20 = vpop.f32.mrb[62].mxu1 }
 0x3d6   :  { %v16035_v31 = vadd.f32 %v2797_v20, %v15888_v24  ;;  %v12210_v56 = vpop.f32.mrb[63].mxu1  ;;  %12804 = vmatmul.mubr.msk.bf16.gmra.mrb[152].mxu0 %vm2474_vm6, %v19475_v26 }
 0x3d7   :  { %12843 = vmatprep.mubr.msk.bf16.mxu0 %vm13920_vm3, %v19311_v15 }
 0x3d8   :  { %12332 = vmatmul.mubr.msk.bf16.vlgmr.msra.gmra.mrb[168].mxu1 %vm2474_vm6, %v15178_v29 }
 0x3d9   :  { %12335 = vmatprep.mubr.msk.bf16.mxu1 %vm13920_vm3, %v19311_v15  ;;  %12360 = vmatpush3.bf16.msra.mxu1 %v15329_v42  ;;  %v16047_v24 = vpop.f32.mrb[48].mxu0 }
 0x3da   :  { %12361 = vmatprep.subr.bf16.mxu1 %v19311_v15  ;;  %19508 = vst [vmem:[#allocation103_spill] sm:$0xff] %v16047_v24  ;;  %v12593_v60 = vpop.f32.mrb[49].mxu0 }
 0x3db   :  { %v2802_v17 = vpop.f32.mrb[64].mxu1  ;;  %v16052_v26 = vpop.f32.mrb[50].mxu0 }
 0x3dc   :  { %v16050_v27 = vadd.f32 %v2802_v17, %v15905_v4  ;;  %v12213_v28 = vpop.f32.mrb[65].mxu1  ;;  %19509 = vst [vmem:[#allocation30_spill] sm:$0xff] %v16052_v26  ;;  %v12594_v37 = vpop.f32.mrb[51].mxu0 }
 0x3dd   :  { %v2805_v20 = vpop.f32.mrb[66].mxu1  ;;  %12362 = vmatpush3.bf16.msra.mxu1 %v15357_v46 }
 0x3de   :  { %v16056_v42 = vadd.f32 %v2805_v20, %v15913_v21  ;;  %v12214_v56 = vpop.f32.mrb[67].mxu1  ;;  %12423 = vmatprep.subr.bf16.mxu1 %v19311_v15  ;;  %12844 = vmatmul.mubr.msk.bf16.vlgmr.msra.gmra.mrb[156].mxu0 %vm2474_vm6, %v19510_v7 }
 0x3df   :  { %12847 = vmatprep.mubr.msk.bf16.mxu0 %vm13920_vm3, %v19311_v15 }
 0x3e0   :  { %12336 = vmatmul.mubr.msk.bf16.gmra.mrb[172].mxu1 %vm2474_vm6, %v15209_v9 }
 0x3e1   :  { %12339 = vmatprep.mubr.msk.bf16.mxu1 %vm13920_vm3, %v19311_v15  ;;  %v16067_v4 = vpop.f32.mrb[52].mxu0 }
 0x3e2   :  { %19511 = vst [vmem:[#allocation75_spill] sm:$0xff] %v16067_v4  ;;  %v12597_v28 = vpop.f32.mrb[53].mxu0 }
 0x3e3   :  { %v2810_v46 = vpop.f32.mrb[68].mxu1  ;;  %v16072_v20 = vpop.f32.mrb[54].mxu0 }
 0x3e4   :  { %v16070_v21 = vadd.f32 %v2810_v46, %v15929_v54  ;;  %v12217_v17 = vpop.f32.mrb[69].mxu1  ;;  %19512 = vst [vmem:[#allocation25_spill] sm:$0xff] %v16072_v20  ;;  %v12598_v37 = vpop.f32.mrb[55].mxu0  ;;  %v19584_v20 = vld [vmem:[#allocation46_spill] sm:$0xff] }
 0x3e5   :  { %v2813_v60 = vpop.f32.mrb[70].mxu1 }
 0x3e6   :  { %v16075_v56 = vadd.f32 %v2813_v60, %v15934_v59  ;;  %v12218_v7 = vpop.f32.mrb[71].mxu1  ;;  %12848 = vmatmul.mubr.msk.bf16.gmra.mrb[160].mxu0 %vm2474_vm6, %v14963_v51 }
 0x3e7   :  { %12851 = vmatprep.mubr.msk.bf16.mxu0 %vm13920_vm3, %v19311_v15 }
 0x3e8   :  { %12340 = vmatmul.mubr.msk.bf16.gmra.mrb[176].mxu1 %vm2474_vm6, %v15233_v11 }
 0x3e9   :  { %12343 = vmatprep.mubr.msk.bf16.mxu1 %vm13920_vm3, %v19311_v15  ;;  %v16085_v46 = vpop.f32.mrb[56].mxu0 }
 0x3ea   :  { %19513 = vst [vmem:[#allocation76_spill] sm:$0xff] %v16085_v46  ;;  %v12601_v28 = vpop.f32.mrb[57].mxu0 }
 0x3eb   :  { %v2818_v54 = vpop.f32.mrb[72].mxu1  ;;  %v16090_v7 = vpop.f32.mrb[58].mxu0 }
 0x3ec   :  { %v16088_v59 = vadd.f32 %v2818_v54, %v15949_v58  ;;  %v12221_v17 = vpop.f32.mrb[73].mxu1  ;;  %19514 = vst [vmem:[#allocation110_spill] sm:$0xff] %v16090_v7  ;;  %v12602_v49 = vpop.f32.mrb[59].mxu0  ;;  %v19581_v7 = vld [vmem:[#allocation45_spill] sm:$0xff] }
 0x3ed   :  { %v2821_v60 = vpop.f32.mrb[74].mxu1 }
 0x3ee   :  { %v16093_v37 = vadd.f32 %v2821_v60, %v15954_v43  ;;  %v12222_v51 = vpop.f32.mrb[75].mxu1  ;;  %12852 = vmatmul.mubr.msk.bf16.gmra.mrb[164].mxu0 %vm2474_vm6, %v14986_v40 }
 0x3ef   :  { %12855 = vmatprep.mubr.msk.bf16.mxu0 %vm13920_vm3, %v19311_v15 }
 0x3f0   :  { %12344 = vmatmul.mubr.msk.bf16.gmra.mrb[180].mxu1 %vm2474_vm6, %v15248_v62 }
 0x3f1   :  { %12347 = vmatprep.mubr.msk.bf16.mxu1 %vm13920_vm3, %v19311_v15  ;;  %v16103_v54 = vpop.f32.mrb[60].mxu0 }
 0x3f2   :  { %19515 = vst [vmem:[#allocation105_spill] sm:$0xff] %v16103_v54  ;;  %v12605_v49 = vpop.f32.mrb[61].mxu0 }
 0x3f3   :  { %v2826_v58 = vpop.f32.mrb[76].mxu1  ;;  %v16108_v60 = vpop.f32.mrb[62].mxu0 }
 0x3f4   :  { %v16106_v43 = vadd.f32 %v2826_v58, %v15967_v6  ;;  %v12225_v17 = vpop.f32.mrb[77].mxu1  ;;  %19516 = vst [vmem:[#allocation32_spill] sm:$0xff] %v16108_v60  ;;  %v12606_v34 = vpop.f32.mrb[63].mxu0 }
 0x3f5   :  { %v2829_v28 = vpop.f32.mrb[78].mxu1 }
 0x3f6   :  { %v16111_v51 = vadd.f32 %v2829_v28, %v15972_v36  ;;  %v12226_v40 = vpop.f32.mrb[79].mxu1  ;;  %12856 = vmatmul.mubr.msk.bf16.gmra.mrb[168].mxu0 %vm2474_vm6, %v14994_v44 }
 0x3f7   :  { %12859 = vmatprep.mubr.msk.bf16.mxu0 %vm13920_vm3, %v19311_v15 }
 0x3f8   :  { %12348 = vmatmul.mubr.msk.bf16.gmra.mrb[184].mxu1 %vm2474_vm6, %v19462_v32 }
 0x3f9   :  { %12351 = vmatprep.mubr.msk.bf16.mxu1 %vm13920_vm3, %v19311_v15  ;;  %v16121_v58 = vpop.f32.mrb[64].mxu0 }
 0x3fa   :  { %19517 = vst [vmem:[#allocation77_spill] sm:$0xff] %v16121_v58  ;;  %v12609_v34 = vpop.f32.mrb[65].mxu0 }
 0x3fb   :  { %v2834_v6 = vpop.f32.mrb[80].mxu1  ;;  %v16126_v28 = vpop.f32.mrb[66].mxu0 }
 0x3fc   :  { %v16124_v36 = vadd.f32 %v2834_v6, %v15988_v52  ;;  %v12229_v17 = vpop.f32.mrb[81].mxu1  ;;  %19518 = vst [vmem:[#allocation112_spill] sm:$0xff] %v16126_v28  ;;  %v12610_v39 = vpop.f32.mrb[67].mxu0 }
 0x3fd   :  { %v2837_v49 = vpop.f32.mrb[82].mxu1 }
 0x3fe   :  { %v16129_v40 = vadd.f32 %v2837_v49, %v15993_v48  ;;  %v12230_v44 = vpop.f32.mrb[83].mxu1  ;;  %12860 = vmatmul.mubr.msk.bf16.gmra.mrb[172].mxu0 %vm2474_vm6, %v15013_v3 }
 0x3ff   :  { %12863 = vmatprep.mubr.msk.bf16.mxu0 %vm13920_vm3, %v19311_v15 }
 0x400   :  { %12352 = vmatmul.mubr.msk.bf16.gmra.mrb[188].mxu1 %vm2474_vm6, %v19466_v33 }
 0x401   :  { %12355 = vmatprep.mubr.msk.bf16.mxu1 %vm13920_vm3, %v19311_v15  ;;  %v16139_v6 = vpop.f32.mrb[68].mxu0 }
 0x402   :  { %19519 = vst [vmem:[#allocation27_spill] sm:$0xff] %v16139_v6  ;;  %v12613_v39 = vpop.f32.mrb[69].mxu0  ;;  %v19557_v6 = vld [vmem:[#allocation52_spill] sm:$0xff] }
 0x403   :  { %v2934_v52 = vpop.f32.mrb[84].mxu1  ;;  %v16144_v49 = vpop.f32.mrb[70].mxu0 }
 0x404   :  { %v16142_v48 = vadd.f32 %v2934_v52, %v16012_v55  ;;  %v12237_v17 = vpop.f32.mrb[85].mxu1  ;;  %19520 = vst [vmem:[#allocation78_spill] sm:$0xff] %v16144_v49  ;;  %v12614_v28 = vpop.f32.mrb[71].mxu0 }
 0x405   :  { %v2937_v34 = vpop.f32.mrb[86].mxu1 }
 0x406   :  { %v16147_v44 = vadd.f32 %v2937_v34, %v16017_v18  ;;  %v12238_v3 = vpop.f32.mrb[87].mxu1  ;;  %12864 = vmatmul.mubr.msk.bf16.gmra.mrb[176].mxu0 %vm2474_vm6, %v15022_v8 }
 0x407   :  { %12867 = vmatprep.mubr.msk.bf16.mxu0 %vm13920_vm3, %v19311_v15 }
 0x408   :  { %12356 = vmatmul.mubr.msk.bf16.gmra.mrb[192].mxu1 %vm2474_vm6, %v19470_v0 }
 0x409   :  { %12363 = vmatprep.mubr.msk.bf16.mxu1 %vm13920_vm3, %v19311_v15  ;;  %v16157_v52 = vpop.f32.mrb[72].mxu0 }
 0x40a   :  { %19521 = vst [vmem:[#allocation107_spill] sm:$0xff] %v16157_v52  ;;  %v12653_v28 = vpop.f32.mrb[73].mxu0  ;;  %v19554_v52 = vld [vmem:[#allocation50_spill] sm:$0xff] }
 0x40b   :  { %v2942_v55 = vpop.f32.mrb[88].mxu1  ;;  %v16162_v34 = vpop.f32.mrb[74].mxu0 }
 0x40c   :  { %v16160_v18 = vadd.f32 %v2942_v55, %v16030_v2  ;;  %v12241_v17 = vpop.f32.mrb[89].mxu1  ;;  %19522 = vst [vmem:[#allocation34_spill] sm:$0xff] %v16162_v34  ;;  %v12654_v49 = vpop.f32.mrb[75].mxu0 }
 0x40d   :  { %v2945_v39 = vpop.f32.mrb[90].mxu1 }
 0x40e   :  { %v16165_v3 = vadd.f32 %v2945_v39, %v16035_v31  ;;  %v12242_v8 = vpop.f32.mrb[91].mxu1  ;;  %12868 = vmatmul.mubr.msk.bf16.gmra.mrb[180].mxu0 %vm2474_vm6, %v15490_v41 }
 0x40f   :  { %12911 = vmatprep.mubr.msk.bf16.mxu0 %vm13920_vm3, %v19311_v15 }
 0x410   :  { %12364 = vmatmul.mubr.msk.bf16.vlgmr.msra.gmra.mrb[196].mxu1 %vm2474_vm6, %v14915_v47 }
 0x411   :  { %12367 = vmatprep.mubr.msk.bf16.mxu1 %vm13920_vm3, %v19311_v15  ;;  %12424 = vmatpush3.bf16.msra.mxu1 %v15572_v14  ;;  %v16177_v31 = vpop.f32.mrb[76].mxu0 }
 0x412   :  { %12425 = vmatprep.subr.bf16.mxu1 %v19311_v15  ;;  %19523 = vst [vmem:[#allocation79_spill] sm:$0xff] %v16177_v31  ;;  %v12657_v17 = vpop.f32.mrb[77].mxu0 }
 0x413   :  { %v2950_v2 = vpop.f32.mrb[92].mxu1  ;;  %v16182_v41 = vpop.f32.mrb[78].mxu0 }
 0x414   :  { %v16180_v49 = vadd.f32 %v2950_v2, %v16050_v27  ;;  %v12245_v55 = vpop.f32.mrb[93].mxu1  ;;  %19524 = vst [vmem:[#allocation29_spill] sm:$0xff] %v16182_v41  ;;  %v12658_v8 = vpop.f32.mrb[79].mxu0 }
 0x415   :  { %v2953_v28 = vpop.f32.mrb[94].mxu1  ;;  %12426 = vmatpush3.bf16.msra.mxu1 %v15583_v19 }
 0x416   :  { %v16186_v14 = vadd.f32 %v2953_v28, %v16056_v42  ;;  %v12246_v39 = vpop.f32.mrb[95].mxu1  ;;  %12487 = vmatprep.subr.bf16.mxu1 %v19311_v15 }
 0x418   :  { %12368 = vmatmul.mubr.msk.bf16.gmra.mrb[200].mxu1 %vm2474_vm6, %v14965_v63 }
 0x419   :  { %12371 = vmatprep.mubr.msk.bf16.mxu1 %vm13920_vm3, %v19311_v15  ;;  %v16193_v2 = vpop.f32.mrb[80].mxu0 }
 0x41a   :  { %19525 = vst [vmem:[#allocation80_spill] sm:$0xff] %v16193_v2  ;;  %v12661_v17 = vpop.f32.mrb[81].mxu0 }
 0x41b   :  { %v2958_v27 = vpop.f32.mrb[96].mxu1  ;;  %v16198_v28 = vpop.f32.mrb[82].mxu0 }
 0x41c   :  { %v16196_v55 = vadd.f32 %v2958_v27, %v16070_v21  ;;  %v12249_v19 = vpop.f32.mrb[97].mxu1  ;;  %19526 = vst [vmem:[#allocation114_spill] sm:$0xff] %v16198_v28  ;;  %v12662_v41 = vpop.f32.mrb[83].mxu0 }
 0x41d   :  { %v2961_v42 = vpop.f32.mrb[98].mxu1 }
 0x41e   :  { %v16201_v39 = vadd.f32 %v2961_v42, %v16075_v56  ;;  %v12250_v8 = vpop.f32.mrb[99].mxu1 }
 0x420   :  { %12372 = vmatmul.mubr.msk.bf16.gmra.mrb[204].mxu1 %vm2474_vm6, %v14942_v50 }
 0x421   :  { %12375 = vmatprep.mubr.msk.bf16.mxu1 %vm13920_vm3, %v19311_v15  ;;  %v16207_v31 = vpop.f32.mrb[84].mxu0 }
 0x422   :  { %19527 = vst [vmem:[#allocation109_spill] sm:$0xff] %v16207_v31  ;;  %v12665_v19 = vpop.f32.mrb[85].mxu0 }
 0x423   :  { %v2966_v2 = vpop.f32.mrb[100].mxu1  ;;  %v16212_v28 = vpop.f32.mrb[86].mxu0 }
 0x424   :  { %v16210_v21 = vadd.f32 %v2966_v2, %v16088_v59  ;;  %v12253_v27 = vpop.f32.mrb[101].mxu1  ;;  %19528 = vst [vmem:[#allocation36_spill] sm:$0xff] %v16212_v28  ;;  %v12666_v42 = vpop.f32.mrb[87].mxu0 }
 0x425   :  { %v2969_v17 = vpop.f32.mrb[102].mxu1 }
 0x426   :  { %v16215_v56 = vadd.f32 %v2969_v17, %v16093_v37  ;;  %v12254_v41 = vpop.f32.mrb[103].mxu1 }
 0x428   :  { %12376 = vmatmul.mubr.msk.bf16.gmra.mrb[208].mxu1 %vm2474_vm6, %v14997_v5 }
 0x429   :  { %12379 = vmatprep.mubr.msk.bf16.mxu1 %vm13920_vm3, %v19311_v15  ;;  %v16221_v31 = vpop.f32.mrb[88].mxu0 }
 0x42a   :  { %19529 = vst [vmem:[#allocation81_spill] sm:$0xff] %v16221_v31  ;;  %v12669_v27 = vpop.f32.mrb[89].mxu0 }
 0x42b   :  { %v2974_v8 = vpop.f32.mrb[104].mxu1  ;;  %v16226_v28 = vpop.f32.mrb[90].mxu0 }
 0x42c   :  { %v16224_v59 = vadd.f32 %v2974_v8, %v16106_v43  ;;  %v12257_v2 = vpop.f32.mrb[105].mxu1  ;;  %19530 = vst [vmem:[#allocation116_spill] sm:$0xff] %v16226_v28  ;;  %v12670_v41 = vpop.f32.mrb[91].mxu0 }
 0x42d   :  { %v2977_v19 = vpop.f32.mrb[106].mxu1 }
 0x42e   :  { %v16229_v37 = vadd.f32 %v2977_v19, %v16111_v51  ;;  %v12258_v17 = vpop.f32.mrb[107].mxu1 }
 0x430   :  { %12380 = vmatmul.mubr.msk.bf16.gmra.mrb[212].mxu1 %vm2474_vm6, %v14974_v10 }
 0x431   :  { %12383 = vmatprep.mubr.msk.bf16.mxu1 %vm13920_vm3, %v19311_v15  ;;  %v16235_v31 = vpop.f32.mrb[92].mxu0 }
 0x432   :  { %19531 = vst [vmem:[#allocation31_spill] sm:$0xff] %v16235_v31  ;;  %v12673_v2 = vpop.f32.mrb[93].mxu0 }
 0x433   :  { %v2982_v42 = vpop.f32.mrb[108].mxu1  ;;  %v16240_v28 = vpop.f32.mrb[94].mxu0 }
 0x434   :  { %v16238_v43 = vadd.f32 %v2982_v42, %v16124_v36  ;;  %v12261_v8 = vpop.f32.mrb[109].mxu1  ;;  %19532 = vst [vmem:[#allocation82_spill] sm:$0xff] %v16240_v28  ;;  %v12674_v17 = vpop.f32.mrb[95].mxu0 }
 0x435   :  { %v2985_v27 = vpop.f32.mrb[110].mxu1 }
 0x436   :  { %v16243_v51 = vadd.f32 %v2985_v27, %v16129_v40  ;;  %v12262_v19 = vpop.f32.mrb[111].mxu1 }
 0x438   :  { %12384 = vmatmul.mubr.msk.bf16.gmra.mrb[216].mxu1 %vm2474_vm6, %v15030_v45  ;;  %v19594_v45 = vld [vmem:[#allocation59_spill] sm:$0xff] }
 0x439   :  { %12387 = vmatprep.mubr.msk.bf16.mxu1 %vm13920_vm3, %v19311_v15  ;;  %v16249_v31 = vpop.f32.mrb[96].mxu0 }
 0x43a   :  { %19533 = vst [vmem:[#allocation111_spill] sm:$0xff] %v16249_v31  ;;  %v12677_v8 = vpop.f32.mrb[97].mxu0 }
 0x43b   :  { %v3103_v41 = vpop.f32.mrb[112].mxu1  ;;  %v16254_v28 = vpop.f32.mrb[98].mxu0 }
 0x43c   :  { %v16252_v36 = vadd.f32 %v3103_v41, %v16142_v48  ;;  %v12269_v42 = vpop.f32.mrb[113].mxu1  ;;  %19534 = vst [vmem:[#allocation38_spill] sm:$0xff] %v16254_v28  ;;  %v12678_v19 = vpop.f32.mrb[99].mxu0 }
 0x43d   :  { %v3106_v2 = vpop.f32.mrb[114].mxu1  ;;  %v19537_v19 = vld [vmem:[#allocation89_spill] sm:$0xff] }
 0x43e   :  { %v16257_v40 = vadd.f32 %v3106_v2, %v16147_v44  ;;  %v12270_v27 = vpop.f32.mrb[115].mxu1 }
 0x440   :  { %12388 = vmatmul.mubr.msk.bf16.gmra.mrb[220].mxu1 %vm2474_vm6, %v15006_v22 }
 0x441   :  { %12427 = vmatprep.mubr.msk.bf16.mxu1 %vm13920_vm3, %v19311_v15  ;;  %v16263_v31 = vpop.f32.mrb[100].mxu0 }
 0x442   :  { %19535 = vst [vmem:[#allocation83_spill] sm:$0xff] %v16263_v31  ;;  %v12717_v42 = vpop.f32.mrb[101].mxu0  ;;  %v19538_v31 = vld [vmem:[#allocation93_spill] sm:$0xff] }
 0x443   :  { %v3111_v17 = vpop.f32.mrb[116].mxu1  ;;  %v16268_v28 = vpop.f32.mrb[102].mxu0 }
 0x444   :  { %v16266_v48 = vadd.f32 %v3111_v17, %v16160_v18  ;;  %v12273_v41 = vpop.f32.mrb[117].mxu1  ;;  %19536 = vst [vmem:[#allocation33_spill] sm:$0xff] %v16268_v28  ;;  %v12718_v27 = vpop.f32.mrb[103].mxu0 }
 0x445   :  { %v3114_v8 = vpop.f32.mrb[118].mxu1  ;;  %v19541_v27 = vld [vmem:[#allocation20_spill] sm:$0xff] }
 0x446   :  { %v16271_v44 = vadd.f32 %v3114_v8, %v16165_v3  ;;  %v12274_v2 = vpop.f32.mrb[119].mxu1 }
 0x448   :  { %12428 = vmatmul.mubr.msk.bf16.vlgmr.msra.gmra.mrb[224].mxu1 %vm2474_vm6, %v19537_v19 }
 0x449   :  { %12431 = vmatprep.mubr.msk.bf16.mxu1 %vm13920_vm3, %v19311_v15  ;;  %12488 = vmatpush3.bf16.msra.mxu1 %v19538_v31  ;;  %v16279_v17 = vpop.f32.mrb[104].mxu0 }
 0x44a   :  { %12489 = vmatprep.subr.bf16.mxu1 %v19311_v15  ;;  %19539 = vst [vmem:[#allocation84_spill] sm:$0xff] %v16279_v17  ;;  %v12721_v42 = vpop.f32.mrb[105].mxu0 }
 0x44b   :  { %v3119_v18 = vpop.f32.mrb[120].mxu1  ;;  %v16284_v2 = vpop.f32.mrb[106].mxu0 }
 0x44c   :  { %v16282_v41 = vadd.f32 %v3119_v18, %v16180_v49  ;;  %v12277_v3 = vpop.f32.mrb[121].mxu1  ;;  %19540 = vst [vmem:[#allocation117_spill] sm:$0xff] %v16284_v2  ;;  %v12722_v31 = vpop.f32.mrb[107].mxu0 }
 0x44d   :  { %v3122_v8 = vpop.f32.mrb[122].mxu1  ;;  %12490 = vmatpush3.bf16.msra.mxu1 %v19541_v27 }
 0x44e   :  { %v16288_v28 = vadd.f32 %v3122_v8, %v16186_v14  ;;  %v12278_v34 = vpop.f32.mrb[123].mxu1  ;;  %12551 = vmatprep.subr.bf16.mxu1 %v19311_v15 }
 0x450   :  { %12432 = vmatmul.mubr.msk.bf16.gmra.mrb[228].mxu1 %vm2474_vm6, %v19494_v57 }
 0x451   :  { %12435 = vmatprep.mubr.msk.bf16.mxu1 %vm13920_vm3, %v19311_v15  ;;  %v16295_v18 = vpop.f32.mrb[108].mxu0 }
 0x452   :  { %19542 = vst [vmem:[#allocation113_spill] sm:$0xff] %v16295_v18  ;;  %v12725_v27 = vpop.f32.mrb[109].mxu0 }
 0x453   :  { %v3127_v49 = vpop.f32.mrb[124].mxu1  ;;  %v16300_v8 = vpop.f32.mrb[110].mxu0 }
 0x454   :  { %v16298_v3 = vadd.f32 %v3127_v49, %v16196_v55  ;;  %v12281_v42 = vpop.f32.mrb[125].mxu1  ;;  %19543 = vst [vmem:[#allocation39_spill] sm:$0xff] %v16300_v8  ;;  %v12726_v2 = vpop.f32.mrb[111].mxu0 }
 0x455   :  { %v3130_v14 = vpop.f32.mrb[126].mxu1 }
 0x456   :  { %v16303_v34 = vadd.f32 %v3130_v14, %v16201_v39  ;;  %v12282_v31 = vpop.f32.mrb[127].mxu1 }
 0x458   :  { %12436 = vmatmul.mubr.msk.bf16.gmra.mrb[232].mxu1 %vm2474_vm6, %v15430_v12 }
 0x459   :  { %12439 = vmatprep.mubr.msk.bf16.mxu1 %vm13920_vm3, %v19311_v15  ;;  %v16309_v17 = vpop.f32.mrb[112].mxu0 }
 0x45a   :  { %19544 = vst [vmem:[#allocation85_spill] sm:$0xff] %v16309_v17  ;;  %v12729_v42 = vpop.f32.mrb[113].mxu0 }
 0x45b   :  { %v3135_v18 = vpop.f32.mrb[128].mxu1  ;;  %v16314_v8 = vpop.f32.mrb[114].mxu0 }
 0x45c   :  { %v16312_v55 = vadd.f32 %v3135_v18, %v16210_v21  ;;  %v12285_v49 = vpop.f32.mrb[129].mxu1  ;;  %19545 = vst [vmem:[#allocation35_spill] sm:$0xff] %v16314_v8  ;;  %v12730_v14 = vpop.f32.mrb[115].mxu0 }
 0x45d   :  { %v3138_v27 = vpop.f32.mrb[130].mxu1 }
 0x45e   :  { %v16317_v39 = vadd.f32 %v3138_v27, %v16215_v56  ;;  %v12286_v2 = vpop.f32.mrb[131].mxu1 }
 0x460   :  { %12440 = vmatmul.mubr.msk.bf16.gmra.mrb[236].mxu1 %vm2474_vm6, %v15444_v53 }
 0x461   :  { %12443 = vmatprep.mubr.msk.bf16.mxu1 %vm13920_vm3, %v19311_v15  ;;  %v16323_v17 = vpop.f32.mrb[116].mxu0 }
 0x462   :  { %19546 = vst [vmem:[#allocation86_spill] sm:$0xff] %v16323_v17  ;;  %v12733_v49 = vpop.f32.mrb[117].mxu0 }
 0x463   :  { %v3143_v31 = vpop.f32.mrb[132].mxu1  ;;  %v16328_v8 = vpop.f32.mrb[118].mxu0 }
 0x464   :  { %v16326_v21 = vadd.f32 %v3143_v31, %v16224_v59  ;;  %v12289_v18 = vpop.f32.mrb[133].mxu1  ;;  %19547 = vst [vmem:[#allocation115_spill] sm:$0xff] %v16328_v8  ;;  %v12734_v2 = vpop.f32.mrb[119].mxu0 }
 0x465   :  { %v3146_v42 = vpop.f32.mrb[134].mxu1 }
 0x466   :  { %v16331_v56 = vadd.f32 %v3146_v42, %v16229_v37  ;;  %v12290_v27 = vpop.f32.mrb[135].mxu1 }
 0x468   :  { %12444 = vmatmul.mubr.msk.bf16.gmra.mrb[240].mxu1 %vm2474_vm6, %v15455_v35 }
 0x469   :  { %12447 = vmatprep.mubr.msk.bf16.mxu1 %vm13920_vm3, %v19311_v15  ;;  %v16337_v17 = vpop.f32.mrb[120].mxu0 }
 0x46a   :  { %19548 = vst [vmem:[#allocation41_spill] sm:$0xff] %v16337_v17  ;;  %v12737_v18 = vpop.f32.mrb[121].mxu0 }
 0x46b   :  { %v3151_v14 = vpop.f32.mrb[136].mxu1  ;;  %v16342_v8 = vpop.f32.mrb[122].mxu0 }
 0x46c   :  { %v16340_v59 = vadd.f32 %v3151_v14, %v16238_v43  ;;  %v12293_v31 = vpop.f32.mrb[137].mxu1  ;;  %19549 = vst [vmem:[#allocation87_spill] sm:$0xff] %v16342_v8  ;;  %v12738_v27 = vpop.f32.mrb[123].mxu0 }
 0x46d   :  { %v3154_v49 = vpop.f32.mrb[138].mxu1 }
 0x46e   :  { %v16345_v37 = vadd.f32 %v3154_v49, %v16243_v51  ;;  %v12294_v42 = vpop.f32.mrb[139].mxu1 }
 0x470   :  { %12448 = vmatmul.mubr.msk.bf16.gmra.mrb[244].mxu1 %vm2474_vm6, %v15999_v38 }
 0x471   :  { %12451 = vmatprep.mubr.msk.bf16.mxu1 %vm13920_vm3, %v19311_v15  ;;  %v16351_v17 = vpop.f32.mrb[124].mxu0 }
 0x472   :  { %19550 = vst [vmem:[#allocation37_spill] sm:$0xff] %v16351_v17  ;;  %v12741_v31 = vpop.f32.mrb[125].mxu0 }
 0x473   :  { %v3271_v2 = vpop.f32.mrb[140].mxu1  ;;  %v16356_v8 = vpop.f32.mrb[126].mxu0 }
 0x474   :  { %v16354_v43 = vadd.f32 %v3271_v2, %v16252_v36  ;;  %v12301_v14 = vpop.f32.mrb[141].mxu1  ;;  %19551 = vst [vmem:[#allocation88_spill] sm:$0xff] %v16356_v8  ;;  %v12742_v42 = vpop.f32.mrb[127].mxu0 }
 0x475   :  { %v3274_v18 = vpop.f32.mrb[142].mxu1 }
 0x476   :  { %v16359_v51 = vadd.f32 %v3274_v18, %v16257_v40  ;;  %v12302_v49 = vpop.f32.mrb[143].mxu1  ;;  %v16375_v40 = vld [vmem:[%s19003_s3] sm:$0xff]  }
 0x478   :  { %12452 = vmatmul.mubr.msk.bf16.gmra.mrb[248].mxu1 %vm2474_vm6, %v15983_v30 }
 0x479   :  { %12491 = vmatprep.mubr.msk.bf16.mxu1 %vm13920_vm3, %v19311_v15  ;;  %v16365_v17 = vpop.f32.mrb[128].mxu0 }
 0x47a   :  { %19552 = vst [vmem:[#allocation54_spill] sm:$0xff] %v16365_v17  ;;  %v12781_v14 = vpop.f32.mrb[129].mxu0 }
 0x47b   :  { %v3279_v27 = vpop.f32.mrb[144].mxu1  ;;  %v16370_v8 = vpop.f32.mrb[130].mxu0 }
 0x47c   :  { %v16368_v36 = vadd.f32 %v3279_v27, %v16266_v48  ;;  %v12305_v2 = vpop.f32.mrb[145].mxu1  ;;  %19553 = vst [vmem:[#allocation47_spill] sm:$0xff] %v16370_v8  ;;  %v12782_v42 = vpop.f32.mrb[131].mxu0  ;;  %v16388_v48 = vld [vmem:[%s19003_s3 + $0x8] sm:$0xff]  }
 0x47d   :  { %v3282_v31 = vpop.f32.mrb[146].mxu1 }
 0x47e   :  { %v16378_v18 = vadd.f32 %v3282_v31, %v16271_v44  ;;  %v12306_v49 = vpop.f32.mrb[147].mxu1 }
 0x480   :  { %12492 = vmatmul.mubr.msk.bf16.vlgmr.msra.gmra.mrb[252].mxu1 %vm2474_vm6, %v19554_v52 }
 0x481   :  { %12495 = vmatprep.mubr.msk.bf16.mxu1 %vm13920_vm3, %v19311_v15  ;;  %12552 = vmatpush3.bf16.msra.mxu1 %v16375_v40  ;;  %v16391_v44 = vpop.f32.mrb[132].mxu0 }
 0x482   :  { %12553 = vmatprep.subr.bf16.mxu1 %v19311_v15  ;;  %19555 = vst [vmem:[#allocation57_spill] sm:$0xff] %v16391_v44  ;;  %v12785_v31 = vpop.f32.mrb[133].mxu0 }
 0x483   :  { %v3287_v27 = vpop.f32.mrb[148].mxu1  ;;  %v16396_v42 = vpop.f32.mrb[134].mxu0 }
 0x484   :  { %v16394_v2 = vadd.f32 %v3287_v27, %v16282_v41  ;;  %v12309_v14 = vpop.f32.mrb[149].mxu1  ;;  %19556 = vst [vmem:[#allocation48_spill] sm:$0xff] %v16396_v42  ;;  %v12786_v52 = vpop.f32.mrb[135].mxu0 }
 0x485   :  { %v3290_v49 = vpop.f32.mrb[150].mxu1  ;;  %12554 = vmatpush3.bf16.msra.mxu1 %v16388_v48 }
 0x486   :  { %v16400_v8 = vadd.f32 %v3290_v49, %v16288_v28  ;;  %v12310_v17 = vpop.f32.mrb[151].mxu1  ;;  %12615 = vmatprep.subr.bf16.mxu1 %v19311_v15 }
 0x488   :  { %12496 = vmatmul.mubr.msk.bf16.gmra.mrb[0].mxu1 %vm2474_vm6, %v19557_v6  ;;  %v19560_v6 = vld [vmem:[#allocation8_spill] sm:$0xff] }
 0x489   :  { %12499 = vmatprep.mubr.msk.bf16.mxu1 %vm13920_vm3, %v19311_v15  ;;  %v16407_v27 = vpop.f32.mrb[136].mxu0 }
 0x48a   :  { %19558 = vst [vmem:[#allocation58_spill] sm:$0xff] %v16407_v27  ;;  %v12789_v42 = vpop.f32.mrb[137].mxu0 }
 0x48b   :  { %v3295_v41 = vpop.f32.mrb[152].mxu1  ;;  %v16412_v49 = vpop.f32.mrb[138].mxu0 }
 0x48c   :  { %v16410_v14 = vadd.f32 %v3295_v41, %v16298_v3  ;;  %v12313_v31 = vpop.f32.mrb[153].mxu1  ;;  %19559 = vst [vmem:[#allocation56_spill] sm:$0xff] %v16412_v49  ;;  %v12790_v44 = vpop.f32.mrb[139].mxu0 }
 0x48d   :  { %v3298_v28 = vpop.f32.mrb[154].mxu1 }
 0x48e   :  { %v16415_v52 = vadd.f32 %v3298_v28, %v16303_v34  ;;  %v12314_v17 = vpop.f32.mrb[155].mxu1 }
 0x48f   :  { %v19563_v17 = vld [vmem:[#allocation55_spill] sm:$0xff] }
 0x490   :  { %12500 = vmatmul.mubr.msk.bf16.gmra.mrb[4].mxu1 %vm2474_vm6, %v19560_v6 }
 0x491   :  { %12503 = vmatprep.mubr.msk.bf16.mxu1 %vm13920_vm3, %v19311_v15  ;;  %v16421_v58 = vpop.f32.mrb[140].mxu0 }
 0x492   :  { %19561 = vst [vmem:[#allocation53_spill] sm:$0xff] %v16421_v58  ;;  %v12793_v41 = vpop.f32.mrb[141].mxu0 }
 0x493   :  { %v3303_v27 = vpop.f32.mrb[156].mxu1  ;;  %v16426_v49 = vpop.f32.mrb[142].mxu0 }
 0x494   :  { %v16424_v3 = vadd.f32 %v3303_v27, %v16312_v55  ;;  %v12317_v42 = vpop.f32.mrb[157].mxu1  ;;  %19562 = vst [vmem:[#allocation14_spill] sm:$0xff] %v16426_v49  ;;  %v12794_v28 = vpop.f32.mrb[143].mxu0 }
 0x495   :  { %v3306_v31 = vpop.f32.mrb[158].mxu1  ;;  %v19566_v28 = vld [vmem:[#allocation11_spill] sm:$0xff] }
 0x496   :  { %v16429_v34 = vadd.f32 %v3306_v31, %v16317_v39  ;;  %v12318_v44 = vpop.f32.mrb[159].mxu1 }
 0x498   :  { %12504 = vmatmul.mubr.msk.bf16.gmra.mrb[8].mxu1 %vm2474_vm6, %v19563_v17 }
 0x499   :  { %12507 = vmatprep.mubr.msk.bf16.mxu1 %vm13920_vm3, %v19311_v15  ;;  %v16435_v6 = vpop.f32.mrb[144].mxu0 }
 0x49a   :  { %19564 = vst [vmem:[#allocation40_spill] sm:$0xff] %v16435_v6  ;;  %v12797_v42 = vpop.f32.mrb[145].mxu0 }
 0x49b   :  { %v3311_v58 = vpop.f32.mrb[160].mxu1  ;;  %v16440_v49 = vpop.f32.mrb[146].mxu0 }
 0x49c   :  { %v16438_v55 = vadd.f32 %v3311_v58, %v16326_v21  ;;  %v12321_v27 = vpop.f32.mrb[161].mxu1  ;;  %19565 = vst [vmem:[#allocation89_spill] sm:$0xff] %v16440_v49  ;;  %v12798_v44 = vpop.f32.mrb[147].mxu0 }
 0x49d   :  { %v3314_v41 = vpop.f32.mrb[162].mxu1  ;;  %v19571_v44 = vld [vmem:[#allocation9_spill] sm:$0xff] }
 0x49e   :  { %v16443_v39 = vadd.f32 %v3314_v41, %v16331_v56  ;;  %v12322_v31 = vpop.f32.mrb[163].mxu1 }
 0x4a0   :  { %12508 = vmatmul.mubr.msk.bf16.gmra.mrb[12].mxu1 %vm2474_vm6, %v19566_v28 }
 0x4a1   :  { %12511 = vmatprep.mubr.msk.bf16.mxu1 %vm13920_vm3, %v19311_v15  ;;  %v16449_v17 = vpop.f32.mrb[148].mxu0 }
 0x4a2   :  { %19567 = vst [vmem:[#allocation93_spill] sm:$0xff] %v16449_v17  ;;  %v12801_v27 = vpop.f32.mrb[149].mxu0  ;;  %v19572_v17 = vld [vmem:[#allocation92_spill] sm:$0xff] }
 0x4a3   :  { %v3319_v6 = vpop.f32.mrb[164].mxu1  ;;  %v16454_v49 = vpop.f32.mrb[150].mxu0 }
 0x4a4   :  { %v16452_v58 = vadd.f32 %v3319_v6, %v16340_v59  ;;  %v12325_v21 = vpop.f32.mrb[165].mxu1  ;;  %19569 = vst [vmem:[#allocation118_spill] sm:$0xff] %v16454_v49  ;;  %v12802_v31 = vpop.f32.mrb[151].mxu0  ;;  %v3995_v6 = vsel %vm2380_vm5, %v19572_v17, 0.0 }
 0x4a5   :  { %v3322_v42 = vpop.f32.mrb[166].mxu1 }
 0x4a6   :  { %19568 = vst [vmem:[#allocation20_spill] sm:$0xff] %v16452_v58  ;;  %v16457_v56 = vadd.f32 %v3322_v42, %v16345_v37  ;;  %v12326_v41 = vpop.f32.mrb[167].mxu1  ;;  %v16474_v42 = vpack.c.bf16 %v19311_v15, %v3995_v6  ;;  %v19596_v58 = vld [vmem:[#allocation10_spill] sm:$0xff] }
 0x4a8   :  { %19570 = vst [vmem:[#allocation119_spill] sm:$0xff] %v16457_v56  ;;  %12512 = vmatmul.mubr.msk.bf16.gmra.mrb[16].mxu1 %vm2474_vm6, %v19571_v44  ;;  %19575 = vst [vmem:[#allocation121_spill] sm:$0xff] %v16474_v42 }
 0x4a9   :  { %12515 = vmatprep.mubr.msk.bf16.mxu1 %vm13920_vm3, %v19311_v15  ;;  %v16467_v21 = vpop.f32.mrb[152].mxu0 }
 0x4aa   :  { %19573 = vst [vmem:[#allocation92_spill] sm:$0xff] %v16467_v21  ;;  %v12805_v49 = vpop.f32.mrb[153].mxu0 }
 0x4ab   :  { %v16465_v59 = vpop.f32.mrb[168].mxu1  ;;  %v16471_v37 = vpop.f32.mrb[154].mxu0 }
 0x4ac   :  { %v12333_v27 = vpop.f32.mrb[169].mxu1  ;;  %19574 = vst [vmem:[#allocation120_spill] sm:$0xff] %v16471_v37  ;;  %v12806_v31 = vpop.f32.mrb[155].mxu0 }
 0x4ad   :  { %v16469_v28 = vpop.f32.mrb[170].mxu1  ;;  %v16495_v31 = vld [vmem:[%s19003_s3 + $0x40] sm:$0xff]  }
 0x4ae   :  { %v12334_v41 = vpop.f32.mrb[171].mxu1 }
 0x4af   :  { %v19578_v41 = vld [vmem:[#allocation44_spill] sm:$0xff] }
 0x4b0   :  { %12516 = vmatmul.mubr.msk.bf16.gmra.mrb[20].mxu1 %vm2474_vm6, %v16474_v42 }
 0x4b1   :  { %12555 = vmatprep.mubr.msk.bf16.mxu1 %vm13920_vm3, %v19311_v15  ;;  %v16482_v21 = vpop.f32.mrb[156].mxu0 }
 0x4b2   :  { %19576 = vst [vmem:[#allocation122_spill] sm:$0xff] %v16482_v21  ;;  %v12845_v27 = vpop.f32.mrb[157].mxu0  ;;  %v16510_v21 = vld [vmem:[%s19003_s3 + $0x48] sm:$0xff]  }
 0x4b3   :  { %v16480_v17 = vpop.f32.mrb[172].mxu1  ;;  %v16486_v37 = vpop.f32.mrb[158].mxu0 }
 0x4b4   :  { %v12337_v49 = vpop.f32.mrb[173].mxu1  ;;  %19577 = vst [vmem:[#allocation123_spill] sm:$0xff] %v16486_v37  ;;  %v12846_v60 = vpop.f32.mrb[159].mxu0 }
 0x4b5   :  { %v16484_v44 = vpop.f32.mrb[174].mxu1 }
 0x4b6   :  { %v12338_v6 = vpop.f32.mrb[175].mxu1 }
 0x4b8   :  { %12556 = vmatmul.mubr.msk.bf16.vlgmr.msra.gmra.mrb[24].mxu1 %vm2474_vm6, %v19578_v41 }
 0x4b9   :  { %12559 = vmatprep.mubr.msk.bf16.mxu1 %vm13920_vm3, %v19311_v15  ;;  %12616 = vmatpush3.bf16.msra.mxu1 %v16495_v31  ;;  %v16501_v27 = vpop.f32.mrb[160].mxu0 }
 0x4ba   :  { %12617 = vmatprep.subr.bf16.mxu1 %v19311_v15  ;;  %19579 = vst [vmem:[#allocation44_spill] sm:$0xff] %v16501_v27  ;;  %v12849_v6 = vpop.f32.mrb[161].mxu0 }
 0x4bb   :  { %v16499_v49 = vpop.f32.mrb[176].mxu1  ;;  %v16505_v41 = vpop.f32.mrb[162].mxu0 }
 0x4bc   :  { %v12341_v60 = vpop.f32.mrb[177].mxu1  ;;  %19580 = vst [vmem:[#allocation124_spill] sm:$0xff] %v16505_v41  ;;  %v12850_v54 = vpop.f32.mrb[163].mxu0 }
 0x4bd   :  { %v16503_v37 = vpop.f32.mrb[178].mxu1  ;;  %12618 = vmatpush3.bf16.msra.mxu1 %v16510_v21 }
 0x4be   :  { %v12342_v42 = vpop.f32.mrb[179].mxu1  ;;  %12679 = vmatprep.subr.bf16.mxu1 %v19311_v15 }
 0x4c0   :  { %12560 = vmatmul.mubr.msk.bf16.gmra.mrb[28].mxu1 %vm2474_vm6, %v19581_v7 }
 0x4c1   :  { %12563 = vmatprep.mubr.msk.bf16.mxu1 %vm13920_vm3, %v19311_v15  ;;  %v16520_v6 = vpop.f32.mrb[164].mxu0 }
 0x4c2   :  { %19582 = vst [vmem:[#allocation45_spill] sm:$0xff] %v16520_v6  ;;  %v12853_v27 = vpop.f32.mrb[165].mxu0 }
 0x4c3   :  { %v16518_v60 = vpop.f32.mrb[180].mxu1  ;;  %v16524_v13 = vpop.f32.mrb[166].mxu0 }
 0x4c4   :  { %v12345_v41 = vpop.f32.mrb[181].mxu1  ;;  %19583 = vst [vmem:[#allocation125_spill] sm:$0xff] %v16524_v13  ;;  %v12854_v54 = vpop.f32.mrb[167].mxu0 }
 0x4c5   :  { %v16522_v46 = vpop.f32.mrb[182].mxu1 }
 0x4c6   :  { %v12346_v42 = vpop.f32.mrb[183].mxu1 }
 0x4c7   :  { %v19587_v42 = vld [vmem:[#allocation6_spill] sm:$0xff] }
 0x4c8   :  { %12564 = vmatmul.mubr.msk.bf16.gmra.mrb[32].mxu1 %vm2474_vm6, %v19584_v20 }
 0x4c9   :  { %12567 = vmatprep.mubr.msk.bf16.mxu1 %vm13920_vm3, %v19311_v15  ;;  %v16532_v4 = vpop.f32.mrb[168].mxu0 }
 0x4ca   :  { %19585 = vst [vmem:[#allocation46_spill] sm:$0xff] %v16532_v4  ;;  %v12857_v6 = vpop.f32.mrb[169].mxu0 }
 0x4cb   :  { %v16530_v7 = vpop.f32.mrb[184].mxu1  ;;  %v16536_v27 = vpop.f32.mrb[170].mxu0 }
 0x4cc   :  { %v12349_v23 = vpop.f32.mrb[185].mxu1  ;;  %19586 = vst [vmem:[#allocation126_spill] sm:$0xff] %v16536_v27  ;;  %v12858_v13 = vpop.f32.mrb[171].mxu0 }
 0x4cd   :  { %v16534_v41 = vpop.f32.mrb[186].mxu1 }
 0x4ce   :  { %v12350_v25 = vpop.f32.mrb[187].mxu1 }
 0x4cf   :  { %v19590_v25 = vld [vmem:[#allocation49_spill] sm:$0xff] }
 0x4d0   :  { %12568 = vmatmul.mubr.msk.bf16.gmra.mrb[36].mxu1 %vm2474_vm6, %v19587_v42 }
 0x4d1   :  { %12571 = vmatprep.mubr.msk.bf16.mxu1 %vm13920_vm3, %v19311_v15  ;;  %v16544_v54 = vpop.f32.mrb[172].mxu0 }
 0x4d2   :  { %19588 = vst [vmem:[#allocation6_spill] sm:$0xff] %v16544_v54  ;;  %v12861_v4 = vpop.f32.mrb[173].mxu0 }
 0x4d3   :  { %v16542_v20 = vpop.f32.mrb[188].mxu1  ;;  %v16548_v6 = vpop.f32.mrb[174].mxu0 }
 0x4d4   :  { %v12353_v26 = vpop.f32.mrb[189].mxu1  ;;  %19589 = vst [vmem:[#allocation127_spill] sm:$0xff] %v16548_v6  ;;  %v12862_v27 = vpop.f32.mrb[175].mxu0 }
 0x4d5   :  { %v16546_v23 = vpop.f32.mrb[190].mxu1 }
 0x4d6   :  { %v12354_v24 = vpop.f32.mrb[191].mxu1 }
 0x4d7   :  { %v19593_v24 = vld [vmem:[#allocation7_spill] sm:$0xff] }
 0x4d8   :  { %12572 = vmatmul.mubr.msk.bf16.gmra.mrb[40].mxu1 %vm2474_vm6, %v19590_v25 }
 0x4d9   :  { %12575 = vmatprep.mubr.msk.bf16.mxu1 %vm13920_vm3, %v19311_v15  ;;  %v16556_v42 = vpop.f32.mrb[176].mxu0 }
 0x4da   :  { %19591 = vst [vmem:[#allocation49_spill] sm:$0xff] %v16556_v42  ;;  %v12865_v54 = vpop.f32.mrb[177].mxu0 }
 0x4db   :  { %v16554_v13 = vpop.f32.mrb[192].mxu1  ;;  %v16560_v4 = vpop.f32.mrb[178].mxu0 }
 0x4dc   :  { %v12357_v16 = vpop.f32.mrb[193].mxu1  ;;  %19592 = vst [vmem:[#allocation128_spill] sm:$0xff] %v16560_v4  ;;  %v12866_v6 = vpop.f32.mrb[179].mxu0 }
 0x4dd   :  { %v16558_v26 = vpop.f32.mrb[194].mxu1 }
 0x4de   :  { %v12358_v1 = vpop.f32.mrb[195].mxu1 }
 0x4e0   :  { %12576 = vmatmul.mubr.msk.bf16.gmra.mrb[44].mxu1 %vm2474_vm6, %v19593_v24  ;;  %v19595_v24 = vld [vmem:[#allocation51_spill] sm:$0xff] }
 0x4e1   :  { %12579 = vmatprep.mubr.msk.bf16.mxu1 %vm13920_vm3, %v19311_v15  ;;  %v16566_v25 = vpop.f32.mrb[180].mxu0 }
 0x4e2   :  { %v12869_v16 = vpop.f32.mrb[181].mxu0 }
 0x4e3   :  { %v3498_v27 = vpop.f32.mrb[196].mxu1  ;;  %v16569_v61 = vpop.f32.mrb[182].mxu0 }
 0x4e4   :  { %v3499_v22 = vadd.f32 %v3498_v27, %v16465_v59  ;;  %v12365_v42 = vpop.f32.mrb[197].mxu1  ;;  %v12870_v6 = vpop.f32.mrb[183].mxu0 }
 0x4e5   :  { %v3501_v54 = vpop.f32.mrb[198].mxu1 }
 0x4e6   :  { %v3502_v4 = vadd.f32 %v3501_v54, %v16469_v28  ;;  %v12366_v1 = vpop.f32.mrb[199].mxu1  ;;  %v16573_v56 = vadd.f32 %v19594_v45, %v3499_v22  ;;  %v19598_v45 = vld [vmem:[#allocation94_spill] sm:$0xff] }
 0x4e7   :  { %v19597_v1 = vld [vmem:[#allocation60_spill] sm:$0xff] }
 0x4e8   :  { %12580 = vmatmul.mubr.msk.bf16.gmra.mrb[48].mxu1 %vm2474_vm6, %v19595_v24  ;;  %v16578_v10 = vadd.f32 %v19596_v58, %v3502_v4  ;;  %v16605_v24 = vld [vmem:[%s19003_s3 + $0x78] sm:$0xff]  }
 0x4e9   :  { %12619 = vmatprep.mubr.msk.bf16.mxu1 %vm13920_vm3, %v19311_v15 }
 0x4eb   :  { %v3506_v59 = vpop.f32.mrb[200].mxu1 }
 0x4ec   :  { %v3507_v42 = vadd.f32 %v3506_v59, %v16480_v17  ;;  %v12369_v27 = vpop.f32.mrb[201].mxu1  ;;  %v16597_v17 = vld [vmem:[%s19003_s3 + $0x70] sm:$0xff]  }
 0x4ed   :  { %v3509_v16 = vpop.f32.mrb[202].mxu1  ;;  %v19599_v27 = vld [vmem:[#allocation90_spill] sm:$0xff] }
 0x4ee   :  { %v3510_v28 = vadd.f32 %v3509_v16, %v16484_v44  ;;  %v12370_v54 = vpop.f32.mrb[203].mxu1  ;;  %v16585_v22 = vadd.f32 %v19597_v1, %v3507_v42 }
 0x4f0   :  { %12620 = vmatmul.mubr.msk.bf16.vlgmr.msra.gmra.mrb[52].mxu1 %vm2474_vm6, %v15178_v29  ;;  %v16590_v58 = vadd.f32 %v19598_v45, %v3510_v28 }
 0x4f1   :  { %12623 = vmatprep.mubr.msk.bf16.mxu1 %vm13920_vm3, %v19311_v15  ;;  %12680 = vmatpush3.bf16.msra.mxu1 %v16597_v17 }
 0x4f2   :  { %12681 = vmatprep.subr.bf16.mxu1 %v19311_v15 }
 0x4f3   :  { %v3514_v44 = vpop.f32.mrb[204].mxu1 }
 0x4f4   :  { %v3515_v4 = vadd.f32 %v3514_v44, %v16499_v49  ;;  %v12373_v6 = vpop.f32.mrb[205].mxu1  ;;  %v19600_v49 = vld [vmem:[#allocation16_spill] sm:$0xff] }
 0x4f5   :  { %v3517_v29 = vpop.f32.mrb[206].mxu1  ;;  %12682 = vmatpush3.bf16.msra.mxu1 %v16605_v24  ;;  %v19601_v6 = vld [vmem:[#allocation61_spill] sm:$0xff] }
 0x4f6   :  { %v3518_v59 = vadd.f32 %v3517_v29, %v16503_v37  ;;  %v12374_v42 = vpop.f32.mrb[207].mxu1  ;;  %v16610_v16 = vadd.f32 %v19599_v27, %v3515_v4  ;;  %12743 = vmatprep.subr.bf16.mxu1 %v19311_v15 }
 0x4f8   :  { %12624 = vmatmul.mubr.msk.bf16.gmra.mrb[56].mxu1 %vm2474_vm6, %v15209_v9  ;;  %v16616_v28 = vadd.f32 %v19600_v49, %v3518_v59  ;;  %v19602_v9 = vld [vmem:[#allocation96_spill] sm:$0xff] }
 0x4f9   :  { %12627 = vmatprep.mubr.msk.bf16.mxu1 %vm13920_vm3, %v19311_v15 }
 0x4fb   :  { %v3522_v54 = vpop.f32.mrb[208].mxu1 }
 0x4fc   :  { %v3523_v1 = vadd.f32 %v3522_v54, %v16518_v60  ;;  %v12377_v45 = vpop.f32.mrb[209].mxu1 }
 0x4fd   :  { %v3525_v37 = vpop.f32.mrb[210].mxu1  ;;  %v19603_v45 = vld [vmem:[#allocation12_spill] sm:$0xff] }
 0x4fe   :  { %v3526_v44 = vadd.f32 %v3525_v37, %v16522_v46  ;;  %v12378_v4 = vpop.f32.mrb[211].mxu1  ;;  %v16623_v29 = vadd.f32 %v19601_v6, %v3523_v1 }
 0x500   :  { %12628 = vmatmul.mubr.msk.bf16.gmra.mrb[60].mxu1 %vm2474_vm6, %v15233_v11  ;;  %v16628_v59 = vadd.f32 %v19602_v9, %v3526_v44  ;;  %v19604_v11 = vld [vmem:[#allocation62_spill] sm:$0xff] }
 0x501   :  { %12631 = vmatprep.mubr.msk.bf16.mxu1 %vm13920_vm3, %v19311_v15 }
 0x503   :  { %v3530_v42 = vpop.f32.mrb[212].mxu1 }
 0x504   :  { %v3531_v60 = vadd.f32 %v3530_v42, %v16530_v7  ;;  %v12381_v27 = vpop.f32.mrb[213].mxu1  ;;  %v19605_v42 = vld [vmem:[#allocation91_spill] sm:$0xff] }
 0x505   :  { %v3533_v49 = vpop.f32.mrb[214].mxu1 }
 0x506   :  { %v3534_v46 = vadd.f32 %v3533_v49, %v16534_v41  ;;  %v12382_v54 = vpop.f32.mrb[215].mxu1  ;;  %v16635_v1 = vadd.f32 %v19603_v45, %v3531_v60 }
 0x508   :  { %12632 = vmatmul.mubr.msk.bf16.gmra.mrb[64].mxu1 %vm2474_vm6, %v15248_v62  ;;  %v16640_v37 = vadd.f32 %v19604_v11, %v3534_v46  ;;  %v19606_v62 = vld [vmem:[#allocation18_spill] sm:$0xff]  ;;  %v19607_v11 = vld [vmem:[#allocation63_spill] sm:$0xff] }
 0x509   :  { %12635 = vmatprep.mubr.msk.bf16.mxu1 %vm13920_vm3, %v19311_v15 }
 0x50b   :  { %v3538_v44 = vpop.f32.mrb[216].mxu1 }
 0x50c   :  { %v3539_v7 = vadd.f32 %v3538_v44, %v16542_v20  ;;  %v12385_v4 = vpop.f32.mrb[217].mxu1 }
 0x50d   :  { %v3541_v6 = vpop.f32.mrb[218].mxu1 }
 0x50e   :  { %v3542_v41 = vadd.f32 %v3541_v6, %v16546_v23  ;;  %v12386_v9 = vpop.f32.mrb[219].mxu1  ;;  %v16647_v60 = vadd.f32 %v19605_v42, %v3539_v7  ;;  %v19609_v42 = vld [vmem:[#allocation64_spill] sm:$0xff] }
 0x510   :  { %12636 = vmatmul.mubr.msk.bf16.gmra.mrb[68].mxu1 %vm2474_vm6, %v19462_v32  ;;  %v16652_v27 = vadd.f32 %v19606_v62, %v3542_v41  ;;  %v19608_v32 = vld [vmem:[#allocation13_spill] sm:$0xff] }
 0x511   :  { %12639 = vmatprep.mubr.msk.bf16.mxu1 %vm13920_vm3, %v19311_v15 }
 0x513   :  { %v3546_v49 = vpop.f32.mrb[220].mxu1 }
 0x514   :  { %v3547_v20 = vadd.f32 %v3546_v49, %v16554_v13  ;;  %v12389_v46 = vpop.f32.mrb[221].mxu1 }
 0x515   :  { %v3549_v54 = vpop.f32.mrb[222].mxu1 }
 0x516   :  { %v3550_v23 = vadd.f32 %v3549_v54, %v16558_v26  ;;  %v12390_v45 = vpop.f32.mrb[223].mxu1  ;;  %v16659_v44 = vadd.f32 %v19607_v11, %v3547_v20 }
 0x517   :  { %v19611_v45 = vld [vmem:[#allocation65_spill] sm:$0xff] }
 0x518   :  { %12640 = vmatmul.mubr.msk.bf16.gmra.mrb[72].mxu1 %vm2474_vm6, %v19466_v33  ;;  %v16664_v7 = vadd.f32 %v19608_v32, %v3550_v23  ;;  %v19610_v33 = vld [vmem:[#allocation98_spill] sm:$0xff] }
 0x519   :  { %12643 = vmatprep.mubr.msk.bf16.mxu1 %vm13920_vm3, %v19311_v15 }
 0x51b   :  { %v3690_v4 = vpop.f32.mrb[224].mxu1 }
 0x51c   :  { %v3745_v13 = vadd.f32 %v3690_v4, %v16573_v56  ;;  %v12429_v6 = vpop.f32.mrb[225].mxu1 }
 0x51d   :  { %v3693_v41 = vpop.f32.mrb[226].mxu1 }
 0x51e   :  { %v3746_v26 = vadd.f32 %v3693_v41, %v16578_v10  ;;  %v12430_v9 = vpop.f32.mrb[227].mxu1  ;;  %v16671_v62 = vadd.f32 %v19609_v42, %v3745_v13 }
 0x520   :  { %12644 = vmatmul.mubr.msk.bf16.gmra.mrb[76].mxu1 %vm2474_vm6, %v19470_v0  ;;  %v16676_v49 = vadd.f32 %v19610_v33, %v3746_v26  ;;  %v19612_v0 = vld [vmem:[#allocation100_spill] sm:$0xff]  ;;  %v19613_v26 = vld [vmem:[#allocation15_spill] sm:$0xff] }
 0x521   :  { %12683 = vmatprep.mubr.msk.bf16.mxu1 %vm13920_vm3, %v19311_v15 }
 0x523   :  { %v3698_v20 = vpop.f32.mrb[228].mxu1 }
 0x524   :  { %v3747_v56 = vadd.f32 %v3698_v20, %v16585_v22  ;;  %v12433_v46 = vpop.f32.mrb[229].mxu1 }
 0x525   :  { %v3701_v54 = vpop.f32.mrb[230].mxu1  ;;  %v19615_v46 = vld [vmem:[#allocation22_spill] sm:$0xff] }
 0x526   :  { %v3748_v10 = vadd.f32 %v3701_v54, %v16590_v58  ;;  %v12434_v23 = vpop.f32.mrb[231].mxu1  ;;  %v16683_v11 = vadd.f32 %v19611_v45, %v3747_v56 }
 0x528   :  { %12684 = vmatmul.mubr.msk.bf16.vlgmr.msra.gmra.mrb[80].mxu1 %vm2474_vm6, %v19537_v19  ;;  %v16688_v32 = vadd.f32 %v19612_v0, %v3748_v10  ;;  %v19616_v10 = vld [vmem:[#allocation67_spill] sm:$0xff] }
 0x529   :  { %12687 = vmatprep.mubr.msk.bf16.mxu1 %vm13920_vm3, %v19311_v15  ;;  %12744 = vmatpush3.bf16.msra.mxu1 %v16375_v40  ;;  %v19614_v40 = vld [vmem:[#allocation66_spill] sm:$0xff] }
 0x52a   :  { %12745 = vmatprep.subr.bf16.mxu1 %v19311_v15 }
 0x52b   :  { %v3706_v22 = vpop.f32.mrb[232].mxu1 }
 0x52c   :  { %v3749_v58 = vadd.f32 %v3706_v22, %v16610_v16  ;;  %v12437_v4 = vpop.f32.mrb[233].mxu1 }
 0x52d   :  { %v3709_v13 = vpop.f32.mrb[234].mxu1  ;;  %12746 = vmatpush3.bf16.msra.mxu1 %v16388_v48  ;;  %v19617_v4 = vld [vmem:[#allocation95_spill] sm:$0xff] }
 0x52e   :  { %v3750_v6 = vadd.f32 %v3709_v13, %v16616_v28  ;;  %v12438_v41 = vpop.f32.mrb[235].mxu1  ;;  %v16698_v9 = vadd.f32 %v19613_v26, %v3749_v58  ;;  %12807 = vmatprep.subr.bf16.mxu1 %v19311_v15 }
 0x530   :  { %12688 = vmatmul.mubr.msk.bf16.gmra.mrb[84].mxu1 %vm2474_vm6, %v19494_v57  ;;  %v16704_v42 = vadd.f32 %v19614_v40, %v3750_v6  ;;  %v19618_v6 = vld [vmem:[#allocation17_spill] sm:$0xff] }
 0x531   :  { %12691 = vmatprep.mubr.msk.bf16.mxu1 %vm13920_vm3, %v19311_v15 }
 0x533   :  { %v3714_v16 = vpop.f32.mrb[236].mxu1 }
 0x534   :  { %v3751_v48 = vadd.f32 %v3714_v16, %v16623_v29  ;;  %v12441_v33 = vpop.f32.mrb[237].mxu1 }
 0x535   :  { %v3717_v28 = vpop.f32.mrb[238].mxu1  ;;  %v19619_v33 = vld [vmem:[#allocation68_spill] sm:$0xff] }
 0x536   :  { %v3752_v20 = vadd.f32 %v3717_v28, %v16628_v59  ;;  %v12442_v56 = vpop.f32.mrb[239].mxu1  ;;  %v16711_v54 = vadd.f32 %v19615_v46, %v3751_v48 }
 0x538   :  { %12692 = vmatmul.mubr.msk.bf16.gmra.mrb[88].mxu1 %vm2474_vm6, %v15430_v12  ;;  %v16716_v23 = vadd.f32 %v19616_v10, %v3752_v20  ;;  %v19620_v20 = vld [vmem:[#allocation102_spill] sm:$0xff] }
 0x539   :  { %12695 = vmatprep.mubr.msk.bf16.mxu1 %vm13920_vm3, %v19311_v15 }
 0x53b   :  { %v3722_v45 = vpop.f32.mrb[240].mxu1 }
 0x53c   :  { %v3753_v29 = vadd.f32 %v3722_v45, %v16635_v1  ;;  %v12445_v0 = vpop.f32.mrb[241].mxu1 }
 0x53d   :  { %v3725_v22 = vpop.f32.mrb[242].mxu1  ;;  %v19621_v0 = vld [vmem:[#allocation97_spill] sm:$0xff] }
 0x53e   :  { %v3754_v59 = vadd.f32 %v3725_v22, %v16640_v37  ;;  %v12446_v58 = vpop.f32.mrb[243].mxu1  ;;  %v16723_v13 = vadd.f32 %v19617_v4, %v3753_v29  ;;  %v16757_v4 = vld [vmem:[%s19004_s4] ss:$0 sm:$0xff] }
 0x540   :  { %12696 = vmatmul.mubr.msk.bf16.gmra.mrb[92].mxu1 %vm2474_vm6, %v15444_v53  ;;  %v16728_v41 = vadd.f32 %v19618_v6, %v3754_v59  ;;  %v19622_v59 = vld [vmem:[#allocation24_spill] sm:$0xff] }
 0x541   :  { %12699 = vmatprep.mubr.msk.bf16.mxu1 %vm13920_vm3, %v19311_v15 }
 0x543   :  { %v3730_v26 = vpop.f32.mrb[244].mxu1 }
 0x544   :  { %v3755_v1 = vadd.f32 %v3730_v26, %v16647_v60  ;;  %v12449_v40 = vpop.f32.mrb[245].mxu1 }
 0x545   :  { %v3733_v16 = vpop.f32.mrb[246].mxu1  ;;  %v3348_v40 = vadd.f32 %v16757_v4, %v16359_v51 }
 0x546   :  { %v3756_v37 = vadd.f32 %v3733_v16, %v16652_v27  ;;  %v12450_v48 = vpop.f32.mrb[247].mxu1  ;;  %v16735_v28 = vadd.f32 %v19619_v33, %v3755_v1 }
 0x548   :  { %12700 = vmatmul.mubr.msk.bf16.gmra.mrb[96].mxu1 %vm2474_vm6, %v15455_v35  ;;  %v16740_v56 = vadd.f32 %v19620_v20, %v3756_v37 }
 0x549   :  { %12703 = vmatprep.mubr.msk.bf16.mxu1 %vm13920_vm3, %v19311_v15 }
 0x54b   :  { %v3738_v46 = vpop.f32.mrb[248].mxu1 }
 0x54c   :  { %v3757_v60 = vadd.f32 %v3738_v46, %v16659_v44  ;;  %v12453_v10 = vpop.f32.mrb[249].mxu1 }
 0x54d   :  { %v3741_v45 = vpop.f32.mrb[250].mxu1  ;;  %v3349_v10 = vadd.f32 %v16757_v4, %v16368_v36 }
 0x54e   :  { %v3758_v27 = vadd.f32 %v3741_v45, %v16664_v7  ;;  %v12454_v29 = vpop.f32.mrb[251].mxu1  ;;  %v16747_v22 = vadd.f32 %v19621_v0, %v3757_v60  ;;  %v3347_v7 = vadd.f32 %v16757_v4, %v16354_v43  ;;  %v3362_v43 = vmax.f32 %v3348_v40, 0.0 }
 0x54f   :  { %v3350_v0 = vadd.f32 %v16757_v4, %v16378_v18  ;;  %v3351_v40 = vadd.f32 %v16757_v4, %v16394_v2 }
 0x550   :  { %12704 = vmatmul.mubr.msk.bf16.gmra.mrb[100].mxu1 %vm2474_vm6, %v15999_v38  ;;  %v16752_v58 = vadd.f32 %v19622_v59, %v3758_v27  ;;  %v3361_v33 = vmax.f32 %v3347_v7, 0.0 }
 0x551   :  { %12707 = vmatprep.mubr.msk.bf16.mxu1 %vm13920_vm3, %v19311_v15  ;;  %v3364_v36 = vmax.f32 %v3350_v0, 0.0 }
 0x553   :  { %v4058_v44 = vpop.f32.mrb[252].mxu1 }
 0x554   :  { %v4113_v6 = vadd.f32 %v4058_v44, %v16671_v62  ;;  %v12493_v26 = vpop.f32.mrb[253].mxu1 }
 0x555   :  { %v4061_v1 = vpop.f32.mrb[254].mxu1 }
 0x556   :  { %v4127_v16 = vadd.f32 %v16757_v4, %v4113_v6  ;;  %v4114_v37 = vadd.f32 %v4061_v1, %v16676_v49  ;;  %v12494_v48 = vpop.f32.mrb[255].mxu1  ;;  %v3363_v6 = vmax.f32 %v3349_v10, 0.0 }
 0x558   :  { %v4141_v20 = vmax.f32 %v4127_v16, 0.0  ;;  %v4128_v46 = vadd.f32 %v16757_v4, %v4114_v37  ;;  %12708 = vmatmul.mubr.msk.bf16.gmra.mrb[104].mxu1 %vm2474_vm6, %v15983_v30 }
 0x559   :  { %12747 = vmatprep.mubr.msk.bf16.mxu1 %vm13920_vm3, %v19311_v15 }
 0x55a   :  { %v16773_v62 = vmax.f32 %v3361_v33, %v4141_v20  ;;  %v4142_v60 = vmax.f32 %v4128_v46, 0.0 }
 0x55b   :  { %v4066_v51 = vpop.f32.mrb[0].mxu1 }
 0x55c   :  { %v16777_v49 = vmax.f32 %v3362_v43, %v4142_v60  ;;  %v4115_v45 = vadd.f32 %v4066_v51, %v16683_v11  ;;  %v12497_v27 = vpop.f32.mrb[1].mxu1  ;;  %v3365_v43 = vmax.f32 %v3351_v40, 0.0 }
 0x55d   :  { %v4069_v29 = vpop.f32.mrb[2].mxu1 }
 0x55e   :  { %v4129_v59 = vadd.f32 %v16757_v4, %v4115_v45  ;;  %v4116_v44 = vadd.f32 %v4069_v29, %v16688_v32  ;;  %v12498_v7 = vpop.f32.mrb[3].mxu1 }
 0x560   :  { %v4143_v26 = vmax.f32 %v4129_v59, 0.0  ;;  %v4130_v1 = vadd.f32 %v16757_v4, %v4116_v44  ;;  %12748 = vmatmul.mubr.msk.bf16.vlgmr.msra.gmra.mrb[108].mxu1 %vm2474_vm6, %v14915_v47 }
 0x561   :  { %12751 = vmatprep.mubr.msk.bf16.mxu1 %vm13920_vm3, %v19311_v15  ;;  %12808 = vmatpush3.bf16.msra.mxu1 %v16495_v31  ;;  %v3352_v31 = vadd.f32 %v16757_v4, %v16400_v8 }
 0x562   :  { %v16790_v11 = vmax.f32 %v3363_v6, %v4143_v26  ;;  %v4144_v18 = vmax.f32 %v4130_v1, 0.0  ;;  %12809 = vmatprep.subr.bf16.mxu1 %v19311_v15 }
 0x563   :  { %v4074_v32 = vpop.f32.mrb[4].mxu1 }
 0x564   :  { %v16795_v16 = vmax.f32 %v3364_v36, %v4144_v18  ;;  %v4117_v37 = vadd.f32 %v4074_v32, %v16698_v9  ;;  %v12501_v47 = vpop.f32.mrb[5].mxu1  ;;  %v3355_v36 = vadd.f32 %v16757_v4, %v16424_v3 }
 0x565   :  { %v4077_v48 = vpop.f32.mrb[6].mxu1  ;;  %12810 = vmatpush3.bf16.msra.mxu1 %v16510_v21  ;;  %v3366_v21 = vmax.f32 %v3352_v31, 0.0 }
 0x566   :  { %v4131_v33 = vadd.f32 %v16757_v4, %v4117_v37  ;;  %v4118_v20 = vadd.f32 %v4077_v48, %v16704_v42  ;;  %v12502_v46 = vpop.f32.mrb[7].mxu1  ;;  %12871 = vmatprep.subr.bf16.mxu1 %v19311_v15  ;;  %v3353_v42 = vadd.f32 %v16757_v4, %v16410_v14  ;;  %v3369_v31 = vmax.f32 %v3355_v36, 0.0 }
 0x568   :  { %v4145_v2 = vmax.f32 %v4131_v33, 0.0  ;;  %v4132_v60 = vadd.f32 %v16757_v4, %v4118_v20  ;;  %12752 = vmatmul.mubr.msk.bf16.gmra.mrb[112].mxu1 %vm2474_vm6, %v14965_v63  ;;  %v3354_v63 = vadd.f32 %v16757_v4, %v16415_v52  ;;  %v3367_v7 = vmax.f32 %v3353_v42, 0.0 }
 0x569   :  { %12755 = vmatprep.mubr.msk.bf16.mxu1 %vm13920_vm3, %v19311_v15 }
 0x56a   :  { %v16809_v9 = vmax.f32 %v3365_v43, %v4145_v2  ;;  %v4146_v8 = vmax.f32 %v4132_v60, 0.0  ;;  %v3368_v14 = vmax.f32 %v3354_v63, 0.0  ;;  %v3357_v43 = vadd.f32 %v16757_v4, %v16438_v55  ;;  %v19623_v63 = vld [vmem:[#allocation42_spill] sm:$0xff] }
 0x56b   :  { %v4082_v51 = vpop.f32.mrb[8].mxu1 }
 0x56c   :  { %v16813_v10 = vmax.f32 %v3366_v21, %v4146_v8  ;;  %v4119_v45 = vadd.f32 %v4082_v51, %v16711_v54  ;;  %v12505_v27 = vpop.f32.mrb[9].mxu1 }
 0x56d   :  { %v4085_v29 = vpop.f32.mrb[10].mxu1 }
 0x56e   :  { %v4133_v0 = vadd.f32 %v16757_v4, %v4119_v45  ;;  %v4120_v59 = vadd.f32 %v4085_v29, %v16716_v23  ;;  %v12506_v44 = vpop.f32.mrb[11].mxu1  ;;  %v3371_v45 = vmax.f32 %v3357_v43, 0.0 }
 0x570   :  { %v4147_v6 = vmax.f32 %v4133_v0, 0.0  ;;  %v4134_v26 = vadd.f32 %v16757_v4, %v4120_v59  ;;  %12756 = vmatmul.mubr.msk.bf16.gmra.mrb[116].mxu1 %vm2474_vm6, %v14942_v50  ;;  %v3356_v50 = vadd.f32 %v16757_v4, %v16429_v34  ;;  %v19624_v59 = vld [vmem:[#allocation20_spill] sm:$0xff] }
 0x571   :  { %12759 = vmatprep.mubr.msk.bf16.mxu1 %vm13920_vm3, %v19311_v15  ;;  %v3359_v44 = vadd.f32 %v16757_v4, %v19624_v59  ;;  %v19637_v59 = vld [vmem:[#allocation103_spill] sm:$0xff] }
 0x572   :  { %v16825_v54 = vmax.f32 %v3367_v7, %v4147_v6  ;;  %v4148_v1 = vmax.f32 %v4134_v26, 0.0  ;;  %v3370_v3 = vmax.f32 %v3356_v50, 0.0 }
 0x573   :  { %v4090_v52 = vpop.f32.mrb[12].mxu1 }
 0x574   :  { %v16829_v23 = vmax.f32 %v3368_v14, %v4148_v1  ;;  %v4121_v18 = vadd.f32 %v4090_v52, %v16723_v13  ;;  %v12509_v32 = vpop.f32.mrb[13].mxu1  ;;  %v19626_v14 = vld [vmem:[#allocation119_spill] sm:$0xff] }
 0x575   :  { %v4093_v40 = vpop.f32.mrb[14].mxu1  ;;  %v3360_v1 = vadd.f32 %v16757_v4, %v19626_v14  ;;  %v3373_v32 = vmax.f32 %v3359_v44, 0.0  ;;  %v19639_v14 = vld [vmem:[#allocation99_spill] sm:$0xff] }
 0x576   :  { %v4135_v37 = vadd.f32 %v16757_v4, %v4121_v18  ;;  %v4122_v47 = vadd.f32 %v4093_v40, %v16728_v41  ;;  %v12510_v48 = vpop.f32.mrb[15].mxu1 }
 0x578   :  { %v4149_v33 = vmax.f32 %v4135_v37, 0.0  ;;  %v4136_v20 = vadd.f32 %v16757_v4, %v4122_v47  ;;  %12760 = vmatmul.mubr.msk.bf16.gmra.mrb[120].mxu1 %vm2474_vm6, %v14997_v5  ;;  %v3358_v5 = vadd.f32 %v16757_v4, %v16443_v39  ;;  %v19627_v37 = vld [vmem:[#allocation5_spill] sm:$0xff] }
 0x579   :  { %12763 = vmatprep.mubr.msk.bf16.mxu1 %vm13920_vm3, %v19311_v15 }
 0x57a   :  { %v16841_v13 = vmax.f32 %v3369_v31, %v4149_v33  ;;  %v4150_v46 = vmax.f32 %v4136_v20, 0.0  ;;  %v3372_v55 = vmax.f32 %v3358_v5, 0.0  ;;  %v19630_v20 = vld [vmem:[#allocation69_spill] sm:$0xff]  ;;  %v19633_v5 = vld [vmem:[#allocation43_spill] sm:$0xff] }
 0x57b   :  { %v4098_v34 = vpop.f32.mrb[16].mxu1 }
 0x57c   :  { %v16845_v41 = vmax.f32 %v3370_v3, %v4150_v46  ;;  %v4123_v2 = vadd.f32 %v4098_v34, %v16735_v28  ;;  %v12513_v60 = vpop.f32.mrb[17].mxu1  ;;  %v19631_v34 = vld [vmem:[#allocation104_spill] sm:$0xff] }
 0x57d   :  { %v4101_v21 = vpop.f32.mrb[18].mxu1  ;;  %v19632_v60 = vld [vmem:[#allocation23_spill] sm:$0xff] }
 0x57e   :  { %v4137_v8 = vadd.f32 %v16757_v4, %v4123_v2  ;;  %v4124_v51 = vadd.f32 %v4101_v21, %v16740_v56  ;;  %v12514_v42 = vpop.f32.mrb[19].mxu1 }
 0x580   :  { %v4151_v27 = vmax.f32 %v4137_v8, 0.0  ;;  %v4138_v29 = vadd.f32 %v16757_v4, %v4124_v51  ;;  %12764 = vmatmul.mubr.msk.bf16.gmra.mrb[124].mxu1 %vm2474_vm6, %v19623_v63  ;;  %v19634_v8 = vld [vmem:[#allocation74_spill] sm:$0xff] }
 0x581   :  { %12767 = vmatprep.mubr.msk.bf16.mxu1 %vm13920_vm3, %v19311_v15 }
 0x582   :  { %v16857_v28 = vmax.f32 %v3371_v45, %v4151_v27  ;;  %v4152_v0 = vmax.f32 %v4138_v29, 0.0  ;;  %v19635_v45 = vld [vmem:[#allocation19_spill] sm:$0xff] }
 0x583   :  { %v4106_v39 = vpop.f32.mrb[20].mxu1 }
 0x584   :  { %v16861_v56 = vmax.f32 %v3372_v55, %v4152_v0  ;;  %v4125_v7 = vadd.f32 %v4106_v39, %v16747_v22  ;;  %v12517_v6 = vpop.f32.mrb[21].mxu1  ;;  %v3374_v22 = vmax.f32 %v3360_v1, 0.0  ;;  %v19636_v55 = vld [vmem:[#allocation70_spill] sm:$0xff] }
 0x585   :  { %v4109_v26 = vpop.f32.mrb[22].mxu1 }
 0x586   :  { %19625 = vst [vmem:[#allocation7_spill] sm:$0xff] %v16861_v56  ;;  %v4139_v52 = vadd.f32 %v16757_v4, %v4125_v7  ;;  %v4126_v36 = vadd.f32 %v4109_v26, %v16752_v58  ;;  %v12518_v18 = vpop.f32.mrb[23].mxu1  ;;  %v19638_v7 = vld [vmem:[#allocation30_spill] sm:$0xff] }
 0x587   :  { %v19640_v18 = vld [vmem:[#allocation26_spill] sm:$0xff] }
 0x588   :  { %v4153_v40 = vmax.f32 %v4139_v52, 0.0  ;;  %v4140_v50 = vadd.f32 %v16757_v4, %v4126_v36  ;;  %12768 = vmatmul.mubr.msk.bf16.gmra.mrb[128].mxu1 %vm2474_vm6, %v19627_v37 }
 0x589   :  { %12771 = vmatprep.mubr.msk.bf16.mxu1 %vm13920_vm3, %v19311_v15 }
 0x58a   :  { %v16873_v47 = vmax.f32 %v3373_v32, %v4153_v40  ;;  %v4154_v48 = vmax.f32 %v4140_v50, 0.0  ;;  %v19641_v40 = vld [vmem:[#allocation75_spill] sm:$0xff] }
 0x58b   :  { %v4294_v31 = vpop.f32.mrb[24].mxu1 }
 0x58c   :  { %19628 = vst [vmem:[#allocation59_spill] sm:$0xff] %v16873_v47  ;;  %v16875_v33 = vmax.f32 %v3374_v22, %v4154_v48  ;;  %v4295_v58 = vadd.f32 %v4294_v31, %v19630_v20  ;;  %v12557_v3 = vpop.f32.mrb[25].mxu1  ;;  %v19643_v48 = vld [vmem:[#allocation71_spill] sm:$0xff] }
 0x58d   :  { %v4297_v46 = vpop.f32.mrb[26].mxu1 }
 0x58e   :  { %19629 = vst [vmem:[#allocation51_spill] sm:$0xff] %v16875_v33  ;;  %v4298_v43 = vadd.f32 %v4297_v46, %v19631_v34  ;;  %v12558_v2 = vpop.f32.mrb[27].mxu1  ;;  %v16880_v21 = vadd.f32 %v19632_v60, %v4295_v58  ;;  %v19644_v58 = vld [vmem:[#allocation21_spill] sm:$0xff]  ;;  %v19645_v34 = vld [vmem:[#allocation76_spill] sm:$0xff] }
 0x590   :  { %12772 = vmatmul.mubr.msk.bf16.gmra.mrb[132].mxu1 %vm2474_vm6, %v19633_v5  ;;  %v16885_v51 = vadd.f32 %v19634_v8, %v4298_v43  ;;  %v19647_v5 = vld [vmem:[#allocation72_spill] sm:$0xff] }
 0x591   :  { %12811 = vmatprep.mubr.msk.bf16.mxu1 %vm13920_vm3, %v19311_v15 }
 0x593   :  { %v4302_v42 = vpop.f32.mrb[28].mxu1 }
 0x594   :  { %v4303_v27 = vadd.f32 %v4302_v42, %v19635_v45  ;;  %v12561_v29 = vpop.f32.mrb[29].mxu1 }
 0x595   :  { %v4305_v63 = vpop.f32.mrb[30].mxu1 }
 0x596   :  { %v4306_v0 = vadd.f32 %v4305_v63, %v19636_v55  ;;  %v12562_v39 = vpop.f32.mrb[31].mxu1  ;;  %v16892_v44 = vadd.f32 %v19637_v59, %v4303_v27  ;;  %v19648_v27 = vld [vmem:[#allocation106_spill] sm:$0xff]  ;;  %v19649_v55 = vld [vmem:[#allocation105_spill] sm:$0xff] }
 0x598   :  { %12812 = vmatmul.mubr.msk.bf16.vlgmr.msra.gmra.mrb[136].mxu1 %vm2474_vm6, %v19537_v19  ;;  %v16897_v6 = vadd.f32 %v19638_v7, %v4306_v0  ;;  %v19651_v7 = vld [vmem:[#allocation101_spill] sm:$0xff] }
 0x599   :  { %12815 = vmatprep.mubr.msk.bf16.mxu1 %vm13920_vm3, %v19311_v15  ;;  %12872 = vmatpush3.bf16.msra.mxu1 %v16597_v17  ;;  %v19642_v17 = vld [vmem:[#allocation25_spill] sm:$0xff] }
 0x59a   :  { %12873 = vmatprep.subr.bf16.mxu1 %v19311_v15 }
 0x59b   :  { %v4310_v26 = vpop.f32.mrb[32].mxu1 }
 0x59c   :  { %v4311_v1 = vadd.f32 %v4310_v26, %v19639_v14  ;;  %v12565_v52 = vpop.f32.mrb[33].mxu1 }
 0x59d   :  { %v4313_v36 = vpop.f32.mrb[34].mxu1  ;;  %12874 = vmatpush3.bf16.msra.mxu1 %v16605_v24  ;;  %v19652_v52 = vld [vmem:[#allocation28_spill] sm:$0xff] }
 0x59e   :  { %v4314_v32 = vadd.f32 %v4313_v36, %v19640_v18  ;;  %v12566_v19 = vpop.f32.mrb[35].mxu1  ;;  %v16907_v50 = vadd.f32 %v19641_v40, %v4311_v1  ;;  %12939 = vmatprep.subr.bf16.mxu1 %v19311_v15 }
 0x5a0   :  { %12816 = vmatmul.mubr.msk.bf16.gmra.mrb[140].mxu1 %vm2474_vm6, %v19494_v57  ;;  %v16913_v37 = vadd.f32 %v19642_v17, %v4314_v32  ;;  %v19646_v57 = vld [vmem:[#allocation110_spill] sm:$0xff]  ;;  %v19653_v32 = vld [vmem:[#allocation77_spill] sm:$0xff] }
 0x5a1   :  { %12819 = vmatprep.mubr.msk.bf16.mxu1 %vm13920_vm3, %v19311_v15 }
 0x5a3   :  { %v4318_v22 = vpop.f32.mrb[36].mxu1 }
 0x5a4   :  { %v4319_v24 = vadd.f32 %v4318_v22, %v19643_v48  ;;  %v12569_v31 = vpop.f32.mrb[37].mxu1  ;;  %v19655_v22 = vld [vmem:[#allocation73_spill] sm:$0xff] }
 0x5a5   :  { %v4321_v20 = vpop.f32.mrb[38].mxu1 }
 0x5a6   :  { %v4322_v3 = vadd.f32 %v4321_v20, %v19644_v58  ;;  %v12570_v46 = vpop.f32.mrb[39].mxu1  ;;  %v16920_v43 = vadd.f32 %v19645_v34, %v4319_v24  ;;  %v19656_v20 = vld [vmem:[#allocation108_spill] sm:$0xff] }
 0x5a7   :  { %v19657_v46 = vld [vmem:[#allocation27_spill] sm:$0xff] }
 0x5a8   :  { %12820 = vmatmul.mubr.msk.bf16.gmra.mrb[144].mxu1 %vm2474_vm6, %v15430_v12  ;;  %v16925_v2 = vadd.f32 %v19646_v57, %v4322_v3  ;;  %v19650_v12 = vld [vmem:[#allocation32_spill] sm:$0xff] }
 0x5a9   :  { %12823 = vmatprep.mubr.msk.bf16.mxu1 %vm13920_vm3, %v19311_v15 }
 0x5ab   :  { %v4326_v60 = vpop.f32.mrb[40].mxu1 }
 0x5ac   :  { %v4327_v8 = vadd.f32 %v4326_v60, %v19647_v5  ;;  %v12573_v42 = vpop.f32.mrb[41].mxu1 }
 0x5ad   :  { %v4329_v45 = vpop.f32.mrb[42].mxu1 }
 0x5ae   :  { %v4330_v29 = vadd.f32 %v4329_v45, %v19648_v27  ;;  %v12574_v63 = vpop.f32.mrb[43].mxu1  ;;  %v16932_v0 = vadd.f32 %v19649_v55, %v4327_v8 }
 0x5b0   :  { %12824 = vmatmul.mubr.msk.bf16.gmra.mrb[148].mxu1 %vm2474_vm6, %v15444_v53  ;;  %v16937_v39 = vadd.f32 %v19650_v12, %v4330_v29  ;;  %v19654_v53 = vld [vmem:[#allocation112_spill] sm:$0xff]  ;;  %v19659_v29 = vld [vmem:[#allocation107_spill] sm:$0xff] }
 0x5b1   :  { %12827 = vmatprep.mubr.msk.bf16.mxu1 %vm13920_vm3, %v19311_v15 }
 0x5b3   :  { %v4334_v59 = vpop.f32.mrb[44].mxu1 }
 0x5b4   :  { %v4335_v26 = vadd.f32 %v4334_v59, %v19651_v7  ;;  %v12577_v14 = vpop.f32.mrb[45].mxu1 }
 0x5b5   :  { %v4337_v1 = vpop.f32.mrb[46].mxu1  ;;  %v19661_v14 = vld [vmem:[#allocation79_spill] sm:$0xff] }
 0x5b6   :  { %v4338_v36 = vadd.f32 %v4337_v1, %v19652_v52  ;;  %v12578_v18 = vpop.f32.mrb[47].mxu1  ;;  %v16944_v19 = vadd.f32 %v19653_v32, %v4335_v26  ;;  %v19662_v52 = vld [vmem:[#allocation50_spill] sm:$0xff] }
 0x5b8   :  { %12828 = vmatmul.mubr.msk.bf16.gmra.mrb[152].mxu1 %vm2474_vm6, %v15455_v35  ;;  %v16949_v40 = vadd.f32 %v19654_v53, %v4338_v36  ;;  %v19658_v35 = vld [vmem:[#allocation78_spill] sm:$0xff] }
 0x5b9   :  { %12831 = vmatprep.mubr.msk.bf16.mxu1 %vm13920_vm3, %v19311_v15 }
 0x5bb   :  { %v4342_v17 = vpop.f32.mrb[48].mxu1 }
 0x5bc   :  { %v4343_v48 = vadd.f32 %v4342_v17, %v19655_v22  ;;  %v12581_v24 = vpop.f32.mrb[49].mxu1  ;;  %v19664_v22 = vld [vmem:[#allocation80_spill] sm:$0xff] }
 0x5bd   :  { %v4345_v31 = vpop.f32.mrb[50].mxu1  ;;  %v19665_v24 = vld [vmem:[#allocation52_spill] sm:$0xff] }
 0x5be   :  { %v4346_v58 = vadd.f32 %v4345_v31, %v19656_v20  ;;  %v12582_v3 = vpop.f32.mrb[51].mxu1  ;;  %v16956_v34 = vadd.f32 %v19657_v46, %v4343_v48  ;;  %v19666_v31 = vld [vmem:[#allocation114_spill] sm:$0xff] }
 0x5c0   :  { %12832 = vmatmul.mubr.msk.bf16.gmra.mrb[156].mxu1 %vm2474_vm6, %v15999_v38  ;;  %v16961_v57 = vadd.f32 %v19658_v35, %v4346_v58  ;;  %v19660_v38 = vld [vmem:[#allocation34_spill] sm:$0xff] }
 0x5c1   :  { %12835 = vmatprep.mubr.msk.bf16.mxu1 %vm13920_vm3, %v19311_v15 }
 0x5c3   :  { %v4503_v60 = vpop.f32.mrb[52].mxu1 }
 0x5c4   :  { %v4558_v5 = vadd.f32 %v4503_v60, %v16880_v21  ;;  %v12621_v8 = vpop.f32.mrb[53].mxu1  ;;  %v19667_v60 = vld [vmem:[#allocation109_spill] sm:$0xff] }
 0x5c5   :  { %v4506_v42 = vpop.f32.mrb[54].mxu1  ;;  %v19668_v8 = vld [vmem:[#allocation8_spill] sm:$0xff] }
 0x5c6   :  { %v4559_v45 = vadd.f32 %v4506_v42, %v16885_v51  ;;  %v12622_v27 = vpop.f32.mrb[55].mxu1  ;;  %v16968_v63 = vadd.f32 %v19659_v29, %v4558_v5  ;;  %v19669_v42 = vld [vmem:[#allocation36_spill] sm:$0xff] }
 0x5c8   :  { %12836 = vmatmul.mubr.msk.bf16.gmra.mrb[160].mxu1 %vm2474_vm6, %v15983_v30  ;;  %v16973_v55 = vadd.f32 %v19660_v38, %v4559_v45  ;;  %v19663_v30 = vld [vmem:[#allocation29_spill] sm:$0xff] }
 0x5c9   :  { %12875 = vmatprep.mubr.msk.bf16.mxu1 %vm13920_vm3, %v19311_v15 }
 0x5cb   :  { %v4511_v12 = vpop.f32.mrb[56].mxu1 }
 0x5cc   :  { %v4560_v21 = vadd.f32 %v4511_v12, %v16892_v44  ;;  %v12625_v59 = vpop.f32.mrb[57].mxu1 }
 0x5cd   :  { %v4514_v7 = vpop.f32.mrb[58].mxu1 }
 0x5ce   :  { %v4561_v51 = vadd.f32 %v4514_v7, %v16897_v6  ;;  %v12626_v26 = vpop.f32.mrb[59].mxu1  ;;  %v16980_v1 = vadd.f32 %v19661_v14, %v4560_v21  ;;  %v19671_v7 = vld [vmem:[#allocation55_spill] sm:$0xff] }
 0x5d0   :  { %12876 = vmatmul.mubr.msk.bf16.vlgmr.msra.gmra.mrb[164].mxu1 %vm2474_vm6, %v19662_v52  ;;  %v16985_v36 = vadd.f32 %v19663_v30, %v4561_v51  ;;  %v19672_v51 = vld [vmem:[#allocation116_spill] sm:$0xff] }
 0x5d1   :  { %12879 = vmatprep.mubr.msk.bf16.mxu1 %vm13920_vm3, %v19311_v15 }
 0x5d3   :  { %v4519_v18 = vpop.f32.mrb[60].mxu1 }
 0x5d4   :  { %v4562_v44 = vadd.f32 %v4519_v18, %v16907_v50  ;;  %v12629_v32 = vpop.f32.mrb[61].mxu1 }
 0x5d5   :  { %v4522_v53 = vpop.f32.mrb[62].mxu1 }
 0x5d6   :  { %v4563_v6 = vadd.f32 %v4522_v53, %v16913_v37  ;;  %v12630_v17 = vpop.f32.mrb[63].mxu1  ;;  %v4682_v48 = vadd.f32 %v19664_v22, %v4562_v44  ;;  %v19674_v53 = vld [vmem:[#allocation11_spill] sm:$0xff] }
 0x5d8   :  { %12880 = vmatmul.mubr.msk.bf16.gmra.mrb[168].mxu1 %vm2474_vm6, %v19665_v24  ;;  %v16995_v20 = vadd.f32 %v19666_v31, %v4563_v6  ;;  %v19675_v6 = vld [vmem:[#allocation82_spill] sm:$0xff] }
 0x5d9   :  { %12883 = vmatprep.mubr.msk.bf16.mxu1 %vm13920_vm3, %v19311_v15 }
 0x5db   :  { %v4527_v58 = vpop.f32.mrb[64].mxu1 }
 0x5dc   :  { %v4564_v3 = vadd.f32 %v4527_v58, %v16920_v43  ;;  %v12633_v50 = vpop.f32.mrb[65].mxu1 }
 0x5dd   :  { %v4530_v46 = vpop.f32.mrb[66].mxu1 }
 0x5de   :  { %v4565_v35 = vadd.f32 %v4530_v46, %v16925_v2  ;;  %v12634_v37 = vpop.f32.mrb[67].mxu1  ;;  %v4684_v5 = vadd.f32 %v19667_v60, %v4564_v3  ;;  %v19670_v2 = vld [vmem:[#allocation81_spill] sm:$0xff] }
 0x5df   :  { %v19677_v46 = vld [vmem:[#allocation9_spill] sm:$0xff] }
 0x5e0   :  { %12884 = vmatmul.mubr.msk.bf16.gmra.mrb[172].mxu1 %vm2474_vm6, %v19668_v8  ;;  %v4685_v45 = vadd.f32 %v19669_v42, %v4565_v35  ;;  %v19678_v35 = vld [vmem:[#allocation38_spill] sm:$0xff] }
 0x5e1   :  { %12887 = vmatprep.mubr.msk.bf16.mxu1 %vm13920_vm3, %v19311_v15 }
 0x5e3   :  { %v4535_v27 = vpop.f32.mrb[68].mxu1 }
 0x5e4   :  { %v4566_v29 = vadd.f32 %v4535_v27, %v16932_v0  ;;  %v12637_v38 = vpop.f32.mrb[69].mxu1 }
 0x5e5   :  { %v4538_v43 = vpop.f32.mrb[70].mxu1  ;;  %v19679_v38 = vld [vmem:[#allocation121_spill] sm:$0xff] }
 0x5e6   :  { %v4567_v12 = vadd.f32 %v4538_v43, %v16937_v39  ;;  %v12638_v21 = vpop.f32.mrb[71].mxu1  ;;  %v4686_v59 = vadd.f32 %v19670_v2, %v4566_v29  ;;  %v19673_v39 = vld [vmem:[#allocation31_spill] sm:$0xff]  ;;  %v13389_v29 = vld [vmem:[%s19005_s5 + $0x20] sm:$0xff]  }
 0x5e7   :  { %12904 = vmatpush3.bf16.msra.mxu0 %v13389_v29 }
 0x5e8   :  { %12888 = vmatmul.mubr.msk.bf16.gmra.mrb[176].mxu1 %vm2474_vm6, %v19671_v7  ;;  %v4687_v26 = vadd.f32 %v19672_v51, %v4567_v12  ;;  %12905 = vmatprep.subr.bf16.mxu0 %v19311_v15 }
 0x5e9   :  { %12891 = vmatprep.mubr.msk.bf16.mxu1 %vm13920_vm3, %v19311_v15 }
 0x5eb   :  { %v4543_v14 = vpop.f32.mrb[72].mxu1 }
 0x5ec   :  { %v4568_v52 = vadd.f32 %v4543_v14, %v16944_v19  ;;  %v12641_v30 = vpop.f32.mrb[73].mxu1 }
 0x5ed   :  { %v4546_v0 = vpop.f32.mrb[74].mxu1 }
 0x5ee   :  { %v4569_v18 = vadd.f32 %v4546_v0, %v16949_v40  ;;  %v12642_v44 = vpop.f32.mrb[75].mxu1  ;;  %v4688_v32 = vadd.f32 %v19673_v39, %v4568_v52  ;;  %v19676_v40 = vld [vmem:[#allocation111_spill] sm:$0xff] }
 0x5f0   :  { %12892 = vmatmul.mubr.msk.bf16.gmra.mrb[180].mxu1 %vm2474_vm6, %v19674_v53  ;;  %v4689_v17 = vadd.f32 %v19675_v6, %v4569_v18 }
 0x5f1   :  { %12895 = vmatprep.mubr.msk.bf16.mxu1 %vm13920_vm3, %v19311_v15 }
 0x5f3   :  { %v4551_v22 = vpop.f32.mrb[76].mxu1 }
 0x5f4   :  { %v4570_v24 = vadd.f32 %v4551_v22, %v16956_v34  ;;  %v12645_v31 = vpop.f32.mrb[77].mxu1 }
 0x5f5   :  { %v4554_v19 = vpop.f32.mrb[78].mxu1 }
 0x5f6   :  { %v4571_v58 = vadd.f32 %v4554_v19, %v16961_v57  ;;  %v12646_v3 = vpop.f32.mrb[79].mxu1  ;;  %v4690_v50 = vadd.f32 %v19676_v40, %v4570_v24 }
 0x5f8   :  { %12896 = vmatmul.mubr.msk.bf16.gmra.mrb[184].mxu1 %vm2474_vm6, %v19677_v46  ;;  %v4691_v37 = vadd.f32 %v19678_v35, %v4571_v58  ;;  %v13391_v58 = vld [vmem:[%s19005_s5 + $0x30] sm:$0xff]  }
 0x5f9   :  { %12899 = vmatprep.mubr.msk.bf16.mxu1 %vm13920_vm3, %v19311_v15 }
 0x5fb   :  { %v4726_v60 = vpop.f32.mrb[80].mxu1 }
 0x5fc   :  { %v17032_v8 = vadd.f32 %v4726_v60, %v16968_v63  ;;  %v12685_v34 = vpop.f32.mrb[81].mxu1 }
 0x5fd   :  { %v4729_v42 = vpop.f32.mrb[82].mxu1 }
 0x5fe   :  { %v17035_v27 = vadd.f32 %v4729_v42, %v16973_v55  ;;  %v12686_v57 = vpop.f32.mrb[83].mxu1  ;;  %v13392_v42 = vld [vmem:[%s19005_s5] sm:$0xff]  }
 0x5ff   :  { %12940 = vmatpush3.bf16.msra.mxu1 %v13392_v42 }
 0x600   :  { %12900 = vmatmul.mubr.msk.bf16.gmra.mrb[188].mxu1 %vm2474_vm6, %v19679_v38  ;;  %12941 = vmatprep.subr.bf16.mxu1 %v19311_v15 }
 0x601   :  { %12947 = vmatprep.mubr.msk.bf16.mxu1 %vm13920_vm3, %v19311_v15 }
 0x603   :  { %v4734_v63 = vpop.f32.mrb[84].mxu1 }
 0x604   :  { %v17046_v43 = vadd.f32 %v4734_v63, %v16980_v1  ;;  %v12689_v55 = vpop.f32.mrb[85].mxu1  ;;  %v13390_v1 = vld [vmem:[%s19005_s5 + $0x28] sm:$0xff]  }
 0x605   :  { %v4737_v12 = vpop.f32.mrb[86].mxu1  ;;  %12906 = vmatpush3.bf16.msra.mxu0 %v13390_v1  ;;  %v19683_v1 = vld [vmem:[#allocation47_spill] sm:$0xff] }
 0x606   :  { %v17049_v21 = vadd.f32 %v4737_v12, %v16985_v36  ;;  %v12690_v2 = vpop.f32.mrb[87].mxu1  ;;  %12907 = vmatprep.subr.bf16.mxu0 %v19311_v15  ;;  %v19681_v12 = vld [vmem:[#allocation33_spill] sm:$0xff] }
 0x609   :  { %12908 = vmatpush3.bf16.msra.mxu0 %v13391_v58 }
 0x60a   :  { %12909 = vmatprep.subr.bf16.mxu0 %v19311_v15 }
 0x60b   :  { %v4742_v7 = vpop.f32.mrb[88].mxu1 }
 0x60c   :  { %v17051_v51 = vadd.f32 %v4742_v7, %v4682_v48  ;;  %v12693_v14 = vpop.f32.mrb[89].mxu1 }
 0x60d   :  { %v4745_v52 = vpop.f32.mrb[90].mxu1  ;;  %v19682_v14 = vld [vmem:[#allocation54_spill] sm:$0xff] }
 0x60e   :  { %v17054_v30 = vadd.f32 %v4745_v52, %v16995_v20  ;;  %v12694_v0 = vpop.f32.mrb[91].mxu1 }
 0x60f   :  { %v13394_v0 = vld [vmem:[%s19005_s5 + $0x38] sm:$0xff]  }
 0x610   :  { %12910 = vmatpush3.bf16.msra.mxu0 %v13394_v0 }
 0x611   :  { %12975 = vmatprep.subr.bf16.mxu0 %v19311_v15 }
 0x613   :  { %v4750_v18 = vpop.f32.mrb[92].mxu1 }
 0x614   :  { %v17060_v36 = vadd.f32 %v4750_v18, %v4684_v5  ;;  %v12697_v44 = vpop.f32.mrb[93].mxu1 }
 0x615   :  { %v4753_v39 = vpop.f32.mrb[94].mxu1  ;;  %v13396_v44 = vld [vmem:[%s19005_s5 + $0x18] sm:$0xff]  }
 0x616   :  { %v17062_v48 = vadd.f32 %v4753_v39, %v4685_v45  ;;  %v12698_v53 = vpop.f32.mrb[95].mxu1 }
 0x617   :  { %v19684_v53 = vld [vmem:[#allocation84_spill] sm:$0xff] }
 0x61b   :  { %v4758_v6 = vpop.f32.mrb[96].mxu1 }
 0x61c   :  { %v17064_v22 = vadd.f32 %v4758_v6, %v4686_v59  ;;  %v12701_v20 = vpop.f32.mrb[97].mxu1 }
 0x61d   :  { %v4761_v24 = vpop.f32.mrb[98].mxu1 }
 0x61e   :  { %v17066_v31 = vadd.f32 %v4761_v24, %v4687_v26  ;;  %v12702_v19 = vpop.f32.mrb[99].mxu1 }
 0x61f   :  { %v19685_v19 = vld [vmem:[#allocation117_spill] sm:$0xff] }
 0x623   :  { %v4766_v5 = vpop.f32.mrb[100].mxu1 }
 0x624   :  { %v17072_v3 = vadd.f32 %v4766_v5, %v4688_v32  ;;  %v12705_v45 = vpop.f32.mrb[101].mxu1  ;;  %v13393_v32 = vld [vmem:[%s19005_s5 + $0x8] sm:$0xff]  }
 0x625   :  { %v4769_v40 = vpop.f32.mrb[102].mxu1  ;;  %12942 = vmatpush3.bf16.msra.mxu1 %v13393_v32  ;;  %v19686_v45 = vld [vmem:[#allocation57_spill] sm:$0xff] }
 0x626   :  { %v17074_v46 = vadd.f32 %v4769_v40, %v4689_v17  ;;  %v12706_v59 = vpop.f32.mrb[103].mxu1  ;;  %12943 = vmatprep.subr.bf16.mxu1 %v19311_v15 }
 0x627   :  { %v19687_v59 = vld [vmem:[#allocation48_spill] sm:$0xff] }
 0x62b   :  { %v4774_v35 = vpop.f32.mrb[104].mxu1 }
 0x62c   :  { %v17076_v60 = vadd.f32 %v4774_v35, %v4690_v50  ;;  %v12709_v26 = vpop.f32.mrb[105].mxu1  ;;  %v19680_v50 = vld [vmem:[#allocation83_spill] sm:$0xff] }
 0x62d   :  { %v4777_v34 = vpop.f32.mrb[106].mxu1 }
 0x62e   :  { %v17081_v57 = vadd.f32 %v4777_v34, %v4691_v37  ;;  %v12710_v29 = vpop.f32.mrb[107].mxu1  ;;  %v13395_v37 = vld [vmem:[%s19005_s5 + $0x10] sm:$0xff]   ;;  %v19688_v34 = vld [vmem:[#allocation113_spill] sm:$0xff] }
 0x62f   :  { %12944 = vmatpush3.bf16.msra.mxu1 %v13395_v37  ;;  %v19691_v37 = vld [vmem:[#allocation56_spill] sm:$0xff] }
 0x630   :  { %12945 = vmatprep.subr.bf16.mxu1 %v19311_v15 }
 0x633   :  { %v4946_v17 = vpop.f32.mrb[108].mxu1  ;;  %12946 = vmatpush3.bf16.msra.mxu1 %v13396_v44  ;;  %v19693_v44 = vld [vmem:[#allocation35_spill] sm:$0xff] }
 0x634   :  { %v4947_v38 = vadd.f32 %v4946_v17, %v19680_v50  ;;  %v12749_v63 = vpop.f32.mrb[109].mxu1  ;;  %13011 = vmatprep.subr.bf16.mxu1 %v19311_v15  ;;  %v19689_v17 = vld [vmem:[#allocation39_spill] sm:$0xff] }
 0x635   :  { %v4949_v55 = vpop.f32.mrb[110].mxu1  ;;  %v19690_v63 = vld [vmem:[#allocation58_spill] sm:$0xff] }
 0x636   :  { %v4950_v2 = vadd.f32 %v4949_v55, %v19681_v12  ;;  %v12750_v7 = vpop.f32.mrb[111].mxu1  ;;  %v5090_v52 = vadd.f32 %v19682_v14, %v4947_v38 }
 0x637   :  { %v19692_v7 = vld [vmem:[#allocation85_spill] sm:$0xff] }
 0x638   :  { %v5091_v18 = vadd.f32 %v19683_v1, %v4950_v2 }
 0x63b   :  { %v4954_v39 = vpop.f32.mrb[112].mxu1 }
 0x63c   :  { %v4955_v6 = vadd.f32 %v4954_v39, %v19684_v53  ;;  %v12753_v20 = vpop.f32.mrb[113].mxu1 }
 0x63d   :  { %v4957_v24 = vpop.f32.mrb[114].mxu1 }
 0x63e   :  { %v4958_v58 = vadd.f32 %v4957_v24, %v19685_v19  ;;  %v12754_v5 = vpop.f32.mrb[115].mxu1  ;;  %v5092_v40 = vadd.f32 %v19686_v45, %v4955_v6  ;;  %v19694_v6 = vld [vmem:[#allocation53_spill] sm:$0xff]  ;;  %v19695_v24 = vld [vmem:[#allocation14_spill] sm:$0xff] }
 0x63f   :  { %v19696_v5 = vld [vmem:[#allocation86_spill] sm:$0xff] }
 0x640   :  { %v5093_v35 = vadd.f32 %v19687_v59, %v4958_v58 }
 0x643   :  { %v4962_v26 = vpop.f32.mrb[116].mxu1 }
 0x644   :  { %v4963_v42 = vadd.f32 %v4962_v26, %v19688_v34  ;;  %v12757_v29 = vpop.f32.mrb[117].mxu1  ;;  %v19697_v34 = vld [vmem:[#allocation115_spill] sm:$0xff] }
 0x645   :  { %v4965_v32 = vpop.f32.mrb[118].mxu1 }
 0x646   :  { %v4966_v50 = vadd.f32 %v4965_v32, %v19689_v17  ;;  %v12758_v38 = vpop.f32.mrb[119].mxu1  ;;  %v5094_v55 = vadd.f32 %v19690_v63, %v4963_v42  ;;  %v19698_v32 = vld [vmem:[#allocation40_spill] sm:$0xff] }
 0x648   :  { %v5095_v12 = vadd.f32 %v19691_v37, %v4966_v50  ;;  %v19699_v50 = vld [vmem:[#allocation89_spill] sm:$0xff] }
 0x649   :  { %v19700_v37 = vld [vmem:[#allocation41_spill] sm:$0xff] }
 0x64b   :  { %v4970_v2 = vpop.f32.mrb[120].mxu1 }
 0x64c   :  { %v4971_v14 = vadd.f32 %v4970_v2, %v19692_v7  ;;  %v12761_v0 = vpop.f32.mrb[121].mxu1 }
 0x64d   :  { %v4973_v1 = vpop.f32.mrb[122].mxu1 }
 0x64e   :  { %v4974_v39 = vadd.f32 %v4973_v1, %v19693_v44  ;;  %v12762_v53 = vpop.f32.mrb[123].mxu1  ;;  %v5096_v20 = vadd.f32 %v19694_v6, %v4971_v14  ;;  %v19701_v14 = vld [vmem:[#allocation87_spill] sm:$0xff]  ;;  %v19703_v6 = vld [vmem:[#allocation118_spill] sm:$0xff] }
 0x650   :  { %v5097_v19 = vadd.f32 %v19695_v24, %v4974_v39  ;;  %v19702_v39 = vld [vmem:[#allocation93_spill] sm:$0xff] }
 0x653   :  { %v4978_v58 = vpop.f32.mrb[124].mxu1 }
 0x654   :  { %v4979_v45 = vadd.f32 %v4978_v58, %v19696_v5  ;;  %v12765_v59 = vpop.f32.mrb[125].mxu1  ;;  %v19704_v5 = vld [vmem:[#allocation37_spill] sm:$0xff] }
 0x655   :  { %v4981_v26 = vpop.f32.mrb[126].mxu1 }
 0x656   :  { %v4982_v42 = vadd.f32 %v4981_v26, %v19697_v34  ;;  %v12766_v29 = vpop.f32.mrb[127].mxu1  ;;  %v5098_v17 = vadd.f32 %v19698_v32, %v4979_v45  ;;  %v19705_v45 = vld [vmem:[#allocation88_spill] sm:$0xff] }
 0x657   :  { %v19706_v32 = vld [vmem:[#allocation92_spill] sm:$0xff] }
 0x658   :  { %v5099_v38 = vadd.f32 %v19699_v50, %v4982_v42 }
 0x65b   :  { %v4986_v63 = vpop.f32.mrb[128].mxu1 }
 0x65c   :  { %v4987_v2 = vadd.f32 %v4986_v63, %v19700_v37  ;;  %v12769_v7 = vpop.f32.mrb[129].mxu1  ;;  %v19707_v63 = vld [vmem:[#allocation120_spill] sm:$0xff] }
 0x65d   :  { %v4989_v0 = vpop.f32.mrb[130].mxu1 }
 0x65e   :  { %v4990_v1 = vadd.f32 %v4989_v0, %v19701_v14  ;;  %v12770_v44 = vpop.f32.mrb[131].mxu1  ;;  %v5100_v53 = vadd.f32 %v19702_v39, %v4987_v2  ;;  %v19708_v39 = vld [vmem:[#allocation122_spill] sm:$0xff] }
 0x660   :  { %v5101_v24 = vadd.f32 %v19703_v6, %v4990_v1  ;;  %v19709_v6 = vld [vmem:[#allocation123_spill] sm:$0xff] }
 0x663   :  { %v4994_v58 = vpop.f32.mrb[132].mxu1 }
 0x664   :  { %v4995_v59 = vadd.f32 %v4994_v58, %v19704_v5  ;;  %v12773_v26 = vpop.f32.mrb[133].mxu1 }
 0x665   :  { %v4997_v34 = vpop.f32.mrb[134].mxu1 }
 0x666   :  { %v4998_v29 = vadd.f32 %v4997_v34, %v19705_v45  ;;  %v12774_v42 = vpop.f32.mrb[135].mxu1  ;;  %v5102_v50 = vadd.f32 %v19706_v32, %v4995_v59  ;;  %v19711_v32 = vld [vmem:[#allocation124_spill] sm:$0xff] }
 0x667   :  { %v19710_v42 = vld [vmem:[#allocation44_spill] sm:$0xff] }
 0x668   :  { %v5103_v37 = vadd.f32 %v19707_v63, %v4998_v29 }
 0x66b   :  { %v5138_v7 = vpop.f32.mrb[136].mxu1 }
 0x66c   :  { %v5193_v33 = vadd.f32 %v5138_v7, %v5090_v52  ;;  %v12813_v0 = vpop.f32.mrb[137].mxu1 }
 0x66d   :  { %v5141_v14 = vpop.f32.mrb[138].mxu1 }
 0x66e   :  { %v5194_v44 = vadd.f32 %v5141_v14, %v5091_v18  ;;  %v12814_v2 = vpop.f32.mrb[139].mxu1  ;;  %v5296_v1 = vadd.f32 %v19708_v39, %v5193_v33  ;;  %v19712_v33 = vld [vmem:[#allocation45_spill] sm:$0xff] }
 0x670   :  { %v5297_v47 = vadd.f32 %v19709_v6, %v5194_v44  ;;  %v19713_v44 = vld [vmem:[#allocation125_spill] sm:$0xff] }
 0x673   :  { %v5146_v58 = vpop.f32.mrb[140].mxu1 }
 0x674   :  { %v5195_v5 = vadd.f32 %v5146_v58, %v5092_v40  ;;  %v12817_v26 = vpop.f32.mrb[141].mxu1 }
 0x675   :  { %v5149_v56 = vpop.f32.mrb[142].mxu1  ;;  %v19714_v26 = vld [vmem:[#allocation46_spill] sm:$0xff] }
 0x676   :  { %v5196_v34 = vadd.f32 %v5149_v56, %v5093_v35  ;;  %v12818_v45 = vpop.f32.mrb[143].mxu1  ;;  %v5298_v59 = vadd.f32 %v19710_v42, %v5195_v5 }
 0x678   :  { %v17132_v29 = vadd.f32 %v19711_v32, %v5196_v34 }
 0x67b   :  { %v5154_v52 = vpop.f32.mrb[144].mxu1 }
 0x67c   :  { %v5197_v63 = vadd.f32 %v5154_v52, %v5094_v55  ;;  %v12821_v7 = vpop.f32.mrb[145].mxu1  ;;  %v19715_v55 = vld [vmem:[#allocation126_spill] sm:$0xff] }
 0x67d   :  { %v5157_v18 = vpop.f32.mrb[146].mxu1 }
 0x67e   :  { %v5198_v0 = vadd.f32 %v5157_v18, %v5095_v12  ;;  %v12822_v14 = vpop.f32.mrb[147].mxu1  ;;  %v17135_v2 = vadd.f32 %v19712_v33, %v5197_v63  ;;  %v19716_v18 = vld [vmem:[#allocation6_spill] sm:$0xff] }
 0x680   :  { %v17138_v40 = vadd.f32 %v19713_v44, %v5198_v0 }
 0x683   :  { %v5162_v39 = vpop.f32.mrb[148].mxu1 }
 0x684   :  { %v5199_v56 = vadd.f32 %v5162_v39, %v5096_v20  ;;  %v12825_v35 = vpop.f32.mrb[149].mxu1  ;;  %v19717_v20 = vld [vmem:[#allocation127_spill] sm:$0xff] }
 0x685   :  { %v5165_v6 = vpop.f32.mrb[150].mxu1 }
 0x686   :  { %v5200_v58 = vadd.f32 %v5165_v6, %v5097_v19  ;;  %v12826_v5 = vpop.f32.mrb[151].mxu1  ;;  %v17141_v34 = vadd.f32 %v19714_v26, %v5199_v56  ;;  %v19718_v6 = vld [vmem:[#allocation49_spill] sm:$0xff] }
 0x688   :  { %v17144_v45 = vadd.f32 %v19715_v55, %v5200_v58 }
 0x68b   :  { %v5170_v12 = vpop.f32.mrb[152].mxu1 }
 0x68c   :  { %v5201_v42 = vadd.f32 %v5170_v12, %v5098_v17  ;;  %v12829_v32 = vpop.f32.mrb[153].mxu1  ;;  %v19719_v17 = vld [vmem:[#allocation128_spill] sm:$0xff] }
 0x68d   :  { %v5173_v52 = vpop.f32.mrb[154].mxu1 }
 0x68e   :  { %v5202_v63 = vadd.f32 %v5173_v52, %v5099_v38  ;;  %v12830_v7 = vpop.f32.mrb[155].mxu1  ;;  %v17147_v0 = vadd.f32 %v19716_v18, %v5201_v42 }
 0x690   :  { %v17150_v14 = vadd.f32 %v19717_v20, %v5202_v63  ;;  %v4795_v63 = vadd.f32 %v16757_v4, %v17032_v8 }
 0x693   :  { %v5178_v19 = vpop.f32.mrb[156].mxu1 }
 0x694   :  { %v5203_v33 = vadd.f32 %v5178_v19, %v5100_v53  ;;  %v12833_v44 = vpop.f32.mrb[157].mxu1 }
 0x695   :  { %v5181_v39 = vpop.f32.mrb[158].mxu1  ;;  %v4809_v44 = vmax.f32 %v4795_v63, 0.0 }
 0x696   :  { %v5204_v56 = vadd.f32 %v5181_v39, %v5101_v24  ;;  %v12834_v35 = vpop.f32.mrb[159].mxu1  ;;  %v17153_v58 = vadd.f32 %v19718_v6, %v5203_v33 }
 0x698   :  { %v17156_v5 = vadd.f32 %v19719_v17, %v5204_v56 }
 0x69b   :  { %v5186_v38 = vpop.f32.mrb[160].mxu1 }
 0x69c   :  { %v5205_v26 = vadd.f32 %v5186_v38, %v5102_v50  ;;  %v12837_v55 = vpop.f32.mrb[161].mxu1  ;;  %v4796_v50 = vadd.f32 %v16757_v4, %v17035_v27  ;;  %v4797_v27 = vadd.f32 %v16757_v4, %v17046_v43 }
 0x69d   :  { %v5189_v12 = vpop.f32.mrb[162].mxu1 }
 0x69e   :  { %v5206_v42 = vadd.f32 %v5189_v12, %v5103_v37  ;;  %v12838_v32 = vpop.f32.mrb[163].mxu1  ;;  %v17159_v52 = vadd.f32 %v16566_v25, %v5205_v26 }
 0x69f   :  { %v4798_v32 = vadd.f32 %v16757_v4, %v17049_v21 }
 0x6a0   :  { %v17162_v53 = vadd.f32 %v16569_v61, %v5206_v42  ;;  %v4810_v61 = vmax.f32 %v4796_v50, 0.0 }
 0x6a3   :  { %v5344_v24 = vpop.f32.mrb[164].mxu1 }
 0x6a4   :  { %v5399_v7 = vadd.f32 %v5344_v24, %v5296_v1  ;;  %v12877_v18 = vpop.f32.mrb[165].mxu1 }
 0x6a5   :  { %v5347_v20 = vpop.f32.mrb[166].mxu1  ;;  %v4811_v18 = vmax.f32 %v4797_v27, 0.0 }
 0x6a6   :  { %v5413_v19 = vadd.f32 %v16757_v4, %v5399_v7  ;;  %v5400_v37 = vadd.f32 %v5347_v20, %v5297_v47  ;;  %v12878_v33 = vpop.f32.mrb[167].mxu1 }
 0x6a8   :  { %v5427_v25 = vmax.f32 %v5413_v19, 0.0  ;;  %v5414_v39 = vadd.f32 %v16757_v4, %v5400_v37 }
 0x6aa   :  { %v5455_v56 = vmax.f32 %v4809_v44, %v5427_v25  ;;  %v5428_v35 = vmax.f32 %v5414_v39, 0.0  ;;  %v13398_v39 = vld [vmem:[%s19005_s5 + $0x48] sm:$0xff]  }
 0x6ab   :  { %v5352_v6 = vpop.f32.mrb[168].mxu1 }
 0x6ac   :  { %v5469_v8 = vmax.f32 %v16773_v62, %v5455_v56  ;;  %v5456_v1 = vmax.f32 %v4810_v61, %v5428_v35  ;;  %v5401_v17 = vadd.f32 %v5352_v6, %v5298_v59  ;;  %v12881_v38 = vpop.f32.mrb[169].mxu1  ;;  %v13397_v62 = vld [vmem:[%s19005_s5 + $0x40] sm:$0xff]   ;;  %v4799_v61 = vadd.f32 %v16757_v4, %v17051_v51 }
 0x6ad   :  { %v5355_v26 = vpop.f32.mrb[170].mxu1  ;;  %v4800_v56 = vadd.f32 %v16757_v4, %v17054_v30  ;;  %v17204_v38 = vld [vmem:[%s19004_s4] ss:$0 sm:$0xff] }
 0x6ae   :  { %v5496_v55 = vrot.slane %v5469_v8, 2  ;;  %v5470_v47 = vmax.f32 %v16777_v49, %v5456_v1  ;;  %v5415_v12 = vadd.f32 %v16757_v4, %v5401_v17  ;;  %v12882_v42 = vpop.f32.mrb[171].mxu1  ;;  %v5402_v24 = vadd.f32 %v5355_v26, %v17132_v29 }
 0x6af   :  { %v5837_v59 = vrot.slane %v5469_v8, 6  ;;  %v4812_v29 = vmax.f32 %v4798_v32, 0.0  ;;  %v4813_v26 = vmax.f32 %v4799_v61, 0.0 }
 0x6b0   :  { %v5497_v63 = vrot.slane %v5470_v47, 2  ;;  %v5560_v43 = vpack.c.bf16 %v5470_v47, %v5469_v8  ;;  %v5838_v7 = vrot.slane %v5470_v47, 6  ;;  %v5429_v20 = vmax.f32 %v5415_v12, 0.0 }
 0x6b1   :  { %v5416_v49 = vadd.f32 %v16757_v4, %v5402_v24  ;;  %v5535_v50 = vsel %vm2380_vm5, 0.0, %v5496_v55 }
 0x6b2   :  { %v5498_v19 = vsel %vm2380_vm5, %v5496_v55, %v5497_v63  ;;  %v17185_v21 = vsel %vm2338_vm4, %v5837_v59, %v5838_v7  ;;  %12912 = vmatmul.mubr.msk.bf16.vlgmr.msra.gmra.mrb[184].mxu0 %vm5591_vm7, %v5560_v43  ;;  %v5457_v33 = vmax.f32 %v4811_v18, %v5429_v20  ;;  %v4814_v55 = vmax.f32 %v4800_v56, 0.0 }
 0x6b3   :  { %v5544_v37 = vpack.c.bf16 %v5498_v19, %v5535_v50  ;;  %v5430_v44 = vmax.f32 %v5416_v49, 0.0  ;;  %v5360_v25 = vpop.f32.mrb[172].mxu1  ;;  %12915 = vmatprep.mubr.msk.bf16.mxu0 %vm13920_vm3, %v19311_v15  ;;  %12976 = vmatpush3.bf16.msra.mxu0 %v13397_v62  ;;  %v13399_v62 = vld [vmem:[%s19005_s5 + $0x50] sm:$0xff]   ;;  %v4801_v20 = vadd.f32 %v17204_v38, %v17060_v36 }
 0x6b4   :  { %v5403_v35 = vadd.f32 %v5360_v25, %v17135_v2  ;;  %v12885_v6 = vpop.f32.mrb[173].mxu1  ;;  %12977 = vmatprep.subr.bf16.mxu0 %v19311_v15  ;;  %v5471_v8 = vmax.f32 %v16790_v11, %v5457_v33  ;;  %v4802_v33 = vadd.f32 %v17204_v38, %v17062_v48  ;;  %v13400_v25 = vld [vmem:[%s19005_s5 + $0x58] sm:$0xff]   ;;  %s13923_s5 = smov [#allocation2]  }
 0x6b5   :  { %v5458_v1 = vmax.f32 %v4812_v29, %v5430_v44  ;;  %v5363_v17 = vpop.f32.mrb[174].mxu1  ;;  %12948 = vmatmul.mubr.msk.bf16.vlgmr.msra.gmra.mrb[192].mxu1 %vm5591_vm7, %v5544_v37  ;;  %v4815_v48 = vmax.f32 %v4801_v20, 0.0  ;;  %s10269_s23 = sshll.u32 %s13923_s5, 4  ;;  %s10270_s23 = int_to_ptr.vmem [resolvable:$true] %s10269_s23 }
 0x6b6   :  { %v5417_v51 = vadd.f32 %v17204_v38, %v5403_v35  ;;  %v5404_v4 = vadd.f32 %v5363_v17, %v17138_v40  ;;  %v12886_v30 = vpop.f32.mrb[175].mxu1  ;;  %12951 = vmatprep.mubr.msk.bf16.mxu1 %vm13920_vm3, %v19311_v15  ;;  %v5499_v2 = vrot.slane %v5471_v8, 2  ;;  %v5840_v27 = vrot.slane %v5471_v8, 6  ;;  %p13899_p1 = scmp.lt.s32.totalorder %s10270_s23, %s10270_s23 }
 0x6b7   :  { %v5472_v11 = vmax.f32 %v16795_v16, %v5458_v1  ;;  %12978 = vmatpush3.bf16.msra.mxu0 %v13398_v39  ;;  %v4816_v30 = vmax.f32 %v4802_v33, 0.0 }
 0x6b8   :  { %v5431_v47 = vmax.f32 %v5417_v51, 0.0  ;;  %v5418_v12 = vadd.f32 %v17204_v38, %v5404_v4  ;;  %12979 = vmatprep.subr.bf16.mxu0 %v19311_v15  ;;  %v5500_v42 = vsel %vm2380_vm5, %v5497_v63, %v5499_v2  ;;  %v17215_v40 = vsel %vm2338_vm4, %v5838_v7, %v5840_v27 }
 0x6b9   :  { %v5501_v32 = vrot.slane %v5472_v11, 2  ;;  %v5561_v24 = vpack.c.bf16 %v5472_v11, %v5471_v8  ;;  %v5887_v16 = vpack.c.bf16 %v17215_v40, %v17185_v21  ;;  %v5842_v59 = vrot.slane %v5472_v11, 6  ;;  %v13401_v40 = vld [vmem:[%s19007_s7 + $0x20] sm:$0xff]  }
 0x6ba   :  { %v5459_v43 = vmax.f32 %v4813_v26, %v5431_v47  ;;  %v5432_v18 = vmax.f32 %v5418_v12, 0.0  ;;  %v4803_v12 = vadd.f32 %v17204_v38, %v17064_v22  ;;  %13012 = vmatpush3.bf16.msra.mxu1 %v13401_v40 }
 0x6bb   :  { %v5502_v63 = vsel %vm2380_vm5, %v5499_v2, %v5501_v32  ;;  %12916 = vmatmul.mubr.msk.bf16.gmra.mrb[188].mxu0 %vm5591_vm7, %v5561_v24  ;;  %v5368_v7 = vpop.f32.mrb[176].mxu1  ;;  %v17227_v50 = vsel %vm2338_vm4, %v5840_v27, %v5842_v59  ;;  %13013 = vmatprep.subr.bf16.mxu1 %v19311_v15 }
 0x6bc   :  { %v5545_v49 = vpack.c.bf16 %v5502_v63, %v5500_v42  ;;  %v5473_v19 = vmax.f32 %v16809_v9, %v5459_v43  ;;  %v5460_v29 = vmax.f32 %v4814_v55, %v5432_v18  ;;  %v12889_v37 = vpop.f32.mrb[177].mxu1  ;;  %12919 = vmatprep.mubr.msk.bf16.mxu0 %vm13920_vm3, %v19311_v15  ;;  %v5405_v36 = vadd.f32 %v5368_v7, %v17141_v34 }
 0x6bd   :  { %v5371_v44 = vpop.f32.mrb[178].mxu1  ;;  %12980 = vmatpush3.bf16.msra.mxu0 %v13399_v62  ;;  %v4804_v42 = vadd.f32 %v17204_v38, %v17066_v31 }
 0x6be   :  { %v5503_v39 = vrot.slane %v5473_v19, 2  ;;  %v5844_v61 = vrot.slane %v5473_v19, 6  ;;  %v5474_v9 = vmax.f32 %v16813_v10, %v5460_v29  ;;  %v5406_v56 = vadd.f32 %v5371_v44, %v17144_v45  ;;  %12952 = vmatmul.mubr.msk.bf16.gmra.mrb[196].mxu1 %vm5591_vm7, %v5545_v49  ;;  %v12890_v35 = vpop.f32.mrb[179].mxu1  ;;  %12981 = vmatprep.subr.bf16.mxu0 %v19311_v15 }
 0x6bf   :  { %v5419_v34 = vadd.f32 %v17204_v38, %v5405_v36  ;;  %12955 = vmatprep.mubr.msk.bf16.mxu1 %vm13920_vm3, %v19311_v15  ;;  %v4818_v49 = vmax.f32 %v4804_v42, 0.0 }
 0x6c0   :  { %v5504_v6 = vsel %vm2380_vm5, %v5501_v32, %v5503_v39  ;;  %v17247_v8 = vsel %vm2338_vm4, %v5842_v59, %v5844_v61  ;;  %v5505_v1 = vrot.slane %v5474_v9, 2  ;;  %v5562_v10 = vpack.c.bf16 %v5474_v9, %v5473_v19 }
 0x6c1   :  { %v5888_v45 = vpack.c.bf16 %v17247_v8, %v17227_v50  ;;  %v5846_v17 = vrot.slane %v5474_v9, 6  ;;  %v5433_v51 = vmax.f32 %v5419_v34, 0.0  ;;  %v5420_v4 = vadd.f32 %v17204_v38, %v5406_v56  ;;  %12982 = vmatpush3.bf16.msra.mxu0 %v13400_v25  ;;  %v13402_v50 = vld [vmem:[%s19007_s7 + $0x28] sm:$0xff]   ;;  %v13403_v8 = vld [vmem:[%s19007_s7 + $0x30] sm:$0xff]  }
 0x6c2   :  { %v5506_v2 = vsel %vm2380_vm5, %v5503_v39, %v5505_v1  ;;  %13047 = vmatprep.subr.bf16.mxu0 %v19311_v15  ;;  %v4805_v39 = vadd.f32 %v17204_v38, %v17072_v3  ;;  %13014 = vmatpush3.bf16.msra.mxu1 %v13402_v50 }
 0x6c3   :  { %v5546_v27 = vpack.c.bf16 %v5506_v2, %v5504_v6  ;;  %v17255_v11 = vsel %vm2338_vm4, %v5844_v61, %v5846_v17  ;;  %v5461_v26 = vmax.f32 %v4815_v48, %v5433_v51  ;;  %v5434_v55 = vmax.f32 %v5420_v4, 0.0  ;;  %12920 = vmatmul.mubr.msk.bf16.gmra.mrb[192].mxu0 %vm5591_vm7, %v5562_v10  ;;  %v5376_v47 = vpop.f32.mrb[180].mxu1  ;;  %13015 = vmatprep.subr.bf16.mxu1 %v19311_v15 }
 0x6c4   :  { %v5407_v32 = vadd.f32 %v5376_v47, %v17147_v0  ;;  %v12893_v24 = vpop.f32.mrb[181].mxu1  ;;  %12923 = vmatprep.mubr.msk.bf16.mxu0 %vm13920_vm3, %v19311_v15  ;;  %v4817_v0 = vmax.f32 %v4803_v12, 0.0  ;;  %v4819_v2 = vmax.f32 %v4805_v39, 0.0 }
 0x6c5   :  { %v5475_v62 = vmax.f32 %v16825_v54, %v5461_v26  ;;  %v5462_v59 = vmax.f32 %v4816_v30, %v5434_v55  ;;  %v5379_v43 = vpop.f32.mrb[182].mxu1 }
 0x6c6   :  { %v5421_v18 = vadd.f32 %v17204_v38, %v5407_v32  ;;  %v5408_v20 = vadd.f32 %v5379_v43, %v17150_v14  ;;  %12956 = vmatmul.mubr.msk.bf16.gmra.mrb[200].mxu1 %vm5591_vm7, %v5546_v27  ;;  %v12894_v22 = vpop.f32.mrb[183].mxu1 }
 0x6c7   :  { %v5507_v63 = vrot.slane %v5475_v62, 2  ;;  %v5848_v7 = vrot.slane %v5475_v62, 6  ;;  %v5476_v31 = vmax.f32 %v16829_v23, %v5462_v59  ;;  %12959 = vmatprep.mubr.msk.bf16.mxu1 %vm13920_vm3, %v19311_v15  ;;  %v4808_v22 = vadd.f32 %v17204_v38, %v17081_v57  ;;  %v19720_v57 = vld [vmem:[#allocation7_spill] sm:$0xff]  ;;  %13016 = vmatpush3.bf16.msra.mxu1 %v13403_v8 }
 0x6c8   :  { %v5435_v19 = vmax.f32 %v5421_v18, 0.0  ;;  %v5422_v54 = vadd.f32 %v17204_v38, %v5408_v20  ;;  %v4807_v20 = vadd.f32 %v17204_v38, %v17076_v60  ;;  %13017 = vmatprep.subr.bf16.mxu1 %v19311_v15 }
 0x6c9   :  { %v5508_v29 = vsel %vm2380_vm5, %v5505_v1, %v5507_v63  ;;  %v17275_v37 = vsel %vm2338_vm4, %v5846_v17, %v5848_v7  ;;  %v5509_v14 = vrot.slane %v5476_v31, 2  ;;  %v5563_v33 = vpack.c.bf16 %v5476_v31, %v5475_v62 }
 0x6ca   :  { %v5889_v36 = vpack.c.bf16 %v17275_v37, %v17255_v11  ;;  %v5850_v44 = vrot.slane %v5476_v31, 6  ;;  %v5463_v23 = vmax.f32 %v4817_v0, %v5435_v19  ;;  %v5436_v25 = vmax.f32 %v5422_v54, 0.0  ;;  %v13405_v11 = vld [vmem:[%s19007_s7 + $0x8] sm:$0xff]   ;;  %v13406_v37 = vld [vmem:[%s19007_s7 + $0x38] sm:$0xff]  }
 0x6cb   :  { %v5510_v61 = vsel %vm2380_vm5, %v5507_v63, %v5509_v14  ;;  %12924 = vmatmul.mubr.msk.bf16.gmra.mrb[196].mxu0 %vm5591_vm7, %v5563_v33  ;;  %v5384_v9 = vpop.f32.mrb[184].mxu1  ;;  %v4806_v1 = vadd.f32 %v17204_v38, %v17074_v46  ;;  %13018 = vmatpush3.bf16.msra.mxu1 %v13406_v37 }
 0x6cc   :  { %v5547_v56 = vpack.c.bf16 %v5510_v61, %v5508_v29  ;;  %v17284_v35 = vsel %vm2338_vm4, %v5848_v7, %v5850_v44  ;;  %v5477_v48 = vmax.f32 %v16841_v13, %v5463_v23  ;;  %v5464_v34 = vmax.f32 %v4818_v49, %v5436_v25  ;;  %v12897_v6 = vpop.f32.mrb[185].mxu1  ;;  %12927 = vmatprep.mubr.msk.bf16.mxu0 %vm13920_vm3, %v19311_v15 }
 0x6cd   :  { %v5409_v3 = vadd.f32 %v5384_v9, %v17153_v58  ;;  %v5387_v10 = vpop.f32.mrb[186].mxu1  ;;  %v4820_v42 = vmax.f32 %v4806_v1, 0.0  ;;  %13083 = vmatprep.subr.bf16.mxu1 %v19311_v15 }
 0x6ce   :  { %v5511_v17 = vrot.slane %v5477_v48, 2  ;;  %v5852_v51 = vrot.slane %v5477_v48, 6  ;;  %v5478_v4 = vmax.f32 %v16845_v41, %v5464_v34  ;;  %v5410_v30 = vadd.f32 %v5387_v10, %v17156_v5  ;;  %12960 = vmatmul.mubr.msk.bf16.gmra.mrb[204].mxu1 %vm5591_vm7, %v5547_v56  ;;  %v12898_v13 = vpop.f32.mrb[187].mxu1  ;;  %v19721_v10 = vld [vmem:[#allocation59_spill] sm:$0xff] }
 0x6cf   :  { %v5423_v27 = vadd.f32 %v17204_v38, %v5409_v3  ;;  %12963 = vmatprep.mubr.msk.bf16.mxu1 %vm13920_vm3, %v19311_v15 }
 0x6d0   :  { %v5512_v46 = vsel %vm2380_vm5, %v5509_v14, %v5511_v17  ;;  %v17300_v58 = vsel %vm2338_vm4, %v5850_v44, %v5852_v51  ;;  %v5513_v26 = vrot.slane %v5478_v4, 2  ;;  %v5564_v55 = vpack.c.bf16 %v5478_v4, %v5477_v48 }
 0x6d1   :  { %v5890_v41 = vpack.c.bf16 %v17300_v58, %v17284_v35  ;;  %v5854_v5 = vrot.slane %v5478_v4, 6  ;;  %v5437_v47 = vmax.f32 %v5423_v27, 0.0  ;;  %v5424_v12 = vadd.f32 %v17204_v38, %v5410_v30  ;;  %v19722_v30 = vld [vmem:[#allocation51_spill] sm:$0xff] }
 0x6d2   :  { %v5514_v32 = vsel %vm2380_vm5, %v5511_v17, %v5513_v26  ;;  %v4822_v44 = vmax.f32 %v4808_v22, 0.0  ;;  %v13408_v35 = vld [vmem:[%s19007_s7 + $0x18] sm:$0xff]  }
 0x6d3   :  { %v5548_v24 = vpack.c.bf16 %v5514_v32, %v5512_v46  ;;  %v17307_v62 = vsel %vm2338_vm4, %v5852_v51, %v5854_v5  ;;  %v5465_v59 = vmax.f32 %v4819_v2, %v5437_v47  ;;  %v5438_v43 = vmax.f32 %v5424_v12, 0.0  ;;  %12928 = vmatmul.mubr.msk.bf16.gmra.mrb[200].mxu0 %vm5591_vm7, %v5564_v55  ;;  %v5392_v18 = vpop.f32.mrb[188].mxu1 }
 0x6d4   :  { %v5411_v63 = vadd.f32 %v5392_v18, %v17159_v52  ;;  %v12901_v7 = vpop.f32.mrb[189].mxu1  ;;  %12931 = vmatprep.mubr.msk.bf16.mxu0 %vm13920_vm3, %v19311_v15  ;;  %v4821_v52 = vmax.f32 %v4807_v20, 0.0 }
 0x6d5   :  { %v5479_v31 = vmax.f32 %v16857_v28, %v5465_v59  ;;  %v5466_v0 = vmax.f32 %v4820_v42, %v5438_v43  ;;  %v5395_v49 = vpop.f32.mrb[190].mxu1 }
 0x6d6   :  { %v5425_v19 = vadd.f32 %v17204_v38, %v5411_v63  ;;  %v5412_v54 = vadd.f32 %v5395_v49, %v17162_v53  ;;  %12964 = vmatmul.mubr.msk.bf16.gmra.mrb[208].mxu1 %vm5591_vm7, %v5548_v24  ;;  %v12902_v60 = vpop.f32.mrb[191].mxu1 }
 0x6d7   :  { %v5515_v29 = vrot.slane %v5479_v31, 2  ;;  %v5856_v14 = vrot.slane %v5479_v31, 6  ;;  %v5480_v33 = vmax.f32 %v19720_v57, %v5466_v0  ;;  %12967 = vmatprep.mubr.msk.bf16.mxu1 %vm13920_vm3, %v19311_v15 }
 0x6d8   :  { %v5439_v23 = vmax.f32 %v5425_v19, 0.0  ;;  %v5426_v28 = vadd.f32 %v17204_v38, %v5412_v54 }
 0x6d9   :  { %v5516_v25 = vsel %vm2380_vm5, %v5513_v26, %v5515_v29  ;;  %v5857_v39 = vsel %vm2338_vm4, %v5854_v5, %v5856_v14  ;;  %v5517_v53 = vrot.slane %v5480_v33, 2  ;;  %v5565_v61 = vpack.c.bf16 %v5480_v33, %v5479_v31 }
 0x6da   :  { %v5891_v9 = vpack.c.bf16 %v5857_v39, %v17307_v62  ;;  %v5858_v56 = vrot.slane %v5480_v33, 6  ;;  %v5467_v48 = vmax.f32 %v4821_v52, %v5439_v23  ;;  %v5440_v34 = vmax.f32 %v5426_v28, 0.0 }
 0x6db   :  { %v5518_v6 = vsel %vm2380_vm5, %v5515_v29, %v5517_v53  ;;  %12932 = vmatmul.mubr.msk.bf16.gmra.mrb[204].mxu0 %vm5591_vm7, %v5565_v61 }
 0x6dc   :  { %v5549_v1 = vpack.c.bf16 %v5518_v6, %v5516_v25  ;;  %v5859_v3 = vsel %vm2338_vm4, %v5856_v14, %v5858_v56  ;;  %v5481_v38 = vmax.f32 %v19721_v10, %v5467_v48  ;;  %v5468_v17 = vmax.f32 %v4822_v44, %v5440_v34  ;;  %12935 = vmatprep.mubr.msk.bf16.mxu0 %vm13920_vm3, %v19311_v15 }
 0x6de   :  { %v5519_v51 = vrot.slane %v5481_v38, 2  ;;  %v5860_v4 = vrot.slane %v5481_v38, 6  ;;  %v5482_v13 = vmax.f32 %v19722_v30, %v5468_v17  ;;  %12968 = vmatmul.mubr.msk.bf16.gmra.mrb[212].mxu1 %vm5591_vm7, %v5549_v1 }
 0x6df   :  { %12971 = vmatprep.mubr.msk.bf16.mxu1 %vm13920_vm3, %v19311_v15 }
 0x6e0   :  { %v5520_v2 = vsel %vm2380_vm5, %v5517_v53, %v5519_v51  ;;  %v5861_v27 = vsel %vm2338_vm4, %v5858_v56, %v5860_v4  ;;  %v5566_v46 = vpack.c.bf16 %v5482_v13, %v5481_v38  ;;  %v5862_v26 = vrot.slane %v5482_v13, 6 }
 0x6e1   :  { %v5550_v55 = vpack.c.bf16 %v5519_v51, %v5520_v2  ;;  %v5892_v5 = vpack.c.bf16 %v5861_v27, %v5859_v3 }
 0x6e2   :  { %v5863_v47 = vsel %vm2338_vm4, %v5860_v4, %v5862_v26 }
 0x6e3   :  { %12936 = vmatmul.mubr.msk.bf16.gmra.mrb[208].mxu0 %vm5591_vm7, %v5566_v46  ;;  %v5877_v21 = vsel %vm2380_vm5, %v5863_v47, 0.0 }
 0x6e4   :  { %12983 = vmatprep.mubr.msk.bf16.mxu0 %vm13920_vm3, %v19311_v15 }
 0x6e6   :  { %12972 = vmatmul.mubr.msk.bf16.gmra.mrb[216].mxu1 %vm5591_vm7, %v5550_v55 }
 0x6e7   :  { %13019 = vmatprep.mubr.msk.bf16.mxu1 %vm13920_vm3, %v19311_v15 }
 0x6eb   :  { %12984 = vmatmul.mubr.msk.bf16.vlgmr.msra.gmra.mrb[212].mxu0 %vm5591_vm7, %v5887_v16  ;;  %v5893_v16 = vpack.c.bf16 %v19311_v15, %v5877_v21 }
 0x6ec   :  { %12987 = vmatprep.mubr.msk.bf16.mxu0 %vm13920_vm3, %v19311_v15 }
 0x6f3   :  { %12988 = vmatmul.mubr.msk.bf16.gmra.mrb[216].mxu0 %vm5591_vm7, %v5888_v45  ;;  %v13404_v45 = vld [vmem:[%s19007_s7] sm:$0xff]  }
 0x6f4   :  { %12991 = vmatprep.mubr.msk.bf16.mxu0 %vm13920_vm3, %v19311_v15  ;;  %13048 = vmatpush3.bf16.msra.mxu0 %v13404_v45 }
 0x6f5   :  { %13049 = vmatprep.subr.bf16.mxu0 %v19311_v15 }
 0x6f8   :  { %13050 = vmatpush3.bf16.msra.mxu0 %v13405_v11 }
 0x6f9   :  { %13051 = vmatprep.subr.bf16.mxu0 %v19311_v15 }
 0x6fb   :  { %12992 = vmatmul.mubr.msk.bf16.gmra.mrb[220].mxu0 %vm5591_vm7, %v5889_v36  ;;  %v13407_v36 = vld [vmem:[%s19007_s7 + $0x10] sm:$0xff]  }
 0x6fc   :  { %12995 = vmatprep.mubr.msk.bf16.mxu0 %vm13920_vm3, %v19311_v15  ;;  %13052 = vmatpush3.bf16.msra.mxu0 %v13407_v36 }
 0x6fd   :  { %13053 = vmatprep.subr.bf16.mxu0 %v19311_v15 }
 0x700   :  { %13054 = vmatpush3.bf16.msra.mxu0 %v13408_v35 }
 0x701   :  { %13119 = vmatprep.subr.bf16.mxu0 %v19311_v15 }
 0x703   :  { %12996 = vmatmul.mubr.msk.bf16.gmra.mrb[224].mxu0 %vm5591_vm7, %v5890_v41 }
 0x704   :  { %12999 = vmatprep.mubr.msk.bf16.mxu0 %vm13920_vm3, %v19311_v15 }
 0x70b   :  { %13000 = vmatmul.mubr.msk.bf16.gmra.mrb[228].mxu0 %vm5591_vm7, %v5891_v9 }
 0x70c   :  { %13003 = vmatprep.mubr.msk.bf16.mxu0 %vm13920_vm3, %v19311_v15 }
 0x713   :  { %13004 = vmatmul.mubr.msk.bf16.gmra.mrb[232].mxu0 %vm5591_vm7, %v5892_v5 }
 0x714   :  { %13007 = vmatprep.mubr.msk.bf16.mxu0 %vm13920_vm3, %v19311_v15 }
 0x71b   :  { %13008 = vmatmul.mubr.msk.bf16.gmra.mrb[236].mxu0 %vm5591_vm7, %v5893_v16 }
 0x71c   :  { %13055 = vmatprep.mubr.msk.bf16.mxu0 %vm13920_vm3, %v19311_v15 }
 0x785   :  { %v5647_v58 = vpop.f32.mrb[184].mxu0 }
 0x786   :  { %v12913_v41 = vpop.f32.mrb[185].mxu0 }
 0x787   :  { %v5650_v12 = vpop.f32.mrb[186].mxu0 }
 0x788   :  { %v12914_v42 = vpop.f32.mrb[187].mxu0  ;;  %v5781_v32 = vpop.f32.mrb[192].mxu1 }
 0x789   :  { %v17414_v24 = vadd.f32 %v5781_v32, %v5647_v58  ;;  %v12949_v62 = vpop.f32.mrb[193].mxu1 }
 0x78a   :  { %v5784_v59 = vpop.f32.mrb[194].mxu1 }
 0x78b   :  { %v17416_v43 = vadd.f32 %v5784_v59, %v5650_v12  ;;  %v12950_v18 = vpop.f32.mrb[195].mxu1 }
 0x78e   :  { %v5655_v20 = vpop.f32.mrb[188].mxu0 }
 0x78f   :  { %v12917_v22 = vpop.f32.mrb[189].mxu0 }
 0x790   :  { %v5658_v63 = vpop.f32.mrb[190].mxu0 }
 0x791   :  { %v12918_v7 = vpop.f32.mrb[191].mxu0  ;;  %v5789_v31 = vpop.f32.mrb[196].mxu1 }
 0x792   :  { %v17418_v0 = vadd.f32 %v5789_v31, %v5655_v20  ;;  %v12953_v49 = vpop.f32.mrb[197].mxu1  ;;  %v17445_v20 = vld [vmem:[%s19006_s6] ss:$0 sm:$0xff] }
 0x793   :  { %v5792_v19 = vpop.f32.mrb[198].mxu1 }
 0x794   :  { %v17420_v54 = vadd.f32 %v5792_v19, %v5658_v63  ;;  %v12954_v60 = vpop.f32.mrb[199].mxu1 }
 0x796   :  { %v5663_v29 = vpop.f32.mrb[192].mxu0 }
 0x797   :  { %v12921_v14 = vpop.f32.mrb[193].mxu0 }
 0x798   :  { %v5666_v57 = vpop.f32.mrb[194].mxu0 }
 0x799   :  { %v12922_v33 = vpop.f32.mrb[195].mxu0  ;;  %v5797_v52 = vpop.f32.mrb[200].mxu1 }
 0x79a   :  { %v17422_v44 = vadd.f32 %v5797_v52, %v5663_v29  ;;  %v12957_v23 = vpop.f32.mrb[201].mxu1  ;;  %v13409_v52 = vld [vmem:[%s19007_s7 + $0x40] sm:$0xff]  }
 0x79b   :  { %v5800_v28 = vpop.f32.mrb[202].mxu1 }
 0x79c   :  { %v17424_v25 = vadd.f32 %v5800_v28, %v5666_v57  ;;  %v12958_v39 = vpop.f32.mrb[203].mxu1 }
 0x79e   :  { %v5671_v53 = vpop.f32.mrb[196].mxu0 }
 0x79f   :  { %v12925_v61 = vpop.f32.mrb[197].mxu0 }
 0x7a0   :  { %v5674_v9 = vpop.f32.mrb[198].mxu0 }
 0x7a1   :  { %v12926_v56 = vpop.f32.mrb[199].mxu0  ;;  %v5805_v48 = vpop.f32.mrb[204].mxu1 }
 0x7a2   :  { %v17426_v34 = vadd.f32 %v5805_v48, %v5671_v53  ;;  %v12961_v6 = vpop.f32.mrb[205].mxu1 }
 0x7a3   :  { %v5808_v1 = vpop.f32.mrb[206].mxu1 }
 0x7a4   :  { %v17428_v3 = vadd.f32 %v5808_v1, %v5674_v9  ;;  %v12962_v10 = vpop.f32.mrb[207].mxu1 }
 0x7a6   :  { %v5679_v38 = vpop.f32.mrb[200].mxu0 }
 0x7a7   :  { %v12929_v17 = vpop.f32.mrb[201].mxu0 }
 0x7a8   :  { %v5682_v51 = vpop.f32.mrb[202].mxu0 }
 0x7a9   :  { %v12930_v4 = vpop.f32.mrb[203].mxu0  ;;  %v5813_v30 = vpop.f32.mrb[208].mxu1 }
 0x7aa   :  { %v17430_v13 = vadd.f32 %v5813_v30, %v5679_v38  ;;  %v12965_v2 = vpop.f32.mrb[209].mxu1 }
 0x7ab   :  { %v5816_v27 = vpop.f32.mrb[210].mxu1 }
 0x7ac   :  { %v17432_v46 = vadd.f32 %v5816_v27, %v5682_v51  ;;  %v12966_v26 = vpop.f32.mrb[211].mxu1  ;;  %v13411_v27 = vld [vmem:[%s19007_s7 + $0x50] sm:$0xff]  }
 0x7ae   :  { %v5687_v55 = vpop.f32.mrb[204].mxu0 }
 0x7af   :  { %v12933_v5 = vpop.f32.mrb[205].mxu0 }
 0x7b0   :  { %v5690_v47 = vpop.f32.mrb[206].mxu0 }
 0x7b1   :  { %v12934_v21 = vpop.f32.mrb[207].mxu0  ;;  %v5821_v40 = vpop.f32.mrb[212].mxu1 }
 0x7b2   :  { %v17434_v16 = vadd.f32 %v5821_v40, %v5687_v55  ;;  %v12969_v50 = vpop.f32.mrb[213].mxu1 }
 0x7b3   :  { %v5824_v8 = vpop.f32.mrb[214].mxu1 }
 0x7b4   :  { %v17436_v45 = vadd.f32 %v5824_v8, %v5690_v47  ;;  %v12970_v11 = vpop.f32.mrb[215].mxu1 }
 0x7b6   :  { %v5695_v37 = vpop.f32.mrb[208].mxu0 }
 0x7b7   :  { %v12937_v36 = vpop.f32.mrb[209].mxu0 }
 0x7b8   :  { %v5698_v35 = vpop.f32.mrb[210].mxu0 }
 0x7b9   :  { %v12938_v58 = vpop.f32.mrb[211].mxu0  ;;  %v5829_v41 = vpop.f32.mrb[216].mxu1 }
 0x7ba   :  { %v17438_v12 = vadd.f32 %v5829_v41, %v5695_v37  ;;  %v12973_v42 = vpop.f32.mrb[217].mxu1 }
 0x7bb   :  { %v5832_v32 = vpop.f32.mrb[218].mxu1  ;;  %v13412_v42 = vld [vmem:[%s19007_s7 + $0x58] sm:$0xff]  }
 0x7bc   :  { %v17440_v62 = vadd.f32 %v5832_v32, %v5698_v35  ;;  %v12974_v59 = vpop.f32.mrb[219].mxu1 }
 0x7be   :  { %v5973_v18 = vpop.f32.mrb[212].mxu0 }
 0x7bf   :  { %v6028_v22 = vadd.f32 %v5973_v18, %v17414_v24  ;;  %v12985_v63 = vpop.f32.mrb[213].mxu0 }
 0x7c0   :  { %v5976_v7 = vpop.f32.mrb[214].mxu0 }
 0x7c1   :  { %v6049_v31 = vadd.f32 %v17445_v20, %v6028_v22  ;;  %v6029_v49 = vadd.f32 %v5976_v7, %v17416_v43  ;;  %v12986_v19 = vpop.f32.mrb[215].mxu0 }
 0x7c3   :  { %v6063_v60 = vmax.f32 %v6049_v31, 0.0  ;;  %v6050_v29 = vadd.f32 %v17445_v20, %v6029_v49 }
 0x7c5   :  { %v6090_v14 = vrot.slane %v6063_v60, 2  ;;  %v6064_v57 = vmax.f32 %v6050_v29, 0.0  ;;  %v6430_v23 = vrot.slane %v6063_v60, 6 }
 0x7c6   :  { %v5981_v33 = vpop.f32.mrb[216].mxu0 }
 0x7c7   :  { %v6091_v28 = vrot.slane %v6064_v57, 2  ;;  %v6154_v24 = vpack.c.bf16 %v6064_v57, %v6063_v60  ;;  %v6431_v39 = vrot.slane %v6064_v57, 6  ;;  %v12989_v53 = vpop.f32.mrb[217].mxu0  ;;  %v6030_v61 = vadd.f32 %v5981_v33, %v17418_v0  ;;  %v13410_v0 = vld [vmem:[%s19007_s7 + $0x48] sm:$0xff]  }
 0x7c8   :  { %v5984_v9 = vpop.f32.mrb[218].mxu0  ;;  %v6129_v43 = vsel %vm2380_vm5, 0.0, %v6090_v14 }
 0x7c9   :  { %v6092_v56 = vsel %vm2380_vm5, %v6090_v14, %v6091_v28  ;;  %v17458_v48 = vsel %vm2338_vm4, %v6430_v23, %v6431_v39  ;;  %v6031_v6 = vadd.f32 %v5984_v9, %v17420_v54  ;;  %v12990_v1 = vpop.f32.mrb[219].mxu0  ;;  %13020 = vmatmul.mubr.msk.bf16.vlgmr.msra.gmra.mrb[220].mxu1 %vm5591_vm7, %v6154_v24  ;;  %v6051_v38 = vadd.f32 %v17445_v20, %v6030_v61 }
 0x7ca   :  { %v6138_v10 = vpack.c.bf16 %v6092_v56, %v6129_v43  ;;  %13023 = vmatprep.mubr.msk.bf16.mxu1 %vm13920_vm3, %v19311_v15  ;;  %13084 = vmatpush3.bf16.msra.mxu1 %v13409_v52 }
 0x7cb   :  { %v6052_v17 = vadd.f32 %v17445_v20, %v6031_v6  ;;  %13085 = vmatprep.subr.bf16.mxu1 %v19311_v15  ;;  %v6065_v51 = vmax.f32 %v6051_v38, 0.0 }
 0x7cc   :  { %13056 = vmatmul.mubr.msk.bf16.vlgmr.msra.gmra.mrb[240].mxu0 %vm5591_vm7, %v6138_v10 }
 0x7cd   :  { %v6066_v54 = vmax.f32 %v6052_v17, 0.0  ;;  %13059 = vmatprep.mubr.msk.bf16.mxu0 %vm13920_vm3, %v19311_v15  ;;  %v6093_v4 = vrot.slane %v6065_v51, 2  ;;  %v6433_v30 = vrot.slane %v6065_v51, 6 }
 0x7ce   :  { %v5989_v2 = vpop.f32.mrb[220].mxu0  ;;  %13086 = vmatpush3.bf16.msra.mxu1 %v13410_v0 }
 0x7cf   :  { %v6095_v26 = vrot.slane %v6066_v54, 2  ;;  %v6155_v55 = vpack.c.bf16 %v6066_v54, %v6065_v51  ;;  %v6435_v5 = vrot.slane %v6066_v54, 6  ;;  %v6032_v47 = vadd.f32 %v5989_v2, %v17422_v44  ;;  %v12993_v21 = vpop.f32.mrb[221].mxu0  ;;  %13087 = vmatprep.subr.bf16.mxu1 %v19311_v15 }
 0x7d0   :  { %v6094_v40 = vsel %vm2380_vm5, %v6091_v28, %v6093_v4  ;;  %v17480_v50 = vsel %vm2338_vm4, %v6431_v39, %v6433_v30  ;;  %v5992_v8 = vpop.f32.mrb[222].mxu0 }
 0x7d1   :  { %v6480_v11 = vpack.c.bf16 %v17480_v50, %v17458_v48  ;;  %v6096_v37 = vsel %vm2380_vm5, %v6093_v4, %v6095_v26  ;;  %v17486_v36 = vsel %vm2338_vm4, %v6433_v30, %v6435_v5  ;;  %v6053_v35 = vadd.f32 %v17445_v20, %v6032_v47  ;;  %v12994_v44 = vpop.f32.mrb[223].mxu0  ;;  %13024 = vmatmul.mubr.msk.bf16.gmra.mrb[224].mxu1 %vm5591_vm7, %v6155_v55  ;;  %v13413_v50 = vld [vmem:[%s19009_s9 + $0x40] sm:$0xff]  }
 0x7d2   :  { %v6139_v58 = vpack.c.bf16 %v6096_v37, %v6094_v40  ;;  %v6033_v41 = vadd.f32 %v5992_v8, %v17424_v25  ;;  %13027 = vmatprep.mubr.msk.bf16.mxu1 %vm13920_vm3, %v19311_v15  ;;  %13088 = vmatpush3.bf16.msra.mxu1 %v13411_v27 }
 0x7d3   :  { %v6067_v32 = vmax.f32 %v6053_v35, 0.0  ;;  %13089 = vmatprep.subr.bf16.mxu1 %v19311_v15  ;;  %13120 = vmatpush3.bf16.msra.mxu0 %v13413_v50 }
 0x7d4   :  { %v6054_v59 = vadd.f32 %v17445_v20, %v6033_v41  ;;  %13060 = vmatmul.mubr.msk.bf16.gmra.mrb[244].mxu0 %vm5591_vm7, %v6139_v58  ;;  %13121 = vmatprep.subr.bf16.mxu0 %v19311_v15 }
 0x7d5   :  { %v6097_v18 = vrot.slane %v6067_v32, 2  ;;  %v6437_v22 = vrot.slane %v6067_v32, 6  ;;  %13063 = vmatprep.mubr.msk.bf16.mxu0 %vm13920_vm3, %v19311_v15 }
 0x7d6   :  { %v6068_v25 = vmax.f32 %v6054_v59, 0.0  ;;  %v5997_v63 = vpop.f32.mrb[224].mxu0  ;;  %13090 = vmatpush3.bf16.msra.mxu1 %v13412_v42 }
 0x7d7   :  { %v6098_v7 = vsel %vm2380_vm5, %v6095_v26, %v6097_v18  ;;  %v17503_v31 = vsel %vm2338_vm4, %v6435_v5, %v6437_v22  ;;  %v6034_v49 = vadd.f32 %v5997_v63, %v17426_v34  ;;  %v12997_v19 = vpop.f32.mrb[225].mxu0  ;;  %13163 = vmatprep.subr.bf16.mxu1 %v19311_v15 }
 0x7d8   :  { %v6481_v60 = vpack.c.bf16 %v17503_v31, %v17486_v36  ;;  %v6099_v29 = vrot.slane %v6068_v25, 2  ;;  %v6156_v14 = vpack.c.bf16 %v6068_v25, %v6067_v32  ;;  %v6439_v57 = vrot.slane %v6068_v25, 6  ;;  %v6000_v33 = vpop.f32.mrb[226].mxu0  ;;  %v13414_v36 = vld [vmem:[%s19009_s9 + $0x48] sm:$0xff]   ;;  %v13415_v31 = vld [vmem:[%s19009_s9 + $0x50] sm:$0xff]  }
 0x7d9   :  { %v6055_v52 = vadd.f32 %v17445_v20, %v6034_v49  ;;  %v6035_v23 = vadd.f32 %v6000_v33, %v17428_v3  ;;  %v12998_v28 = vpop.f32.mrb[227].mxu0  ;;  %13122 = vmatpush3.bf16.msra.mxu0 %v13414_v36 }
 0x7da   :  { %v6100_v24 = vsel %vm2380_vm5, %v6097_v18, %v6099_v29  ;;  %v17513_v39 = vsel %vm2338_vm4, %v6437_v22, %v6439_v57  ;;  %13028 = vmatmul.mubr.msk.bf16.gmra.mrb[228].mxu1 %vm5591_vm7, %v6156_v14  ;;  %13123 = vmatprep.subr.bf16.mxu0 %v19311_v15 }
 0x7db   :  { %v6140_v34 = vpack.c.bf16 %v6100_v24, %v6098_v7  ;;  %v6069_v53 = vmax.f32 %v6055_v52, 0.0  ;;  %v6056_v61 = vadd.f32 %v17445_v20, %v6035_v23  ;;  %13031 = vmatprep.mubr.msk.bf16.mxu1 %vm13920_vm3, %v19311_v15 }
 0x7dd   :  { %v6101_v9 = vrot.slane %v6069_v53, 2  ;;  %v6441_v43 = vrot.slane %v6069_v53, 6  ;;  %v6070_v56 = vmax.f32 %v6056_v61, 0.0  ;;  %13064 = vmatmul.mubr.msk.bf16.gmra.mrb[248].mxu0 %vm5591_vm7, %v6140_v34 }
 0x7de   :  { %v6005_v3 = vpop.f32.mrb[228].mxu0  ;;  %13067 = vmatprep.mubr.msk.bf16.mxu0 %vm13920_vm3, %v19311_v15  ;;  %13124 = vmatpush3.bf16.msra.mxu0 %v13415_v31 }
 0x7df   :  { %v6102_v6 = vsel %vm2380_vm5, %v6099_v29, %v6101_v9  ;;  %v17524_v1 = vsel %vm2338_vm4, %v6439_v57, %v6441_v43  ;;  %v6103_v10 = vrot.slane %v6070_v56, 2  ;;  %v6157_v38 = vpack.c.bf16 %v6070_v56, %v6069_v53  ;;  %v13001_v0 = vpop.f32.mrb[229].mxu0  ;;  %13125 = vmatprep.subr.bf16.mxu0 %v19311_v15 }
 0x7e0   :  { %v6482_v17 = vpack.c.bf16 %v17524_v1, %v17513_v39  ;;  %v6443_v51 = vrot.slane %v6070_v56, 6  ;;  %v6036_v54 = vadd.f32 %v6005_v3, %v17430_v13  ;;  %v6008_v4 = vpop.f32.mrb[230].mxu0  ;;  %v13417_v39 = vld [vmem:[%s19009_s9] sm:$0xff]   ;;  %v13418_v1 = vld [vmem:[%s19009_s9 + $0x8] sm:$0xff]  }
 0x7e1   :  { %v6104_v30 = vsel %vm2380_vm5, %v6101_v9, %v6103_v10  ;;  %v6037_v2 = vadd.f32 %v6008_v4, %v17432_v46  ;;  %v13002_v27 = vpop.f32.mrb[231].mxu0 }
 0x7e2   :  { %v6141_v26 = vpack.c.bf16 %v6104_v30, %v6102_v6  ;;  %v17532_v55 = vsel %vm2338_vm4, %v6441_v43, %v6443_v51  ;;  %v6057_v5 = vadd.f32 %v17445_v20, %v6036_v54  ;;  %13032 = vmatmul.mubr.msk.bf16.gmra.mrb[232].mxu1 %vm5591_vm7, %v6157_v38 }
 0x7e3   :  { %v6058_v47 = vadd.f32 %v17445_v20, %v6037_v2  ;;  %13035 = vmatprep.mubr.msk.bf16.mxu1 %vm13920_vm3, %v19311_v15 }
 0x7e4   :  { %v6071_v13 = vmax.f32 %v6057_v5, 0.0 }
 0x7e5   :  { %v6072_v21 = vmax.f32 %v6058_v47, 0.0  ;;  %13068 = vmatmul.mubr.msk.bf16.gmra.mrb[252].mxu0 %vm5591_vm7, %v6141_v26  ;;  %v13420_v47 = vld [vmem:[%s19009_s9 + $0x10] sm:$0xff]  }
 0x7e6   :  { %v6105_v40 = vrot.slane %v6071_v13, 2  ;;  %v6445_v46 = vrot.slane %v6071_v13, 6  ;;  %v6013_v8 = vpop.f32.mrb[232].mxu0  ;;  %13071 = vmatprep.mubr.msk.bf16.mxu0 %vm13920_vm3, %v19311_v15 }
 0x7e7   :  { %v6107_v37 = vrot.slane %v6072_v21, 2  ;;  %v6158_v35 = vpack.c.bf16 %v6072_v21, %v6071_v13  ;;  %v6447_v44 = vrot.slane %v6072_v21, 6  ;;  %v6038_v58 = vadd.f32 %v6013_v8, %v17434_v16  ;;  %v13005_v41 = vpop.f32.mrb[233].mxu0  ;;  %v13421_v13 = vld [vmem:[%s19009_s9 + $0x18] sm:$0xff]   ;;  %v13422_v21 = vld [vmem:[%s19009_s9 + $0x68] sm:$0xff]   ;;  %v13425_v8 = vld [vmem:[%s19009_s9 + $0x70] sm:$0xff]  }
 0x7e8   :  { %v6106_v42 = vsel %vm2380_vm5, %v6103_v10, %v6105_v40  ;;  %v6446_v32 = vsel %vm2338_vm4, %v6443_v51, %v6445_v46  ;;  %v6016_v59 = vpop.f32.mrb[234].mxu0 }
 0x7e9   :  { %v6483_v18 = vpack.c.bf16 %v6446_v32, %v17532_v55  ;;  %v6108_v22 = vsel %vm2380_vm5, %v6105_v40, %v6107_v37  ;;  %v6448_v25 = vsel %vm2338_vm4, %v6445_v46, %v6447_v44  ;;  %v6059_v63 = vadd.f32 %v17445_v20, %v6038_v58  ;;  %v13006_v7 = vpop.f32.mrb[235].mxu0  ;;  %v13423_v40 = vld [vmem:[%s19009_s9 + $0x20] sm:$0xff]   ;;  %v13424_v46 = vld [vmem:[%s19009_s9 + $0x28] sm:$0xff]  }
 0x7ea   :  { %v6142_v49 = vpack.c.bf16 %v6108_v22, %v6106_v42  ;;  %v6039_v19 = vadd.f32 %v6016_v59, %v17436_v45  ;;  %13036 = vmatmul.mubr.msk.bf16.gmra.mrb[236].mxu1 %vm5591_vm7, %v6158_v35  ;;  %v13427_v35 = vld [vmem:[%s19009_s9 + $0x78] sm:$0xff]  }
 0x7eb   :  { %v6073_v16 = vmax.f32 %v6059_v63, 0.0  ;;  %13039 = vmatprep.mubr.msk.bf16.mxu1 %vm13920_vm3, %v19311_v15 }
 0x7ec   :  { %v6060_v29 = vadd.f32 %v17445_v20, %v6039_v19 }
 0x7ed   :  { %v6109_v14 = vrot.slane %v6073_v16, 2  ;;  %v6449_v57 = vrot.slane %v6073_v16, 6  ;;  %13072 = vmatmul.mubr.msk.bf16.gmra.mrb[0].mxu0 %vm5591_vm7, %v6142_v49 }
 0x7ee   :  { %v6074_v33 = vmax.f32 %v6060_v29, 0.0  ;;  %v6021_v52 = vpop.f32.mrb[236].mxu0  ;;  %13075 = vmatprep.mubr.msk.bf16.mxu0 %vm13920_vm3, %v19311_v15 }
 0x7ef   :  { %v6110_v23 = vsel %vm2380_vm5, %v6107_v37, %v6109_v14  ;;  %v6450_v45 = vsel %vm2338_vm4, %v6447_v44, %v6449_v57  ;;  %v6040_v28 = vadd.f32 %v6021_v52, %v17438_v12  ;;  %v13009_v24 = vpop.f32.mrb[237].mxu0  ;;  %v13426_v37 = vld [vmem:[%s19009_s9 + $0x30] sm:$0xff]   ;;  %v13428_v44 = vld [vmem:[%s19009_s9 + $0x38] sm:$0xff]  }
 0x7f0   :  { %v6484_v34 = vpack.c.bf16 %v6450_v45, %v6448_v25  ;;  %v6111_v53 = vrot.slane %v6074_v33, 2  ;;  %v6159_v61 = vpack.c.bf16 %v6074_v33, %v6073_v16  ;;  %v6451_v9 = vrot.slane %v6074_v33, 6  ;;  %v6024_v43 = vpop.f32.mrb[238].mxu0 }
 0x7f1   :  { %v6061_v56 = vadd.f32 %v17445_v20, %v6040_v28  ;;  %v6041_v3 = vadd.f32 %v6024_v43, %v17440_v62  ;;  %v13010_v6 = vpop.f32.mrb[239].mxu0 }
 0x7f2   :  { %v6112_v10 = vsel %vm2380_vm5, %v6109_v14, %v6111_v53  ;;  %v6452_v38 = vsel %vm2338_vm4, %v6449_v57, %v6451_v9  ;;  %13040 = vmatmul.mubr.msk.bf16.gmra.mrb[240].mxu1 %vm5591_vm7, %v6159_v61 }
 0x7f3   :  { %v6143_v0 = vpack.c.bf16 %v6112_v10, %v6110_v23  ;;  %v6075_v51 = vmax.f32 %v6061_v56, 0.0  ;;  %v6062_v12 = vadd.f32 %v17445_v20, %v6041_v3  ;;  %13043 = vmatprep.mubr.msk.bf16.mxu1 %vm13920_vm3, %v19311_v15 }
 0x7f5   :  { %v6113_v54 = vrot.slane %v6075_v51, 2  ;;  %v6453_v4 = vrot.slane %v6075_v51, 6  ;;  %v6076_v30 = vmax.f32 %v6062_v12, 0.0  ;;  %13076 = vmatmul.mubr.msk.bf16.gmra.mrb[4].mxu0 %vm5591_vm7, %v6143_v0 }
 0x7f6   :  { %13079 = vmatprep.mubr.msk.bf16.mxu0 %vm13920_vm3, %v19311_v15 }
 0x7f7   :  { %v6114_v62 = vsel %vm2380_vm5, %v6111_v53, %v6113_v54  ;;  %v6454_v2 = vsel %vm2338_vm4, %v6451_v9, %v6453_v4  ;;  %v6160_v27 = vpack.c.bf16 %v6076_v30, %v6075_v51  ;;  %v6455_v26 = vrot.slane %v6076_v30, 6 }
 0x7f8   :  { %v6144_v55 = vpack.c.bf16 %v6113_v54, %v6114_v62  ;;  %v6485_v5 = vpack.c.bf16 %v6454_v2, %v6452_v38 }
 0x7f9   :  { %v6456_v20 = vsel %vm2338_vm4, %v6453_v4, %v6455_v26 }
 0x7fa   :  { %13044 = vmatmul.mubr.msk.bf16.gmra.mrb[244].mxu1 %vm5591_vm7, %v6160_v27  ;;  %v6470_v48 = vsel %vm2380_vm5, %v6456_v20, 0.0 }
 0x7fb   :  { %13091 = vmatprep.mubr.msk.bf16.mxu1 %vm13920_vm3, %v19311_v15 }
 0x7fd   :  { %13080 = vmatmul.mubr.msk.bf16.gmra.mrb[8].mxu0 %vm5591_vm7, %v6144_v55 }
 0x7fe   :  { %13135 = vmatprep.mubr.msk.bf16.mxu0 %vm13920_vm3, %v19311_v15 }
 0x802   :  { %13092 = vmatmul.mubr.msk.bf16.vlgmr.msra.gmra.mrb[248].mxu1 %vm5591_vm7, %v6480_v11  ;;  %v6486_v11 = vpack.c.bf16 %v19311_v15, %v6470_v48 }
 0x803   :  { %13095 = vmatprep.mubr.msk.bf16.mxu1 %vm13920_vm3, %v19311_v15  ;;  %13164 = vmatpush3.bf16.msra.mxu1 %v13417_v39 }
 0x804   :  { %13165 = vmatprep.subr.bf16.mxu1 %v19311_v15 }
 0x807   :  { %13166 = vmatpush3.bf16.msra.mxu1 %v13418_v1 }
 0x808   :  { %13167 = vmatprep.subr.bf16.mxu1 %v19311_v15 }
 0x80a   :  { %13096 = vmatmul.mubr.msk.bf16.gmra.mrb[252].mxu1 %vm5591_vm7, %v6481_v60  ;;  %v13416_v60 = vld [vmem:[%s19009_s9 + $0x58] sm:$0xff]  }
 0x80b   :  { %13099 = vmatprep.mubr.msk.bf16.mxu1 %vm13920_vm3, %v19311_v15  ;;  %13126 = vmatpush3.bf16.msra.mxu0 %v13416_v60 }
 0x80c   :  { %13127 = vmatprep.subr.bf16.mxu0 %v19311_v15  ;;  %13168 = vmatpush3.bf16.msra.mxu1 %v13420_v47 }
 0x80d   :  { %13169 = vmatprep.subr.bf16.mxu1 %v19311_v15 }
 0x810   :  { %13170 = vmatpush3.bf16.msra.mxu1 %v13421_v13 }
 0x811   :  { %13171 = vmatprep.subr.bf16.mxu1 %v19311_v15 }
 0x812   :  { %13100 = vmatmul.mubr.msk.bf16.gmra.mrb[0].mxu1 %vm5591_vm7, %v6482_v17  ;;  %v13419_v17 = vld [vmem:[%s19009_s9 + $0x60] sm:$0xff]  }
 0x813   :  { %13103 = vmatprep.mubr.msk.bf16.mxu1 %vm13920_vm3, %v19311_v15  ;;  %13128 = vmatpush3.bf16.msra.mxu0 %v13419_v17 }
 0x814   :  { %13129 = vmatprep.subr.bf16.mxu0 %v19311_v15  ;;  %13172 = vmatpush3.bf16.msra.mxu1 %v13423_v40 }
 0x815   :  { %13173 = vmatprep.subr.bf16.mxu1 %v19311_v15 }
 0x817   :  { %13130 = vmatpush3.bf16.msra.mxu0 %v13422_v21 }
 0x818   :  { %13131 = vmatprep.subr.bf16.mxu0 %v19311_v15  ;;  %13174 = vmatpush3.bf16.msra.mxu1 %v13424_v46 }
 0x819   :  { %13175 = vmatprep.subr.bf16.mxu1 %v19311_v15 }
 0x81a   :  { %13104 = vmatmul.mubr.msk.bf16.gmra.mrb[4].mxu1 %vm5591_vm7, %v6483_v18 }
 0x81b   :  { %13107 = vmatprep.mubr.msk.bf16.mxu1 %vm13920_vm3, %v19311_v15  ;;  %13132 = vmatpush3.bf16.msra.mxu0 %v13425_v8 }
 0x81c   :  { %13133 = vmatprep.subr.bf16.mxu0 %v19311_v15  ;;  %13176 = vmatpush3.bf16.msra.mxu1 %v13426_v37 }
 0x81d   :  { %13177 = vmatprep.subr.bf16.mxu1 %v19311_v15 }
 0x81f   :  { %13134 = vmatpush3.bf16.msra.mxu0 %v13427_v35 }
 0x820   :  { %13207 = vmatprep.subr.bf16.mxu0 %v19311_v15  ;;  %13178 = vmatpush3.bf16.msra.mxu1 %v13428_v44 }
 0x822   :  { %13108 = vmatmul.mubr.msk.bf16.gmra.mrb[8].mxu1 %vm5591_vm7, %v6484_v34 }
 0x823   :  { %13111 = vmatprep.mubr.msk.bf16.mxu1 %vm13920_vm3, %v19311_v15 }
 0x82a   :  { %13112 = vmatmul.mubr.msk.bf16.gmra.mrb[12].mxu1 %vm5591_vm7, %v6485_v5 }
 0x82b   :  { %13115 = vmatprep.mubr.msk.bf16.mxu1 %vm13920_vm3, %v19311_v15 }
 0x832   :  { %13116 = vmatmul.mubr.msk.bf16.gmra.mrb[16].mxu1 %vm5591_vm7, %v6486_v11 }
 0x833   :  { %13179 = vmatprep.mubr.msk.bf16.mxu1 %vm13920_vm3, %v19311_v15 }
 0x89c   :  { %v6240_v58 = vpop.f32.mrb[220].mxu1 }
 0x89d   :  { %v13021_v41 = vpop.f32.mrb[221].mxu1 }
 0x89e   :  { %v6243_v42 = vpop.f32.mrb[222].mxu1 }
 0x89f   :  { %v13022_v32 = vpop.f32.mrb[223].mxu1  ;;  %v6374_v59 = vpop.f32.mrb[240].mxu0 }
 0x8a0   :  { %v17675_v18 = vadd.f32 %v6374_v59, %v6240_v58  ;;  %v13057_v22 = vpop.f32.mrb[241].mxu0 }
 0x8a1   :  { %v6377_v25 = vpop.f32.mrb[242].mxu0 }
 0x8a2   :  { %v17677_v63 = vadd.f32 %v6377_v25, %v6243_v42  ;;  %v13058_v7 = vpop.f32.mrb[243].mxu0 }
 0x8a4   :  { %v6248_v49 = vpop.f32.mrb[224].mxu1 }
 0x8a5   :  { %v13025_v19 = vpop.f32.mrb[225].mxu1 }
 0x8a6   :  { %v6251_v16 = vpop.f32.mrb[226].mxu1 }
 0x8a7   :  { %v13026_v29 = vpop.f32.mrb[227].mxu1  ;;  %v6382_v14 = vpop.f32.mrb[244].mxu0 }
 0x8a8   :  { %v17679_v57 = vadd.f32 %v6382_v14, %v6248_v49  ;;  %v13061_v33 = vpop.f32.mrb[245].mxu0  ;;  %v17706_v49 = vld [vmem:[%s19008_s8] ss:$0 sm:$0xff] }
 0x8a9   :  { %v6385_v52 = vpop.f32.mrb[246].mxu0 }
 0x8aa   :  { %v17681_v23 = vadd.f32 %v6385_v52, %v6251_v16  ;;  %v13062_v45 = vpop.f32.mrb[247].mxu0 }
 0x8ad   :  { %v6256_v28 = vpop.f32.mrb[228].mxu1 }
 0x8ae   :  { %v13029_v24 = vpop.f32.mrb[229].mxu1 }
 0x8af   :  { %v6259_v34 = vpop.f32.mrb[230].mxu1 }
 0x8b0   :  { %v13030_v53 = vpop.f32.mrb[231].mxu1  ;;  %v6390_v61 = vpop.f32.mrb[248].mxu0 }
 0x8b1   :  { %v17683_v9 = vadd.f32 %v6390_v61, %v6256_v28  ;;  %v13065_v43 = vpop.f32.mrb[249].mxu0 }
 0x8b2   :  { %v6393_v56 = vpop.f32.mrb[250].mxu0 }
 0x8b3   :  { %v17685_v3 = vadd.f32 %v6393_v56, %v6259_v34  ;;  %v13066_v6 = vpop.f32.mrb[251].mxu0 }
 0x8b5   :  { %v6264_v10 = vpop.f32.mrb[232].mxu1 }
 0x8b6   :  { %v13033_v38 = vpop.f32.mrb[233].mxu1 }
 0x8b7   :  { %v6267_v0 = vpop.f32.mrb[234].mxu1 }
 0x8b8   :  { %v13034_v51 = vpop.f32.mrb[235].mxu1  ;;  %v6398_v12 = vpop.f32.mrb[252].mxu0 }
 0x8b9   :  { %v17687_v54 = vadd.f32 %v6398_v12, %v6264_v10  ;;  %v13069_v4 = vpop.f32.mrb[253].mxu0 }
 0x8ba   :  { %v6401_v30 = vpop.f32.mrb[254].mxu0 }
 0x8bb   :  { %v17689_v62 = vadd.f32 %v6401_v30, %v6267_v0  ;;  %v13070_v2 = vpop.f32.mrb[255].mxu0 }
 0x8bd   :  { %v6272_v27 = vpop.f32.mrb[236].mxu1 }
 0x8be   :  { %v13037_v26 = vpop.f32.mrb[237].mxu1 }
 0x8bf   :  { %v6275_v55 = vpop.f32.mrb[238].mxu1 }
 0x8c0   :  { %v13038_v5 = vpop.f32.mrb[239].mxu1  ;;  %v6406_v20 = vpop.f32.mrb[0].mxu0 }
 0x8c1   :  { %v17691_v48 = vadd.f32 %v6406_v20, %v6272_v27  ;;  %v13073_v50 = vpop.f32.mrb[1].mxu0 }
 0x8c2   :  { %v6409_v11 = vpop.f32.mrb[2].mxu0 }
 0x8c3   :  { %v17693_v36 = vadd.f32 %v6409_v11, %v6275_v55  ;;  %v13074_v31 = vpop.f32.mrb[3].mxu0  ;;  %v13431_v11 = vld [vmem:[%s19009_s9 + $0x90] sm:$0xff]  }
 0x8c5   :  { %v6280_v60 = vpop.f32.mrb[240].mxu1 }
 0x8c6   :  { %v13041_v39 = vpop.f32.mrb[241].mxu1 }
 0x8c7   :  { %v6283_v1 = vpop.f32.mrb[242].mxu1 }
 0x8c8   :  { %v13042_v17 = vpop.f32.mrb[243].mxu1  ;;  %v6414_v47 = vpop.f32.mrb[4].mxu0 }
 0x8c9   :  { %v17695_v13 = vadd.f32 %v6414_v47, %v6280_v60  ;;  %v13077_v21 = vpop.f32.mrb[5].mxu0 }
 0x8ca   :  { %v6417_v40 = vpop.f32.mrb[6].mxu0 }
 0x8cb   :  { %v17697_v46 = vadd.f32 %v6417_v40, %v6283_v1  ;;  %v13078_v8 = vpop.f32.mrb[7].mxu0 }
 0x8cd   :  { %v6288_v37 = vpop.f32.mrb[244].mxu1 }
 0x8ce   :  { %v13045_v35 = vpop.f32.mrb[245].mxu1 }
 0x8cf   :  { %v6291_v44 = vpop.f32.mrb[246].mxu1 }
 0x8d0   :  { %v13046_v58 = vpop.f32.mrb[247].mxu1  ;;  %v6422_v41 = vpop.f32.mrb[8].mxu0 }
 0x8d1   :  { %v17699_v42 = vadd.f32 %v6422_v41, %v6288_v37  ;;  %v13081_v32 = vpop.f32.mrb[9].mxu0 }
 0x8d2   :  { %v6425_v59 = vpop.f32.mrb[10].mxu0 }
 0x8d3   :  { %v17701_v22 = vadd.f32 %v6425_v59, %v6291_v44  ;;  %v13082_v25 = vpop.f32.mrb[11].mxu0 }
 0x8d5   :  { %v6566_v7 = vpop.f32.mrb[248].mxu1 }
 0x8d6   :  { %v6621_v19 = vadd.f32 %v6566_v7, %v17675_v18  ;;  %v13093_v16 = vpop.f32.mrb[249].mxu1  ;;  %v13429_v18 = vld [vmem:[%s19009_s9 + $0x80] sm:$0xff]  }
 0x8d7   :  { %v6569_v29 = vpop.f32.mrb[250].mxu1 }
 0x8d8   :  { %v6642_v14 = vadd.f32 %v17706_v49, %v6621_v19  ;;  %v6622_v33 = vadd.f32 %v6569_v29, %v17677_v63  ;;  %v13094_v52 = vpop.f32.mrb[251].mxu1  ;;  %v13433_v29 = vld [vmem:[%s19009_s9 + $0xa0] sm:$0xff]  }
 0x8da   :  { %v6656_v45 = vmax.f32 %v6642_v14, 0.0  ;;  %v6643_v28 = vadd.f32 %v17706_v49, %v6622_v33 }
 0x8dc   :  { %v6657_v24 = vmax.f32 %v6643_v28, 0.0  ;;  %v6683_v34 = vrot.slane %v6656_v45, 2  ;;  %v7045_v53 = vrot.slane %v6656_v45, 6 }
 0x8dd   :  { %v6574_v61 = vpop.f32.mrb[252].mxu1 }
 0x8de   :  { %v6684_v56 = vrot.slane %v6657_v24, 2  ;;  %v6763_v6 = vpack.c.bf16 %v6657_v24, %v6656_v45  ;;  %v7046_v63 = vrot.slane %v6657_v24, 6  ;;  %v6623_v10 = vadd.f32 %v6574_v61, %v17679_v57  ;;  %v13097_v38 = vpop.f32.mrb[253].mxu1  ;;  %v13430_v57 = vld [vmem:[%s19009_s9 + $0x88] sm:$0xff]  }
 0x8df   :  { %v6577_v0 = vpop.f32.mrb[254].mxu1 }
 0x8e0   :  { %v6685_v51 = vsel %vm2380_vm5, %v6683_v34, %v6684_v56  ;;  %v17723_v12 = vsel %vm2338_vm4, %v7045_v53, %v7046_v63  ;;  %v6644_v4 = vadd.f32 %v17706_v49, %v6623_v10  ;;  %v6624_v30 = vadd.f32 %v6577_v0, %v17681_v23  ;;  %v13098_v2 = vpop.f32.mrb[255].mxu1  ;;  %13136 = vmatmul.mubr.bf16.vlgmr.msra.gmra.mrb[12].mxu0 %v6763_v6  ;;  %v13434_v10 = vld [vmem:[%s19009_s9 + $0xa8] sm:$0xff]  }
 0x8e1   :  { %v10848_v27 = vpack.c.bf16 %v6685_v51, %v6683_v34  ;;  %13139 = vmatprep.mubr.msk.bf16.mxu0 %vm13920_vm3, %v19311_v15  ;;  %13208 = vmatpush3.bf16.msra.mxu0 %v13429_v18 }
 0x8e2   :  { %v6658_v26 = vmax.f32 %v6644_v4, 0.0  ;;  %v6645_v55 = vadd.f32 %v17706_v49, %v6624_v30  ;;  %13209 = vmatprep.subr.bf16.mxu0 %v19311_v15 }
 0x8e3   :  { %13180 = vmatmul.mubr.msk.bf16.vlgmr.msra.gmra.mrb[20].mxu1 %vm10847_vm10, %v10848_v27 }
 0x8e4   :  { %v6686_v23 = vrot.slane %v6658_v26, 2  ;;  %v7048_v5 = vrot.slane %v6658_v26, 6  ;;  %v6659_v20 = vmax.f32 %v6645_v55, 0.0  ;;  %13183 = vmatprep.mubr.msk.bf16.mxu1 %vm13920_vm3, %v19311_v15  ;;  %v13435_v55 = vld [vmem:[%s19009_s9 + $0xb0] sm:$0xff]  }
 0x8e5   :  { %v6582_v50 = vpop.f32.mrb[0].mxu1  ;;  %13210 = vmatpush3.bf16.msra.mxu0 %v13430_v57 }
 0x8e6   :  { %v6687_v31 = vsel %vm2380_vm5, %v6684_v56, %v6686_v23  ;;  %v17744_v60 = vsel %vm2338_vm4, %v7046_v63, %v7048_v5  ;;  %v6688_v39 = vrot.slane %v6659_v20, 2  ;;  %v6764_v1 = vpack.c.bf16 %v6659_v20, %v6658_v26  ;;  %v13101_v17 = vpop.f32.mrb[1].mxu1  ;;  %13211 = vmatprep.subr.bf16.mxu0 %v19311_v15 }
 0x8e7   :  { %v7103_v47 = vpack.c.bf16 %v17744_v60, %v17723_v12  ;;  %v7050_v21 = vrot.slane %v6659_v20, 6  ;;  %v6625_v40 = vadd.f32 %v6582_v50, %v17683_v9  ;;  %v6585_v8 = vpop.f32.mrb[2].mxu1  ;;  %v13432_v9 = vld [vmem:[%s19009_s9 + $0x98] sm:$0xff]   ;;  %v13437_v12 = vld [vmem:[%s19011_s11 + $0x80] ss:$8 sps:$4 sm:$0xff]  }
 0x8e8   :  { %v6689_v37 = vsel %vm2380_vm5, %v6686_v23, %v6688_v39  ;;  %v6626_v35 = vadd.f32 %v6585_v8, %v17685_v3  ;;  %v13102_v44 = vpop.f32.mrb[3].mxu1  ;;  %13140 = vmatmul.mubr.bf16.gmra.mrb[16].mxu0 %v6764_v1  ;;  %v13439_v60 = vld [vmem:[%s19011_s11 + $0x84] ss:$8 sps:$4 sm:$0xff]  }
 0x8e9   :  { %v6740_v58 = vpack.c.bf16 %v6689_v37, %v6687_v31  ;;  %v17753_v41 = vsel %vm2338_vm4, %v7048_v5, %v7050_v21  ;;  %v6646_v32 = vadd.f32 %v17706_v49, %v6625_v40  ;;  %13143 = vmatprep.mubr.msk.bf16.mxu0 %vm13920_vm3, %v19311_v15  ;;  %13212 = vmatpush3.bf16.msra.mxu0 %v13431_v11  ;;  %v13436_v37 = vld [vmem:[%s19009_s9 + $0xb8] sm:$0xff]  }
 0x8ea   :  { %v6647_v59 = vadd.f32 %v17706_v49, %v6626_v35  ;;  %13213 = vmatprep.subr.bf16.mxu0 %v19311_v15  ;;  %7537 = vmatprep.subr.bf16.mxu1 %v13439_v60 }
 0x8eb   :  { %v6660_v3 = vmax.f32 %v6646_v32, 0.0  ;;  %13184 = vmatmul.mubr.bf16.gmra.mrb[24].mxu1 %v6740_v58 }
 0x8ec   :  { %v6661_v25 = vmax.f32 %v6647_v59, 0.0  ;;  %13187 = vmatprep.mubr.msk.bf16.mxu1 %vm13920_vm3, %v19311_v15  ;;  %7538 = vmatpush1.bf16.msra.mxu1 %v13437_v12 }
 0x8ed   :  { %v6690_v7 = vrot.slane %v6660_v3, 2  ;;  %v7052_v19 = vrot.slane %v6660_v3, 6  ;;  %v6590_v16 = vpop.f32.mrb[4].mxu1  ;;  %13214 = vmatpush3.bf16.msra.mxu0 %v13432_v9 }
 0x8ee   :  { %v6692_v14 = vrot.slane %v6661_v25, 2  ;;  %v6765_v33 = vpack.c.bf16 %v6661_v25, %v6660_v3  ;;  %v7054_v52 = vrot.slane %v6661_v25, 6  ;;  %v6627_v45 = vadd.f32 %v6590_v16, %v17687_v54  ;;  %v13105_v28 = vpop.f32.mrb[5].mxu1  ;;  %13215 = vmatprep.subr.bf16.mxu0 %v19311_v15 }
 0x8ef   :  { %v6691_v24 = vsel %vm2380_vm5, %v6688_v39, %v6690_v7  ;;  %v17772_v34 = vsel %vm2338_vm4, %v7050_v21, %v7052_v19  ;;  %v6593_v53 = vpop.f32.mrb[6].mxu1 }
 0x8f0   :  { %v7104_v61 = vpack.c.bf16 %v17772_v34, %v17753_v41  ;;  %v6693_v43 = vsel %vm2380_vm5, %v6690_v7, %v6692_v14  ;;  %v17778_v18 = vsel %vm2338_vm4, %v7052_v19, %v7054_v52  ;;  %v6648_v56 = vadd.f32 %v17706_v49, %v6627_v45  ;;  %v13106_v54 = vpop.f32.mrb[7].mxu1  ;;  %13144 = vmatmul.mubr.bf16.gmra.mrb[20].mxu0 %v6765_v33  ;;  %v13442_v41 = vld [vmem:[%s19011_s11 + $0x94] ss:$8 sps:$4 sm:$0xff]   ;;  %v13443_v34 = vld [vmem:[%s19011_s11 + $0xa0] ss:$8 sps:$4 sm:$0xff]  }
 0x8f1   :  { %v6741_v6 = vpack.c.bf16 %v6693_v43, %v6691_v24  ;;  %v6628_v63 = vadd.f32 %v6593_v53, %v17689_v62  ;;  %13147 = vmatprep.mubr.msk.bf16.mxu0 %vm13920_vm3, %v19311_v15  ;;  %13216 = vmatpush3.bf16.msra.mxu0 %v13433_v29 }
 0x8f2   :  { %v6662_v38 = vmax.f32 %v6648_v56, 0.0  ;;  %13217 = vmatprep.subr.bf16.mxu0 %v19311_v15  ;;  %7539 = vmatprep.subr.bf16.mxu1 %v13442_v41 }
 0x8f3   :  { %v6649_v0 = vadd.f32 %v17706_v49, %v6628_v63  ;;  %13188 = vmatmul.mubr.bf16.gmra.mrb[28].mxu1 %v6741_v6 }
 0x8f4   :  { %v6694_v51 = vrot.slane %v6662_v38, 2  ;;  %v7056_v4 = vrot.slane %v6662_v38, 6  ;;  %13191 = vmatprep.mubr.msk.bf16.mxu1 %vm13920_vm3, %v19311_v15 }
 0x8f5   :  { %v6663_v62 = vmax.f32 %v6649_v0, 0.0  ;;  %v6598_v30 = vpop.f32.mrb[8].mxu1  ;;  %13218 = vmatpush3.bf16.msra.mxu0 %v13434_v10 }
 0x8f6   :  { %v6695_v2 = vsel %vm2380_vm5, %v6692_v14, %v6694_v51  ;;  %v17793_v27 = vsel %vm2338_vm4, %v7054_v52, %v7056_v4  ;;  %v6629_v57 = vadd.f32 %v6598_v30, %v17691_v48  ;;  %v13109_v26 = vpop.f32.mrb[9].mxu1  ;;  %13219 = vmatprep.subr.bf16.mxu0 %v19311_v15 }
 0x8f7   :  { %v7105_v23 = vpack.c.bf16 %v17793_v27, %v17778_v18  ;;  %v6696_v5 = vrot.slane %v6663_v62, 2  ;;  %v6766_v20 = vpack.c.bf16 %v6663_v62, %v6662_v38  ;;  %v7058_v50 = vrot.slane %v6663_v62, 6  ;;  %v6601_v11 = vpop.f32.mrb[10].mxu1  ;;  %v13446_v18 = vld [vmem:[%s19011_s11 + $0x100] ss:$8 sps:$4 sm:$0xff]  }
 0x8f8   :  { %v6650_v31 = vadd.f32 %v17706_v49, %v6629_v57  ;;  %v6630_v39 = vadd.f32 %v6601_v11, %v17693_v36  ;;  %v13110_v1 = vpop.f32.mrb[11].mxu1  ;;  %v13448_v27 = vld [vmem:[%s19011_s11 + $0x104] ss:$8 sps:$4 sm:$0xff]  }
 0x8f9   :  { %v6697_v48 = vsel %vm2380_vm5, %v6694_v51, %v6696_v5  ;;  %v17806_v17 = vsel %vm2338_vm4, %v7056_v4, %v7058_v50  ;;  %13148 = vmatmul.mubr.bf16.gmra.mrb[24].mxu0 %v6766_v20 }
 0x8fa   :  { %v6742_v21 = vpack.c.bf16 %v6697_v48, %v6695_v2  ;;  %v6664_v40 = vmax.f32 %v6650_v31, 0.0  ;;  %v6651_v8 = vadd.f32 %v17706_v49, %v6630_v39  ;;  %13151 = vmatprep.mubr.msk.bf16.mxu0 %vm13920_vm3, %v19311_v15  ;;  %13220 = vmatpush3.bf16.msra.mxu0 %v13435_v55 }
 0x8fb   :  { %13221 = vmatprep.subr.bf16.mxu0 %v19311_v15 }
 0x8fc   :  { %v6698_v36 = vrot.slane %v6664_v40, 2  ;;  %v7060_v35 = vrot.slane %v6664_v40, 6  ;;  %v6665_v44 = vmax.f32 %v6651_v8, 0.0  ;;  %13192 = vmatmul.mubr.bf16.gmra.mrb[32].mxu1 %v6742_v21 }
 0x8fd   :  { %v6606_v58 = vpop.f32.mrb[12].mxu1  ;;  %13195 = vmatprep.mubr.msk.bf16.mxu1 %vm13920_vm3, %v19311_v15 }
 0x8fe   :  { %v6699_v32 = vsel %vm2380_vm5, %v6696_v5, %v6698_v36  ;;  %v17819_v9 = vsel %vm2338_vm4, %v7058_v50, %v7060_v35  ;;  %v6700_v59 = vrot.slane %v6665_v44, 2  ;;  %v6767_v3 = vpack.c.bf16 %v6665_v44, %v6664_v40  ;;  %v13113_v25 = vpop.f32.mrb[13].mxu1  ;;  %13222 = vmatpush3.bf16.msra.mxu0 %v13436_v37  ;;  %v13451_v37 = vld [vmem:[%s19011_s11 + $0xb4] ss:$8 sps:$4 sm:$0xff]  }
 0x8ff   :  { %v7106_v7 = vpack.c.bf16 %v17819_v9, %v17806_v17  ;;  %v7062_v19 = vrot.slane %v6665_v44, 6  ;;  %v6631_v16 = vadd.f32 %v6606_v58, %v17695_v13  ;;  %v6609_v29 = vpop.f32.mrb[14].mxu1  ;;  %7800 = vmatprep.subr.bf16.mxu0 %v13448_v27  ;;  %v13457_v44 = vld [vmem:[%s19011_s11 + $0x124] ss:$8 sps:$4 sm:$0xff]   ;;  %v13455_v58 = vld [vmem:[%s19011_s11 + $0x120] ss:$8 sps:$4 sm:$0xff]  }
 0x900   :  { %v6701_v14 = vsel %vm2380_vm5, %v6698_v36, %v6700_v59  ;;  %v6632_v33 = vadd.f32 %v6609_v29, %v17697_v46  ;;  %v13114_v52 = vpop.f32.mrb[15].mxu1  ;;  %v13452_v36 = vld [vmem:[%s19011_s11 + $0x110] ss:$8 sps:$4 sm:$0xff]   ;;  %v13469_v25 = vld [vmem:[%s19011_s11 + $0x144] ss:$8 sps:$4 sm:$0xff]  }
 0x901   :  { %v6743_v45 = vpack.c.bf16 %v6701_v14, %v6699_v32  ;;  %v7063_v28 = vsel %vm2338_vm4, %v7060_v35, %v7062_v19  ;;  %v6652_v24 = vadd.f32 %v17706_v49, %v6631_v16  ;;  %13152 = vmatmul.mubr.bf16.gmra.mrb[28].mxu0 %v6767_v3  ;;  %v13454_v35 = vld [vmem:[%s19011_s11 + $0x114] ss:$8 sps:$4 sm:$0xff]   ;;  %v13461_v9 = vld [vmem:[%s19011_s11 + $0x130] ss:$8 sps:$4 sm:$0xff]   ;;  %v13458_v3 = vld [vmem:[%s19011_s11 + $0xc0] ss:$8 sps:$4 sm:$0xff]  }
 0x902   :  { %v6653_v53 = vadd.f32 %v17706_v49, %v6632_v33  ;;  %13155 = vmatprep.mubr.msk.bf16.mxu0 %vm13920_vm3, %v19311_v15  ;;  %v13463_v32 = vld [vmem:[%s19011_s11 + $0x134] ss:$8 sps:$4 sm:$0xff]   ;;  %v13464_v16 = vld [vmem:[%s19011_s11 + $0xd0] ss:$8 sps:$4 sm:$0xff]   ;;  %v13475_v33 = vld [vmem:[%s19011_s11 + $0xe4] ss:$8 sps:$4 sm:$0xff]  }
 0x903   :  { %v6666_v43 = vmax.f32 %v6652_v24, 0.0  ;;  %v13472_v29 = vld [vmem:[%s19011_s11 + $0x154] ss:$8 sps:$4 sm:$0xff]   ;;  %v13470_v14 = vld [vmem:[%s19011_s11 + $0x150] ss:$8 sps:$4 sm:$0xff]  }
 0x904   :  { %v6667_v56 = vmax.f32 %v6653_v53, 0.0  ;;  %13196 = vmatmul.mubr.bf16.gmra.mrb[36].mxu1 %v6743_v45  ;;  %v13473_v52 = vld [vmem:[%s19011_s11 + $0xe0] ss:$8 sps:$4 sm:$0xff]   ;;  %v13478_v45 = vld [vmem:[%s19011_s11 + $0x164] ss:$8 sps:$4 sm:$0xff]  }
 0x905   :  { %v6702_v13 = vrot.slane %v6666_v43, 2  ;;  %v7064_v54 = vrot.slane %v6666_v43, 6  ;;  %v6614_v6 = vpop.f32.mrb[16].mxu1  ;;  %13199 = vmatprep.mubr.msk.bf16.mxu1 %vm13920_vm3, %v19311_v15  ;;  %v13481_v24 = vld [vmem:[%s19011_s11 + $0xf4] ss:$8 sps:$4 sm:$0xff]  }
 0x906   :  { %v6704_v46 = vrot.slane %v6667_v56, 2  ;;  %v6768_v63 = vpack.c.bf16 %v6667_v56, %v6666_v43  ;;  %v7066_v10 = vrot.slane %v6667_v56, 6  ;;  %v6633_v38 = vadd.f32 %v6614_v6, %v17699_v42  ;;  %v13117_v0 = vpop.f32.mrb[17].mxu1  ;;  %v13479_v53 = vld [vmem:[%s19011_s11 + $0xf0] ss:$8 sps:$4 sm:$0xff]  }
 0x907   :  { %v6703_v51 = vsel %vm2380_vm5, %v6700_v59, %v6702_v13  ;;  %v7065_v4 = vsel %vm2338_vm4, %v7062_v19, %v7064_v54  ;;  %v6617_v62 = vpop.f32.mrb[18].mxu1  ;;  %v13460_v59 = vld [vmem:[%s19011_s11 + $0xc4] ss:$8 sps:$4 sm:$0xff]   ;;  %v13466_v19 = vld [vmem:[%s19011_s11 + $0xd4] ss:$8 sps:$4 sm:$0xff]  }
 0x908   :  { %v7107_v30 = vpack.c.bf16 %v7065_v4, %v7063_v28  ;;  %v6705_v2 = vsel %vm2380_vm5, %v6702_v13, %v6704_v46  ;;  %v7067_v57 = vsel %vm2338_vm4, %v7064_v54, %v7066_v10  ;;  %v6654_v26 = vadd.f32 %v17706_v49, %v6633_v38  ;;  %v13118_v55 = vpop.f32.mrb[19].mxu1  ;;  %v13476_v28 = vld [vmem:[%s19011_s11 + $0x160] ss:$8 sps:$4 sm:$0xff]   ;;  %v13484_v43 = vld [vmem:[%s19011_s11 + $0x174] ss:$8 sps:$4 sm:$0xff]  }
 0x909   :  { %v6744_v5 = vpack.c.bf16 %v6705_v2, %v6703_v51  ;;  %v6634_v20 = vadd.f32 %v6617_v62, %v17701_v22  ;;  %13156 = vmatmul.mubr.bf16.gmra.mrb[32].mxu0 %v6768_v63  ;;  %v13482_v56 = vld [vmem:[%s19011_s11 + $0x170] ss:$8 sps:$4 sm:$0xff]   ;;  %v13487_v13 = vld [vmem:[%s19011_s11 + $0x4] ss:$8 sps:$4 sm:$0xff]   ;;  %v13922_v54 = vmov 0  }
 0x90a   :  { %v6668_v50 = vmax.f32 %v6654_v26, 0.0  ;;  %13159 = vmatprep.mubr.msk.bf16.mxu0 %vm13920_vm3, %v19311_v15  ;;  %v13490_v6 = vld [vmem:[%s19011_s11 + $0x204] ss:$8 sps:$4 sm:$0xff]  }
 0x90b   :  { %v6655_v42 = vadd.f32 %v17706_v49, %v6634_v20 }
 0x90c   :  { %v6706_v11 = vrot.slane %v6668_v50, 2  ;;  %v7068_v31 = vrot.slane %v6668_v50, 6  ;;  %13200 = vmatmul.mubr.bf16.gmra.mrb[40].mxu1 %v6744_v5 }
 0x90d   :  { %v6669_v39 = vmax.f32 %v6655_v42, 0.0  ;;  %13203 = vmatprep.mubr.msk.bf16.mxu1 %vm13920_vm3, %v19311_v15 }
 0x90e   :  { %v6707_v1 = vsel %vm2380_vm5, %v6704_v46, %v6706_v11  ;;  %v7069_v48 = vsel %vm2338_vm4, %v7066_v10, %v7068_v31 }
 0x90f   :  { %v6745_v17 = vpack.c.bf16 %v6706_v11, %v6707_v1  ;;  %v7108_v22 = vpack.c.bf16 %v7069_v48, %v7067_v57  ;;  %v6769_v21 = vpack.c.bf16 %v6669_v39, %v6668_v50  ;;  %v7070_v40 = vrot.slane %v6669_v39, 6 }
 0x911   :  { %v7071_v8 = vsel %vm2338_vm4, %v7068_v31, %v7070_v40  ;;  %13160 = vmatmul.mubr.bf16.gmra.mrb[36].mxu0 %v6769_v21 }
 0x912   :  { %13223 = vmatprep.mubr.msk.bf16.mxu0 %vm13920_vm3, %v19311_v15  ;;  %v10875_v49 = vpack.c.bf16 %v19311_v15, %v7071_v8 }
 0x914   :  { %13204 = vmatmul.mubr.bf16.gmra.mrb[44].mxu1 %v6745_v17 }
 0x915   :  { %7569 = vmatprep.mubr.bf16.mxu1 %v13922_v54 }
 0x919   :  { %13224 = vmatmul.mubr.bf16.vlgmr.msra.gmra.mrb[40].mxu0 %v7103_v47  ;;  %v13440_v47 = vld [vmem:[%s19011_s11 + $0x90] ss:$8 sps:$4 sm:$0xff]  }
 0x91a   :  { %13227 = vmatprep.mubr.msk.bf16.mxu0 %vm13920_vm3, %v19311_v15  ;;  %7540 = vmatpush1.bf16.msra.mxu1 %v13440_v47 }
 0x91b   :  { %7801 = vmatpush1.bf16.msra.mxu0 %v13446_v18 }
 0x91c   :  { %7802 = vmatprep.subr.bf16.mxu0 %v13454_v35 }
 0x91f   :  { %7803 = vmatpush1.bf16.msra.mxu0 %v13452_v36 }
 0x920   :  { %7804 = vmatprep.subr.bf16.mxu0 %v13457_v44 }
 0x921   :  { %13228 = vmatmul.mubr.bf16.gmra.mrb[44].mxu0 %v7104_v61  ;;  %v13445_v61 = vld [vmem:[%s19011_s11 + $0xa4] ss:$8 sps:$4 sm:$0xff]  }
 0x922   :  { %13231 = vmatprep.mubr.msk.bf16.mxu0 %vm13920_vm3, %v19311_v15  ;;  %7541 = vmatprep.subr.bf16.mxu1 %v13445_v61 }
 0x923   :  { %7542 = vmatpush1.bf16.msra.mxu1 %v13443_v34  ;;  %7805 = vmatpush1.bf16.msra.mxu0 %v13455_v58 }
 0x924   :  { %7543 = vmatprep.subr.bf16.mxu1 %v13451_v37  ;;  %7806 = vmatprep.subr.bf16.mxu0 %v13463_v32 }
 0x927   :  { %7807 = vmatpush1.bf16.msra.mxu0 %v13461_v9 }
 0x928   :  { %7808 = vmatprep.subr.bf16.mxu0 %v13469_v25 }
 0x929   :  { %13232 = vmatmul.mubr.bf16.gmra.mrb[48].mxu0 %v7105_v23  ;;  %v13449_v23 = vld [vmem:[%s19011_s11 + $0xb0] ss:$8 sps:$4 sm:$0xff]  }
 0x92a   :  { %13235 = vmatprep.mubr.msk.bf16.mxu0 %vm13920_vm3, %v19311_v15  ;;  %7544 = vmatpush1.bf16.msra.mxu1 %v13449_v23 }
 0x92b   :  { %7545 = vmatprep.subr.bf16.mxu1 %v13460_v59 }
 0x92e   :  { %7546 = vmatpush1.bf16.msra.mxu1 %v13458_v3 }
 0x92f   :  { %7547 = vmatprep.subr.bf16.mxu1 %v13466_v19 }
 0x931   :  { %13236 = vmatmul.mubr.bf16.gmra.mrb[52].mxu0 %v7106_v7  ;;  %v13467_v7 = vld [vmem:[%s19011_s11 + $0x140] ss:$8 sps:$4 sm:$0xff]  }
 0x932   :  { %13239 = vmatprep.mubr.msk.bf16.mxu0 %vm13920_vm3, %v19311_v15  ;;  %7809 = vmatpush1.bf16.msra.mxu0 %v13467_v7 }
 0x933   :  { %7548 = vmatpush1.bf16.msra.mxu1 %v13464_v16  ;;  %7810 = vmatprep.subr.bf16.mxu0 %v13472_v29 }
 0x934   :  { %7549 = vmatprep.subr.bf16.mxu1 %v13475_v33 }
 0x936   :  { %7811 = vmatpush1.bf16.msra.mxu0 %v13470_v14 }
 0x937   :  { %7550 = vmatpush1.bf16.msra.mxu1 %v13473_v52  ;;  %7812 = vmatprep.subr.bf16.mxu0 %v13478_v45 }
 0x938   :  { %7551 = vmatprep.subr.bf16.mxu1 %v13481_v24 }
 0x939   :  { %13240 = vmatmul.mubr.bf16.gmra.mrb[56].mxu0 %v7107_v30 }
 0x93a   :  { %13243 = vmatprep.mubr.msk.bf16.mxu0 %vm13920_vm3, %v19311_v15  ;;  %7813 = vmatpush1.bf16.msra.mxu0 %v13476_v28 }
 0x93b   :  { %7552 = vmatpush1.bf16.msra.mxu1 %v13479_v53  ;;  %7814 = vmatprep.subr.bf16.mxu0 %v13484_v43 }
 0x93c   :  { %7658 = vmatprep.subr.bf16.mxu1 %v13487_v13 }
 0x93e   :  { %7815 = vmatpush1.bf16.msra.mxu0 %v13482_v56 }
 0x93f   :  { %8085 = vmatprep.subr.bf16.mxu0 %v13490_v6 }
 0x941   :  { %13244 = vmatmul.mubr.bf16.gmra.mrb[60].mxu0 %v7108_v22 }
 0x942   :  { %13247 = vmatprep.mubr.msk.bf16.mxu0 %vm13920_vm3, %v19311_v15 }
 0x949   :  { %13248 = vmatmul.mubr.msk.bf16.gmra.mrb[64].mxu0 %vm10874_vm11, %v10875_v49 }
 0x94a   :  { %7832 = vmatprep.mubr.bf16.mxu0 %v13922_v54 }
 0x9b3   :  { %v6852_v46 = vpop.f32.mrb[12].mxu0 }
 0x9b4   :  { %v13137_v63 = vpop.f32.mrb[13].mxu0 }
 0x9b5   :  { %v6855_v10 = vpop.f32.mrb[14].mxu0 }
 0x9b6   :  { %v13138_v38 = vpop.f32.mrb[15].mxu0  ;;  %v6989_v0 = vpop.f32.mrb[20].mxu1 }
 0x9b7   :  { %v17978_v51 = vadd.f32 %v6989_v0, %v6852_v46  ;;  %v13181_v4 = vpop.f32.mrb[21].mxu1 }
 0x9b8   :  { %v6992_v62 = vpop.f32.mrb[22].mxu1 }
 0x9b9   :  { %v17980_v30 = vadd.f32 %v6992_v62, %v6855_v10  ;;  %v13182_v2 = vpop.f32.mrb[23].mxu1 }
 0x9bb   :  { %v6860_v57 = vpop.f32.mrb[16].mxu0 }
 0x9bc   :  { %v13141_v26 = vpop.f32.mrb[17].mxu0 }
 0x9bd   :  { %v6863_v55 = vpop.f32.mrb[18].mxu0  ;;  %v18009_v26 = vld [vmem:[%s19010_s10] ss:$0 sm:$0xff] }
 0x9be   :  { %v13142_v5 = vpop.f32.mrb[19].mxu0  ;;  %v6997_v20 = vpop.f32.mrb[24].mxu1 }
 0x9bf   :  { %v17982_v50 = vadd.f32 %v6997_v20, %v6860_v57  ;;  %v13185_v42 = vpop.f32.mrb[25].mxu1 }
 0x9c0   :  { %v7000_v11 = vpop.f32.mrb[26].mxu1 }
 0x9c1   :  { %v17984_v31 = vadd.f32 %v7000_v11, %v6863_v55  ;;  %v13186_v39 = vpop.f32.mrb[27].mxu1 }
 0x9c3   :  { %v6868_v1 = vpop.f32.mrb[20].mxu0 }
 0x9c4   :  { %v13145_v48 = vpop.f32.mrb[21].mxu0 }
 0x9c5   :  { %v6871_v17 = vpop.f32.mrb[22].mxu0 }
 0x9c6   :  { %v13146_v22 = vpop.f32.mrb[23].mxu0  ;;  %v7005_v21 = vpop.f32.mrb[28].mxu1 }
 0x9c7   :  { %v17986_v40 = vadd.f32 %v7005_v21, %v6868_v1  ;;  %v13189_v8 = vpop.f32.mrb[29].mxu1 }
 0x9c8   :  { %v7008_v49 = vpop.f32.mrb[30].mxu1 }
 0x9c9   :  { %v17988_v12 = vadd.f32 %v7008_v49, %v6871_v17  ;;  %v13190_v60 = vpop.f32.mrb[31].mxu1 }
 0x9cc   :  { %v6876_v47 = vpop.f32.mrb[24].mxu0 }
 0x9cd   :  { %v13149_v41 = vpop.f32.mrb[25].mxu0 }
 0x9ce   :  { %v6879_v34 = vpop.f32.mrb[26].mxu0 }
 0x9cf   :  { %v13150_v61 = vpop.f32.mrb[27].mxu0  ;;  %v7013_v18 = vpop.f32.mrb[32].mxu1 }
 0x9d0   :  { %v17990_v27 = vadd.f32 %v7013_v18, %v6876_v47  ;;  %v13193_v23 = vpop.f32.mrb[33].mxu1 }
 0x9d1   :  { %v7016_v37 = vpop.f32.mrb[34].mxu1 }
 0x9d2   :  { %v17992_v36 = vadd.f32 %v7016_v37, %v6879_v34  ;;  %v13194_v35 = vpop.f32.mrb[35].mxu1 }
 0x9d4   :  { %v6884_v44 = vpop.f32.mrb[28].mxu0 }
 0x9d5   :  { %v13153_v58 = vpop.f32.mrb[29].mxu0 }
 0x9d6   :  { %v6887_v32 = vpop.f32.mrb[30].mxu0 }
 0x9d7   :  { %v13154_v9 = vpop.f32.mrb[31].mxu0  ;;  %v7021_v59 = vpop.f32.mrb[36].mxu1 }
 0x9d8   :  { %v17994_v3 = vadd.f32 %v7021_v59, %v6884_v44  ;;  %v13197_v25 = vpop.f32.mrb[37].mxu1 }
 0x9d9   :  { %v7024_v7 = vpop.f32.mrb[38].mxu1 }
 0x9da   :  { %v17996_v19 = vadd.f32 %v7024_v7, %v6887_v32  ;;  %v13198_v16 = vpop.f32.mrb[39].mxu1 }
 0x9dc   :  { %v6892_v29 = vpop.f32.mrb[32].mxu0 }
 0x9dd   :  { %v13157_v14 = vpop.f32.mrb[33].mxu0 }
 0x9de   :  { %v6895_v33 = vpop.f32.mrb[34].mxu0 }
 0x9df   :  { %v13158_v52 = vpop.f32.mrb[35].mxu0  ;;  %v7029_v45 = vpop.f32.mrb[40].mxu1 }
 0x9e0   :  { %v17998_v28 = vadd.f32 %v7029_v45, %v6892_v29  ;;  %v13201_v24 = vpop.f32.mrb[41].mxu1 }
 0x9e1   :  { %v7032_v53 = vpop.f32.mrb[42].mxu1 }
 0x9e2   :  { %v18000_v43 = vadd.f32 %v7032_v53, %v6895_v33  ;;  %v13202_v56 = vpop.f32.mrb[43].mxu1 }
 0x9e4   :  { %v6900_v13 = vpop.f32.mrb[36].mxu0 }
 0x9e5   :  { %v13161_v6 = vpop.f32.mrb[37].mxu0 }
 0x9e6   :  { %v6903_v46 = vpop.f32.mrb[38].mxu0 }
 0x9e7   :  { %v13162_v63 = vpop.f32.mrb[39].mxu0  ;;  %v7037_v10 = vpop.f32.mrb[44].mxu1 }
 0x9e8   :  { %v18002_v38 = vadd.f32 %v7037_v10, %v6900_v13  ;;  %v13205_v0 = vpop.f32.mrb[45].mxu1 }
 0x9e9   :  { %v7040_v4 = vpop.f32.mrb[46].mxu1 }
 0x9ea   :  { %v18004_v62 = vadd.f32 %v7040_v4, %v6903_v46  ;;  %v13206_v2 = vpop.f32.mrb[47].mxu1 }
 0x9ec   :  { %v7192_v57 = vpop.f32.mrb[40].mxu0 }
 0x9ed   :  { %v7247_v55 = vadd.f32 %v7192_v57, %v17978_v51  ;;  %v13225_v5 = vpop.f32.mrb[41].mxu0 }
 0x9ee   :  { %v7195_v20 = vpop.f32.mrb[42].mxu0 }
 0x9ef   :  { %v7268_v42 = vadd.f32 %v18009_v26, %v7247_v55  ;;  %v7248_v11 = vadd.f32 %v7195_v20, %v17980_v30  ;;  %v13226_v39 = vpop.f32.mrb[43].mxu0 }
 0x9f1   :  { %v7282_v1 = vmax.f32 %v7268_v42, 0.0  ;;  %v7269_v48 = vadd.f32 %v18009_v26, %v7248_v11  ;;  %v13488_v42 = vld [vmem:[%s19011_s11 + $0x200] ss:$8 sps:$4 sm:$0xff]  }
 0x9f3   :  { %v7309_v17 = vrot.slane %v7282_v1, 2  ;;  %v7283_v22 = vmax.f32 %v7269_v48, 0.0  ;;  %v7364_v21 = vrot.slane %v7282_v1, 6 }
 0x9f4   :  { %v7200_v8 = vpop.f32.mrb[44].mxu0 }
 0x9f5   :  { %v7348_v49 = vsel %vm2380_vm5, 0.0, %v7309_v17  ;;  %v7310_v60 = vrot.slane %v7283_v22, 2  ;;  %v7365_v47 = vrot.slane %v7283_v22, 6  ;;  %v7249_v51 = vadd.f32 %v7200_v8, %v17982_v50  ;;  %v13229_v41 = vpop.f32.mrb[45].mxu0 }
 0x9f6   :  { %v7349_v34 = vmax.f32 %v7348_v49, %v7282_v1  ;;  %v7203_v61 = vpop.f32.mrb[46].mxu0 }
 0x9f7   :  { %v7311_v18 = vsel %vm2380_vm5, %v7309_v17, %v7310_v60  ;;  %v7366_v30 = vsel %vm2338_vm4, %v7364_v21, %v7365_v47  ;;  %v7270_v23 = vadd.f32 %v18009_v26, %v7249_v51  ;;  %v7250_v37 = vadd.f32 %v7203_v61, %v17984_v31  ;;  %v13230_v35 = vpop.f32.mrb[47].mxu0  ;;  %v13496_v17 = vld [vmem:[%s19011_s11 + $0x214] ss:$8 sps:$4 sm:$0xff]  }
 0x9f8   :  { %v7350_v44 = vmax.f32 %v7311_v18, %v7283_v22  ;;  %v18021_v58 = vmax.f32 %v7349_v34, %v7366_v30  ;;  %v13499_v34 = vld [vmem:[%s19011_s11 + $0x24] ss:$8 sps:$4 sm:$0xff]  }
 0x9f9   :  { %v7284_v32 = vmax.f32 %v7270_v23, 0.0  ;;  %v7271_v9 = vadd.f32 %v18009_v26, %v7250_v37  ;;  %v13494_v37 = vld [vmem:[%s19011_s11 + $0x210] ss:$8 sps:$4 sm:$0xff]  }
 0x9fb   :  { %v7312_v59 = vrot.slane %v7284_v32, 2  ;;  %v7367_v50 = vrot.slane %v7284_v32, 6  ;;  %v7285_v25 = vmax.f32 %v7271_v9, 0.0  ;;  %v13502_v9 = vld [vmem:[%s19011_s11 + $0x224] ss:$8 sps:$4 sm:$0xff]  }
 0x9fc   :  { %v7208_v7 = vpop.f32.mrb[48].mxu0 }
 0x9fd   :  { %v7313_v16 = vsel %vm2380_vm5, %v7310_v60, %v7312_v59  ;;  %v7368_v29 = vsel %vm2338_vm4, %v7365_v47, %v7367_v50  ;;  %v7314_v14 = vrot.slane %v7285_v25, 2  ;;  %v7369_v33 = vrot.slane %v7285_v25, 6  ;;  %v13233_v52 = vpop.f32.mrb[49].mxu0  ;;  %v13491_v60 = vld [vmem:[%s19011_s11 + $0x10] ss:$8 sps:$4 sm:$0xff]  }
 0x9fe   :  { %v7351_v45 = vmax.f32 %v7313_v16, %v7284_v32  ;;  %v7406_v31 = vmax.f32 %v7350_v44, %v7368_v29  ;;  %v7251_v24 = vadd.f32 %v7208_v7, %v17986_v40  ;;  %v7211_v53 = vpop.f32.mrb[50].mxu0  ;;  %v13485_v40 = vld [vmem:[%s19011_s11] ss:$8 sps:$4 sm:$0xff]  }
 0x9ff   :  { %v7315_v56 = vsel %vm2380_vm5, %v7312_v59, %v7314_v14  ;;  %v7370_v13 = vsel %vm2338_vm4, %v7367_v50, %v7369_v33  ;;  %v7252_v6 = vadd.f32 %v7211_v53, %v17988_v12  ;;  %v13234_v46 = vpop.f32.mrb[51].mxu0  ;;  %v13493_v12 = vld [vmem:[%s19011_s11 + $0x14] ss:$8 sps:$4 sm:$0xff]   ;;  %v13497_v50 = vld [vmem:[%s19011_s11 + $0x20] ss:$8 sps:$4 sm:$0xff]  }
 0xa00   :  { %v7453_v63 = vpack.c.bf16 %v7406_v31, %v18021_v58  ;;  %v7352_v10 = vmax.f32 %v7315_v56, %v7285_v25  ;;  %v18031_v0 = vmax.f32 %v7351_v45, %v7370_v13  ;;  %v7272_v4 = vadd.f32 %v18009_v26, %v7251_v24  ;;  %v13500_v29 = vld [vmem:[%s19011_s11 + $0x220] ss:$8 sps:$4 sm:$0xff]   ;;  %v13503_v56 = vld [vmem:[%s19011_s11 + $0x30] ss:$8 sps:$4 sm:$0xff]  }
 0xa01   :  { %v7273_v2 = vadd.f32 %v18009_v26, %v7252_v6 }
 0xa02   :  { %v7455_v57 = vrot.slane %v7453_v63, 3  ;;  %v7716_v55 = vpack.c.bf16 %v18031_v0, %v7406_v31  ;;  %v7286_v5 = vmax.f32 %v7272_v4, 0.0  ;;  %v13508_v31 = vld [vmem:[%s19011_s11 + $0x234] ss:$8 sps:$4 sm:$0xff]   ;;  %v13511_v4 = vld [vmem:[%s19011_s11 + $0x44] ss:$8 sps:$4 sm:$0xff]  }
 0xa03   :  { %v18042_v20 = vmax.f32 %v7273_v2, 0.0 }
 0xa04   :  { %v7718_v11 = vrot.slane %v7716_v55, 2  ;;  %v7316_v39 = vrot.slane %v7286_v5, 2  ;;  %v7371_v1 = vrot.slane %v7286_v5, 6  ;;  %v7216_v48 = vpop.f32.mrb[52].mxu0  ;;  %7570 = vmatmul.mubr.bf16.vlgmr.msra.gmra.mrb[48].mxu1 %v7455_v57 }
 0xa05   :  { %v7318_v22 = vrot.slane %v18042_v20, 2  ;;  %v7373_v21 = vrot.slane %v18042_v20, 6  ;;  %v7253_v8 = vadd.f32 %v7216_v48, %v17990_v27  ;;  %7659 = vmatpush1.bf16.msra.mxu1 %v13485_v40  ;;  %v13237_v49 = vpop.f32.mrb[53].mxu0  ;;  %7690 = vmatprep.mubr.bf16.mxu1 %v13922_v54 }
 0xa06   :  { %v7317_v47 = vsel %vm2380_vm5, %v7314_v14, %v7316_v39  ;;  %v7372_v51 = vsel %vm2338_vm4, %v7369_v33, %v7371_v1  ;;  %v7219_v41 = vpop.f32.mrb[54].mxu0  ;;  %7833 = vmatmul.mubr.bf16.vlgmr.msra.gmra.mrb[68].mxu0 %v7718_v11  ;;  %7660 = vmatprep.subr.bf16.mxu1 %v13493_v12 }
 0xa07   :  { %v7353_v27 = vmax.f32 %v7317_v47, %v7286_v5  ;;  %v18062_v61 = vmax.f32 %v7352_v10, %v7372_v51  ;;  %v7319_v18 = vsel %vm2380_vm5, %v7316_v39, %v7318_v22  ;;  %v7374_v30 = vsel %vm2338_vm4, %v7371_v1, %v7373_v21  ;;  %8086 = vmatpush1.bf16.msra.mxu0 %v13488_v42  ;;  %v13238_v23 = vpop.f32.mrb[55].mxu0  ;;  %v13506_v5 = vld [vmem:[%s19011_s11 + $0x230] ss:$8 sps:$4 sm:$0xff]   ;;  %v13514_v42 = vld [vmem:[%s19011_s11 + $0x244] ss:$8 sps:$4 sm:$0xff]  }
 0xa08   :  { %v7354_v35 = vmax.f32 %v7319_v18, %v18042_v20  ;;  %v7274_v44 = vadd.f32 %v18009_v26, %v7253_v8  ;;  %v7254_v32 = vadd.f32 %v7219_v41, %v17992_v36  ;;  %8087 = vmatprep.subr.bf16.mxu0 %v13496_v17  ;;  %8117 = vmatprep.mubr.bf16.mxu0 %v13922_v54  ;;  %v13505_v36 = vld [vmem:[%s19011_s11 + $0x34] ss:$8 sps:$4 sm:$0xff]   ;;  %v13509_v1 = vld [vmem:[%s19011_s11 + $0x40] ss:$8 sps:$4 sm:$0xff]  }
 0xa09   :  { %v18076_v59 = vmax.f32 %v7353_v27, %v7374_v30  ;;  %7661 = vmatpush1.bf16.msra.mxu1 %v13491_v60  ;;  %v13520_v51 = vld [vmem:[%s19011_s11 + $0x254] ss:$8 sps:$4 sm:$0xff]   ;;  %v13515_v27 = vld [vmem:[%s19011_s11 + $0x50] ss:$8 sps:$4 sm:$0xff]  }
 0xa0a   :  { %v7288_v25 = vmax.f32 %v7274_v44, 0.0  ;;  %v7275_v7 = vadd.f32 %v18009_v26, %v7254_v32  ;;  %7662 = vmatprep.subr.bf16.mxu1 %v13499_v34  ;;  %v13523_v44 = vld [vmem:[%s19011_s11 + $0x64] ss:$8 sps:$4 sm:$0xff]  }
 0xa0b   :  { %v8145_v16 = vpack.c.bf16 %v18076_v59, %v18062_v61  ;;  %8088 = vmatpush1.bf16.msra.mxu0 %v13494_v37 }
 0xa0c   :  { %v7320_v14 = vrot.slane %v7288_v25, 2  ;;  %v7375_v33 = vrot.slane %v7288_v25, 6  ;;  %v7289_v52 = vmax.f32 %v7275_v7, 0.0  ;;  %v7224_v45 = vpop.f32.mrb[56].mxu0  ;;  %8089 = vmatprep.subr.bf16.mxu0 %v13502_v9  ;;  %v13518_v7 = vld [vmem:[%s19011_s11 + $0x250] ss:$8 sps:$4 sm:$0xff]  }
 0xa0d   :  { %v7255_v24 = vadd.f32 %v7224_v45, %v17994_v3  ;;  %7663 = vmatpush1.bf16.msra.mxu1 %v13497_v50  ;;  %v13241_v53 = vpop.f32.mrb[57].mxu0 }
 0xa0e   :  { %v7321_v13 = vsel %vm2380_vm5, %v7318_v22, %v7320_v14  ;;  %v7376_v6 = vsel %vm2338_vm4, %v7373_v21, %v7375_v33  ;;  %v7322_v46 = vrot.slane %v7289_v52, 2  ;;  %v7377_v63 = vrot.slane %v7289_v52, 6  ;;  %v7227_v10 = vpop.f32.mrb[58].mxu0  ;;  %7664 = vmatprep.subr.bf16.mxu1 %v13505_v36  ;;  %v13517_v22 = vld [vmem:[%s19011_s11 + $0x54] ss:$8 sps:$4 sm:$0xff]  }
 0xa0f   :  { %v7355_v2 = vmax.f32 %v7321_v13, %v7288_v25  ;;  %v18102_v3 = vmax.f32 %v7354_v35, %v7376_v6  ;;  %v7276_v40 = vadd.f32 %v18009_v26, %v7255_v24  ;;  %v7256_v57 = vadd.f32 %v7227_v10, %v17996_v19  ;;  %8090 = vmatpush1.bf16.msra.mxu0 %v13500_v29  ;;  %v13242_v55 = vpop.f32.mrb[59].mxu0  ;;  %v13512_v21 = vld [vmem:[%s19011_s11 + $0x240] ss:$8 sps:$4 sm:$0xff]   ;;  %v13529_v53 = vld [vmem:[%s19011_s11 + $0x74] ss:$8 sps:$4 sm:$0xff]  }
 0xa10   :  { %v7323_v12 = vsel %vm2380_vm5, %v7320_v14, %v7322_v46  ;;  %v7378_v20 = vsel %vm2338_vm4, %v7375_v33, %v7377_v63  ;;  %8091 = vmatprep.subr.bf16.mxu0 %v13508_v31  ;;  %v13526_v14 = vld [vmem:[%s19011_s11 + $0x264] ss:$8 sps:$4 sm:$0xff]   ;;  %v13521_v31 = vld [vmem:[%s19011_s11 + $0x60] ss:$8 sps:$4 sm:$0xff]   ;;  %v13527_v55 = vld [vmem:[%s19011_s11 + $0x70] ss:$8 sps:$4 sm:$0xff]  }
 0xa11   :  { %v8289_v11 = vpack.c.bf16 %v18102_v3, %v18076_v59  ;;  %v7356_v39 = vmax.f32 %v7323_v12, %v7289_v52  ;;  %v18116_v19 = vmax.f32 %v7355_v2, %v7378_v20  ;;  %7665 = vmatpush1.bf16.msra.mxu1 %v13503_v56  ;;  %v7290_v48 = vmax.f32 %v7276_v40, 0.0  ;;  %v13524_v6 = vld [vmem:[%s19011_s11 + $0x260] ss:$8 sps:$4 sm:$0xff]   ;;  %v13635_v59 = vld [vmem:[%s19011_s11 + $0x390] ss:$8 sps:$4 sm:$0xff]  }
 0xa12   :  { %v7277_v17 = vadd.f32 %v18009_v26, %v7256_v57  ;;  %7666 = vmatprep.subr.bf16.mxu1 %v13511_v4  ;;  %v13532_v4 = vld [vmem:[%s19011_s11 + $0x274] ss:$8 sps:$4 sm:$0xff]  }
 0xa13   :  { %8092 = vmatpush1.bf16.msra.mxu0 %v13506_v5  ;;  %v7324_v8 = vrot.slane %v7290_v48, 2  ;;  %v7379_v49 = vrot.slane %v7290_v48, 6 }
 0xa14   :  { %v7291_v60 = vmax.f32 %v7277_v17, 0.0  ;;  %v7232_v47 = vpop.f32.mrb[60].mxu0  ;;  %8093 = vmatprep.subr.bf16.mxu0 %v13514_v42 }
 0xa15   :  { %v7257_v41 = vadd.f32 %v7232_v47, %v17998_v28  ;;  %7667 = vmatpush1.bf16.msra.mxu1 %v13509_v1  ;;  %v13245_v34 = vpop.f32.mrb[61].mxu0  ;;  %v7325_v18 = vsel %vm2380_vm5, %v7322_v46, %v7324_v8  ;;  %v7380_v30 = vsel %vm2338_vm4, %v7377_v63, %v7379_v49  ;;  %v13535_v1 = vld [vmem:[%s19011_s11 + $0x184] ss:$8 sps:$4 sm:$0xff]  }
 0xa16   :  { %v7326_v23 = vrot.slane %v7291_v60, 2  ;;  %v7381_v37 = vrot.slane %v7291_v60, 6  ;;  %v7235_v35 = vpop.f32.mrb[62].mxu0  ;;  %7668 = vmatprep.subr.bf16.mxu1 %v13517_v22  ;;  %v7357_v32 = vmax.f32 %v7325_v18, %v7290_v48  ;;  %v18140_v28 = vmax.f32 %v7356_v39, %v7380_v30  ;;  %v13541_v18 = vld [vmem:[%s19011_s11 + $0x194] ss:$8 sps:$4 sm:$0xff]  }
 0xa17   :  { %v7278_v9 = vadd.f32 %v18009_v26, %v7257_v41  ;;  %v7258_v50 = vadd.f32 %v7235_v35, %v18000_v43  ;;  %8094 = vmatpush1.bf16.msra.mxu0 %v13512_v21  ;;  %v13246_v25 = vpop.f32.mrb[63].mxu0  ;;  %v13530_v21 = vld [vmem:[%s19011_s11 + $0x270] ss:$8 sps:$4 sm:$0xff]   ;;  %v7435_v34 = vpack.c.bf16 %v18021_v58, %v18021_v58  ;;  %v13536_v35 = vld [vmem:[%s19011_s11 + $0x300] ss:$8 sps:$4 sm:$0xff]   ;;  %v8004_v58 = vpack.c.bf16 %v18062_v61, %v18062_v61 }
 0xa18   :  { %v7327_v36 = vsel %vm2380_vm5, %v7324_v8, %v7326_v23  ;;  %v7382_v29 = vsel %vm2338_vm4, %v7379_v49, %v7381_v37  ;;  %8095 = vmatprep.subr.bf16.mxu0 %v13520_v51  ;;  %v8718_v33 = vpack.c.bf16 %v18140_v28, %v18116_v19  ;;  %v13640_v61 = vld [vmem:[%s19011_s11 + $0x514] ss:$8 sps:$4 sm:$0xff]  }
 0xa19   :  { %v7358_v52 = vmax.f32 %v7327_v36, %v7291_v60  ;;  %v18154_v43 = vmax.f32 %v7357_v32, %v7382_v29  ;;  %v7292_v45 = vmax.f32 %v7278_v9, 0.0  ;;  %7669 = vmatpush1.bf16.msra.mxu1 %v13515_v27  ;;  %v7279_v24 = vadd.f32 %v18009_v26, %v7258_v50  ;;  %v13538_v60 = vld [vmem:[%s19011_s11 + $0x304] ss:$8 sps:$4 sm:$0xff]   ;;  %v13539_v50 = vld [vmem:[%s19011_s11 + $0x190] ss:$8 sps:$4 sm:$0xff]  }
 0xa1a   :  { %7670 = vmatprep.subr.bf16.mxu1 %v13523_v44 }
 0xa1b   :  { %v8862_v56 = vpack.c.bf16 %v18154_v43, %v18140_v28  ;;  %v7328_v13 = vrot.slane %v7292_v45, 2  ;;  %8096 = vmatpush1.bf16.msra.mxu0 %v13518_v7  ;;  %v7383_v46 = vrot.slane %v7292_v45, 6  ;;  %v7293_v63 = vmax.f32 %v7279_v24, 0.0  ;;  %v13550_v24 = vld [vmem:[%s19011_s11 + $0x324] ss:$8 sps:$4 sm:$0xff]  }
 0xa1c   :  { %v7240_v10 = vpop.f32.mrb[64].mxu0  ;;  %8097 = vmatprep.subr.bf16.mxu0 %v13526_v14  ;;  %v13547_v14 = vld [vmem:[%s19011_s11 + $0x1a4] ss:$8 sps:$4 sm:$0xff]   ;;  %v13731_v28 = vld [vmem:[%s19011_s11 + $0x590] ss:$8 sps:$4 sm:$0xff]  }
 0xa1d   :  { %v7329_v2 = vsel %vm2380_vm5, %v7326_v23, %v7328_v13  ;;  %v7259_v40 = vadd.f32 %v7240_v10, %v18002_v38  ;;  %7671 = vmatpush1.bf16.msra.mxu1 %v13521_v31  ;;  %v13249_v57 = vpop.f32.mrb[65].mxu0  ;;  %v7384_v12 = vsel %vm2338_vm4, %v7381_v37, %v7383_v46  ;;  %v7330_v20 = vrot.slane %v7293_v63, 2  ;;  %v13548_v10 = vld [vmem:[%s19011_s11 + $0x320] ss:$8 sps:$4 sm:$0xff]  }
 0xa1e   :  { %v7359_v5 = vmax.f32 %v7329_v2, %v7292_v45  ;;  %v7385_v42 = vrot.slane %v7293_v63, 6  ;;  %v7243_v39 = vpop.f32.mrb[66].mxu0  ;;  %7672 = vmatprep.subr.bf16.mxu1 %v13529_v53  ;;  %v18180_v48 = vmax.f32 %v7358_v52, %v7384_v12  ;;  %v13542_v52 = vld [vmem:[%s19011_s11 + $0x310] ss:$8 sps:$4 sm:$0xff]   ;;  %v13556_v2 = vld [vmem:[%s19011_s11 + $0x334] ss:$8 sps:$4 sm:$0xff]  }
 0xa1f   :  { %v7280_v38 = vadd.f32 %v18009_v26, %v7259_v40  ;;  %v7260_v17 = vadd.f32 %v7243_v39, %v18004_v62  ;;  %8098 = vmatpush1.bf16.msra.mxu0 %v13524_v6  ;;  %v13250_v22 = vpop.f32.mrb[67].mxu0  ;;  %v7331_v8 = vsel %vm2380_vm5, %v7328_v13, %v7330_v20  ;;  %v13533_v62 = vld [vmem:[%s19011_s11 + $0x180] ss:$8 sps:$4 sm:$0xff]   ;;  %v13551_v40 = vld [vmem:[%s19011_s11 + $0x1b0] ss:$8 sps:$4 sm:$0xff]  }
 0xa20   :  { %v7386_v49 = vsel %vm2338_vm4, %v7383_v46, %v7385_v42  ;;  %8099 = vmatprep.subr.bf16.mxu0 %v13532_v4  ;;  %v7360_v47 = vmax.f32 %v7331_v8, %v7293_v63  ;;  %v13545_v13 = vld [vmem:[%s19011_s11 + $0x1a0] ss:$8 sps:$4 sm:$0xff]   ;;  %v13553_v63 = vld [vmem:[%s19011_s11 + $0x1b4] ss:$8 sps:$4 sm:$0xff]   ;;  %v13559_v57 = vld [vmem:[%s19011_s11 + $0x1c4] ss:$8 sps:$4 sm:$0xff]  }
 0xa21   :  { %v18192_v51 = vmax.f32 %v7359_v5, %v7386_v49  ;;  %v7294_v41 = vmax.f32 %v7280_v38, 0.0  ;;  %7673 = vmatpush1.bf16.msra.mxu1 %v13527_v55  ;;  %v7281_v27 = vadd.f32 %v18009_v26, %v7260_v17  ;;  %v13544_v26 = vld [vmem:[%s19011_s11 + $0x314] ss:$8 sps:$4 sm:$0xff]   ;;  %v13554_v55 = vld [vmem:[%s19011_s11 + $0x330] ss:$8 sps:$4 sm:$0xff]  }
 0xa22   :  { %7944 = vmatprep.subr.bf16.mxu1 %v13535_v1  ;;  %v13562_v5 = vld [vmem:[%s19011_s11 + $0x344] ss:$8 sps:$4 sm:$0xff]   ;;  %v13557_v12 = vld [vmem:[%s19011_s11 + $0x1c0] ss:$8 sps:$4 sm:$0xff]   ;;  %v13568_v39 = vld [vmem:[%s19011_s11 + $0x354] ss:$8 sps:$4 sm:$0xff]  }
 0xa23   :  { %v9291_v30 = vpack.c.bf16 %v18192_v51, %v18180_v48  ;;  %v7387_v23 = vrot.slane %v7294_v41, 6  ;;  %v7332_v37 = vrot.slane %v7294_v41, 2  ;;  %8100 = vmatpush1.bf16.msra.mxu0 %v13530_v21  ;;  %v7295_v44 = vmax.f32 %v7281_v27, 0.0  ;;  %v13563_v1 = vld [vmem:[%s19011_s11 + $0x1d0] ss:$8 sps:$4 sm:$0xff]  }
 0xa24   :  { %7691 = vmatmul.mubr.bf16.vlgmr.msra.gmra.mrb[52].mxu1 %v7435_v34  ;;  %8373 = vmatprep.subr.bf16.mxu0 %v13538_v60  ;;  %v13571_v38 = vld [vmem:[%s19011_s11 + $0x1e4] ss:$8 sps:$4 sm:$0xff]   ;;  %v13566_v17 = vld [vmem:[%s19011_s11 + $0x350] ss:$8 sps:$4 sm:$0xff]   ;;  %v13569_v21 = vld [vmem:[%s19011_s11 + $0x1e0] ss:$8 sps:$4 sm:$0xff]  }
 0xa25   :  { %v7388_v32 = vsel %vm2338_vm4, %v7385_v42, %v7387_v23  ;;  %v7333_v9 = vsel %vm2380_vm5, %v7330_v20, %v7332_v37  ;;  %7945 = vmatpush1.bf16.msra.mxu1 %v13533_v62  ;;  %7976 = vmatprep.mubr.bf16.mxu1 %v13922_v54  ;;  %v7362_v36 = vmax.f32 %v7332_v37, %v7295_v44  ;;  %v7389_v29 = vrot.slane %v7295_v44, 6  ;;  %v13565_v20 = vld [vmem:[%s19011_s11 + $0x1d4] ss:$8 sps:$4 sm:$0xff]   ;;  %v13560_v42 = vld [vmem:[%s19011_s11 + $0x340] ss:$8 sps:$4 sm:$0xff]  }
 0xa26   :  { %v18219_v25 = vmax.f32 %v7360_v47, %v7388_v32  ;;  %v7361_v7 = vmax.f32 %v7333_v9, %v7294_v41  ;;  %8118 = vmatmul.mubr.bf16.vlgmr.msra.gmra.mrb[72].mxu0 %v8004_v58  ;;  %7946 = vmatprep.subr.bf16.mxu1 %v13541_v18  ;;  %v13574_v22 = vld [vmem:[%s19011_s11 + $0x364] ss:$8 sps:$4 sm:$0xff]   ;;  %v13577_v8 = vld [vmem:[%s19011_s11 + $0x1f4] ss:$8 sps:$4 sm:$0xff]   ;;  %v13572_v49 = vld [vmem:[%s19011_s11 + $0x360] ss:$8 sps:$4 sm:$0xff]   ;;  %v7860_v41 = vpack.c.bf16 %v18031_v0, %v18031_v0 }
 0xa27   :  { %8374 = vmatpush1.bf16.msra.mxu0 %v13536_v35  ;;  %8405 = vmatprep.mubr.bf16.mxu0 %v13922_v54  ;;  %v7390_v31 = vsel %vm2338_vm4, %v7387_v23, %v7389_v29  ;;  %v7418_v46 = vmax.f32 %v7362_v36, 0.0  ;;  %v13580_v60 = vld [vmem:[%s19011_s11 + $0x374] ss:$8 sps:$4 sm:$0xff]   ;;  %v13575_v47 = vld [vmem:[%s19011_s11 + $0x1f0] ss:$8 sps:$4 sm:$0xff]   ;;  %v8291_v35 = vrot.slane %v8289_v11, 2 }
 0xa28   :  { %v9435_v45 = vpack.c.bf16 %v18219_v25, %v18192_v51  ;;  %8375 = vmatprep.subr.bf16.mxu0 %v13544_v26  ;;  %v7404_v53 = vsel %vm2380_vm5, %v7390_v31, 0.0  ;;  %v13583_v62 = vld [vmem:[%s19011_s11 + $0x284] ss:$8 sps:$4 sm:$0xff]   ;;  %v13578_v34 = vld [vmem:[%s19011_s11 + $0x370] ss:$8 sps:$4 sm:$0xff]   ;;  %v7862_v18 = vrot.slane %v7860_v41, 1 }
 0xa29   :  { %7947 = vmatpush1.bf16.msra.mxu1 %v13539_v50  ;;  %v18238_v6 = vmax.f32 %v7361_v7, %v7404_v53  ;;  %v13586_v27 = vld [vmem:[%s19011_s11 + $0x404] ss:$8 sps:$4 sm:$0xff]   ;;  %v13581_v0 = vld [vmem:[%s19011_s11 + $0x280] ss:$8 sps:$4 sm:$0xff]   ;;  %v13589_v23 = vld [vmem:[%s19011_s11 + $0x294] ss:$8 sps:$4 sm:$0xff]  }
 0xa2a   :  { %7948 = vmatprep.subr.bf16.mxu1 %v13547_v14  ;;  %v13584_v37 = vld [vmem:[%s19011_s11 + $0x400] ss:$8 sps:$4 sm:$0xff]   ;;  %v13592_v58 = vld [vmem:[%s19011_s11 + $0x414] ss:$8 sps:$4 sm:$0xff]   ;;  %v13587_v44 = vld [vmem:[%s19011_s11 + $0x290] ss:$8 sps:$4 sm:$0xff]  }
 0xa2b   :  { %8376 = vmatpush1.bf16.msra.mxu0 %v13542_v52  ;;  %v18247_v4 = vpack.c.bf16 %v7418_v46, %v18238_v6  ;;  %v13595_v26 = vld [vmem:[%s19011_s11 + $0x2a4] ss:$8 sps:$4 sm:$0xff]   ;;  %v13590_v11 = vld [vmem:[%s19011_s11 + $0x410] ss:$8 sps:$4 sm:$0xff]   ;;  %v13593_v9 = vld [vmem:[%s19011_s11 + $0x2a0] ss:$8 sps:$4 sm:$0xff]  }
 0xa2c   :  { %8377 = vmatprep.subr.bf16.mxu0 %v13550_v24  ;;  %v13598_v32 = vld [vmem:[%s19011_s11 + $0x424] ss:$8 sps:$4 sm:$0xff]   ;;  %v13601_v50 = vld [vmem:[%s19011_s11 + $0x2b4] ss:$8 sps:$4 sm:$0xff]   ;;  %v13596_v7 = vld [vmem:[%s19011_s11 + $0x420] ss:$8 sps:$4 sm:$0xff]  }
 0xa2d   :  { %7949 = vmatpush1.bf16.msra.mxu1 %v13545_v13  ;;  %v13604_v36 = vld [vmem:[%s19011_s11 + $0x434] ss:$8 sps:$4 sm:$0xff]   ;;  %v13599_v29 = vld [vmem:[%s19011_s11 + $0x2b0] ss:$8 sps:$4 sm:$0xff]   ;;  %v13607_v14 = vld [vmem:[%s19011_s11 + $0x2c4] ss:$8 sps:$4 sm:$0xff]  }
 0xa2e   :  { %7950 = vmatprep.subr.bf16.mxu1 %v13553_v63  ;;  %v13602_v52 = vld [vmem:[%s19011_s11 + $0x430] ss:$8 sps:$4 sm:$0xff]   ;;  %v13610_v31 = vld [vmem:[%s19011_s11 + $0x444] ss:$8 sps:$4 sm:$0xff]   ;;  %v13605_v24 = vld [vmem:[%s19011_s11 + $0x2c0] ss:$8 sps:$4 sm:$0xff]  }
 0xa2f   :  { %8378 = vmatpush1.bf16.msra.mxu0 %v13548_v10  ;;  %v13613_v53 = vld [vmem:[%s19011_s11 + $0x2d4] ss:$8 sps:$4 sm:$0xff]   ;;  %v13608_v13 = vld [vmem:[%s19011_s11 + $0x440] ss:$8 sps:$4 sm:$0xff]   ;;  %v13611_v63 = vld [vmem:[%s19011_s11 + $0x2d0] ss:$8 sps:$4 sm:$0xff]  }
 0xa30   :  { %8379 = vmatprep.subr.bf16.mxu0 %v13556_v2  ;;  %v13616_v46 = vld [vmem:[%s19011_s11 + $0x454] ss:$8 sps:$4 sm:$0xff]   ;;  %v13619_v10 = vld [vmem:[%s19011_s11 + $0x2e4] ss:$8 sps:$4 sm:$0xff]   ;;  %v13614_v2 = vld [vmem:[%s19011_s11 + $0x450] ss:$8 sps:$4 sm:$0xff]  }
 0xa31   :  { %7951 = vmatpush1.bf16.msra.mxu1 %v13551_v40  ;;  %v13622_v40 = vld [vmem:[%s19011_s11 + $0x464] ss:$8 sps:$4 sm:$0xff]   ;;  %v13649_v41 = vld [vmem:[%s19011_s11 + $0x3b4] ss:$8 sps:$4 sm:$0xff]   ;;  %v13827_v51 = vld [vmem:[%s19011_s11 + $0x7a0] ss:$8 sps:$4 sm:$0xff]  }
 0xa32   :  { %7952 = vmatprep.subr.bf16.mxu1 %v13559_v57  ;;  %v13617_v57 = vld [vmem:[%s19011_s11 + $0x2e0] ss:$8 sps:$4 sm:$0xff]  }
 0xa33   :  { %8380 = vmatpush1.bf16.msra.mxu0 %v13554_v55  ;;  %v13625_v55 = vld [vmem:[%s19011_s11 + $0x2f4] ss:$8 sps:$4 sm:$0xff]  }
 0xa34   :  { %8381 = vmatprep.subr.bf16.mxu0 %v13562_v5  ;;  %v13620_v5 = vld [vmem:[%s19011_s11 + $0x460] ss:$8 sps:$4 sm:$0xff]  }
 0xa35   :  { %7953 = vmatpush1.bf16.msra.mxu1 %v13557_v12  ;;  %v13628_v12 = vld [vmem:[%s19011_s11 + $0x474] ss:$8 sps:$4 sm:$0xff]  }
 0xa36   :  { %7954 = vmatprep.subr.bf16.mxu1 %v13565_v20  ;;  %v13623_v20 = vld [vmem:[%s19011_s11 + $0x2f0] ss:$8 sps:$4 sm:$0xff]  }
 0xa37   :  { %8382 = vmatpush1.bf16.msra.mxu0 %v13560_v42  ;;  %v13631_v42 = vld [vmem:[%s19011_s11 + $0x384] ss:$8 sps:$4 sm:$0xff]  }
 0xa38   :  { %8383 = vmatprep.subr.bf16.mxu0 %v13568_v39  ;;  %v13626_v39 = vld [vmem:[%s19011_s11 + $0x470] ss:$8 sps:$4 sm:$0xff]  }
 0xa39   :  { %7955 = vmatpush1.bf16.msra.mxu1 %v13563_v1  ;;  %v13634_v1 = vld [vmem:[%s19011_s11 + $0x504] ss:$8 sps:$4 sm:$0xff]  }
 0xa3a   :  { %7956 = vmatprep.subr.bf16.mxu1 %v13571_v38  ;;  %v13629_v38 = vld [vmem:[%s19011_s11 + $0x380] ss:$8 sps:$4 sm:$0xff]  }
 0xa3b   :  { %8384 = vmatpush1.bf16.msra.mxu0 %v13566_v17  ;;  %v8147_v17 = vrot.slane %v8145_v16, 3  ;;  %v13643_v16 = vld [vmem:[%s19011_s11 + $0x3a4] ss:$8 sps:$4 sm:$0xff]  }
 0xa3c   :  { %8385 = vmatprep.subr.bf16.mxu0 %v13574_v22  ;;  %v13637_v22 = vld [vmem:[%s19011_s11 + $0x394] ss:$8 sps:$4 sm:$0xff]  }
 0xa3d   :  { %7957 = vmatpush1.bf16.msra.mxu1 %v13569_v21  ;;  %v13632_v21 = vld [vmem:[%s19011_s11 + $0x500] ss:$8 sps:$4 sm:$0xff]  }
 0xa3e   :  { %7958 = vmatprep.subr.bf16.mxu1 %v13577_v8  ;;  %v8577_v8 = vpack.c.bf16 %v18116_v19, %v18116_v19  ;;  %v13736_v19 = vld [vmem:[%s19011_s11 + $0x714] ss:$8 sps:$4 sm:$0xff]  }
 0xa3f   :  { %8386 = vmatpush1.bf16.msra.mxu0 %v13572_v49  ;;  %v13638_v49 = vld [vmem:[%s19011_s11 + $0x510] ss:$8 sps:$4 sm:$0xff]  }
 0xa40   :  { %8387 = vmatprep.subr.bf16.mxu0 %v13580_v60  ;;  %v13646_v60 = vld [vmem:[%s19011_s11 + $0x524] ss:$8 sps:$4 sm:$0xff]  }
 0xa41   :  { %7959 = vmatpush1.bf16.msra.mxu1 %v13575_v47  ;;  %v13641_v47 = vld [vmem:[%s19011_s11 + $0x3a0] ss:$8 sps:$4 sm:$0xff]  }
 0xa42   :  { %8229 = vmatprep.subr.bf16.mxu1 %v13583_v62  ;;  %v13644_v62 = vld [vmem:[%s19011_s11 + $0x520] ss:$8 sps:$4 sm:$0xff]  }
 0xa43   :  { %8388 = vmatpush1.bf16.msra.mxu0 %v13578_v34  ;;  %v13652_v34 = vld [vmem:[%s19011_s11 + $0x534] ss:$8 sps:$4 sm:$0xff]  }
 0xa44   :  { %7977 = vmatmul.mubr.bf16.vlgmr.msra.gmra.mrb[56].mxu1 %v7862_v18  ;;  %8658 = vmatprep.subr.bf16.mxu0 %v13586_v27  ;;  %v13647_v27 = vld [vmem:[%s19011_s11 + $0x3b0] ss:$8 sps:$4 sm:$0xff]  }
 0xa45   :  { %8230 = vmatpush1.bf16.msra.mxu1 %v13581_v0  ;;  %8261 = vmatprep.mubr.bf16.mxu1 %v13922_v54  ;;  %v13655_v0 = vld [vmem:[%s19011_s11 + $0x3c4] ss:$8 sps:$4 sm:$0xff]   ;;  %v13650_v18 = vld [vmem:[%s19011_s11 + $0x530] ss:$8 sps:$4 sm:$0xff]  }
 0xa46   :  { %8406 = vmatmul.mubr.bf16.vlgmr.msra.gmra.mrb[76].mxu0 %v8291_v35  ;;  %8231 = vmatprep.subr.bf16.mxu1 %v13589_v23  ;;  %v13658_v23 = vld [vmem:[%s19011_s11 + $0x544] ss:$8 sps:$4 sm:$0xff]   ;;  %v13661_v35 = vld [vmem:[%s19011_s11 + $0x3d4] ss:$8 sps:$4 sm:$0xff]  }
 0xa47   :  { %8659 = vmatpush1.bf16.msra.mxu0 %v13584_v37  ;;  %8690 = vmatprep.mubr.bf16.mxu0 %v13922_v54  ;;  %v13653_v37 = vld [vmem:[%s19011_s11 + $0x3c0] ss:$8 sps:$4 sm:$0xff]  }
 0xa48   :  { %8660 = vmatprep.subr.bf16.mxu0 %v13592_v58  ;;  %v13656_v58 = vld [vmem:[%s19011_s11 + $0x540] ss:$8 sps:$4 sm:$0xff]  }
 0xa49   :  { %8232 = vmatpush1.bf16.msra.mxu1 %v13587_v44  ;;  %v13664_v44 = vld [vmem:[%s19011_s11 + $0x554] ss:$8 sps:$4 sm:$0xff]  }
 0xa4a   :  { %8233 = vmatprep.subr.bf16.mxu1 %v13595_v26  ;;  %v13659_v26 = vld [vmem:[%s19011_s11 + $0x3d0] ss:$8 sps:$4 sm:$0xff]  }
 0xa4b   :  { %8661 = vmatpush1.bf16.msra.mxu0 %v13590_v11  ;;  %v13667_v11 = vld [vmem:[%s19011_s11 + $0x3e4] ss:$8 sps:$4 sm:$0xff]  }
 0xa4c   :  { %8662 = vmatprep.subr.bf16.mxu0 %v13598_v32  ;;  %v13662_v32 = vld [vmem:[%s19011_s11 + $0x550] ss:$8 sps:$4 sm:$0xff]  }
 0xa4d   :  { %8234 = vmatpush1.bf16.msra.mxu1 %v13593_v9  ;;  %v13670_v9 = vld [vmem:[%s19011_s11 + $0x564] ss:$8 sps:$4 sm:$0xff]  }
 0xa4e   :  { %8235 = vmatprep.subr.bf16.mxu1 %v13601_v50  ;;  %v13665_v50 = vld [vmem:[%s19011_s11 + $0x3e0] ss:$8 sps:$4 sm:$0xff]  }
 0xa4f   :  { %8663 = vmatpush1.bf16.msra.mxu0 %v13596_v7  ;;  %v13673_v7 = vld [vmem:[%s19011_s11 + $0x3f4] ss:$8 sps:$4 sm:$0xff]  }
 0xa50   :  { %8664 = vmatprep.subr.bf16.mxu0 %v13604_v36  ;;  %v13668_v36 = vld [vmem:[%s19011_s11 + $0x560] ss:$8 sps:$4 sm:$0xff]  }
 0xa51   :  { %8236 = vmatpush1.bf16.msra.mxu1 %v13599_v29  ;;  %v13676_v29 = vld [vmem:[%s19011_s11 + $0x574] ss:$8 sps:$4 sm:$0xff]  }
 0xa52   :  { %8237 = vmatprep.subr.bf16.mxu1 %v13607_v14  ;;  %v13671_v14 = vld [vmem:[%s19011_s11 + $0x3f0] ss:$8 sps:$4 sm:$0xff]  }
 0xa53   :  { %8665 = vmatpush1.bf16.msra.mxu0 %v13602_v52  ;;  %v8433_v52 = vpack.c.bf16 %v18102_v3, %v18102_v3  ;;  %v13677_v3 = vld [vmem:[%s19011_s11 + $0x480] ss:$8 sps:$4 sm:$0xff]  }
 0xa54   :  { %8666 = vmatprep.subr.bf16.mxu0 %v13610_v31  ;;  %v13679_v31 = vld [vmem:[%s19011_s11 + $0x484] ss:$8 sps:$4 sm:$0xff]  }
 0xa55   :  { %8238 = vmatpush1.bf16.msra.mxu1 %v13605_v24  ;;  %v13674_v24 = vld [vmem:[%s19011_s11 + $0x570] ss:$8 sps:$4 sm:$0xff]  }
 0xa56   :  { %8239 = vmatprep.subr.bf16.mxu1 %v13613_v53  ;;  %v13682_v53 = vld [vmem:[%s19011_s11 + $0x604] ss:$8 sps:$4 sm:$0xff]  }
 0xa57   :  { %8667 = vmatpush1.bf16.msra.mxu0 %v13608_v13  ;;  %v8435_v13 = vrot.slane %v8433_v52, 1  ;;  %v13746_v52 = vld [vmem:[%s19011_s11 + $0x730] ss:$8 sps:$4 sm:$0xff]  }
 0xa58   :  { %8668 = vmatprep.subr.bf16.mxu0 %v13616_v46  ;;  %v13685_v46 = vld [vmem:[%s19011_s11 + $0x494] ss:$8 sps:$4 sm:$0xff]  }
 0xa59   :  { %8240 = vmatpush1.bf16.msra.mxu1 %v13611_v63  ;;  %v13680_v63 = vld [vmem:[%s19011_s11 + $0x600] ss:$8 sps:$4 sm:$0xff]  }
 0xa5a   :  { %8241 = vmatprep.subr.bf16.mxu1 %v13619_v10  ;;  %v8864_v10 = vrot.slane %v8862_v56, 2  ;;  %v13686_v56 = vld [vmem:[%s19011_s11 + $0x610] ss:$8 sps:$4 sm:$0xff]  }
 0xa5b   :  { %8669 = vmatpush1.bf16.msra.mxu0 %v13614_v2  ;;  %v13688_v2 = vld [vmem:[%s19011_s11 + $0x614] ss:$8 sps:$4 sm:$0xff]  }
 0xa5c   :  { %8670 = vmatprep.subr.bf16.mxu0 %v13622_v40  ;;  %v13683_v40 = vld [vmem:[%s19011_s11 + $0x490] ss:$8 sps:$4 sm:$0xff]  }
 0xa5d   :  { %8242 = vmatpush1.bf16.msra.mxu1 %v13617_v57  ;;  %v13691_v57 = vld [vmem:[%s19011_s11 + $0x4a4] ss:$8 sps:$4 sm:$0xff]  }
 0xa5e   :  { %8243 = vmatprep.subr.bf16.mxu1 %v13625_v55  ;;  %v13694_v55 = vld [vmem:[%s19011_s11 + $0x624] ss:$8 sps:$4 sm:$0xff]  }
 0xa5f   :  { %8671 = vmatpush1.bf16.msra.mxu0 %v13620_v5  ;;  %v13689_v5 = vld [vmem:[%s19011_s11 + $0x4a0] ss:$8 sps:$4 sm:$0xff]  }
 0xa60   :  { %8672 = vmatprep.subr.bf16.mxu0 %v13628_v12  ;;  %v13697_v12 = vld [vmem:[%s19011_s11 + $0x4b4] ss:$8 sps:$4 sm:$0xff]  }
 0xa61   :  { %8244 = vmatpush1.bf16.msra.mxu1 %v13623_v20  ;;  %v13692_v20 = vld [vmem:[%s19011_s11 + $0x620] ss:$8 sps:$4 sm:$0xff]  }
 0xa62   :  { %8517 = vmatprep.subr.bf16.mxu1 %v13631_v42  ;;  %v13700_v42 = vld [vmem:[%s19011_s11 + $0x634] ss:$8 sps:$4 sm:$0xff]  }
 0xa63   :  { %8673 = vmatpush1.bf16.msra.mxu0 %v13626_v39  ;;  %v13695_v39 = vld [vmem:[%s19011_s11 + $0x4b0] ss:$8 sps:$4 sm:$0xff]  }
 0xa64   :  { %8262 = vmatmul.mubr.bf16.vlgmr.msra.gmra.mrb[60].mxu1 %v8147_v17  ;;  %8946 = vmatprep.subr.bf16.mxu0 %v13634_v1  ;;  %v13703_v1 = vld [vmem:[%s19011_s11 + $0x4c4] ss:$8 sps:$4 sm:$0xff]  }
 0xa65   :  { %8518 = vmatpush1.bf16.msra.mxu1 %v13629_v38  ;;  %8549 = vmatprep.mubr.bf16.mxu1 %v13922_v54  ;;  %v13698_v38 = vld [vmem:[%s19011_s11 + $0x630] ss:$8 sps:$4 sm:$0xff]   ;;  %v13706_v17 = vld [vmem:[%s19011_s11 + $0x644] ss:$8 sps:$4 sm:$0xff]  }
 0xa66   :  { %8691 = vmatmul.mubr.bf16.vlgmr.msra.gmra.mrb[80].mxu0 %v8577_v8  ;;  %8519 = vmatprep.subr.bf16.mxu1 %v13637_v22  ;;  %v13701_v22 = vld [vmem:[%s19011_s11 + $0x4c0] ss:$8 sps:$4 sm:$0xff]  }
 0xa67   :  { %8947 = vmatpush1.bf16.msra.mxu0 %v13632_v21  ;;  %8978 = vmatprep.mubr.bf16.mxu0 %v13922_v54  ;;  %v13709_v21 = vld [vmem:[%s19011_s11 + $0x4d4] ss:$8 sps:$4 sm:$0xff]   ;;  %v13704_v8 = vld [vmem:[%s19011_s11 + $0x640] ss:$8 sps:$4 sm:$0xff]  }
 0xa68   :  { %8948 = vmatprep.subr.bf16.mxu0 %v13640_v61  ;;  %v13712_v61 = vld [vmem:[%s19011_s11 + $0x654] ss:$8 sps:$4 sm:$0xff]  }
 0xa69   :  { %8520 = vmatpush1.bf16.msra.mxu1 %v13635_v59  ;;  %v13707_v59 = vld [vmem:[%s19011_s11 + $0x4d0] ss:$8 sps:$4 sm:$0xff]  }
 0xa6a   :  { %8521 = vmatprep.subr.bf16.mxu1 %v13643_v16  ;;  %v13715_v16 = vld [vmem:[%s19011_s11 + $0x4e4] ss:$8 sps:$4 sm:$0xff]  }
 0xa6b   :  { %8949 = vmatpush1.bf16.msra.mxu0 %v13638_v49  ;;  %v13710_v49 = vld [vmem:[%s19011_s11 + $0x650] ss:$8 sps:$4 sm:$0xff]  }
 0xa6c   :  { %8950 = vmatprep.subr.bf16.mxu0 %v13646_v60  ;;  %v13718_v60 = vld [vmem:[%s19011_s11 + $0x664] ss:$8 sps:$4 sm:$0xff]  }
 0xa6d   :  { %8522 = vmatpush1.bf16.msra.mxu1 %v13641_v47  ;;  %v13713_v47 = vld [vmem:[%s19011_s11 + $0x4e0] ss:$8 sps:$4 sm:$0xff]  }
 0xa6e   :  { %8523 = vmatprep.subr.bf16.mxu1 %v13649_v41  ;;  %v13721_v41 = vld [vmem:[%s19011_s11 + $0x4f4] ss:$8 sps:$4 sm:$0xff]  }
 0xa6f   :  { %8951 = vmatpush1.bf16.msra.mxu0 %v13644_v62  ;;  %v13716_v62 = vld [vmem:[%s19011_s11 + $0x660] ss:$8 sps:$4 sm:$0xff]  }
 0xa70   :  { %8952 = vmatprep.subr.bf16.mxu0 %v13652_v34  ;;  %v13724_v34 = vld [vmem:[%s19011_s11 + $0x674] ss:$8 sps:$4 sm:$0xff]  }
 0xa71   :  { %8524 = vmatpush1.bf16.msra.mxu1 %v13647_v27  ;;  %v13719_v27 = vld [vmem:[%s19011_s11 + $0x4f0] ss:$8 sps:$4 sm:$0xff]  }
 0xa72   :  { %8525 = vmatprep.subr.bf16.mxu1 %v13655_v0  ;;  %v13727_v0 = vld [vmem:[%s19011_s11 + $0x584] ss:$8 sps:$4 sm:$0xff]  }
 0xa73   :  { %8953 = vmatpush1.bf16.msra.mxu0 %v13650_v18  ;;  %v13722_v18 = vld [vmem:[%s19011_s11 + $0x670] ss:$8 sps:$4 sm:$0xff]  }
 0xa74   :  { %8954 = vmatprep.subr.bf16.mxu0 %v13658_v23  ;;  %v13730_v23 = vld [vmem:[%s19011_s11 + $0x704] ss:$8 sps:$4 sm:$0xff]  }
 0xa75   :  { %8526 = vmatpush1.bf16.msra.mxu1 %v13653_v37  ;;  %v13725_v37 = vld [vmem:[%s19011_s11 + $0x580] ss:$8 sps:$4 sm:$0xff]  }
 0xa76   :  { %8527 = vmatprep.subr.bf16.mxu1 %v13661_v35  ;;  %v8720_v35 = vrot.slane %v8718_v33, 3  ;;  %v13739_v33 = vld [vmem:[%s19011_s11 + $0x5a4] ss:$8 sps:$4 sm:$0xff]  }
 0xa77   :  { %8955 = vmatpush1.bf16.msra.mxu0 %v13656_v58  ;;  %v13733_v58 = vld [vmem:[%s19011_s11 + $0x594] ss:$8 sps:$4 sm:$0xff]  }
 0xa78   :  { %8956 = vmatprep.subr.bf16.mxu0 %v13664_v44  ;;  %v13728_v44 = vld [vmem:[%s19011_s11 + $0x700] ss:$8 sps:$4 sm:$0xff]  }
 0xa79   :  { %8528 = vmatpush1.bf16.msra.mxu1 %v13659_v26  ;;  %v9150_v26 = vpack.c.bf16 %v18180_v48, %v18180_v48  ;;  %v13829_v48 = vld [vmem:[%s19011_s11 + $0x7a4] ss:$8 sps:$4 sm:$0xff]  }
 0xa7a   :  { %8529 = vmatprep.subr.bf16.mxu1 %v13667_v11  ;;  %v13734_v11 = vld [vmem:[%s19011_s11 + $0x710] ss:$8 sps:$4 sm:$0xff]  }
 0xa7b   :  { %8957 = vmatpush1.bf16.msra.mxu0 %v13662_v32  ;;  %v13742_v32 = vld [vmem:[%s19011_s11 + $0x724] ss:$8 sps:$4 sm:$0xff]  }
 0xa7c   :  { %8958 = vmatprep.subr.bf16.mxu0 %v13670_v9  ;;  %v13737_v9 = vld [vmem:[%s19011_s11 + $0x5a0] ss:$8 sps:$4 sm:$0xff]  }
 0xa7d   :  { %8530 = vmatpush1.bf16.msra.mxu1 %v13665_v50  ;;  %v13745_v50 = vld [vmem:[%s19011_s11 + $0x5b4] ss:$8 sps:$4 sm:$0xff]  }
 0xa7e   :  { %8531 = vmatprep.subr.bf16.mxu1 %v13673_v7  ;;  %v13740_v7 = vld [vmem:[%s19011_s11 + $0x720] ss:$8 sps:$4 sm:$0xff]  }
 0xa7f   :  { %8959 = vmatpush1.bf16.msra.mxu0 %v13668_v36  ;;  %v13748_v36 = vld [vmem:[%s19011_s11 + $0x734] ss:$8 sps:$4 sm:$0xff]  }
 0xa80   :  { %8960 = vmatprep.subr.bf16.mxu0 %v13676_v29  ;;  %v13743_v29 = vld [vmem:[%s19011_s11 + $0x5b0] ss:$8 sps:$4 sm:$0xff]  }
 0xa81   :  { %8532 = vmatpush1.bf16.msra.mxu1 %v13671_v14  ;;  %v13751_v14 = vld [vmem:[%s19011_s11 + $0x5c4] ss:$8 sps:$4 sm:$0xff]  }
 0xa82   :  { %8802 = vmatprep.subr.bf16.mxu1 %v13679_v31  ;;  %v13754_v31 = vld [vmem:[%s19011_s11 + $0x744] ss:$8 sps:$4 sm:$0xff]  }
 0xa83   :  { %8961 = vmatpush1.bf16.msra.mxu0 %v13674_v24  ;;  %v13749_v24 = vld [vmem:[%s19011_s11 + $0x5c0] ss:$8 sps:$4 sm:$0xff]  }
 0xa84   :  { %8550 = vmatmul.mubr.bf16.vlgmr.msra.gmra.mrb[64].mxu1 %v8435_v13  ;;  %9231 = vmatprep.subr.bf16.mxu0 %v13682_v53  ;;  %v13757_v53 = vld [vmem:[%s19011_s11 + $0x5d4] ss:$8 sps:$4 sm:$0xff]  }
 0xa85   :  { %8803 = vmatpush1.bf16.msra.mxu1 %v13677_v3  ;;  %8834 = vmatprep.mubr.bf16.mxu1 %v13922_v54  ;;  %v13752_v3 = vld [vmem:[%s19011_s11 + $0x740] ss:$8 sps:$4 sm:$0xff]   ;;  %v13760_v13 = vld [vmem:[%s19011_s11 + $0x754] ss:$8 sps:$4 sm:$0xff]  }
 0xa86   :  { %8979 = vmatmul.mubr.bf16.vlgmr.msra.gmra.mrb[84].mxu0 %v8864_v10  ;;  %8804 = vmatprep.subr.bf16.mxu1 %v13685_v46  ;;  %v13755_v46 = vld [vmem:[%s19011_s11 + $0x5d0] ss:$8 sps:$4 sm:$0xff]  }
 0xa87   :  { %9232 = vmatpush1.bf16.msra.mxu0 %v13680_v63  ;;  %9263 = vmatprep.mubr.bf16.mxu0 %v13922_v54  ;;  %v13763_v63 = vld [vmem:[%s19011_s11 + $0x5e4] ss:$8 sps:$4 sm:$0xff]   ;;  %v13758_v10 = vld [vmem:[%s19011_s11 + $0x750] ss:$8 sps:$4 sm:$0xff]  }
 0xa88   :  { %9233 = vmatprep.subr.bf16.mxu0 %v13688_v2  ;;  %v13766_v2 = vld [vmem:[%s19011_s11 + $0x764] ss:$8 sps:$4 sm:$0xff]  }
 0xa89   :  { %8805 = vmatpush1.bf16.msra.mxu1 %v13683_v40  ;;  %v13761_v40 = vld [vmem:[%s19011_s11 + $0x5e0] ss:$8 sps:$4 sm:$0xff]  }
 0xa8a   :  { %8806 = vmatprep.subr.bf16.mxu1 %v13691_v57  ;;  %v13769_v57 = vld [vmem:[%s19011_s11 + $0x5f4] ss:$8 sps:$4 sm:$0xff]  }
 0xa8b   :  { %9234 = vmatpush1.bf16.msra.mxu0 %v13686_v56  ;;  %v13764_v56 = vld [vmem:[%s19011_s11 + $0x760] ss:$8 sps:$4 sm:$0xff]  }
 0xa8c   :  { %9235 = vmatprep.subr.bf16.mxu0 %v13694_v55  ;;  %v13772_v55 = vld [vmem:[%s19011_s11 + $0x774] ss:$8 sps:$4 sm:$0xff]  }
 0xa8d   :  { %8807 = vmatpush1.bf16.msra.mxu1 %v13689_v5  ;;  %v13767_v5 = vld [vmem:[%s19011_s11 + $0x5f0] ss:$8 sps:$4 sm:$0xff]  }
 0xa8e   :  { %8808 = vmatprep.subr.bf16.mxu1 %v13697_v12  ;;  %v9006_v12 = vpack.c.bf16 %v18154_v43, %v18154_v43  ;;  %v13773_v43 = vld [vmem:[%s19011_s11 + $0x680] ss:$8 sps:$4 sm:$0xff]  }
 0xa8f   :  { %9236 = vmatpush1.bf16.msra.mxu0 %v13692_v20  ;;  %v13775_v20 = vld [vmem:[%s19011_s11 + $0x684] ss:$8 sps:$4 sm:$0xff]  }
 0xa90   :  { %9237 = vmatprep.subr.bf16.mxu0 %v13700_v42  ;;  %v13770_v42 = vld [vmem:[%s19011_s11 + $0x770] ss:$8 sps:$4 sm:$0xff]  }
 0xa91   :  { %8809 = vmatpush1.bf16.msra.mxu1 %v13695_v39  ;;  %v13778_v39 = vld [vmem:[%s19011_s11 + $0x804] ss:$8 sps:$4 sm:$0xff]  }
 0xa92   :  { %8810 = vmatprep.subr.bf16.mxu1 %v13703_v1  ;;  %v9008_v1 = vrot.slane %v9006_v12, 1 }
 0xa93   :  { %9238 = vmatpush1.bf16.msra.mxu0 %v13698_v38  ;;  %v13781_v38 = vld [vmem:[%s19011_s11 + $0x694] ss:$8 sps:$4 sm:$0xff]  }
 0xa94   :  { %9239 = vmatprep.subr.bf16.mxu0 %v13706_v17  ;;  %v13776_v17 = vld [vmem:[%s19011_s11 + $0x800] ss:$8 sps:$4 sm:$0xff]  }
 0xa95   :  { %8811 = vmatpush1.bf16.msra.mxu1 %v13701_v22  ;;  %v9437_v22 = vrot.slane %v9435_v45, 2  ;;  %v13782_v45 = vld [vmem:[%s19011_s11 + $0x810] ss:$8 sps:$4 sm:$0xff]  }
 0xa96   :  { %8812 = vmatprep.subr.bf16.mxu1 %v13709_v21  ;;  %v13784_v21 = vld [vmem:[%s19011_s11 + $0x814] ss:$8 sps:$4 sm:$0xff]  }
 0xa97   :  { %9240 = vmatpush1.bf16.msra.mxu0 %v13704_v8  ;;  %v13779_v8 = vld [vmem:[%s19011_s11 + $0x690] ss:$8 sps:$4 sm:$0xff]  }
 0xa98   :  { %9241 = vmatprep.subr.bf16.mxu0 %v13712_v61  ;;  %v13787_v61 = vld [vmem:[%s19011_s11 + $0x6a4] ss:$8 sps:$4 sm:$0xff]  }
 0xa99   :  { %8813 = vmatpush1.bf16.msra.mxu1 %v13707_v59  ;;  %v13790_v59 = vld [vmem:[%s19011_s11 + $0x824] ss:$8 sps:$4 sm:$0xff]  }
 0xa9a   :  { %8814 = vmatprep.subr.bf16.mxu1 %v13715_v16  ;;  %v13785_v16 = vld [vmem:[%s19011_s11 + $0x6a0] ss:$8 sps:$4 sm:$0xff]  }
 0xa9b   :  { %9242 = vmatpush1.bf16.msra.mxu0 %v13710_v49  ;;  %v13793_v49 = vld [vmem:[%s19011_s11 + $0x6b4] ss:$8 sps:$4 sm:$0xff]  }
 0xa9c   :  { %9243 = vmatprep.subr.bf16.mxu0 %v13718_v60  ;;  %v13788_v60 = vld [vmem:[%s19011_s11 + $0x820] ss:$8 sps:$4 sm:$0xff]  }
 0xa9d   :  { %8815 = vmatpush1.bf16.msra.mxu1 %v13713_v47  ;;  %v13796_v47 = vld [vmem:[%s19011_s11 + $0x834] ss:$8 sps:$4 sm:$0xff]  }
 0xa9e   :  { %8816 = vmatprep.subr.bf16.mxu1 %v13721_v41  ;;  %v13791_v41 = vld [vmem:[%s19011_s11 + $0x6b0] ss:$8 sps:$4 sm:$0xff]  }
 0xa9f   :  { %9244 = vmatpush1.bf16.msra.mxu0 %v13716_v62  ;;  %v13799_v62 = vld [vmem:[%s19011_s11 + $0x6c4] ss:$8 sps:$4 sm:$0xff]  }
 0xaa0   :  { %9245 = vmatprep.subr.bf16.mxu0 %v13724_v34  ;;  %v13794_v34 = vld [vmem:[%s19011_s11 + $0x830] ss:$8 sps:$4 sm:$0xff]  }
 0xaa1   :  { %8817 = vmatpush1.bf16.msra.mxu1 %v13719_v27  ;;  %v13802_v27 = vld [vmem:[%s19011_s11 + $0x844] ss:$8 sps:$4 sm:$0xff]  }
 0xaa2   :  { %9090 = vmatprep.subr.bf16.mxu1 %v13727_v0  ;;  %v13797_v0 = vld [vmem:[%s19011_s11 + $0x6c0] ss:$8 sps:$4 sm:$0xff]  }
 0xaa3   :  { %9246 = vmatpush1.bf16.msra.mxu0 %v13722_v18  ;;  %v13805_v18 = vld [vmem:[%s19011_s11 + $0x6d4] ss:$8 sps:$4 sm:$0xff]  }
 0xaa4   :  { %8835 = vmatmul.mubr.bf16.vlgmr.msra.gmra.mrb[68].mxu1 %v8720_v35  ;;  %9519 = vmatprep.subr.bf16.mxu0 %v13730_v23  ;;  %v13800_v23 = vld [vmem:[%s19011_s11 + $0x840] ss:$8 sps:$4 sm:$0xff]   ;;  %v13803_v35 = vld [vmem:[%s19011_s11 + $0x6d0] ss:$8 sps:$4 sm:$0xff]  }
 0xaa5   :  { %9091 = vmatpush1.bf16.msra.mxu1 %v13725_v37  ;;  %9122 = vmatprep.mubr.bf16.mxu1 %v13922_v54  ;;  %v13808_v37 = vld [vmem:[%s19011_s11 + $0x854] ss:$8 sps:$4 sm:$0xff]  }
 0xaa6   :  { %9264 = vmatmul.mubr.bf16.vlgmr.msra.gmra.mrb[88].mxu0 %v9150_v26  ;;  %9092 = vmatprep.subr.bf16.mxu1 %v13733_v58  ;;  %v13811_v58 = vld [vmem:[%s19011_s11 + $0x6e4] ss:$8 sps:$4 sm:$0xff]   ;;  %v13806_v26 = vld [vmem:[%s19011_s11 + $0x850] ss:$8 sps:$4 sm:$0xff]  }
 0xaa7   :  { %9520 = vmatpush1.bf16.msra.mxu0 %v13728_v44  ;;  %9551 = vmatprep.mubr.bf16.mxu0 %v13922_v54 }
 0xaa8   :  { %9521 = vmatprep.subr.bf16.mxu0 %v13736_v19 }
 0xaa9   :  { %9093 = vmatpush1.bf16.msra.mxu1 %v13731_v28  ;;  %v13814_v28 = vld [vmem:[%s19011_s11 + $0x864] ss:$8 sps:$4 sm:$0xff]  }
 0xaaa   :  { %9094 = vmatprep.subr.bf16.mxu1 %v13739_v33 }
 0xaab   :  { %9522 = vmatpush1.bf16.msra.mxu0 %v13734_v11 }
 0xaac   :  { %9523 = vmatprep.subr.bf16.mxu0 %v13742_v32  ;;  %v13809_v32 = vld [vmem:[%s19011_s11 + $0x6e0] ss:$8 sps:$4 sm:$0xff]  }
 0xaad   :  { %9095 = vmatpush1.bf16.msra.mxu1 %v13737_v9 }
 0xaae   :  { %9096 = vmatprep.subr.bf16.mxu1 %v13745_v50 }
 0xaaf   :  { %9524 = vmatpush1.bf16.msra.mxu0 %v13740_v7  ;;  %v13817_v7 = vld [vmem:[%s19011_s11 + $0x6f4] ss:$8 sps:$4 sm:$0xff]  }
 0xab0   :  { %9525 = vmatprep.subr.bf16.mxu0 %v13748_v36 }
 0xab1   :  { %9097 = vmatpush1.bf16.msra.mxu1 %v13743_v29  ;;  %v13812_v29 = vld [vmem:[%s19011_s11 + $0x860] ss:$8 sps:$4 sm:$0xff]  }
 0xab2   :  { %9098 = vmatprep.subr.bf16.mxu1 %v13751_v14 }
 0xab3   :  { %9526 = vmatpush1.bf16.msra.mxu0 %v13746_v52  ;;  %v13820_v52 = vld [vmem:[%s19011_s11 + $0x874] ss:$8 sps:$4 sm:$0xff]  }
 0xab4   :  { %9527 = vmatprep.subr.bf16.mxu0 %v13754_v31  ;;  %v13815_v31 = vld [vmem:[%s19011_s11 + $0x6f0] ss:$8 sps:$4 sm:$0xff]  }
 0xab5   :  { %9099 = vmatpush1.bf16.msra.mxu1 %v13749_v24  ;;  %v13823_v24 = vld [vmem:[%s19011_s11 + $0x784] ss:$8 sps:$4 sm:$0xff]  }
 0xab6   :  { %9100 = vmatprep.subr.bf16.mxu1 %v13757_v53  ;;  %v13818_v53 = vld [vmem:[%s19011_s11 + $0x870] ss:$8 sps:$4 sm:$0xff]  }
 0xab7   :  { %9528 = vmatpush1.bf16.msra.mxu0 %v13752_v3  ;;  %v13821_v3 = vld [vmem:[%s19011_s11 + $0x780] ss:$8 sps:$4 sm:$0xff]  }
 0xab8   :  { %9529 = vmatprep.subr.bf16.mxu0 %v13760_v13  ;;  %v9293_v13 = vrot.slane %v9291_v30, 3  ;;  %v13832_v30 = vld [vmem:[%s19011_s11 + $0x7b4] ss:$8 sps:$4 sm:$0xff]  }
 0xab9   :  { %9101 = vmatpush1.bf16.msra.mxu1 %v13755_v46  ;;  %v13826_v46 = vld [vmem:[%s19011_s11 + $0x794] ss:$8 sps:$4 sm:$0xff]  }
 0xaba   :  { %9102 = vmatprep.subr.bf16.mxu1 %v13763_v63  ;;  %v9723_v63 = vpack.c.bf16 %v18238_v6, %v18238_v6  ;;  %v13830_v6 = vld [vmem:[%s19011_s11 + $0x7b0] ss:$8 sps:$4 sm:$0xff]  }
 0xabb   :  { %9530 = vmatpush1.bf16.msra.mxu0 %v13758_v10  ;;  %v13824_v10 = vld [vmem:[%s19011_s11 + $0x790] ss:$8 sps:$4 sm:$0xff]  }
 0xabc   :  { %9531 = vmatprep.subr.bf16.mxu0 %v13766_v2  ;;  %v13835_v2 = vld [vmem:[%s19011_s11 + $0x7c4] ss:$8 sps:$4 sm:$0xff]  }
 0xabd   :  { %9103 = vmatpush1.bf16.msra.mxu1 %v13761_v40  ;;  %v13833_v40 = vld [vmem:[%s19011_s11 + $0x7c0] ss:$8 sps:$4 sm:$0xff]  }
 0xabe   :  { %9104 = vmatprep.subr.bf16.mxu1 %v13769_v57  ;;  %v13838_v57 = vld [vmem:[%s19011_s11 + $0x7d4] ss:$8 sps:$4 sm:$0xff]  }
 0xabf   :  { %9532 = vmatpush1.bf16.msra.mxu0 %v13764_v56  ;;  %v13836_v56 = vld [vmem:[%s19011_s11 + $0x7d0] ss:$8 sps:$4 sm:$0xff]  }
 0xac0   :  { %9533 = vmatprep.subr.bf16.mxu0 %v13772_v55  ;;  %v13841_v55 = vld [vmem:[%s19011_s11 + $0x7e4] ss:$8 sps:$4 sm:$0xff]  }
 0xac1   :  { %9105 = vmatpush1.bf16.msra.mxu1 %v13767_v5 }
 0xac2   :  { %9375 = vmatprep.subr.bf16.mxu1 %v13775_v20 }
 0xac3   :  { %9534 = vmatpush1.bf16.msra.mxu0 %v13770_v42 }
 0xac4   :  { %9123 = vmatmul.mubr.bf16.vlgmr.msra.gmra.mrb[72].mxu1 %v9008_v1  ;;  %9804 = vmatprep.subr.bf16.mxu0 %v13778_v39  ;;  %v13839_v1 = vld [vmem:[%s19011_s11 + $0x7e0] ss:$8 sps:$4 sm:$0xff]  }
 0xac5   :  { %9376 = vmatpush1.bf16.msra.mxu1 %v13773_v43  ;;  %9407 = vmatprep.mubr.bf16.mxu1 %v13922_v54 }
 0xac6   :  { %9552 = vmatmul.mubr.bf16.vlgmr.msra.gmra.mrb[92].mxu0 %v9437_v22  ;;  %9377 = vmatprep.subr.bf16.mxu1 %v13781_v38  ;;  %v13844_v22 = vld [vmem:[%s19011_s11 + $0x7f4] ss:$8 sps:$4 sm:$0xff]  }
 0xac7   :  { %9805 = vmatpush1.bf16.msra.mxu0 %v13776_v17  ;;  %9836 = vmatprep.mubr.bf16.mxu0 %v13922_v54 }
 0xac8   :  { %9806 = vmatprep.subr.bf16.mxu0 %v13784_v21 }
 0xac9   :  { %9378 = vmatpush1.bf16.msra.mxu1 %v13779_v8 }
 0xaca   :  { %9379 = vmatprep.subr.bf16.mxu1 %v13787_v61 }
 0xacb   :  { %9807 = vmatpush1.bf16.msra.mxu0 %v13782_v45 }
 0xacc   :  { %9808 = vmatprep.subr.bf16.mxu0 %v13790_v59  ;;  %v13842_v59 = vld [vmem:[%s19011_s11 + $0x7f0] ss:$8 sps:$4 sm:$0xff]  }
 0xacd   :  { %9380 = vmatpush1.bf16.msra.mxu1 %v13785_v16  ;;  %v9579_v16 = vpack.c.bf16 %v18219_v25, %v18219_v25  ;;  %v13848_v25 = vld [vmem:[%s19011_s11 + $0x890] ss:$8 sps:$4 sm:$0xff]  }
 0xace   :  { %9381 = vmatprep.subr.bf16.mxu1 %v13793_v49  ;;  %v13847_v49 = vld [vmem:[%s19011_s11 + $0x884] ss:$8 sps:$4 sm:$0xff]  }
 0xacf   :  { %9809 = vmatpush1.bf16.msra.mxu0 %v13788_v60  ;;  %v13845_v60 = vld [vmem:[%s19011_s11 + $0x880] ss:$8 sps:$4 sm:$0xff]  }
 0xad0   :  { %9810 = vmatprep.subr.bf16.mxu0 %v13796_v47  ;;  %v9581_v47 = vrot.slane %v9579_v16, 1  ;;  %v13878_v16 = vld [vmem:[%s19013_s13 + $0x20] sm:$0xff]  }
 0xad1   :  { %9382 = vmatpush1.bf16.msra.mxu1 %v13791_v41  ;;  %v13850_v41 = vld [vmem:[%s19011_s11 + $0x894] ss:$8 sps:$4 sm:$0xff]  }
 0xad2   :  { %9383 = vmatprep.subr.bf16.mxu1 %v13799_v62  ;;  %v13853_v62 = vld [vmem:[%s19011_s11 + $0x8a4] ss:$8 sps:$4 sm:$0xff]  }
 0xad3   :  { %9811 = vmatpush1.bf16.msra.mxu0 %v13794_v34  ;;  %v13851_v34 = vld [vmem:[%s19011_s11 + $0x8a0] ss:$8 sps:$4 sm:$0xff]  }
 0xad4   :  { %9812 = vmatprep.subr.bf16.mxu0 %v13802_v27  ;;  %v13856_v27 = vld [vmem:[%s19011_s11 + $0x8b4] ss:$8 sps:$4 sm:$0xff]  }
 0xad5   :  { %9384 = vmatpush1.bf16.msra.mxu1 %v13797_v0  ;;  %v13859_v0 = vld [vmem:[%s19011_s11 + $0x8c4] ss:$8 sps:$4 sm:$0xff]  }
 0xad6   :  { %9385 = vmatprep.subr.bf16.mxu1 %v13805_v18  ;;  %v13857_v18 = vld [vmem:[%s19011_s11 + $0x8c0] ss:$8 sps:$4 sm:$0xff]  }
 0xad7   :  { %9813 = vmatpush1.bf16.msra.mxu0 %v13800_v23  ;;  %v7571_v44 = vpop.f32.mrb[48].mxu1  ;;  %v13862_v23 = vld [vmem:[%s19011_s11 + $0x8d4] ss:$8 sps:$4 sm:$0xff]  }
 0xad8   :  { %v7573_v19 = vpop.f32.mrb[49].mxu1  ;;  %9814 = vmatprep.subr.bf16.mxu0 %v13808_v37  ;;  %v13860_v37 = vld [vmem:[%s19011_s11 + $0x8d0] ss:$8 sps:$4 sm:$0xff]  }
 0xad9   :  { %9386 = vmatpush1.bf16.msra.mxu1 %v13803_v35  ;;  %v7575_v33 = vpop.f32.mrb[50].mxu1  ;;  %v7834_v11 = vpop.f32.mrb[68].mxu0  ;;  %v13865_v35 = vld [vmem:[%s19011_s11 + $0x8e4] ss:$8 sps:$4 sm:$0xff]  }
 0xada   :  { %v7576_v9 = vpop.f32.mrb[51].mxu1  ;;  %v7836_v50 = vpop.f32.mrb[69].mxu0  ;;  %9387 = vmatprep.subr.bf16.mxu1 %v13811_v58 }
 0xadb   :  { %9815 = vmatpush1.bf16.msra.mxu0 %v13806_v26  ;;  %v7838_v36 = vpop.f32.mrb[70].mxu0 }
 0xadc   :  { %v7839_v14 = vpop.f32.mrb[71].mxu0  ;;  %9816 = vmatprep.subr.bf16.mxu0 %v13814_v28 }
 0xadd   :  { %9388 = vmatpush1.bf16.msra.mxu1 %v13809_v32 }
 0xade   :  { %9389 = vmatprep.subr.bf16.mxu1 %v13817_v7 }
 0xadf   :  { %9817 = vmatpush1.bf16.msra.mxu0 %v13812_v29 }
 0xae0   :  { %9818 = vmatprep.subr.bf16.mxu0 %v13820_v52  ;;  %v13866_v52 = vld [vmem:[%s19011_s11 + $0x8f0] ss:$8 sps:$4 sm:$0xff]  }
 0xae1   :  { %9390 = vmatpush1.bf16.msra.mxu1 %v13815_v31  ;;  %v9866_v31 = vrot.slane %v18247_v4, 3 }
 0xae2   :  { %9663 = vmatprep.subr.bf16.mxu1 %v13823_v24 }
 0xae3   :  { %9819 = vmatpush1.bf16.msra.mxu0 %v13818_v53 }
 0xae4   :  { %9408 = vmatmul.mubr.bf16.vlgmr.msra.gmra.mrb[76].mxu1 %v9293_v13 }
 0xae5   :  { %9664 = vmatpush1.bf16.msra.mxu1 %v13821_v3  ;;  %9695 = vmatprep.mubr.bf16.mxu1 %v13922_v54 }
 0xae6   :  { %9837 = vmatmul.mubr.bf16.vlgmr.msra.gmra.mrb[96].mxu0 %v9723_v63  ;;  %9665 = vmatprep.subr.bf16.mxu1 %v13826_v46 }
 0xae9   :  { %9666 = vmatpush1.bf16.msra.mxu1 %v13824_v10 }
 0xaea   :  { %9667 = vmatprep.subr.bf16.mxu1 %v13829_v48 }
 0xaed   :  { %9668 = vmatpush1.bf16.msra.mxu1 %v13827_v51 }
 0xaee   :  { %9669 = vmatprep.subr.bf16.mxu1 %v13832_v30 }
 0xaf1   :  { %9670 = vmatpush1.bf16.msra.mxu1 %v13830_v6 }
 0xaf2   :  { %9671 = vmatprep.subr.bf16.mxu1 %v13835_v2 }
 0xaf5   :  { %9672 = vmatpush1.bf16.msra.mxu1 %v13833_v40 }
 0xaf6   :  { %9673 = vmatprep.subr.bf16.mxu1 %v13838_v57 }
 0xaf7   :  { %v7692_v5 = vpop.f32.mrb[52].mxu1 }
 0xaf8   :  { %v7693_v12 = vadd.f32 %v7692_v5, %v7571_v44  ;;  %v7694_v20 = vpop.f32.mrb[53].mxu1 }
 0xaf9   :  { %v7695_v42 = vadd.f32 %v7694_v20, %v7573_v19  ;;  %v7696_v39 = vpop.f32.mrb[54].mxu1  ;;  %v8119_v43 = vpop.f32.mrb[72].mxu0  ;;  %9674 = vmatpush1.bf16.msra.mxu1 %v13836_v56 }
 0xafa   :  { %v7697_v38 = vpop.f32.mrb[55].mxu1  ;;  %v8121_v17 = vpop.f32.mrb[73].mxu0  ;;  %9675 = vmatprep.subr.bf16.mxu1 %v13841_v55  ;;  %v7841_v21 = vadd.f32 %v7834_v11, %v7693_v12  ;;  %v13863_v11 = vld [vmem:[%s19011_s11 + $0x8e0] ss:$8 sps:$4 sm:$0xff]  }
 0xafb   :  { %v8123_v8 = vpop.f32.mrb[74].mxu0  ;;  %v7842_v61 = vadd.f32 %v7836_v50, %v7695_v42  ;;  %v13868_v50 = vld [vmem:[%s19011_s11 + $0x8f4] ss:$8 sps:$4 sm:$0xff]   ;;  %v13869_v42 = vld [vmem:[%s19013_s13 + $0x40] sm:$0xff]  }
 0xafc   :  { %v8124_v45 = vpop.f32.mrb[75].mxu0  ;;  %v13870_v39 = vld [vmem:[%s19013_s13] sm:$0xff]   ;;  %11893 = vmatprep.subr.bf16.mxu0 %v13869_v42  ;;  %v13874_v8 = vld [vmem:[%s19013_s13 + $0x10] sm:$0xff]  }
 0xafd   :  { %9676 = vmatpush1.bf16.msra.mxu1 %v13839_v1  ;;  %11894 = vmatpush3.bf16.msra.mxu0 %v13870_v39  ;;  %v13876_v45 = vld [vmem:[%s19013_s13 + $0x18] sm:$0xff]  }
 0xafe   :  { %9677 = vmatprep.subr.bf16.mxu1 %v13844_v22  ;;  %v13872_v22 = vld [vmem:[%s19013_s13 + $0x8] sm:$0xff]  }
 0xb01   :  { %9678 = vmatpush1.bf16.msra.mxu1 %v13842_v59  ;;  %v13877_v59 = vld [vmem:[%s19013_s13 + $0x60] sm:$0xff]  }
 0xb02   :  { %9948 = vmatprep.subr.bf16.mxu1 %v13847_v49  ;;  %v13879_v49 = vld [vmem:[%s19013_s13 + $0x68] sm:$0xff]  }
 0xb04   :  { %9696 = vmatmul.mubr.bf16.vlgmr.msra.gmra.mrb[80].mxu1 %v9581_v47 }
 0xb05   :  { %9949 = vmatpush1.bf16.msra.mxu1 %v13845_v60  ;;  %9980 = vmatprep.mubr.bf16.mxu1 %v13922_v54  ;;  %v13854_v54 = vld [vmem:[%s19011_s11 + $0x8b0] ss:$8 sps:$4 sm:$0xff]  }
 0xb06   :  { %9950 = vmatprep.subr.bf16.mxu1 %v13850_v41 }
 0xb09   :  { %9951 = vmatpush1.bf16.msra.mxu1 %v13848_v25 }
 0xb0a   :  { %9952 = vmatprep.subr.bf16.mxu1 %v13853_v62 }
 0xb0d   :  { %9953 = vmatpush1.bf16.msra.mxu1 %v13851_v34 }
 0xb0e   :  { %9954 = vmatprep.subr.bf16.mxu1 %v13856_v27 }
 0xb11   :  { %9955 = vmatpush1.bf16.msra.mxu1 %v13854_v54 }
 0xb12   :  { %9956 = vmatprep.subr.bf16.mxu1 %v13859_v0 }
 0xb15   :  { %9957 = vmatpush1.bf16.msra.mxu1 %v13857_v18  ;;  %v13880_v18 = vld [vmem:[%s19013_s13 + $0x28] sm:$0xff]  }
 0xb16   :  { %9958 = vmatprep.subr.bf16.mxu1 %v13862_v23 }
 0xb17   :  { %v7978_v58 = vpop.f32.mrb[56].mxu1 }
 0xb18   :  { %v7985_v44 = vadd.f32 %v7978_v58, %v7841_v21  ;;  %v7980_v26 = vpop.f32.mrb[57].mxu1  ;;  %v13873_v21 = vld [vmem:[%s19013_s13 + $0x50] sm:$0xff]  }
 0xb19   :  { %v7986_v19 = vadd.f32 %v7980_v26, %v7842_v61  ;;  %v7982_v28 = vpop.f32.mrb[58].mxu1  ;;  %v8407_v33 = vpop.f32.mrb[76].mxu0  ;;  %9959 = vmatpush1.bf16.msra.mxu1 %v13860_v37  ;;  %v13875_v61 = vld [vmem:[%s19013_s13 + $0x58] sm:$0xff]   ;;  %v13881_v58 = vld [vmem:[%s19013_s13 + $0x70] sm:$0xff]  }
 0xb1a   :  { %v7983_v32 = vpop.f32.mrb[59].mxu1  ;;  %v8409_v9 = vpop.f32.mrb[77].mxu0  ;;  %9960 = vmatprep.subr.bf16.mxu1 %v13865_v35  ;;  %v8126_v7 = vadd.f32 %v8119_v43, %v7985_v44  ;;  %v13871_v43 = vld [vmem:[%s19013_s13 + $0x48] sm:$0xff]   ;;  %v13882_v44 = vld [vmem:[%s19013_s13 + $0x30] sm:$0xff]   ;;  %v13883_v26 = vld [vmem:[%s19013_s13 + $0x78] sm:$0xff]  }
 0xb1b   :  { %v8411_v36 = vpop.f32.mrb[78].mxu0  ;;  %v8127_v29 = vadd.f32 %v8121_v17, %v7986_v19  ;;  %11895 = vmatprep.subr.bf16.mxu0 %v13871_v43  ;;  %v13884_v19 = vld [vmem:[%s19013_s13 + $0x38] sm:$0xff]   ;;  %v9991_v43 = vld [vmem:[%s19012_s12] sm:$0x3] }
 0xb1c   :  { %v8412_v14 = vpop.f32.mrb[79].mxu0  ;;  %11896 = vmatpush3.bf16.msra.mxu0 %v13872_v22 }
 0xb1d   :  { %9961 = vmatpush1.bf16.msra.mxu1 %v13863_v11  ;;  %11897 = vmatprep.subr.bf16.mxu0 %v13873_v21 }
 0xb1e   :  { %9962 = vmatprep.subr.bf16.mxu1 %v13868_v50 }
 0xb20   :  { %11898 = vmatpush3.bf16.msra.mxu0 %v13874_v8 }
 0xb21   :  { %9963 = vmatpush1.bf16.msra.mxu1 %v13866_v52  ;;  %11899 = vmatprep.subr.bf16.mxu0 %v13875_v61 }
 0xb22   :  { %13251 = vmatprep.subr.mxu1 %v19311_v15 }
 0xb24   :  { %9981 = vmatmul.mubr.bf16.vlgmr.msra.gmra.mrb[84].mxu1 %v9866_v31  ;;  %11900 = vmatpush3.bf16.msra.mxu0 %v13876_v45 }
 0xb25   :  { %13253 = vmatprep.mubr.msk.f32.mxu1 %vm13920_vm3, %v19311_v15  ;;  %11901 = vmatprep.subr.bf16.mxu0 %v13877_v59 }
 0xb28   :  { %11902 = vmatpush3.bf16.msra.mxu0 %v13878_v16 }
 0xb29   :  { %11903 = vmatprep.subr.bf16.mxu0 %v13879_v49 }
 0xb2c   :  { %11904 = vmatpush3.bf16.msra.mxu0 %v13880_v18 }
 0xb2d   :  { %11905 = vmatprep.subr.bf16.mxu0 %v13881_v58 }
 0xb30   :  { %11906 = vmatpush3.bf16.msra.mxu0 %v13882_v44 }
 0xb31   :  { %11907 = vmatprep.subr.bf16.mxu0 %v13883_v26 }
 0xb34   :  { %11908 = vmatpush3.bf16.msra.mxu0 %v13884_v19 }
 0xb37   :  { %v8263_v24 = vpop.f32.mrb[60].mxu1 }
 0xb38   :  { %v8270_v53 = vadd.f32 %v8263_v24, %v8126_v7  ;;  %v8265_v3 = vpop.f32.mrb[61].mxu1 }
 0xb39   :  { %v8271_v13 = vadd.f32 %v8265_v3, %v8127_v29  ;;  %v8267_v46 = vpop.f32.mrb[62].mxu1  ;;  %v8692_v63 = vpop.f32.mrb[80].mxu0 }
 0xb3a   :  { %v8268_v10 = vpop.f32.mrb[63].mxu1  ;;  %v8694_v48 = vpop.f32.mrb[81].mxu0  ;;  %v8414_v51 = vadd.f32 %v8407_v33, %v8270_v53 }
 0xb3b   :  { %v8696_v30 = vpop.f32.mrb[82].mxu0  ;;  %v8415_v6 = vadd.f32 %v8409_v9, %v8271_v13 }
 0xb3c   :  { %v8697_v2 = vpop.f32.mrb[83].mxu0 }
 0xb57   :  { %v8551_v40 = vpop.f32.mrb[64].mxu1 }
 0xb58   :  { %v8558_v4 = vadd.f32 %v8551_v40, %v8414_v51  ;;  %v8553_v57 = vpop.f32.mrb[65].mxu1 }
 0xb59   :  { %v8559_v56 = vadd.f32 %v8553_v57, %v8415_v6  ;;  %v8555_v55 = vpop.f32.mrb[66].mxu1  ;;  %v8980_v5 = vpop.f32.mrb[84].mxu0 }
 0xb5a   :  { %v8556_v12 = vpop.f32.mrb[67].mxu1  ;;  %v8982_v15 = vpop.f32.mrb[85].mxu0  ;;  %v8699_v20 = vadd.f32 %v8692_v63, %v8558_v4 }
 0xb5b   :  { %v8984_v1 = vpop.f32.mrb[86].mxu0  ;;  %v8700_v38 = vadd.f32 %v8694_v48, %v8559_v56 }
 0xb5c   :  { %v8985_v17 = vpop.f32.mrb[87].mxu0 }
 0xb77   :  { %v8836_v60 = vpop.f32.mrb[68].mxu1 }
 0xb78   :  { %v8843_v47 = vadd.f32 %v8836_v60, %v8699_v20  ;;  %v8838_v41 = vpop.f32.mrb[69].mxu1  ;;  %v9993_v20 = vlaneseq }
 0xb79   :  { %v8844_v25 = vadd.f32 %v8838_v41, %v8700_v38  ;;  %v8840_v62 = vpop.f32.mrb[70].mxu1  ;;  %v9265_v34 = vpop.f32.mrb[88].mxu0 }
 0xb7a   :  { %v8841_v27 = vpop.f32.mrb[71].mxu1  ;;  %v9267_v54 = vpop.f32.mrb[89].mxu0  ;;  %v8987_v0 = vadd.f32 %v8980_v5, %v8843_v47  ;;  %v9994_v42 = vshrl.u32 %v9993_v20, 7 }
 0xb7b   :  { %v9269_v23 = vpop.f32.mrb[90].mxu0  ;;  %v8988_v37 = vadd.f32 %v8982_v15, %v8844_v25 }
 0xb7c   :  { %v9270_v35 = vpop.f32.mrb[91].mxu0  ;;  %v9995_v39 = vsub.s32 0, %v9994_v42  ;;  %v9999_v1 = vsub.s32 1, %v9994_v42 }
 0xb7e   :  { %v9996_v38 = vrot.slane %v9991_v43, %v9995_v39  ;;  %v10000_v22 = vrot.slane %v9991_v43, %v9999_v1 }
 0xb97   :  { %v9124_v28 = vpop.f32.mrb[72].mxu1 }
 0xb98   :  { %v9131_v33 = vadd.f32 %v9124_v28, %v8987_v0  ;;  %v9126_v11 = vpop.f32.mrb[73].mxu1 }
 0xb99   :  { %v9132_v32 = vadd.f32 %v9126_v11, %v8988_v37  ;;  %v9128_v9 = vpop.f32.mrb[74].mxu1  ;;  %v9553_v50 = vpop.f32.mrb[92].mxu0  ;;  %v10184_v37 = vld [vmem:[%s19015_s15] sm:$0x3] }
 0xb9a   :  { %v9129_v7 = vpop.f32.mrb[75].mxu1  ;;  %v9555_v36 = vpop.f32.mrb[93].mxu0  ;;  %v9272_v29 = vadd.f32 %v9265_v34, %v9131_v33  ;;  %v11438_v34 = vld [vmem:[%s19014_s14] ss:$0 sm:$0xff]  ;;  %s13894_s14 = scalar_lea.vmem %s10270_s23, 32 }
 0xb9b   :  { %v9557_v14 = vpop.f32.mrb[94].mxu0  ;;  %v9273_v52 = vadd.f32 %v9267_v54, %v9132_v32  ;;  %p13895_p0 = scmp.ne.s32.totalorder %s10270_s23, %s13894_s14  ;;  %p13900_p2 = scmp.lt.s32.totalorder %s13894_s14, %s13894_s14 }
 0xb9c   :  { %v9558_v31 = vpop.f32.mrb[95].mxu0 }
 0xb9d   :  { %p13901_p3 = por %p13900_p2, %p13899_p1 }
 0xb9f   :  { %p13902_p4 = pnand %p13901_p3, %p13895_p0 }
 0xbb7   :  { %v9409_v24 = vpop.f32.mrb[76].mxu1 }
 0xbb8   :  { %v9416_v53 = vadd.f32 %v9409_v24, %v9272_v29  ;;  %v9411_v3 = vpop.f32.mrb[77].mxu1 }
 0xbb9   :  { %v9417_v13 = vadd.f32 %v9411_v3, %v9273_v52  ;;  %v9413_v46 = vpop.f32.mrb[78].mxu1  ;;  %v9838_v63 = vpop.f32.mrb[96].mxu0 }
 0xbba   :  { %v9414_v10 = vpop.f32.mrb[79].mxu1  ;;  %v9840_v48 = vpop.f32.mrb[97].mxu0  ;;  %v9560_v51 = vadd.f32 %v9553_v50, %v9416_v53 }
 0xbbb   :  { %v9842_v30 = vpop.f32.mrb[98].mxu0  ;;  %v9561_v6 = vadd.f32 %v9555_v36, %v9417_v13 }
 0xbbc   :  { %v9843_v2 = vpop.f32.mrb[99].mxu0 }
 0xbd7   :  { %v9697_v40 = vpop.f32.mrb[80].mxu1 }
 0xbd8   :  { %v9704_v4 = vadd.f32 %v9697_v40, %v9560_v51  ;;  %v9699_v57 = vpop.f32.mrb[81].mxu1 }
 0xbd9   :  { %v9705_v56 = vadd.f32 %v9699_v57, %v9561_v6  ;;  %v9701_v55 = vpop.f32.mrb[82].mxu1 }
 0xbda   :  { %v9702_v5 = vpop.f32.mrb[83].mxu1  ;;  %v9845_v12 = vadd.f32 %v9838_v63, %v9704_v4 }
 0xbdb   :  { %v9846_v15 = vadd.f32 %v9840_v48, %v9705_v56 }
 0xbf7   :  { %v9982_v17 = vpop.f32.mrb[84].mxu1 }
 0xbf8   :  { %v9989_v21 = vadd.f32 %v9982_v17, %v9845_v12  ;;  %v9984_v8 = vpop.f32.mrb[85].mxu1 }
 0xbf9   :  { %v9990_v61 = vadd.f32 %v9984_v8, %v9846_v15  ;;  %v9986_v45 = vpop.f32.mrb[86].mxu1 }
 0xbfa   :  { %v10003_v59 = vadd.f32 %v9996_v38, %v9989_v21  ;;  %v9987_v16 = vpop.f32.mrb[87].mxu1 }
 0xbfb   :  { %v10004_v49 = vadd.f32 %v10000_v22, %v9990_v61 }
 0xbfc   :  { %v10005_v60 = vmax.f32 %v10003_v59, 0.0 }
 0xbfd   :  { %v10006_v47 = vmax.f32 %v10004_v49, 0.0 }
 0xbfe   :  { %v10039_v25 = vpack.c.bf16 %v10005_v60, %v10005_v60 }
 0xbff   :  { %v10040_v41 = vpack.c.bf16 %v10006_v47, %v10006_v47 }
 0xc01   :  { %10176 = vmatprep.mubr.bf16.mxu0 %v10040_v41 }
 0xc02   :  { %10177 = vmatmul.mubr.bf16.vlgmr.msra.gmra.mrb[100].mxu0 %v10039_v25 }
 0xcd5   :  { %v11909_v62 = vpop.f32.mrb[100].mxu0 }
 0xcd6   :  { %v11910_v27 = vpop.f32.mrb[101].mxu0 }
 0xcd7   :  { %v11911_v54 = vadd.f32 %v11910_v27, %v11909_v62  ;;  %v11912_v0 = vpop.f32.mrb[102].mxu0 }
 0xcd8   :  { %v11913_v18 = vpop.f32.mrb[103].mxu0 }
 0xcd9   :  { %v10179_v23 = vadd.f32 %v11911_v54, %v11438_v34 }
 0xcdb   :  { %13252 = vmatpush3.msk.msra.mxu1 %vm2380_vm5, %v10179_v23 }
 0xcdc   :  { %13254 = vmatmul.mubr.msk.f32.vlgmr.msra.gmra.mrb[88].mxu1 %vm10185_vm12, %v10184_v37 }
 0xdaf   :  { %v10258_v35 = vpop.f32.mrb[88].mxu1 }
 0xdb0   :  { %10262 = vst [vmem:[#allocation2] sm:$0x3] %v10258_v35  ;;  %v13255_v58 = vpop.f32.mrb[89].mxu1 }
 0xdb1   :  { %13905 = shalt.err (!%p13902_p4)
}
 0xdb2   :  { %s13906_s15 = scalar_lea.hbm %s19016_s16, 32 }
 0xdb3   :  { %p13907_p5 = scmp.ne.s32.totalorder %s19016_s16, %s13906_s15  ;;  %p13910_p6 = scmp.lt.u32.totalorder %s13906_s15, %s19016_s16 }
 0xdb5   :  { %p13912_p7 = pnand %p13910_p6, %p13907_p5 }
 0xdb7   :  { %13915 = shalt.err (!%p13912_p7)
}
 0xdb8   :  { %10272 = dma.vmem_to_hbm [thread:$0]  %s10270_s23, 32, %s19016_s16, [#allocation3]  }
 0xdb9   :  { %13916 = dma.done.wait [#allocation3], 32  }
 0xdba   :  { %13917 = vsyncadd [#allocation3], 4294967264 }
 0xdbb   :  { %10276 = vsyncpa [#allocation3], 1 }

</bundles_post_ra>
